<compile_context>
chip_gen: v5e
topology: v5e:2x2
jax: 0.10.0
libtpu: 0.0.40
codegen_flags: <defaults>
</compile_context>

<pallas_src>
import functools

import jax
import jax.numpy as jnp
import numpy as np
from jax.experimental import pallas as pl
from jax.experimental.pallas import tpu as pltpu

LANE = 128


def _round_up(c, m=LANE):
    return ((c + m - 1) // m) * m


# ---------------------------------------------------------------------------
# Pallas kernel: fused cv1 -> cv2 (+ residual) for one image
# ---------------------------------------------------------------------------
def _bottleneck_kernel(xp_ref, w1_ref, b1_ref, w2_ref, b2_ref, o_ref,
                       col1_ref, yp_ref, col2_ref, *, add):
    """One grid step = one image.

    xp_ref  : (1, h+2, w+2, c1p) f32   zero-padded (spatial+channel) NHWC input
    w1_ref  : (9*c1p, c_p)       bf16  cv1 weights (BN folded, im2col layout)
    b1_ref  : (1, c_p)           f32   cv1 folded bias
    w2_ref  : (9*c_p, c2p)       bf16  cv2 weights (BN folded, im2col layout)
    b2_ref  : (1, c2p)           f32   cv2 folded bias
    o_ref   : (1, h, w, c2p)           lane-dense output block
    col1_ref: (h*w, 9*c1p) bf16 VMEM scratch  (im2col of padded input)
    yp_ref  : (h+2, w+2, c_p) bf16 VMEM scratch (zero-padded cv1 output)
    col2_ref: (h*w, 9*c_p) bf16 VMEM scratch  (im2col of padded cv1 output)
    """
    _, h, w, c2p = o_ref.shape
    c1p = xp_ref.shape[-1]
    c_p = b1_ref.shape[-1]
    m = h * w

    xpad_f32 = xp_ref[0]                          # (h+2, w+2, c1p) f32 (residual source)
    xpad = xpad_f32.astype(jnp.bfloat16)          # single up-front bf16 cast

    # ---- cv1: im2col (9 shifted taps written once) + one MXU matmul + SiLU --
    for k in range(9):                            # static unroll
        dy, dx = divmod(k, 3)
        col1_ref[:, k * c1p:(k + 1) * c1p] = (
            xpad[dy:dy + h, dx:dx + w, :].reshape(m, c1p))
    acc = jnp.dot(col1_ref[...], w1_ref[...],
                  preferred_element_type=jnp.float32)          # (m, c_p) f32
    acc = acc + b1_ref[...]
    y = acc * jax.nn.sigmoid(acc)                 # SiLU in f32

    # ---- zero-pad cv1 output in bf16 VMEM scratch (zero only the border) ----
    zrow = jnp.zeros((1, w + 2, c_p), jnp.bfloat16)
    zcol = jnp.zeros((h + 2, 1, c_p), jnp.bfloat16)
    yp_ref[0:1, :, :] = zrow
    yp_ref[h + 1:h + 2, :, :] = zrow
    yp_ref[:, 0:1, :] = zcol
    yp_ref[:, w + 1:w + 2, :] = zcol
    yp_ref[1:h + 1, 1:w + 1, :] = y.reshape(h, w, c_p).astype(jnp.bfloat16)
    ypad = yp_ref[...]                            # (h+2, w+2, c_p) bf16

    # ---- cv2: im2col + one MXU matmul + SiLU (+ residual) -------------------
    for k in range(9):
        dy, dx = divmod(k, 3)
        col2_ref[:, k * c_p:(k + 1) * c_p] = (
            ypad[dy:dy + h, dx:dx + w, :].reshape(m, c_p))
    acc2 = jnp.dot(col2_ref[...], w2_ref[...],
                   preferred_element_type=jnp.float32)         # (m, c2p) f32
    acc2 = acc2 + b2_ref[...]
    z = acc2 * jax.nn.sigmoid(acc2)

    if add:                                       # shortcut: x + cv2(cv1(x)), f32 add
        z = z + xpad_f32[1:h + 1, 1:w + 1, :].reshape(m, c1p)  # c1p == c2p here

    o_ref[...] = z.reshape(1, h, w, c2p).astype(o_ref.dtype)   # dense (128-lane) store


# ---------------------------------------------------------------------------
# Wrapper: BN folding, channel padding, layout, pallas_call plumbing
# ---------------------------------------------------------------------------
def fold_bn(w_hwio, gamma, beta, mean, var, eps=1e-3):
    """Fold BatchNorm2d (eval mode, ultralytics eps=1e-3) into conv weight/bias."""
    scale = gamma / jnp.sqrt(var + eps)
    return w_hwio * scale, beta - mean * scale


def init_bottleneck_params(key, c1, c2, e=0.5):
    """Deterministic synthetic parameters for Bottleneck(c1, c2, k=(3,3), e)."""
    c_ = int(c2 * e)
    ks = jax.random.split(key, 10)
    w1 = 0.2 * jax.random.normal(ks[0], (3, 3, c1, c_), jnp.float32)
    g1 = 1.0 + 0.1 * jax.random.normal(ks[1], (c_,), jnp.float32)
    be1 = 0.1 * jax.random.normal(ks[2], (c_,), jnp.float32)
    mu1 = 0.1 * jax.random.normal(ks[3], (c_,), jnp.float32)
    v1 = jax.random.uniform(ks[4], (c_,), jnp.float32, 0.5, 1.5)
    w2 = 0.2 * jax.random.normal(ks[5], (3, 3, c_, c2), jnp.float32)
    g2 = 1.0 + 0.1 * jax.random.normal(ks[6], (c2,), jnp.float32)
    be2 = 0.1 * jax.random.normal(ks[7], (c2,), jnp.float32)
    mu2 = 0.1 * jax.random.normal(ks[8], (c2,), jnp.float32)
    v2 = jax.random.uniform(ks[9], (c2,), jnp.float32, 0.5, 1.5)
    w1f, b1f = fold_bn(w1, g1, be1, mu1, v1)
    w2f, b2f = fold_bn(w2, g2, be2, mu2, v2)
    return (w1f, b1f, w2f, b2f)


def bottleneck_forward(x_nchw, params, shortcut=True):
    """Bottleneck.forward: x + cv2(cv1(x)) if (shortcut and c1 == c2)."""
    w1f, b1f, w2f, b2f = params
    n, c1, h, w = x_nchw.shape
    c_ = w1f.shape[-1]
    c2 = w2f.shape[-1]
    add = bool(shortcut and c1 == c2)

    c1p, c_p, c2p = _round_up(c1), _round_up(c_), _round_up(c2)
    m = h * w

    # NCHW -> NHWC, 1-pixel spatial halo, channel pad to a lane multiple (one fused op).
    x = jnp.transpose(x_nchw, (0, 2, 3, 1))
    xp = jnp.pad(x, ((0, 0), (1, 1), (1, 1), (0, c1p - c1)))

    # Weights -> im2col layout (9*Cin_p, Cout_p); BN already folded; bf16 for the MXU.
    w1_mat = jnp.pad(w1f.reshape(9, c1, c_),
                     ((0, 0), (0, c1p - c1), (0, c_p - c_))
                     ).reshape(9 * c1p, c_p).astype(jnp.bfloat16)
    w2_mat = jnp.pad(w2f.reshape(9, c_, c2),
                     ((0, 0), (0, c_p - c_), (0, c2p - c2))
                     ).reshape(9 * c_p, c2p).astype(jnp.bfloat16)
    b1p = jnp.pad(b1f, (0, c_p - c_)).reshape(1, c_p).astype(jnp.float32)
    b2p = jnp.pad(b2f, (0, c2p - c2)).reshape(1, c2p).astype(jnp.float32)

    # Rough per-step VMEM working set -> raise the scoped-VMEM limit with headroom
    # (capped at 64 MiB so it also respects v7x physical VMEM).
    est = (2 * (h + 2) * (w + 2) * c1p * 4          # xp block, double-buffered
           + 2 * 9 * c1p * c_p * 2                  # w1 (bf16), double-buffered
           + 2 * 9 * c_p * c2p * 2                  # w2 (bf16), double-buffered
           + 2 * h * w * c2p * 4                    # out block, double-buffered
           + m * 9 * c1p * 2 + m * 9 * c_p * 2      # im2col scratches (bf16)
           + (h + 2) * (w + 2) * c_p * 2            # padded cv1-output scratch (bf16)
           + 2 * m * c2p * 4)                       # live f32 accumulators
    vmem_limit = int(min(max(2 * est, 32 << 20), 64 << 20))

    kernel = functools.partial(_bottleneck_kernel, add=add)
    out = pl.pallas_call(
        kernel,
        out_shape=jax.ShapeDtypeStruct((n, h, w, c2p), x_nchw.dtype),
        grid=(n,),
        in_specs=[
            pl.BlockSpec((1, h + 2, w + 2, c1p), lambda i: (i, 0, 0, 0)),
            pl.BlockSpec((9 * c1p, c_p), lambda i: (0, 0)),
            pl.BlockSpec((1, c_p), lambda i: (0, 0)),
            pl.BlockSpec((9 * c_p, c2p), lambda i: (0, 0)),
            pl.BlockSpec((1, c2p), lambda i: (0, 0)),
        ],
        out_specs=pl.BlockSpec((1, h, w, c2p), lambda i: (i, 0, 0, 0)),
        scratch_shapes=[
            pltpu.VMEM((m, 9 * c1p), jnp.bfloat16),          # cv1 im2col
            pltpu.VMEM((h + 2, w + 2, c_p), jnp.bfloat16),   # padded cv1 output
            pltpu.VMEM((m, 9 * c_p), jnp.bfloat16),          # cv2 im2col
        ],
        compiler_params=pltpu.CompilerParams(
            dimension_semantics=("parallel",),
            vmem_limit_bytes=vmem_limit),
    )(xp, w1_mat, b1p, w2_mat, b2p)

    # Lane-dense padded NHWC -> slice real channels -> NCHW (PyTorch parity).
    return jnp.transpose(out[..., :c2], (0, 3, 1, 2))


# ---------------------------------------------------------------------------
# Pure-JAX reference for verification
# ---------------------------------------------------------------------------
def _reference(x_nchw, params, shortcut=True):
    w1f, b1f, w2f, b2f = params
    x = jnp.transpose(x_nchw, (0, 2, 3, 1))

    def conv(v, wgt, b):
        o = jax.lax.conv_general_dilated(
            v, wgt, window_strides=(1, 1), padding="SAME",
            dimension_numbers=("NHWC", "HWIO", "NHWC"),
            precision=jax.lax.Precision.HIGHEST) + b
        return o * jax.nn.sigmoid(o)

    y = conv(x, w1f, b1f)
    z = conv(y, w2f, b2f)
    if shortcut and x_nchw.shape[1] == w2f.shape[-1]:
        z = z + x
    return jnp.transpose(z, (0, 3, 1, 2))


if __name__ == "__main__":
    key = jax.random.PRNGKey(0)
    kx, kp = jax.random.split(key)

    c1 = c2 = 4                                    # shortcut path active (c1 == c2)
    x = jax.random.normal(kx, (2, c1, 16, 16), jnp.float32)   # NCHW, like PyTorch
    params = init_bottleneck_params(kp, c1, c2, e=0.5)

    out = jax.jit(bottleneck_forward)(x, params)
    out = jax.block_until_ready(out)

    assert out.shape == x.shape and out.dtype == x.dtype
    ref = _reference(x, params)
    np.testing.assert_allclose(np.asarray(out), np.asarray(ref),
                               rtol=5e-2, atol=5e-2)
    print("KERNEL_OK")
</pallas_src>

<mosaic_0001>
module attributes {stable_mosaic.version = 11 : i64} {
  func.func @_bottleneck_kernel(%arg0: i32, %arg1: memref<1x18x18x128xf32, #tpu.memory_space<vmem>>, %arg2: memref<1152x128xbf16, #tpu.memory_space<vmem>>, %arg3: memref<1x128xf32, #tpu.memory_space<vmem>>, %arg4: memref<1152x128xbf16, #tpu.memory_space<vmem>>, %arg5: memref<1x128xf32, #tpu.memory_space<vmem>>, %arg6: memref<1x16x16x128xf32, #tpu.memory_space<vmem>>, %arg7: memref<256x1152xbf16, #tpu.memory_space<vmem>>, %arg8: memref<18x18x128xbf16, #tpu.memory_space<vmem>>, %arg9: memref<256x1152xbf16, #tpu.memory_space<vmem>>) attributes {dimension_semantics = [#tpu.dimension_semantics<parallel>], iteration_bounds = array<i64: 2>, scalar_prefetch = 0 : i64, scratch_operands = 3 : i64, tpu.core_type = #tpu.core_type<tc>, window_params = [{transform_indices = @transform_0, window_bounds = array<i64: 1, 18, 18, 128>}, {pipeline_mode = #tpu.pipeline_mode<synchronous>, transform_indices = @transform_1, window_bounds = array<i64: 1152, 128>}, {pipeline_mode = #tpu.pipeline_mode<synchronous>, transform_indices = @transform_2, window_bounds = array<i64: 1, 128>}, {pipeline_mode = #tpu.pipeline_mode<synchronous>, transform_indices = @transform_3, window_bounds = array<i64: 1152, 128>}, {pipeline_mode = #tpu.pipeline_mode<synchronous>, transform_indices = @transform_4, window_bounds = array<i64: 1, 128>}, {transform_indices = @transform_5, window_bounds = array<i64: 1, 16, 16, 128>}]} {
    %c0 = arith.constant 0 : index
    %c0_0 = arith.constant 0 : index
    %c0_1 = arith.constant 0 : index
    %c0_2 = arith.constant 0 : index
    %0 = vector.load %arg1[%c0, %c0_0, %c0_1, %c0_2] : memref<1x18x18x128xf32, #tpu.memory_space<vmem>>, vector<1x18x18x128xf32>
    %1 = vector.shape_cast %0 : vector<1x18x18x128xf32> to vector<18x18x128xf32>
    %2 = arith.truncf %1 : vector<18x18x128xf32> to vector<18x18x128xbf16>
    %3 = vector.extract_strided_slice %2 {offsets = [0, 0, 0], sizes = [16, 16, 128], strides = [1, 1, 1]} : vector<18x18x128xbf16> to vector<16x16x128xbf16>
    %4 = vector.shape_cast %3 : vector<16x16x128xbf16> to vector<256x128xbf16>
    %c0_3 = arith.constant 0 : index
    %c0_4 = arith.constant 0 : index
    %5 = vector.load %arg7[%c0_3, %c0_4] : memref<256x1152xbf16, #tpu.memory_space<vmem>>, vector<256x128xbf16>
    tpu.vector_store %arg7[%c0_3, %c0_4], %4 {strides = array<i32>} : memref<256x1152xbf16, #tpu.memory_space<vmem>>, vector<256x128xbf16>,
    %6 = vector.extract_strided_slice %2 {offsets = [0, 1, 0], sizes = [16, 16, 128], strides = [1, 1, 1]} : vector<18x18x128xbf16> to vector<16x16x128xbf16>
    %7 = vector.shape_cast %6 : vector<16x16x128xbf16> to vector<256x128xbf16>
    %c0_5 = arith.constant 0 : index
    %c128 = arith.constant 128 : index
    %8 = vector.load %arg7[%c0_5, %c128] : memref<256x1152xbf16, #tpu.memory_space<vmem>>, vector<256x128xbf16>
    tpu.vector_store %arg7[%c0_5, %c128], %7 {strides = array<i32>} : memref<256x1152xbf16, #tpu.memory_space<vmem>>, vector<256x128xbf16>,
    %9 = vector.extract_strided_slice %2 {offsets = [0, 2, 0], sizes = [16, 16, 128], strides = [1, 1, 1]} : vector<18x18x128xbf16> to vector<16x16x128xbf16>
    %10 = vector.shape_cast %9 : vector<16x16x128xbf16> to vector<256x128xbf16>
    %c0_6 = arith.constant 0 : index
    %c256 = arith.constant 256 : index
    %11 = vector.load %arg7[%c0_6, %c256] : memref<256x1152xbf16, #tpu.memory_space<vmem>>, vector<256x128xbf16>
    tpu.vector_store %arg7[%c0_6, %c256], %10 {strides = array<i32>} : memref<256x1152xbf16, #tpu.memory_space<vmem>>, vector<256x128xbf16>,
    %12 = vector.extract_strided_slice %2 {offsets = [1, 0, 0], sizes = [16, 16, 128], strides = [1, 1, 1]} : vector<18x18x128xbf16> to vector<16x16x128xbf16>
    %13 = vector.shape_cast %12 : vector<16x16x128xbf16> to vector<256x128xbf16>
    %c0_7 = arith.constant 0 : index
    %c384 = arith.constant 384 : index
    %14 = vector.load %arg7[%c0_7, %c384] : memref<256x1152xbf16, #tpu.memory_space<vmem>>, vector<256x128xbf16>
    tpu.vector_store %arg7[%c0_7, %c384], %13 {strides = array<i32>} : memref<256x1152xbf16, #tpu.memory_space<vmem>>, vector<256x128xbf16>,
    %15 = vector.extract_strided_slice %2 {offsets = [1, 1, 0], sizes = [16, 16, 128], strides = [1, 1, 1]} : vector<18x18x128xbf16> to vector<16x16x128xbf16>
    %16 = vector.shape_cast %15 : vector<16x16x128xbf16> to vector<256x128xbf16>
    %c0_8 = arith.constant 0 : index
    %c512 = arith.constant 512 : index
    %17 = vector.load %arg7[%c0_8, %c512] : memref<256x1152xbf16, #tpu.memory_space<vmem>>, vector<256x128xbf16>
    tpu.vector_store %arg7[%c0_8, %c512], %16 {strides = array<i32>} : memref<256x1152xbf16, #tpu.memory_space<vmem>>, vector<256x128xbf16>,
    %18 = vector.extract_strided_slice %2 {offsets = [1, 2, 0], sizes = [16, 16, 128], strides = [1, 1, 1]} : vector<18x18x128xbf16> to vector<16x16x128xbf16>
    %19 = vector.shape_cast %18 : vector<16x16x128xbf16> to vector<256x128xbf16>
    %c0_9 = arith.constant 0 : index
    %c640 = arith.constant 640 : index
    %20 = vector.load %arg7[%c0_9, %c640] : memref<256x1152xbf16, #tpu.memory_space<vmem>>, vector<256x128xbf16>
    tpu.vector_store %arg7[%c0_9, %c640], %19 {strides = array<i32>} : memref<256x1152xbf16, #tpu.memory_space<vmem>>, vector<256x128xbf16>,
    %21 = vector.extract_strided_slice %2 {offsets = [2, 0, 0], sizes = [16, 16, 128], strides = [1, 1, 1]} : vector<18x18x128xbf16> to vector<16x16x128xbf16>
    %22 = vector.shape_cast %21 : vector<16x16x128xbf16> to vector<256x128xbf16>
    %c0_10 = arith.constant 0 : index
    %c768 = arith.constant 768 : index
    %23 = vector.load %arg7[%c0_10, %c768] : memref<256x1152xbf16, #tpu.memory_space<vmem>>, vector<256x128xbf16>
    tpu.vector_store %arg7[%c0_10, %c768], %22 {strides = array<i32>} : memref<256x1152xbf16, #tpu.memory_space<vmem>>, vector<256x128xbf16>,
    %24 = vector.extract_strided_slice %2 {offsets = [2, 1, 0], sizes = [16, 16, 128], strides = [1, 1, 1]} : vector<18x18x128xbf16> to vector<16x16x128xbf16>
    %25 = vector.shape_cast %24 : vector<16x16x128xbf16> to vector<256x128xbf16>
    %c0_11 = arith.constant 0 : index
    %c896 = arith.constant 896 : index
    %26 = vector.load %arg7[%c0_11, %c896] : memref<256x1152xbf16, #tpu.memory_space<vmem>>, vector<256x128xbf16>
    tpu.vector_store %arg7[%c0_11, %c896], %25 {strides = array<i32>} : memref<256x1152xbf16, #tpu.memory_space<vmem>>, vector<256x128xbf16>,
    %27 = vector.extract_strided_slice %2 {offsets = [2, 2, 0], sizes = [16, 16, 128], strides = [1, 1, 1]} : vector<18x18x128xbf16> to vector<16x16x128xbf16>
    %28 = vector.shape_cast %27 : vector<16x16x128xbf16> to vector<256x128xbf16>
    %c0_12 = arith.constant 0 : index
    %c1024 = arith.constant 1024 : index
    %29 = vector.load %arg7[%c0_12, %c1024] : memref<256x1152xbf16, #tpu.memory_space<vmem>>, vector<256x128xbf16>
    tpu.vector_store %arg7[%c0_12, %c1024], %28 {strides = array<i32>} : memref<256x1152xbf16, #tpu.memory_space<vmem>>, vector<256x128xbf16>,
    %c0_13 = arith.constant 0 : index
    %c0_14 = arith.constant 0 : index
    %30 = vector.load %arg7[%c0_13, %c0_14] : memref<256x1152xbf16, #tpu.memory_space<vmem>>, vector<256x1152xbf16>
    %c0_15 = arith.constant 0 : index
    %c0_16 = arith.constant 0 : index
    %31 = vector.load %arg2[%c0_15, %c0_16] : memref<1152x128xbf16, #tpu.memory_space<vmem>>, vector<1152x128xbf16>
    %cst = arith.constant dense<0.000000e+00> : vector<256x128xf32>
    %32 = tpu.matmul %30, %31, %cst {dimension_numbers = #tpu.dot_dimension_numbers<[1], [0], [0], [1], [0, 0, 1, 1], [], []>} : vector<256x1152xbf16>, vector<1152x128xbf16>, vector<256x128xf32> -> vector<256x128xf32>
    %c0_17 = arith.constant 0 : index
    %c0_18 = arith.constant 0 : index
    %33 = vector.load %arg3[%c0_17, %c0_18] : memref<1x128xf32, #tpu.memory_space<vmem>>, vector<1x128xf32>
    %34 = vector.broadcast %33 : vector<1x128xf32> to vector<256x128xf32>
    %35 = arith.addf %32, %34 : vector<256x128xf32>
    %36 = arith.negf %35 : vector<256x128xf32>
    %37 = math.exp %36 : vector<256x128xf32>
    %cst_19 = arith.constant 1.000000e+00 : f32
    %38 = vector.broadcast %cst_19 : f32 to vector<256x128xf32>
    %39 = arith.addf %38, %37 : vector<256x128xf32>
    %40 = arith.divf %38, %39 : vector<256x128xf32>
    %41 = arith.mulf %35, %40 : vector<256x128xf32>
    %cst_20 = arith.constant 0.000000e+00 : bf16
    %42 = vector.broadcast %cst_20 : bf16 to vector<1x18x128xbf16>
    %cst_21 = arith.constant 0.000000e+00 : bf16
    %43 = vector.broadcast %cst_21 : bf16 to vector<18x1x128xbf16>
    %c0_22 = arith.constant 0 : index
    %c0_23 = arith.constant 0 : index
    %c0_24 = arith.constant 0 : index
    %44 = vector.load %arg8[%c0_22, %c0_23, %c0_24] : memref<18x18x128xbf16, #tpu.memory_space<vmem>>, vector<1x18x128xbf16>
    tpu.vector_store %arg8[%c0_22, %c0_23, %c0_24], %42 {strides = array<i32>} : memref<18x18x128xbf16, #tpu.memory_space<vmem>>, vector<1x18x128xbf16>,
    %c17 = arith.constant 17 : index
    %c0_25 = arith.constant 0 : index
    %c0_26 = arith.constant 0 : index
    %45 = vector.load %arg8[%c17, %c0_25, %c0_26] : memref<18x18x128xbf16, #tpu.memory_space<vmem>>, vector<1x18x128xbf16>
    tpu.vector_store %arg8[%c17, %c0_25, %c0_26], %42 {strides = array<i32>} : memref<18x18x128xbf16, #tpu.memory_space<vmem>>, vector<1x18x128xbf16>,
    %c0_27 = arith.constant 0 : index
    %c0_28 = arith.constant 0 : index
    %c0_29 = arith.constant 0 : index
    %46 = vector.load %arg8[%c0_27, %c0_28, %c0_29] : memref<18x18x128xbf16, #tpu.memory_space<vmem>>, vector<18x1x128xbf16>
    tpu.vector_store %arg8[%c0_27, %c0_28, %c0_29], %43 {strides = array<i32>} : memref<18x18x128xbf16, #tpu.memory_space<vmem>>, vector<18x1x128xbf16>,
    %c0_30 = arith.constant 0 : index
    %c17_31 = arith.constant 17 : index
    %c0_32 = arith.constant 0 : index
    %47 = vector.load %arg8[%c0_30, %c17_31, %c0_32] : memref<18x18x128xbf16, #tpu.memory_space<vmem>>, vector<18x1x128xbf16>
    tpu.vector_store %arg8[%c0_30, %c17_31, %c0_32], %43 {strides = array<i32>} : memref<18x18x128xbf16, #tpu.memory_space<vmem>>, vector<18x1x128xbf16>,
    %48 = vector.shape_cast %41 : vector<256x128xf32> to vector<16x16x128xf32>
    %49 = arith.truncf %48 : vector<16x16x128xf32> to vector<16x16x128xbf16>
    %c1 = arith.constant 1 : index
    %c1_33 = arith.constant 1 : index
    %c0_34 = arith.constant 0 : index
    %50 = vector.load %arg8[%c1, %c1_33, %c0_34] : memref<18x18x128xbf16, #tpu.memory_space<vmem>>, vector<16x16x128xbf16>
    tpu.vector_store %arg8[%c1, %c1_33, %c0_34], %49 {strides = array<i32>} : memref<18x18x128xbf16, #tpu.memory_space<vmem>>, vector<16x16x128xbf16>,
    %c0_35 = arith.constant 0 : index
    %c0_36 = arith.constant 0 : index
    %c0_37 = arith.constant 0 : index
    %51 = vector.load %arg8[%c0_35, %c0_36, %c0_37] : memref<18x18x128xbf16, #tpu.memory_space<vmem>>, vector<18x18x128xbf16>
    %52 = vector.extract_strided_slice %51 {offsets = [0, 0, 0], sizes = [16, 16, 128], strides = [1, 1, 1]} : vector<18x18x128xbf16> to vector<16x16x128xbf16>
    %53 = vector.shape_cast %52 : vector<16x16x128xbf16> to vector<256x128xbf16>
    %c0_38 = arith.constant 0 : index
    %c0_39 = arith.constant 0 : index
    %54 = vector.load %arg9[%c0_38, %c0_39] : memref<256x1152xbf16, #tpu.memory_space<vmem>>, vector<256x128xbf16>
    tpu.vector_store %arg9[%c0_38, %c0_39], %53 {strides = array<i32>} : memref<256x1152xbf16, #tpu.memory_space<vmem>>, vector<256x128xbf16>,
    %55 = vector.extract_strided_slice %51 {offsets = [0, 1, 0], sizes = [16, 16, 128], strides = [1, 1, 1]} : vector<18x18x128xbf16> to vector<16x16x128xbf16>
    %56 = vector.shape_cast %55 : vector<16x16x128xbf16> to vector<256x128xbf16>
    %c0_40 = arith.constant 0 : index
    %c128_41 = arith.constant 128 : index
    %57 = vector.load %arg9[%c0_40, %c128_41] : memref<256x1152xbf16, #tpu.memory_space<vmem>>, vector<256x128xbf16>
    tpu.vector_store %arg9[%c0_40, %c128_41], %56 {strides = array<i32>} : memref<256x1152xbf16, #tpu.memory_space<vmem>>, vector<256x128xbf16>,
    %58 = vector.extract_strided_slice %51 {offsets = [0, 2, 0], sizes = [16, 16, 128], strides = [1, 1, 1]} : vector<18x18x128xbf16> to vector<16x16x128xbf16>
    %59 = vector.shape_cast %58 : vector<16x16x128xbf16> to vector<256x128xbf16>
    %c0_42 = arith.constant 0 : index
    %c256_43 = arith.constant 256 : index
    %60 = vector.load %arg9[%c0_42, %c256_43] : memref<256x1152xbf16, #tpu.memory_space<vmem>>, vector<256x128xbf16>
    tpu.vector_store %arg9[%c0_42, %c256_43], %59 {strides = array<i32>} : memref<256x1152xbf16, #tpu.memory_space<vmem>>, vector<256x128xbf16>,
    %61 = vector.extract_strided_slice %51 {offsets = [1, 0, 0], sizes = [16, 16, 128], strides = [1, 1, 1]} : vector<18x18x128xbf16> to vector<16x16x128xbf16>
    %62 = vector.shape_cast %61 : vector<16x16x128xbf16> to vector<256x128xbf16>
    %c0_44 = arith.constant 0 : index
    %c384_45 = arith.constant 384 : index
    %63 = vector.load %arg9[%c0_44, %c384_45] : memref<256x1152xbf16, #tpu.memory_space<vmem>>, vector<256x128xbf16>
    tpu.vector_store %arg9[%c0_44, %c384_45], %62 {strides = array<i32>} : memref<256x1152xbf16, #tpu.memory_space<vmem>>, vector<256x128xbf16>,
    %64 = vector.extract_strided_slice %51 {offsets = [1, 1, 0], sizes = [16, 16, 128], strides = [1, 1, 1]} : vector<18x18x128xbf16> to vector<16x16x128xbf16>
    %65 = vector.shape_cast %64 : vector<16x16x128xbf16> to vector<256x128xbf16>
    %c0_46 = arith.constant 0 : index
    %c512_47 = arith.constant 512 : index
    %66 = vector.load %arg9[%c0_46, %c512_47] : memref<256x1152xbf16, #tpu.memory_space<vmem>>, vector<256x128xbf16>
    tpu.vector_store %arg9[%c0_46, %c512_47], %65 {strides = array<i32>} : memref<256x1152xbf16, #tpu.memory_space<vmem>>, vector<256x128xbf16>,
    %67 = vector.extract_strided_slice %51 {offsets = [1, 2, 0], sizes = [16, 16, 128], strides = [1, 1, 1]} : vector<18x18x128xbf16> to vector<16x16x128xbf16>
    %68 = vector.shape_cast %67 : vector<16x16x128xbf16> to vector<256x128xbf16>
    %c0_48 = arith.constant 0 : index
    %c640_49 = arith.constant 640 : index
    %69 = vector.load %arg9[%c0_48, %c640_49] : memref<256x1152xbf16, #tpu.memory_space<vmem>>, vector<256x128xbf16>
    tpu.vector_store %arg9[%c0_48, %c640_49], %68 {strides = array<i32>} : memref<256x1152xbf16, #tpu.memory_space<vmem>>, vector<256x128xbf16>,
    %70 = vector.extract_strided_slice %51 {offsets = [2, 0, 0], sizes = [16, 16, 128], strides = [1, 1, 1]} : vector<18x18x128xbf16> to vector<16x16x128xbf16>
    %71 = vector.shape_cast %70 : vector<16x16x128xbf16> to vector<256x128xbf16>
    %c0_50 = arith.constant 0 : index
    %c768_51 = arith.constant 768 : index
    %72 = vector.load %arg9[%c0_50, %c768_51] : memref<256x1152xbf16, #tpu.memory_space<vmem>>, vector<256x128xbf16>
    tpu.vector_store %arg9[%c0_50, %c768_51], %71 {strides = array<i32>} : memref<256x1152xbf16, #tpu.memory_space<vmem>>, vector<256x128xbf16>,
    %73 = vector.extract_strided_slice %51 {offsets = [2, 1, 0], sizes = [16, 16, 128], strides = [1, 1, 1]} : vector<18x18x128xbf16> to vector<16x16x128xbf16>
    %74 = vector.shape_cast %73 : vector<16x16x128xbf16> to vector<256x128xbf16>
    %c0_52 = arith.constant 0 : index
    %c896_53 = arith.constant 896 : index
    %75 = vector.load %arg9[%c0_52, %c896_53] : memref<256x1152xbf16, #tpu.memory_space<vmem>>, vector<256x128xbf16>
    tpu.vector_store %arg9[%c0_52, %c896_53], %74 {strides = array<i32>} : memref<256x1152xbf16, #tpu.memory_space<vmem>>, vector<256x128xbf16>,
    %76 = vector.extract_strided_slice %51 {offsets = [2, 2, 0], sizes = [16, 16, 128], strides = [1, 1, 1]} : vector<18x18x128xbf16> to vector<16x16x128xbf16>
    %77 = vector.shape_cast %76 : vector<16x16x128xbf16> to vector<256x128xbf16>
    %c0_54 = arith.constant 0 : index
    %c1024_55 = arith.constant 1024 : index
    %78 = vector.load %arg9[%c0_54, %c1024_55] : memref<256x1152xbf16, #tpu.memory_space<vmem>>, vector<256x128xbf16>
    tpu.vector_store %arg9[%c0_54, %c1024_55], %77 {strides = array<i32>} : memref<256x1152xbf16, #tpu.memory_space<vmem>>, vector<256x128xbf16>,
    %c0_56 = arith.constant 0 : index
    %c0_57 = arith.constant 0 : index
    %79 = vector.load %arg9[%c0_56, %c0_57] : memref<256x1152xbf16, #tpu.memory_space<vmem>>, vector<256x1152xbf16>
    %c0_58 = arith.constant 0 : index
    %c0_59 = arith.constant 0 : index
    %80 = vector.load %arg4[%c0_58, %c0_59] : memref<1152x128xbf16, #tpu.memory_space<vmem>>, vector<1152x128xbf16>
    %cst_60 = arith.constant dense<0.000000e+00> : vector<256x128xf32>
    %81 = tpu.matmul %79, %80, %cst_60 {dimension_numbers = #tpu.dot_dimension_numbers<[1], [0], [0], [1], [0, 0, 1, 1], [], []>} : vector<256x1152xbf16>, vector<1152x128xbf16>, vector<256x128xf32> -> vector<256x128xf32>
    %c0_61 = arith.constant 0 : index
    %c0_62 = arith.constant 0 : index
    %82 = vector.load %arg5[%c0_61, %c0_62] : memref<1x128xf32, #tpu.memory_space<vmem>>, vector<1x128xf32>
    %83 = vector.broadcast %82 : vector<1x128xf32> to vector<256x128xf32>
    %84 = arith.addf %81, %83 : vector<256x128xf32>
    %85 = arith.negf %84 : vector<256x128xf32>
    %86 = math.exp %85 : vector<256x128xf32>
    %cst_63 = arith.constant 1.000000e+00 : f32
    %87 = vector.broadcast %cst_63 : f32 to vector<256x128xf32>
    %88 = arith.addf %87, %86 : vector<256x128xf32>
    %89 = arith.divf %87, %88 : vector<256x128xf32>
    %90 = arith.mulf %84, %89 : vector<256x128xf32>
    %91 = vector.extract_strided_slice %1 {offsets = [1, 1, 0], sizes = [16, 16, 128], strides = [1, 1, 1]} : vector<18x18x128xf32> to vector<16x16x128xf32>
    %92 = vector.shape_cast %91 : vector<16x16x128xf32> to vector<256x128xf32>
    %93 = arith.addf %90, %92 : vector<256x128xf32>
    %94 = vector.shape_cast %93 : vector<256x128xf32> to vector<1x16x16x128xf32>
    %c0_64 = arith.constant 0 : index
    %c0_65 = arith.constant 0 : index
    %c0_66 = arith.constant 0 : index
    %c0_67 = arith.constant 0 : index
    %95 = vector.load %arg6[%c0_64, %c0_65, %c0_66, %c0_67] : memref<1x16x16x128xf32, #tpu.memory_space<vmem>>, vector<1x16x16x128xf32>
    tpu.vector_store %arg6[%c0_64, %c0_65, %c0_66, %c0_67], %94 {strides = array<i32>} : memref<1x16x16x128xf32, #tpu.memory_space<vmem>>, vector<1x16x16x128xf32>,
    return
  }
  func.func @transform_0(%arg0: i32) -> (i32, i32, i32, i32) {
    %c0_i32 = arith.constant 0 : i32
    %c0_i32_0 = arith.constant 0 : i32
    %c0_i32_1 = arith.constant 0 : i32
    %c0_i32_2 = arith.constant 0 : i32
    return %arg0, %c0_i32, %c0_i32_0, %c0_i32_1 : i32, i32, i32, i32
  }
  func.func @transform_1(%arg0: i32) -> (i32, i32) {
    %c0_i32 = arith.constant 0 : i32
    %c0_i32_0 = arith.constant 0 : i32
    %c0_i32_1 = arith.constant 0 : i32
    return %c0_i32, %c0_i32_0 : i32, i32
  }
  func.func @transform_2(%arg0: i32) -> (i32, i32) {
    %c0_i32 = arith.constant 0 : i32
    %c0_i32_0 = arith.constant 0 : i32
    %c0_i32_1 = arith.constant 0 : i32
    return %c0_i32, %c0_i32_0 : i32, i32
  }
  func.func @transform_3(%arg0: i32) -> (i32, i32) {
    %c0_i32 = arith.constant 0 : i32
    %c0_i32_0 = arith.constant 0 : i32
    %c0_i32_1 = arith.constant 0 : i32
    return %c0_i32, %c0_i32_0 : i32, i32
  }
  func.func @transform_4(%arg0: i32) -> (i32, i32) {
    %c0_i32 = arith.constant 0 : i32
    %c0_i32_0 = arith.constant 0 : i32
    %c0_i32_1 = arith.constant 0 : i32
    return %c0_i32, %c0_i32_0 : i32, i32
  }
  func.func @transform_5(%arg0: i32) -> (i32, i32, i32, i32) {
    %c0_i32 = arith.constant 0 : i32
    %c0_i32_0 = arith.constant 0 : i32
    %c0_i32_1 = arith.constant 0 : i32
    %c0_i32_2 = arith.constant 0 : i32
    return %arg0, %c0_i32, %c0_i32_0, %c0_i32_1 : i32, i32, i32, i32
  }
}

</mosaic_0001>

<bundles_post_ra>
// kernel: bottleneck_forward.1
= control target key start
LH: loop header
LB: loop body
LE: loop exit
PB: predicated region body
PF: predicated region fallthrough
CT: control target
= control target key end

     0   :  { %s11685_s18 = smov 0   ;;  %s15800_s0 = inlined_call_operand.vmem [shape: f32[2,18,18,128], index: 0, kind: input, shape index: {}]   ;;  %s15801_s1 = inlined_call_operand.vmem [shape: bf16[1152,128], index: 1, kind: input, shape index: {}]   ;;  %s15802_s2 = inlined_call_operand.vmem [shape: f32[1,128], index: 2, kind: input, shape index: {}]   ;;  %s15803_s3 = inlined_call_operand.vmem [shape: bf16[1152,128], index: 3, kind: input, shape index: {}]   ;;  %s15804_s4 = inlined_call_operand.vmem [shape: f32[1,128], index: 4, kind: input, shape index: {}]   ;;  %s15805_s5 = inlined_call_operand.vmem [shape: f32[2,16,16,128], index: 5, kind: output, shape index: {}]  }
   0x1 LB: > { %s9041_s19 = sadd.s32 4294967295, %s11652_s18   ;;  %p9045_p0 = scmp.ge.s32.totalorder %s11652_s18, 1  ;;  %s11652_s18 = sphi %s11685_s18, %s15_s18  }
   0x2   : > { %p187_p1 = scmp.lt.s32.totalorder %s11652_s18, 3 }
   0x4   : > { %p188_p2 = pnand %p9045_p0, %p187_p1 }
   0x6   : > { %191 = sbr.rel (%p188_p2) target bundleno = 1708 (0x6ac), region = 40 }
   0xb   : > { %v11031_v0 = vld [vmem:[%s15801_s1 + $0x38] sm:$0xff]  ;;  %p215_p3 = scmp.lt.s32.totalorder %s9041_s19, 1  ;;  %v11030_v2 = vld [vmem:[%s15801_s1 + $0x30] sm:$0xff]  ;;  %v11029_v4 = vld [vmem:[%s15801_s1 + $0x28] sm:$0xff]  ;;  %vm366_vm0 = vsmask.f32 3328 }
   0xc   : > { %v11039_v1 = vld [vmem:[%s15801_s1 + $0x78] sm:$0xff]  ;;  %2788 = vmatpush.bf16.msra.mxu0 %v11031_v0  ;;  %11312 = vmatpush.bf16.msra.mxu2 %v11031_v0  ;;  %v11038_v3 = vld [vmem:[%s15801_s1 + $0x70] sm:$0xff]  ;;  %v11037_v5 = vld [vmem:[%s15801_s1 + $0x68] sm:$0xff]  ;;  %vm367_vm1 = vsmask.f32 7440  ;;  %vm865_vm3 = vcmask 1042432  }
   0xd   : > { %s15992_s19 = smov (!%p215_p3, %s9041_s19), 1  ;;  %11320 = vmatpush.bf16.msra.mxu3 %v11039_v1  ;;  %2877 = vmatpush.bf16.msra.mxu1 %v11039_v1  ;;  %v11028_v15 = vld [vmem:[%s15801_s1 + $0x20] sm:$0xff]  ;;  %v11027_v32 = vld [vmem:[%s15801_s1 + $0x18] sm:$0xff]  ;;  %vm11771_vm2 = vmor %vm366_vm0, %vm367_vm1  ;;  %vm866_vm4 = vcmask 1046532   ;;  %vm4236_vm6 = vcmask 1040384   ;;  %vm4704_vm0 = vcmask 1043456  }
   0xe   : > { %s11328_s28 = smul.u32 432, %s15992_s19  ;;  %v11036_v16 = vld [vmem:[%s15801_s1 + $0x60] sm:$0xff]  ;;  %v11035_v42 = vld [vmem:[%s15801_s1 + $0x58] sm:$0xff]  ;;  %v11026_v54 = vld [vmem:[%s15801_s1 + $0x10] sm:$0xff]  ;;  %vm4237_vm7 = vsmask.f32 256 }
   0xf   : > { %v11034_v59 = vld [vmem:[%s15801_s1 + $0x50] sm:$0xff]  ;;  %vm12270_vm5 = vmor %vm865_vm3, %vm866_vm4  ;;  %vm4293_vm9 = vsmask.f32 7938  ;;  %s10879_s8 = sshll.u32 %s15992_s19, 8 }
  0x10   : > { %2789 = vmatpush.bf16.msra.mxu0 %v11030_v2  ;;  %11313 = vmatpush.bf16.msra.mxu2 %v11030_v2  ;;  %s11717_s10 = scalar_lea.vmem %s15800_s0, %s11328_s28  ;;  %vm12788_vm8 = vmand %vm4236_vm6, %vm4237_vm7  ;;  %s15242_s11 = scalar_lea.vmem %s15805_s5, %s10879_s8 }
  0x11   : > { %11321 = vmatpush.bf16.msra.mxu3 %v11038_v3  ;;  %2878 = vmatpush.bf16.msra.mxu1 %v11038_v3  ;;  %v226_v6 = vld [vmem:[%s11717_s10] sm:$0xff]  ;;  %v227_v7 = vld [vmem:[%s11717_s10 + $0x8] sm:$0xff]  ;;  %v252_v13 = vld [vmem:[%s11717_s10 + $0xd0] sm:$0x3] }
  0x12   : > { %v250_v8 = vld [vmem:[%s11717_s10 + $0xc0] sm:$0xff]  ;;  %v11722_v9 = vpack.c.bf16 %v226_v6, %v226_v6  ;;  %v11724_v10 = vpack.c.bf16 %v227_v7, %v227_v7  ;;  %v251_v11 = vld [vmem:[%s11717_s10 + $0xc8] sm:$0xff]  ;;  %v228_v14 = vld [vmem:[%s11717_s10 + $0x10] sm:$0x3]  ;;  %v11739_v18 = vpack.c.bf16 %v252_v13, %v252_v13 }
  0x13   : > { %v11727_v12 = vpack.c.bf16 %v250_v8, %v250_v8  ;;  %v11737_v17 = vpack.c.bf16 %v251_v11, %v251_v11  ;;  %v11741_v19 = vpack.c.bf16 %v228_v14, %v228_v14  ;;  %v229_v35 = vld [vmem:[%s11717_s10 + $0x18] sm:$0xff]  ;;  %v254_v41 = vld [vmem:[%s11717_s10 + $0xe0] sm:$0xff]  ;;  %v255_v58 = vld [vmem:[%s11717_s10 + $0xe8] sm:$0x3] }
  0x14   : > { %2790 = vmatpush.bf16.msra.mxu0 %v11029_v4  ;;  %11314 = vmatpush.bf16.msra.mxu2 %v11029_v4  ;;  %334 = vst [vmem:[#allocation2] sm:$0xf] %v11722_v9  ;;  %v370_v22 = vshrl.u32 %v11722_v9, 16  ;;  %v373_v23 = vshll.u32 %v11722_v9, 16  ;;  %v581_v26 = vshll.u32 %v11739_v18, 16  ;;  %v379_v27 = vshll.u32 %v11724_v10, 16  ;;  %vm12809_vm10 = vmand %vm4236_vm6, %vm4293_vm9 }
  0x15   : > { %v562_v20 = vshrl.u32 %v11727_v12, 16  ;;  %v565_v21 = vshll.u32 %v11727_v12, 16  ;;  %11322 = vmatpush.bf16.msra.mxu3 %v11037_v5  ;;  %2879 = vmatpush.bf16.msra.mxu1 %v11037_v5  ;;  %335 = vst [vmem:[#allocation2 + $0x24] sm:$0xf] %v11724_v10  ;;  %v571_v24 = vshll.u32 %v11737_v17, 16  ;;  %v575_v25 = vshrl.u32 %v11737_v17, 16  ;;  %vm12870_vm6 = vmand %vm4704_vm0, %vm4293_vm9 }
  0x16   : > { %350 = vst [vmem:[#allocation2 + $0x240] sm:$0xf] %v11727_v12  ;;  %v372_v30 = vrot.slane %v370_v22, 4  ;;  %v375_v31 = vrot.slane %v373_v23, 5  ;;  %v11760_v38 = vrot.slane %v379_v27, 5  ;;  %v383_v39 = vshrl.u32 %v11724_v10, 16 }
  0x17   : > { %v564_v28 = vrot.slane %v562_v20, 4  ;;  %v567_v29 = vrot.slane %v565_v21, 5  ;;  %351 = vst [vmem:[#allocation2 + $0x264] sm:$0xf] %v11737_v17  ;;  %v573_v33 = vrot.slane %v571_v24, 5  ;;  %v577_v34 = vrot.slane %v575_v25, 4 }
  0x18   : > { %2791 = vmatpush.bf16.msra.mxu0 %v11028_v15  ;;  %11315 = vmatpush.bf16.msra.mxu2 %v11028_v15  ;;  %1058 = vst [vmem:[#allocation2 + $0x204] sm:$0xf] %v11727_v12  ;;  %v376_v37 = vor.u32 %v375_v31, %v372_v30  ;;  %v253_v40 = vld [vmem:[%s11717_s10 + $0xd8] sm:$0xff]  ;;  %v583_v45 = vrot.slane %v581_v26, 5  ;;  %v389_v46 = vshll.u32 %v11741_v19, 16  ;;  %v385_v48 = vrot.slane %v383_v39, 4 }
  0x19   : > { %v568_v36 = vor.u32 %v567_v29, %v564_v28  ;;  %11323 = vmatpush.bf16.msra.mxu3 %v11036_v16  ;;  %2880 = vmatpush.bf16.msra.mxu1 %v11036_v16  ;;  %1059 = vst [vmem:[#allocation2 + $0x228] sm:$0xf] %v11737_v17  ;;  %v578_v44 = vor.u32 %v577_v34, %v573_v33  ;;  %v230_v51 = vld [vmem:[%s11717_s10 + $0x20] sm:$0xff]  ;;  %v11025_v6 = vld [vmem:[%s15801_s1 + $0x8] sm:$0xff]  ;;  %v11047_v31 = vld [vmem:[%s15801_s1 + $0xb8] sm:$0xff] }
  0x1a   : > { %1190 = vst [vmem:[#allocation2 + $0x1c8] sm:$0xf] %v11727_v12  ;;  %v11777_v49 = vpack.c.bf16 %v229_v35, %v229_v35  ;;  %v11781_v52 = vpack.c.bf16 %v253_v40, %v253_v40  ;;  %v11783_v53 = vpack.c.bf16 %v254_v41, %v254_v41  ;;  %v377_v56 = vrot.slane %v376_v37, 4  ;;  %v11033_v7 = vld [vmem:[%s15801_s1 + $0x48] sm:$0xff]  ;;  %v11024_v22 = vld [vmem:[%s15801_s1] sm:$0xff] }
  0x1b   : > { %v569_v47 = vrot.slane %v568_v36, 4  ;;  %1191 = vst [vmem:[#allocation2 + $0x1ec] sm:$0xf] %v11737_v17  ;;  %v579_v50 = vrot.slane %v578_v44, 4  ;;  %v386_v57 = vor.u32 %v385_v48, %v11760_v38  ;;  %v391_v61 = vrot.slane %v389_v46, 5  ;;  %v11032_v27 = vld [vmem:[%s15801_s1 + $0x40] sm:$0xff] }
  0x1c   : > { %2792 = vmatpush.bf16.msra.mxu0 %v11027_v32  ;;  %11316 = vmatpush.bf16.msra.mxu2 %v11027_v32  ;;  %336 = vst [vmem:[#allocation2 + $0x48] sm:$0xf] %v11777_v49  ;;  %v586_v62 = vshrl.u32 %v11781_v52, 16  ;;  %v589_v63 = vshll.u32 %v11781_v52, 16  ;;  %v11800_v1 = vpack.c.bf16 %v230_v51, %v230_v51  ;;  %v595_v2 = vshll.u32 %v11783_v53, 16  ;;  %v256_v46 = vld [vmem:[%s11717_s10 + $0xf0] sm:$0xff] }
  0x1d   : > { %v574_v55 = vsel %vm11771_vm2, %v569_v47, %v573_v33  ;;  %11324 = vmatpush.bf16.msra.mxu3 %v11035_v42  ;;  %2881 = vmatpush.bf16.msra.mxu1 %v11035_v42  ;;  %v584_v60 = vsel %vm11771_vm2, %v579_v50, %v583_v45  ;;  %v387_v0 = vrot.slane %v386_v57, 4  ;;  %v599_v5 = vshrl.u32 %v11783_v53, 16  ;;  %v231_v20 = vld [vmem:[%s11717_s10 + $0x28] sm:$0x3]  ;;  %v9069_v23 = vld [vmem:[#allocation2] sm:$0xf] }
  0x1e   : > { %801 = vst [vmem:[#allocation2 + $0x244] sm:$0xf] %v574_v55  ;;  %v588_v3 = vrot.slane %v586_v62, 4  ;;  %v591_v4 = vrot.slane %v589_v63, 5  ;;  %v382_v8 = vsel %vm11771_vm2, %v377_v56, %v11760_v38  ;;  %v11813_v11 = vpack.c.bf16 %v255_v58, %v255_v58  ;;  %v10884_v24 = vld [vmem:[#allocation2 + $0x20] sm:$0xf0] }
  0x1f   : > { %802 = vst [vmem:[#allocation2 + $0x268] sm:$0xf] %v584_v60  ;;  %v11815_v13 = vrot.slane %v595_v2, 5  ;;  %v394_v14 = vshrl.u32 %v11777_v49, 16  ;;  %v392_v15 = vsel %vm11771_vm2, %v387_v0, %v391_v61  ;;  %v601_v16 = vrot.slane %v599_v5, 4  ;;  %v11055_v38 = vld [vmem:[%s15801_s1 + $0xf8] sm:$0xff] }
  0x20   : > { %1116 = vst [vmem:[#allocation2 + $0x208] sm:$0xf] %v574_v55  ;;  %2793 = vmatpush.bf16.msra.mxu0 %v11026_v54  ;;  %11317 = vmatpush.bf16.msra.mxu2 %v11026_v54  ;;  %v397_v21 = vshll.u32 %v11777_v49, 16  ;;  %v403_v25 = vshll.u32 %v11800_v1, 16  ;;  %v407_v26 = vshrl.u32 %v11800_v1, 16  ;;  %v592_v30 = vor.u32 %v591_v4, %v588_v3  ;;  %v11063_v48 = vld [vmem:[%s15801_s1 + $0x138] sm:$0xff] }
  0x21   : > { %1117 = vst [vmem:[#allocation2 + $0x22c] sm:$0xf] %v584_v60  ;;  %11325 = vmatpush.bf16.msra.mxu3 %v11034_v59  ;;  %2882 = vmatpush.bf16.msra.mxu1 %v11034_v59  ;;  %v9357_v28 = vld [vmem:[#allocation2 + $0x240] sm:$0xf]  ;;  %v10956_v29 = vld [vmem:[#allocation2 + $0x260] sm:$0xf0]  ;;  %v602_v32 = vor.u32 %v601_v16, %v11815_v13  ;;  %v11840_v39 = vpack.c.bf16 %v231_v20, %v231_v20 }
  0x22   : > { %1248 = vst [vmem:[#allocation2 + $0x1cc] sm:$0xf] %v574_v55  ;;  %v605_v33 = vshll.u32 %v11813_v11, 16  ;;  %v396_v34 = vrot.slane %v394_v14, 4  ;;  %v399_v35 = vrot.slane %v397_v21, 5  ;;  %v405_v40 = vrot.slane %v403_v25, 5 }
  0x23   : > { %1249 = vst [vmem:[#allocation2 + $0x1f0] sm:$0xf] %v584_v60  ;;  %v409_v41 = vrot.slane %v407_v26, 4  ;;  %v9070_v42 = vor.u32 %v10884_v24, %v9069_v23  ;;  %v9358_v44 = vor.u32 %v10956_v29, %v9357_v28  ;;  %v593_v45 = vrot.slane %v592_v30, 4  ;;  %v257_v54 = vld [vmem:[%s11717_s10 + $0xf8] sm:$0xff]  ;;  %v11046_v55 = vld [vmem:[%s15801_s1 + $0xb0] sm:$0xff] }
  0x24   : > { %785 = vst [vmem:[#allocation2 + $0x4] sm:$0xf] %v382_v8  ;;  %2794 = vmatpush.bf16.msra.mxu0 %v11025_v6  ;;  %11318 = vmatpush.bf16.msra.mxu2 %v11025_v6  ;;  %v603_v50 = vrot.slane %v602_v32, 4  ;;  %v607_v51 = vrot.slane %v605_v33, 5  ;;  %v400_v56 = vor.u32 %v399_v35, %v396_v34  ;;  %v11054_v58 = vld [vmem:[%s15801_s1 + $0xf0] sm:$0xff]  ;;  %v413_v60 = vshll.u32 %v11840_v39, 16 }
  0x25   : > { %786 = vst [vmem:[#allocation2 + $0x28] sm:$0xf] %v392_v15  ;;  %11326 = vmatpush.bf16.msra.mxu3 %v11033_v7  ;;  %2883 = vmatpush.bf16.msra.mxu1 %v11033_v7  ;;  %v10952_v36 = vld [vmem:[#allocation2 + $0x244] sm:$0xf]  ;;  %v410_v59 = vor.u32 %v409_v41, %v405_v40  ;;  %v11858_v61 = vpack.c.bf16 %v256_v46, %v256_v46  ;;  %v11062_v4 = vld [vmem:[%s15801_s1 + $0x130] sm:$0xff]  ;;  %v11045_v16 = vld [vmem:[%s15801_s1 + $0xa8] sm:$0xff] }
  0x26   : > { %v9359_v37 = vld [vmem:[#allocation2 + $0x264] sm:$0xf0]  ;;  %337 = vst [vmem:[#allocation2 + $0x6c] sm:$0xf] %v11800_v1  ;;  %v598_v63 = vsel %vm11771_vm2, %v593_v45, %v11815_v13  ;;  %v11864_v0 = vpack.c.bf16 %v257_v54, %v257_v54  ;;  %v608_v3 = vsel %vm11771_vm2, %v603_v50, %v607_v51  ;;  %v401_v5 = vrot.slane %v400_v56, 4  ;;  %v232_v8 = vld [vmem:[%s11717_s10 + $0x30] sm:$0xff] }
  0x27   : > { %1044 = vst [vmem:[#allocation2 + $0xc] sm:$0xf] %v11777_v49  ;;  %v9362_v47 = vor.u32 %v10952_v36, %v9359_v37  ;;  %v411_v6 = vrot.slane %v410_v59, 4  ;;  %v415_v7 = vrot.slane %v413_v60, 5  ;;  %v610_v13 = vshrl.u32 %v11858_v61, 16  ;;  %v11053_v20 = vld [vmem:[%s15801_s1 + $0xe8] sm:$0xff] }
  0x28   : > { %1045 = vst [vmem:[#allocation2 + $0x30] sm:$0xf] %v11800_v1  ;;  %2795 = vmatpush.bf16.msra.mxu0 %v11024_v22  ;;  %11319 = vmatpush.bf16.msra.mxu2 %v11024_v22  ;;  %v613_v14 = vshll.u32 %v11858_v61, 16  ;;  %v619_v15 = vshll.u32 %v11864_v0, 16  ;;  %v233_v21 = vld [vmem:[%s11717_s10 + $0x38] sm:$0xff]  ;;  %v406_v22 = vsel %vm11771_vm2, %v401_v5, %v405_v40  ;;  %v623_v23 = vshrl.u32 %v11864_v0, 16 }
  0x29   : > { %352 = vst [vmem:[#allocation2 + $0x288] sm:$0xf] %v11781_v52  ;;  %11327 = vmatpush.bf16.msra.mxu3 %v11032_v27  ;;  %2884 = vmatpush.bf16.msra.mxu1 %v11032_v27  ;;  %v9105_v24 = vld [vmem:[#allocation2 + $0x48] sm:$0xf]  ;;  %v416_v25 = vsel %vm11771_vm2, %v411_v6, %v415_v7  ;;  %v11889_v26 = vpack.c.bf16 %v232_v8, %v232_v8  ;;  %v258_v27 = vld [vmem:[%s11717_s10 + $0x100] sm:$0x3] }
  0x2a   : > { %353 = vst [vmem:[#allocation2 + $0x2ac] sm:$0xf] %v11783_v53  ;;  %v612_v28 = vrot.slane %v610_v13, 4  ;;  %v11892_v30 = vpack.c.bf16 %v233_v21, %v233_v21  ;;  %v621_v32 = vrot.slane %v619_v15, 5  ;;  %v625_v36 = vrot.slane %v623_v23, 4  ;;  %v11061_v37 = vld [vmem:[%s15801_s1 + $0x128] sm:$0xff] }
  0x2b   : > { %v10880_v57 = vld [vmem:[#allocation2 + $0x4] sm:$0xf]  ;;  %1060 = vst [vmem:[#allocation2 + $0x24c] sm:$0xf] %v11781_v52  ;;  %2796 = vmatmul.bf16.vlgmr.msra.gmra.mxu0 %v9070_v42  ;;  %2836 = vmatmul.bf16.vlgmr.msra.gmra.mxu2 %v9358_v44  ;;  %v11897_v40 = vpack.c.bf16 %v258_v27, %v258_v27  ;;  %v418_v41 = vshrl.u32 %v11889_v26, 16  ;;  %v421_v42 = vshll.u32 %v11889_v26, 16 }
  0x2c   : > { %2966 = vmatpush.bf16.msrb.mxu2 %v11047_v31  ;;  %v9071_v62 = vld [vmem:[#allocation2 + $0x24] sm:$0xf0]  ;;  %1061 = vst [vmem:[#allocation2 + $0x270] sm:$0xf] %v11783_v53  ;;  %2925 = vmatmul.bf16.vlgmr.msra.gmra.mxu3 %v9362_v47  ;;  %v615_v31 = vrot.slane %v613_v14, 5  ;;  %v427_v46 = vshll.u32 %v11892_v30, 16  ;;  %v626_v54 = vor.u32 %v625_v36, %v621_v32 }
  0x2d   : > { %3055 = vmatpush.bf16.msrb.mxu3 %v11055_v38  ;;  %v9074_v2 = vor.u32 %v10880_v57, %v9071_v62  ;;  %3144 = vmatpush.bf16.msrb.mxu0 %v11063_v48  ;;  %1192 = vst [vmem:[#allocation2 + $0x210] sm:$0xf] %v11781_v52  ;;  %v10893_v29 = vld [vmem:[#allocation2 + $0x68] sm:$0xf0]  ;;  %v431_v47 = vshrl.u32 %v11892_v30, 16  ;;  %v420_v56 = vrot.slane %v418_v41, 4 }
  0x2e   : > { %1193 = vst [vmem:[#allocation2 + $0x234] sm:$0xf] %v11783_v53  ;;  %v9106_v44 = vor.u32 %v10893_v29, %v9105_v24  ;;  %v234_v50 = vld [vmem:[%s11717_s10 + $0x40] sm:$0x3]  ;;  %v616_v51 = vor.u32 %v615_v31, %v612_v28  ;;  %v423_v57 = vrot.slane %v421_v42, 5  ;;  %v429_v60 = vrot.slane %v427_v46, 5 }
  0x2f   : > { %2885 = vmatmul.bf16.vlgmr.msra.gmra.mxu1 %v9074_v2  ;;  %803 = vst [vmem:[#allocation2 + $0x28c] sm:$0xf] %v598_v63  ;;  %v11909_v59 = vpack.c.bf16 %v234_v50, %v234_v50  ;;  %v433_v62 = vrot.slane %v431_v47, 4  ;;  %v259_v15 = vld [vmem:[%s11717_s10 + $0x108] sm:$0xff] }
  0x30   : > { %2967 = vmatpush.bf16.msrb.mxu2 %v11046_v55  ;;  %804 = vst [vmem:[#allocation2 + $0x2b0] sm:$0xf] %v608_v3  ;;  %v9393_v33 = vld [vmem:[#allocation2 + $0x288] sm:$0xf]  ;;  %v629_v55 = vshll.u32 %v11897_v40, 16  ;;  %v424_v6 = vor.u32 %v423_v57, %v420_v56  ;;  %v11926_v27 = vpack.c.bf16 %v259_v15, %v259_v15  ;;  %v11060_v57 = vld [vmem:[%s15801_s1 + $0x120] sm:$0xff] }
  0x31   : > { %3056 = vmatpush.bf16.msrb.mxu3 %v11054_v58  ;;  %1118 = vst [vmem:[#allocation2 + $0x250] sm:$0xf] %v598_v63  ;;  %3145 = vmatpush.bf16.msrb.mxu0 %v11062_v4  ;;  %v10965_v34 = vld [vmem:[#allocation2 + $0x2a8] sm:$0xf0]  ;;  %v627_v4 = vrot.slane %v626_v54, 4  ;;  %v434_v7 = vor.u32 %v433_v62, %v429_v60  ;;  %v437_v8 = vshll.u32 %v11909_v59, 16 }
  0x32   : > { %1119 = vst [vmem:[#allocation2 + $0x274] sm:$0xf] %v608_v3  ;;  %v9394_v45 = vor.u32 %v10965_v34, %v9393_v33  ;;  %v631_v5 = vrot.slane %v629_v55, 5  ;;  %v11044_v34 = vld [vmem:[%s15801_s1 + $0xa0] sm:$0xff]  ;;  %v634_v41 = vshrl.u32 %v11926_v27, 16  ;;  %v637_v42 = vshll.u32 %v11926_v27, 16 }
  0x33   : > { %1250 = vst [vmem:[#allocation2 + $0x214] sm:$0xf] %v598_v63  ;;  %v439_v21 = vrot.slane %v437_v8, 5 }
  0x34   : > { %2968 = vmatpush.bf16.msrb.mxu2 %v11045_v16  ;;  %1251 = vst [vmem:[#allocation2 + $0x238] sm:$0xf] %v608_v3  ;;  %v617_v3 = vrot.slane %v616_v51, 4  ;;  %v632_v14 = vsel %vm11771_vm2, %v627_v4, %v631_v5  ;;  %v425_v16 = vrot.slane %v424_v6, 4  ;;  %v636_v55 = vrot.slane %v634_v41, 4  ;;  %v262_v41 = vld [vmem:[%s11717_s10 + $0x120] sm:$0xff] }
  0x35   : > { %3057 = vmatpush.bf16.msrb.mxu3 %v11053_v20  ;;  %787 = vst [vmem:[#allocation2 + $0x4c] sm:$0xf] %v406_v22  ;;  %3146 = vmatpush.bf16.msrb.mxu0 %v11061_v37  ;;  %v435_v20 = vrot.slane %v434_v7, 4  ;;  %v235_v37 = vld [vmem:[%s11717_s10 + $0x48] sm:$0xff]  ;;  %v639_v56 = vrot.slane %v637_v42, 5 }
  0x36   : > { %v10961_v35 = vld [vmem:[#allocation2 + $0x28c] sm:$0xf]  ;;  %788 = vst [vmem:[#allocation2 + $0x70] sm:$0xf] %v416_v25  ;;  %v622_v13 = vsel %vm11771_vm2, %v617_v3, %v621_v32  ;;  %v430_v33 = vsel %vm11771_vm2, %v425_v16, %v429_v60  ;;  %v11946_v47 = vpack.c.bf16 %v235_v37, %v235_v37  ;;  %v237_v7 = vld [vmem:[%s11717_s10 + $0x58] sm:$0x3] }
  0x37   : > { %v9395_v38 = vld [vmem:[#allocation2 + $0x2ac] sm:$0xf0]  ;;  %1102 = vst [vmem:[#allocation2 + $0x10] sm:$0xf] %v406_v22  ;;  %v440_v36 = vsel %vm11771_vm2, %v435_v20, %v439_v21  ;;  %v640_v6 = vor.u32 %v639_v56, %v636_v55  ;;  %v11967_v21 = vpack.c.bf16 %v237_v7, %v237_v7 }
  0x38   : > { %1103 = vst [vmem:[#allocation2 + $0x34] sm:$0xf] %v416_v25  ;;  %v9398_v48 = vor.u32 %v10961_v35, %v9395_v38  ;;  %v260_v22 = vld [vmem:[%s11717_s10 + $0x110] sm:$0xff]  ;;  %v11052_v35 = vld [vmem:[%s15801_s1 + $0xe0] sm:$0xff]  ;;  %2969 = vmatpush.bf16.msrb.mxu2 %v11044_v34 }
  0x39   : > { %338 = vst [vmem:[#allocation2 + $0x90] sm:$0xf] %v11889_v26  ;;  %v11928_v29 = vpack.c.bf16 %v260_v22, %v260_v22  ;;  %v236_v38 = vld [vmem:[%s11717_s10 + $0x50] sm:$0xff]  ;;  %3058 = vmatpush.bf16.msrb.mxu3 %v11052_v35  ;;  %3147 = vmatpush.bf16.msrb.mxu0 %v11060_v57  ;;  %v461_v35 = vshll.u32 %v11967_v21, 16 }
  0x3a   : > { %339 = vst [vmem:[#allocation2 + $0xb4] sm:$0xf] %v11892_v30  ;;  %v11949_v51 = vpack.c.bf16 %v236_v38, %v236_v38 }
  0x3b   : > { %1046 = vst [vmem:[#allocation2 + $0x54] sm:$0xf] %v11889_v26  ;;  %2801 = vmatmul.bf16.gmra.mxu0 %v9106_v44  ;;  %2841 = vmatmul.bf16.gmra.mxu2 %v9394_v45  ;;  %v643_v44 = vshll.u32 %v11928_v29, 16  ;;  %v647_v45 = vshrl.u32 %v11928_v29, 16 }
  0x3c   : > { %v10889_v58 = vld [vmem:[#allocation2 + $0x4c] sm:$0xf]  ;;  %1047 = vst [vmem:[#allocation2 + $0x78] sm:$0xf] %v11892_v30  ;;  %2930 = vmatmul.bf16.gmra.mxu3 %v9398_v48  ;;  %v261_v48 = vld [vmem:[%s11717_s10 + $0x118] sm:$0x3] }
  0x3d   : > { %v9107_v63 = vld [vmem:[#allocation2 + $0x6c] sm:$0xf0]  ;;  %1178 = vst [vmem:[#allocation2 + $0x18] sm:$0xf] %v11889_v26  ;;  %v645_v60 = vrot.slane %v643_v44, 5  ;;  %v649_v62 = vrot.slane %v647_v45, 4 }
  0x3e   : > { %v9110_v2 = vor.u32 %v10889_v58, %v9107_v63  ;;  %1179 = vst [vmem:[#allocation2 + $0x3c] sm:$0xf] %v11892_v30  ;;  %v11954_v58 = vpack.c.bf16 %v261_v48, %v261_v48  ;;  %v442_v63 = vshrl.u32 %v11946_v47, 16  ;;  %v451_v3 = vshll.u32 %v11949_v51, 16  ;;  %v263_v44 = vld [vmem:[%s11717_s10 + $0x128] sm:$0xff] }
  0x3f   : > { %354 = vst [vmem:[#allocation2 + $0x2d0] sm:$0xf] %v11858_v61  ;;  %v455_v4 = vshrl.u32 %v11949_v51, 16  ;;  %v11985_v55 = vpack.c.bf16 %v263_v44, %v263_v44 }
  0x40   : > { %2890 = vmatmul.bf16.gmra.mxu1 %v9110_v2  ;;  %355 = vst [vmem:[#allocation2 + $0x2f4] sm:$0xf] %v11864_v0  ;;  %v9141_v23 = vld [vmem:[#allocation2 + $0x90] sm:$0xf]  ;;  %v445_v2 = vshll.u32 %v11946_v47, 16  ;;  %v444_v16 = vrot.slane %v442_v63, 4 }
  0x41   : > { %1062 = vst [vmem:[#allocation2 + $0x294] sm:$0xf] %v11858_v61  ;;  %v10902_v24 = vld [vmem:[#allocation2 + $0xb0] sm:$0xf0]  ;;  %v453_v22 = vrot.slane %v451_v3, 5  ;;  %v239_v3 = vld [vmem:[%s11717_s10 + $0x68] sm:$0xff] }
  0x42   : > { %1063 = vst [vmem:[#allocation2 + $0x2b8] sm:$0xf] %v11864_v0  ;;  %v9142_v31 = vor.u32 %v10902_v24, %v9141_v23  ;;  %v447_v20 = vrot.slane %v445_v2, 5  ;;  %v457_v23 = vrot.slane %v455_v4, 4  ;;  %v641_v24 = vrot.slane %v640_v6, 4  ;;  %v238_v2 = vld [vmem:[%s11717_s10 + $0x60] sm:$0xff] }
  0x43   : > { %1194 = vst [vmem:[#allocation2 + $0x258] sm:$0xf] %v11858_v61  ;;  %v667_v6 = vshll.u32 %v11985_v55, 16  ;;  %v671_v7 = vshrl.u32 %v11985_v55, 16 }
  0x44   : > { %1195 = vst [vmem:[#allocation2 + $0x27c] sm:$0xf] %v11864_v0  ;;  %v458_v34 = vor.u32 %v457_v23, %v453_v22  ;;  %v646_v37 = vsel %vm11771_vm2, %v641_v24, %v645_v60  ;;  %v11059_v24 = vld [vmem:[%s15801_s1 + $0x118] sm:$0xff] }
  0x45   : > { %805 = vst [vmem:[#allocation2 + $0x2d4] sm:$0xf] %v622_v13  ;;  %3148 = vmatpush.bf16.msrb.mxu0 %v11059_v24 }
  0x46   : > { %v9429_v25 = vld [vmem:[#allocation2 + $0x2d0] sm:$0xf]  ;;  %806 = vst [vmem:[#allocation2 + $0x2f8] sm:$0xf] %v632_v14  ;;  %v459_v45 = vrot.slane %v458_v34, 4 }
  0x47   : > { %v10974_v28 = vld [vmem:[#allocation2 + $0x2f0] sm:$0xf0]  ;;  %1120 = vst [vmem:[#allocation2 + $0x298] sm:$0xf] %v622_v13 }
  0x48   : > { %v9430_v32 = vor.u32 %v10974_v28, %v9429_v25  ;;  %1121 = vst [vmem:[#allocation2 + $0x2bc] sm:$0xf] %v632_v14 }
  0x49   : > { %1252 = vst [vmem:[#allocation2 + $0x25c] sm:$0xf] %v622_v13  ;;  %v650_v13 = vor.u32 %v649_v62, %v645_v60  ;;  %v11043_v60 = vld [vmem:[%s15801_s1 + $0x98] sm:$0xff] }
  0x4a   : > { %1253 = vst [vmem:[#allocation2 + $0x280] sm:$0xf] %v632_v14  ;;  %v653_v14 = vshll.u32 %v11954_v58, 16  ;;  %v11051_v62 = vld [vmem:[%s15801_s1 + $0xd8] sm:$0xff]  ;;  %2970 = vmatpush.bf16.msrb.mxu2 %v11043_v60 }
  0x4b   : > { %789 = vst [vmem:[#allocation2 + $0x94] sm:$0xf] %v430_v33  ;;  %2806 = vmatmul.bf16.gmra.mxu0 %v9142_v31  ;;  %2846 = vmatmul.bf16.gmra.mxu2 %v9430_v32  ;;  %v651_v25 = vrot.slane %v650_v13, 4  ;;  %v448_v32 = vor.u32 %v447_v20, %v444_v16  ;;  %v12003_v13 = vpack.c.bf16 %v238_v2, %v238_v2 }
  0x4c   : > { %v10970_v46 = vld [vmem:[#allocation2 + $0x2d4] sm:$0xf]  ;;  %790 = vst [vmem:[#allocation2 + $0xb8] sm:$0xf] %v440_v36  ;;  %v655_v28 = vrot.slane %v653_v14, 5  ;;  %3059 = vmatpush.bf16.msrb.mxu3 %v11051_v62  ;;  %v12006_v16 = vpack.c.bf16 %v239_v3, %v239_v3 }
  0x4d   : > { %v9431_v50 = vld [vmem:[#allocation2 + $0x2f4] sm:$0xf0]  ;;  %1236 = vst [vmem:[#allocation2 + $0x1c] sm:$0xf] %v430_v33  ;;  %v449_v42 = vrot.slane %v448_v32, 4  ;;  %v466_v32 = vshrl.u32 %v12003_v13, 16 }
  0x4e   : > { %v9434_v54 = vor.u32 %v10970_v46, %v9431_v50  ;;  %1237 = vst [vmem:[#allocation2 + $0x40] sm:$0xf] %v440_v36  ;;  %v656_v38 = vsel %vm11771_vm2, %v651_v25, %v655_v28  ;;  %v463_v46 = vrot.slane %v461_v35, 5  ;;  %v11983_v50 = vpack.c.bf16 %v262_v41, %v262_v41  ;;  %v264_v14 = vld [vmem:[%s11717_s10 + $0x130] sm:$0x3] }
  0x4f   : > { %1104 = vst [vmem:[#allocation2 + $0x58] sm:$0xf] %v430_v33  ;;  %v454_v57 = vsel %vm11771_vm2, %v449_v42, %v453_v22  ;;  %v12011_v25 = vpack.c.bf16 %v264_v14, %v264_v14  ;;  %v669_v28 = vrot.slane %v667_v6, 5  ;;  %v475_v34 = vshll.u32 %v12006_v16, 16 }
  0x50   : > { %2935 = vmatmul.bf16.gmra.mxu3 %v9434_v54  ;;  %1105 = vst [vmem:[#allocation2 + $0x7c] sm:$0xf] %v440_v36  ;;  %v464_v63 = vsel %vm11771_vm2, %v459_v45, %v463_v46  ;;  %v658_v4 = vshrl.u32 %v11983_v50, 16  ;;  %v479_v35 = vshrl.u32 %v12006_v16, 16  ;;  %v468_v46 = vrot.slane %v466_v32, 4 }
  0x51   : > { %340 = vst [vmem:[#allocation2 + $0xd8] sm:$0xf] %v11946_v47  ;;  %v677_v44 = vshll.u32 %v12011_v25, 16 }
  0x52   : > { %v10898_v5 = vld [vmem:[#allocation2 + $0x94] sm:$0xf]  ;;  %341 = vst [vmem:[#allocation2 + $0xfc] sm:$0xf] %v11949_v51  ;;  %v660_v22 = vrot.slane %v658_v4, 4 }
  0x53   : > { %v9143_v8 = vld [vmem:[#allocation2 + $0xb4] sm:$0xf0]  ;;  %1048 = vst [vmem:[#allocation2 + $0x9c] sm:$0xf] %v11946_v47 }
  0x54   : > { %v9146_v15 = vor.u32 %v10898_v5, %v9143_v8  ;;  %1049 = vst [vmem:[#allocation2 + $0xc0] sm:$0xf] %v11949_v51  ;;  %v661_v5 = vshll.u32 %v11983_v50, 16 }
  0x55   : > { %1180 = vst [vmem:[#allocation2 + $0x60] sm:$0xf] %v11946_v47 }
  0x56   : > { %2895 = vmatmul.bf16.gmra.mxu1 %v9146_v15  ;;  %1181 = vst [vmem:[#allocation2 + $0x84] sm:$0xf] %v11949_v51  ;;  %v663_v23 = vrot.slane %v661_v5, 5 }
  0x57   : > { %356 = vst [vmem:[#allocation2 + $0x318] sm:$0xf] %v11926_v27 }
  0x58   : > { %v9177_v31 = vld [vmem:[#allocation2 + $0xd8] sm:$0xf]  ;;  %357 = vst [vmem:[#allocation2 + $0x33c] sm:$0xf] %v11928_v29 }
  0x59   : > { %v10911_v33 = vld [vmem:[#allocation2 + $0xf8] sm:$0xf0]  ;;  %1064 = vst [vmem:[#allocation2 + $0x2dc] sm:$0xf] %v11926_v27 }
  0x5a   : > { %v9178_v36 = vor.u32 %v10911_v33, %v9177_v31  ;;  %1065 = vst [vmem:[#allocation2 + $0x300] sm:$0xf] %v11928_v29  ;;  %v673_v31 = vrot.slane %v671_v7, 4  ;;  %v469_v33 = vshll.u32 %v12003_v13, 16 }
  0x5b   : > { %1196 = vst [vmem:[#allocation2 + $0x2a0] sm:$0xf] %v11926_v27 }
  0x5c   : > { %2811 = vmatmul.bf16.gmra.mxu0 %v9178_v36  ;;  %1197 = vst [vmem:[#allocation2 + $0x2c4] sm:$0xf] %v11928_v29  ;;  %v674_v42 = vor.u32 %v673_v31, %v669_v28 }
  0x5d   : > { %807 = vst [vmem:[#allocation2 + $0x31c] sm:$0xf] %v646_v37 }
  0x5e   : > { %v9465_v48 = vld [vmem:[#allocation2 + $0x318] sm:$0xf]  ;;  %808 = vst [vmem:[#allocation2 + $0x340] sm:$0xf] %v656_v38  ;;  %v675_v62 = vrot.slane %v674_v42, 4  ;;  %v242_v42 = vld [vmem:[%s11717_s10 + $0x80] sm:$0xff] }
  0x5f   : > { %15819 = vst [vmem:[#allocation5_spill] sm:$0xff] %v11983_v50  ;;  %v10983_v54 = vld [vmem:[#allocation2 + $0x338] sm:$0xf0] }
  0x60   : > { %1122 = vst [vmem:[#allocation2 + $0x2e0] sm:$0xf] %v646_v37  ;;  %v9466_v56 = vor.u32 %v10983_v54, %v9465_v48  ;;  %v471_v48 = vrot.slane %v469_v33, 5 }
  0x61   : > { %1123 = vst [vmem:[#allocation2 + $0x304] sm:$0xf] %v656_v38 }
  0x62   : > { %1254 = vst [vmem:[#allocation2 + $0x2a4] sm:$0xf] %v646_v37  ;;  %2851 = vmatmul.bf16.gmra.mxu2 %v9466_v56  ;;  %v664_v37 = vor.u32 %v663_v23, %v660_v22  ;;  %v477_v56 = vrot.slane %v475_v34, 5  ;;  %v472_v3 = vor.u32 %v471_v48, %v468_v46  ;;  %v266_v22 = vld [vmem:[%s11717_s10 + $0x140] sm:$0xff] }
  0x63   : > { %1255 = vst [vmem:[#allocation2 + $0x2c8] sm:$0xf] %v656_v38  ;;  %v240_v38 = vld [vmem:[%s11717_s10 + $0x70] sm:$0x3]  ;;  %v12042_v33 = vpack.c.bf16 %v266_v22, %v266_v22 }
  0x64   : > { %791 = vst [vmem:[#allocation2 + $0xdc] sm:$0xf] %v454_v57  ;;  %v10979_v8 = vld [vmem:[#allocation2 + $0x31c] sm:$0xf]  ;;  %v12024_v54 = vpack.c.bf16 %v240_v38, %v240_v38  ;;  %v665_v60 = vrot.slane %v664_v37, 4  ;;  %v11050_v37 = vld [vmem:[%s15801_s1 + $0xd0] sm:$0xff] }
  0x65   : > { %792 = vst [vmem:[#allocation2 + $0x100] sm:$0xf] %v464_v63  ;;  %v9467_v15 = vld [vmem:[#allocation2 + $0x33c] sm:$0xf0]  ;;  %3060 = vmatpush.bf16.msrb.mxu3 %v11050_v37  ;;  %v691_v46 = vshll.u32 %v12042_v33, 16  ;;  %v695_v48 = vshrl.u32 %v12042_v33, 16 }
  0x66   : > { %1106 = vst [vmem:[#allocation2 + $0xa0] sm:$0xf] %v454_v57  ;;  %v9470_v20 = vor.u32 %v10979_v8, %v9467_v15  ;;  %v485_v6 = vshll.u32 %v12024_v54, 16  ;;  %v670_v8 = vsel %vm11771_vm2, %v665_v60, %v669_v28  ;;  %v265_v15 = vld [vmem:[%s11717_s10 + $0x138] sm:$0xff]  ;;  %v267_v60 = vld [vmem:[%s11717_s10 + $0x148] sm:$0x3] }
  0x67   : > { %1107 = vst [vmem:[#allocation2 + $0xc4] sm:$0xf] %v464_v63  ;;  %v12040_v32 = vpack.c.bf16 %v265_v15, %v265_v15 }
  0x68   : > { %1238 = vst [vmem:[#allocation2 + $0x64] sm:$0xf] %v454_v57  ;;  %2940 = vmatmul.bf16.gmra.mxu3 %v9470_v20  ;;  %v481_v57 = vrot.slane %v479_v35, 4  ;;  %v473_v20 = vrot.slane %v472_v3, 4  ;;  %v487_v24 = vrot.slane %v485_v6, 5  ;;  %v12068_v6 = vpack.c.bf16 %v267_v60, %v267_v60 }
  0x69   : > { %15820 = vst [vmem:[#allocation6_spill] sm:$0xff] %v12011_v25 }
  0x6a   : > { %1239 = vst [vmem:[#allocation2 + $0x88] sm:$0xf] %v464_v63  ;;  %v679_v63 = vrot.slane %v677_v44, 5  ;;  %v482_v5 = vor.u32 %v481_v57, %v477_v56  ;;  %v478_v35 = vsel %vm11771_vm2, %v473_v20, %v477_v56  ;;  %v682_v44 = vshrl.u32 %v12040_v32, 16 }
  0x6b   : > { %342 = vst [vmem:[#allocation2 + $0x120] sm:$0xf] %v12003_v13  ;;  %v10907_v36 = vld [vmem:[#allocation2 + $0xdc] sm:$0xf] }
  0x6c   : > { %343 = vst [vmem:[#allocation2 + $0x144] sm:$0xf] %v12006_v16  ;;  %v9179_v41 = vld [vmem:[#allocation2 + $0xfc] sm:$0xf0]  ;;  %v680_v14 = vsel %vm11771_vm2, %v675_v62, %v679_v63  ;;  %v483_v23 = vrot.slane %v482_v5, 4  ;;  %v12063_v63 = vpack.c.bf16 %v242_v42, %v242_v42  ;;  %v684_v3 = vrot.slane %v682_v44, 4 }
  0x6d   : > { %1050 = vst [vmem:[#allocation2 + $0xe4] sm:$0xf] %v12003_v13  ;;  %v9182_v45 = vor.u32 %v10907_v36, %v9179_v41  ;;  %v11042_v36 = vld [vmem:[%s15801_s1 + $0x90] sm:$0xff]  ;;  %v241_v41 = vld [vmem:[%s11717_s10 + $0x78] sm:$0xff] }
  0x6e   : > { %1051 = vst [vmem:[#allocation2 + $0x108] sm:$0xf] %v12006_v16  ;;  %v488_v38 = vsel %vm11771_vm2, %v483_v23, %v487_v24  ;;  %2971 = vmatpush.bf16.msrb.mxu2 %v11042_v36  ;;  %v12060_v57 = vpack.c.bf16 %v241_v41, %v241_v41  ;;  %v11058_v5 = vld [vmem:[%s15801_s1 + $0x110] sm:$0xff]  ;;  %v499_v20 = vshll.u32 %v12063_v63, 16  ;;  %v503_v22 = vshrl.u32 %v12063_v63, 16 }
  0x6f   : > { %1182 = vst [vmem:[#allocation2 + $0xa8] sm:$0xf] %v12003_v13  ;;  %2900 = vmatmul.bf16.gmra.mxu1 %v9182_v45  ;;  %v685_v45 = vshll.u32 %v12040_v32, 16  ;;  %3149 = vmatpush.bf16.msrb.mxu0 %v11058_v5 }
  0x70   : > { %1183 = vst [vmem:[#allocation2 + $0xcc] sm:$0xf] %v12006_v16  ;;  %v493_v15 = vshll.u32 %v12060_v57, 16  ;;  %v501_v42 = vrot.slane %v499_v20, 5  ;;  %v505_v44 = vrot.slane %v503_v22, 4  ;;  %v269_v20 = vld [vmem:[%s11717_s10 + $0x158] sm:$0xff] }
  0x71   : > { %358 = vst [vmem:[#allocation2 + $0x360] sm:$0xf] %v11983_v50 }
  0x72   : > { %v9213_v2 = vld [vmem:[#allocation2 + $0x120] sm:$0xf]  ;;  %359 = vst [vmem:[#allocation2 + $0x384] sm:$0xf] %v11985_v55 }
  0x73   : > { %v10920_v4 = vld [vmem:[#allocation2 + $0x140] sm:$0xf0]  ;;  %1066 = vst [vmem:[#allocation2 + $0x324] sm:$0xf] %v11983_v50 }
  0x74   : > { %v9214_v7 = vor.u32 %v10920_v4, %v9213_v2  ;;  %1067 = vst [vmem:[#allocation2 + $0x348] sm:$0xf] %v11985_v55  ;;  %v687_v4 = vrot.slane %v685_v45, 5 }
  0x75   : > { %1198 = vst [vmem:[#allocation2 + $0x2e8] sm:$0xf] %v11983_v50 }
  0x76   : > { %2816 = vmatmul.bf16.gmra.mxu0 %v9214_v7  ;;  %1199 = vst [vmem:[#allocation2 + $0x30c] sm:$0xf] %v11985_v55  ;;  %v693_v7 = vrot.slane %v691_v46, 5  ;;  %v688_v24 = vor.u32 %v687_v4, %v684_v3 }
  0x77   : > { %809 = vst [vmem:[#allocation2 + $0x364] sm:$0xf] %v670_v8 }
  0x78   : > { %v9501_v31 = vld [vmem:[#allocation2 + $0x360] sm:$0xf]  ;;  %810 = vst [vmem:[#allocation2 + $0x388] sm:$0xf] %v680_v14  ;;  %v689_v45 = vrot.slane %v688_v24, 4 }
  0x79   : > { %15821 = vst [vmem:[#allocation7_spill] sm:$0xff] %v12040_v32  ;;  %v10992_v28 = vld [vmem:[#allocation2 + $0x380] sm:$0xf0] }
  0x7a   : > { %1124 = vst [vmem:[#allocation2 + $0x328] sm:$0xf] %v670_v8  ;;  %v9502_v34 = vor.u32 %v10992_v28, %v9501_v31  ;;  %v243_v31 = vld [vmem:[%s11717_s10 + $0x88] sm:$0x3]  ;;  %v694_v5 = vsel %vm11771_vm2, %v689_v45, %v693_v7  ;;  %v245_v45 = vld [vmem:[%s11717_s10 + $0x98] sm:$0xff] }
  0x7b   : > { %15822 = vst [vmem:[#allocation8_spill] sm:$0xff] %v12042_v33  ;;  %v12081_v41 = vpack.c.bf16 %v243_v31, %v243_v31 }
  0x7c   : > { %1125 = vst [vmem:[#allocation2 + $0x34c] sm:$0xf] %v680_v14  ;;  %2856 = vmatmul.bf16.gmra.mxu2 %v9502_v34 }
  0x7d   : > { %1256 = vst [vmem:[#allocation2 + $0x2ec] sm:$0xf] %v670_v8  ;;  %v697_v8 = vrot.slane %v695_v48, 4  ;;  %v509_v3 = vshll.u32 %v12081_v41, 16 }
  0x7e   : > { %1257 = vst [vmem:[#allocation2 + $0x310] sm:$0xf] %v680_v14  ;;  %v10988_v56 = vld [vmem:[#allocation2 + $0x364] sm:$0xf]  ;;  %v490_v14 = vshrl.u32 %v12060_v57, 16 }
  0x7f   : > { %793 = vst [vmem:[#allocation2 + $0x124] sm:$0xf] %v478_v35  ;;  %v9503_v62 = vld [vmem:[#allocation2 + $0x384] sm:$0xf0]  ;;  %v698_v34 = vor.u32 %v697_v8, %v693_v7 }
  0x80   : > { %794 = vst [vmem:[#allocation2 + $0x148] sm:$0xf] %v488_v38  ;;  %v9506_v2 = vor.u32 %v10988_v56, %v9503_v62  ;;  %v492_v37 = vrot.slane %v490_v14, 4  ;;  %v268_v14 = vld [vmem:[%s11717_s10 + $0x150] sm:$0xff] }
  0x81   : > { %1108 = vst [vmem:[#allocation2 + $0xe8] sm:$0xf] %v478_v35  ;;  %v699_v46 = vrot.slane %v698_v34, 4  ;;  %v12097_v31 = vpack.c.bf16 %v268_v14, %v268_v14 }
  0x82   : > { %1109 = vst [vmem:[#allocation2 + $0x10c] sm:$0xf] %v488_v38  ;;  %2945 = vmatmul.bf16.gmra.mxu3 %v9506_v2  ;;  %v506_v2 = vor.u32 %v505_v44, %v501_v42  ;;  %v244_v44 = vld [vmem:[%s11717_s10 + $0x90] sm:$0xff] }
  0x83   : > { %1240 = vst [vmem:[#allocation2 + $0xac] sm:$0xf] %v478_v35  ;;  %v701_v35 = vshll.u32 %v12068_v6, 16 }
  0x84   : > { %15823 = vst [vmem:[#allocation9_spill] sm:$0xff] %v12068_v6  ;;  %v507_v22 = vrot.slane %v506_v2, 4  ;;  %v270_v2 = vld [vmem:[%s11717_s10 + $0x160] sm:$0x3] }
  0x85   : > { %1241 = vst [vmem:[#allocation2 + $0xd0] sm:$0xf] %v488_v38  ;;  %v495_v38 = vrot.slane %v493_v15, 5  ;;  %v703_v48 = vrot.slane %v701_v35, 5 }
  0x86   : > { %344 = vst [vmem:[#allocation2 + $0x168] sm:$0xf] %v12060_v57  ;;  %v10916_v23 = vld [vmem:[#allocation2 + $0x124] sm:$0xf] }
  0x87   : > { %345 = vst [vmem:[#allocation2 + $0x18c] sm:$0xf] %v12063_v63  ;;  %v9215_v28 = vld [vmem:[#allocation2 + $0x144] sm:$0xf0]  ;;  %v496_v60 = vor.u32 %v495_v38, %v492_v37  ;;  %v704_v8 = vsel %vm11771_vm2, %v699_v46, %v703_v48  ;;  %v706_v46 = vshrl.u32 %v12097_v31, 16 }
  0x88   : > { %1052 = vst [vmem:[#allocation2 + $0x12c] sm:$0xf] %v12060_v57  ;;  %v9218_v36 = vor.u32 %v10916_v23, %v9215_v28  ;;  %v511_v23 = vrot.slane %v509_v3, 5  ;;  %v12099_v28 = vpack.c.bf16 %v269_v20, %v269_v20  ;;  %v11049_v37 = vld [vmem:[%s15801_s1 + $0xc8] sm:$0xff]  ;;  %v11071_v20 = vld [vmem:[%s15801_s1 + $0x178] sm:$0xff] }
  0x89   : > { %1053 = vst [vmem:[#allocation2 + $0x150] sm:$0xf] %v12063_v63  ;;  %v497_v15 = vrot.slane %v496_v60, 4  ;;  %3061 = vmatpush.bf16.msrb.mxu3 %v11049_v37  ;;  %3233 = vmatpush.bf16.msrb.mxu1 %v11071_v20 }
  0x8a   : > { %1184 = vst [vmem:[#allocation2 + $0xf0] sm:$0xf] %v12060_v57  ;;  %2905 = vmatmul.bf16.gmra.mxu1 %v9218_v36  ;;  %v11041_v36 = vld [vmem:[%s15801_s1 + $0x88] sm:$0xff]  ;;  %v512_v38 = vsel %vm11771_vm2, %v507_v22, %v511_v23  ;;  %v715_v48 = vshll.u32 %v12099_v28, 16  ;;  %v12128_v22 = vpack.c.bf16 %v270_v2, %v270_v2 }
  0x8b   : > { %1185 = vst [vmem:[#allocation2 + $0x114] sm:$0xf] %v12063_v63  ;;  %v502_v35 = vsel %vm11771_vm2, %v497_v15, %v501_v42  ;;  %v709_v42 = vshll.u32 %v12097_v31, 16  ;;  %2972 = vmatpush.bf16.msrb.mxu2 %v11041_v36  ;;  %v11057_v15 = vld [vmem:[%s15801_s1 + $0x108] sm:$0xff] }
  0x8c   : > { %360 = vst [vmem:[#allocation2 + $0x3a8] sm:$0xf] %v12040_v32  ;;  %v717_v23 = vrot.slane %v715_v48, 5  ;;  %3150 = vmatpush.bf16.msrb.mxu0 %v11057_v15 }
  0x8d   : > { %v9249_v56 = vld [vmem:[#allocation2 + $0x168] sm:$0xf]  ;;  %361 = vst [vmem:[#allocation2 + $0x3cc] sm:$0xf] %v12042_v33  ;;  %v711_v14 = vrot.slane %v709_v42, 5  ;;  %v725_v42 = vshll.u32 %v12128_v22, 16 }
  0x8e   : > { %v10929_v62 = vld [vmem:[#allocation2 + $0x188] sm:$0xf0]  ;;  %1068 = vst [vmem:[#allocation2 + $0x36c] sm:$0xf] %v12040_v32 }
  0x8f   : > { %v9250_v4 = vor.u32 %v10929_v62, %v9249_v56  ;;  %1069 = vst [vmem:[#allocation2 + $0x390] sm:$0xf] %v12042_v33  ;;  %v719_v56 = vshrl.u32 %v12099_v28, 16  ;;  %v12117_v62 = vpack.c.bf16 %v244_v44, %v244_v44  ;;  %v727_v15 = vrot.slane %v725_v42, 5 }
  0x90   : > { %1200 = vst [vmem:[#allocation2 + $0x330] sm:$0xf] %v12040_v32 }
  0x91   : > { %2821 = vmatmul.bf16.gmra.mxu0 %v9250_v4  ;;  %1201 = vst [vmem:[#allocation2 + $0x354] sm:$0xf] %v12042_v33  ;;  %v12120_v4 = vpack.c.bf16 %v245_v45, %v245_v45  ;;  %v246_v45 = vld [vmem:[%s11717_s10 + $0xa0] sm:$0x3] }
  0x92   : > { %811 = vst [vmem:[#allocation2 + $0x3ac] sm:$0xf] %v694_v5  ;;  %v12141_v2 = vpack.c.bf16 %v246_v45, %v246_v45  ;;  %v271_v45 = vld [vmem:[%s11717_s10 + $0x168] sm:$0xff] }
  0x93   : > { %v9537_v24 = vld [vmem:[#allocation2 + $0x3a8] sm:$0xf]  ;;  %812 = vst [vmem:[#allocation2 + $0x3d0] sm:$0xf] %v704_v8  ;;  %v523_v36 = vshll.u32 %v12120_v4, 16  ;;  %v527_v37 = vshrl.u32 %v12120_v4, 16 }
  0x94   : > { %15824 = vst [vmem:[#allocation10_spill] sm:$0xff] %v12097_v31  ;;  %v11001_v7 = vld [vmem:[#allocation2 + $0x3c8] sm:$0xf0] }
  0x95   : > { %1126 = vst [vmem:[#allocation2 + $0x370] sm:$0xf] %v694_v5  ;;  %v9538_v34 = vor.u32 %v11001_v7, %v9537_v24  ;;  %v721_v24 = vrot.slane %v719_v56, 4  ;;  %v514_v7 = vshrl.u32 %v12117_v62, 16 }
  0x96   : > { %15825 = vst [vmem:[#allocation11_spill] sm:$0xff] %v12099_v28 }
  0x97   : > { %1127 = vst [vmem:[#allocation2 + $0x394] sm:$0xf] %v704_v8  ;;  %2861 = vmatmul.bf16.gmra.mxu2 %v9538_v34  ;;  %v517_v34 = vshll.u32 %v12117_v62, 16  ;;  %v516_v56 = vrot.slane %v514_v7, 4 }
  0x98   : > { %1258 = vst [vmem:[#allocation2 + $0x334] sm:$0xf] %v694_v5 }
  0x99   : > { %1259 = vst [vmem:[#allocation2 + $0x358] sm:$0xf] %v704_v8  ;;  %v10997_v60 = vld [vmem:[#allocation2 + $0x3ac] sm:$0xf]  ;;  %v708_v8 = vrot.slane %v706_v46, 4 }
  0x9a   : > { %795 = vst [vmem:[#allocation2 + $0x16c] sm:$0xf] %v502_v35  ;;  %v9539_v3 = vld [vmem:[#allocation2 + $0x3cc] sm:$0xf0] }
  0x9b   : > { %796 = vst [vmem:[#allocation2 + $0x190] sm:$0xf] %v512_v38  ;;  %v9542_v5 = vor.u32 %v10997_v60, %v9539_v3  ;;  %v712_v44 = vor.u32 %v711_v14, %v708_v8  ;;  %v519_v60 = vrot.slane %v517_v34, 5  ;;  %v525_v3 = vrot.slane %v523_v36, 5 }
  0x9c   : > { %1110 = vst [vmem:[#allocation2 + $0x130] sm:$0xf] %v502_v35  ;;  %v533_v36 = vshll.u32 %v12141_v2, 16 }
  0x9d   : > { %1111 = vst [vmem:[#allocation2 + $0x154] sm:$0xf] %v512_v38  ;;  %2950 = vmatmul.bf16.gmra.mxu3 %v9542_v5  ;;  %v529_v5 = vrot.slane %v527_v37, 4  ;;  %v713_v8 = vrot.slane %v712_v44, 4 }
  0x9e   : > { %1242 = vst [vmem:[#allocation2 + $0xf4] sm:$0xf] %v502_v35 }
  0x9f   : > { %15826 = vst [vmem:[#allocation12_spill] sm:$0xff] %v12128_v22  ;;  %v530_v34 = vor.u32 %v529_v5, %v525_v3 }
  0xa0   : > { %1243 = vst [vmem:[#allocation2 + $0x118] sm:$0xf] %v512_v38  ;;  %v722_v38 = vor.u32 %v721_v24, %v717_v23  ;;  %v520_v24 = vor.u32 %v519_v60, %v516_v56  ;;  %v12157_v60 = vpack.c.bf16 %v271_v45, %v271_v45 }
  0xa1   : > { %346 = vst [vmem:[#allocation2 + $0x1b0] sm:$0xf] %v12117_v62  ;;  %v10925_v35 = vld [vmem:[#allocation2 + $0x16c] sm:$0xf]  ;;  %v531_v42 = vrot.slane %v530_v34, 4 }
  0xa2   : > { %347 = vst [vmem:[#allocation2 + $0x1d4] sm:$0xf] %v12120_v4  ;;  %v9251_v46 = vld [vmem:[#allocation2 + $0x18c] sm:$0xf0]  ;;  %v723_v14 = vrot.slane %v722_v38, 4  ;;  %v247_v34 = vld [vmem:[%s11717_s10 + $0xa8] sm:$0xff] }
  0xa3   : > { %1054 = vst [vmem:[#allocation2 + $0x174] sm:$0xf] %v12117_v62  ;;  %v9254_v48 = vor.u32 %v10925_v35, %v9251_v46  ;;  %v718_v35 = vsel %vm11771_vm2, %v713_v8, %v717_v23  ;;  %v521_v46 = vrot.slane %v520_v24, 4  ;;  %v272_v38 = vld [vmem:[%s11717_s10 + $0x170] sm:$0xff]  ;;  %v11048_v24 = vld [vmem:[%s15801_s1 + $0xc0] sm:$0xff] }
  0xa4   : > { %1055 = vst [vmem:[#allocation2 + $0x198] sm:$0xf] %v12120_v4  ;;  %v728_v44 = vsel %vm11771_vm2, %v723_v14, %v727_v15  ;;  %v12159_v5 = vpack.c.bf16 %v272_v38, %v272_v38  ;;  %v11070_v8 = vld [vmem:[%s15801_s1 + $0x170] sm:$0xff]  ;;  %3062 = vmatpush.bf16.msrb.mxu3 %v11048_v24  ;;  %v12180_v38 = vpack.c.bf16 %v247_v34, %v247_v34 }
  0xa5   : > { %1186 = vst [vmem:[#allocation2 + $0x138] sm:$0xf] %v12117_v62  ;;  %2910 = vmatmul.bf16.gmra.mxu1 %v9254_v48  ;;  %v535_v48 = vrot.slane %v533_v36, 5  ;;  %v526_v15 = vsel %vm11771_vm2, %v521_v46, %v525_v3  ;;  %v248_v36 = vld [vmem:[%s11717_s10 + $0xb0] sm:$0xff]  ;;  %v730_v3 = vshrl.u32 %v12157_v60, 16 }
  0xa6   : > { %1187 = vst [vmem:[#allocation2 + $0x15c] sm:$0xf] %v12120_v4  ;;  %3234 = vmatpush.bf16.msrb.mxu1 %v11070_v8  ;;  %v739_v45 = vshll.u32 %v12159_v5, 16  ;;  %v743_v46 = vshrl.u32 %v12159_v5, 16 }
  0xa7   : > { %362 = vst [vmem:[#allocation2 + $0x3f0] sm:$0xf] %v12097_v31  ;;  %v732_v8 = vrot.slane %v730_v3, 4  ;;  %v538_v3 = vshrl.u32 %v12180_v38, 16 }
  0xa8   : > { %v9285_v20 = vld [vmem:[#allocation2 + $0x1b0] sm:$0xf]  ;;  %363 = vst [vmem:[#allocation2 + $0x414] sm:$0xf] %v12099_v28  ;;  %v741_v34 = vrot.slane %v739_v45, 5  ;;  %v745_v22 = vrot.slane %v743_v46, 4 }
  0xa9   : > { %v10938_v7 = vld [vmem:[#allocation2 + $0x1d0] sm:$0xf0]  ;;  %1070 = vst [vmem:[#allocation2 + $0x3b4] sm:$0xf] %v12097_v31 }
  0xaa   : > { %v9286_v37 = vor.u32 %v10938_v7, %v9285_v20  ;;  %1071 = vst [vmem:[#allocation2 + $0x3d8] sm:$0xf] %v12099_v28  ;;  %v11040_v20 = vld [vmem:[%s15801_s1 + $0x80] sm:$0xff]  ;;  %v536_v7 = vsel %vm11771_vm2, %v531_v42, %v535_v48  ;;  %v273_v42 = vld [vmem:[%s11717_s10 + $0x178] sm:$0x3] }
  0xab   : > { %1202 = vst [vmem:[#allocation2 + $0x378] sm:$0xf] %v12097_v31  ;;  %2973 = vmatpush.bf16.msrb.mxu2 %v11040_v20  ;;  %v11056_v20 = vld [vmem:[%s15801_s1 + $0x100] sm:$0xff]  ;;  %v12191_v24 = vpack.c.bf16 %v273_v42, %v273_v42  ;;  %v2797_v31 = vpop.f32.mrf.mxu0 }
  0xac   : > { %2826 = vmatmul.bf16.gmra.mxu0 %v9286_v37  ;;  %1203 = vst [vmem:[#allocation2 + $0x39c] sm:$0xf] %v12099_v28  ;;  %v733_v37 = vshll.u32 %v12157_v60, 16 }
  0xad   : > { %813 = vst [vmem:[#allocation2 + $0x3f4] sm:$0xf] %v718_v35  ;;  %3151 = vmatpush.bf16.msrb.mxu0 %v11056_v20  ;;  %v11067_v20 = vld [vmem:[%s15801_s1 + $0x158] sm:$0xff] }
  0xae   : > { %v9573_v56 = vld [vmem:[#allocation2 + $0x3f0] sm:$0xf]  ;;  %814 = vst [vmem:[#allocation2 + $0x418] sm:$0xf] %v728_v44 }
  0xaf   : > { %v11010_v23 = vld [vmem:[#allocation2 + $0x410] sm:$0xf0]  ;;  %1128 = vst [vmem:[#allocation2 + $0x3b8] sm:$0xf] %v718_v35 }
  0xb0   : > { %v9574_v14 = vor.u32 %v11010_v23, %v9573_v56  ;;  %1129 = vst [vmem:[#allocation2 + $0x3dc] sm:$0xf] %v728_v44  ;;  %v11069_v56 = vld [vmem:[%s15801_s1 + $0x168] sm:$0xff] }
  0xb1   : > { %1260 = vst [vmem:[#allocation2 + $0x37c] sm:$0xf] %v718_v35  ;;  %3235 = vmatpush.bf16.msrb.mxu1 %v11069_v56  ;;  %v746_v56 = vor.u32 %v745_v22, %v741_v34 }
  0xb2   : > { %2866 = vmatmul.bf16.gmra.mxu2 %v9574_v14  ;;  %1261 = vst [vmem:[#allocation2 + $0x3a0] sm:$0xf] %v728_v44  ;;  %v12183_v44 = vpack.c.bf16 %v248_v36, %v248_v36  ;;  %v735_v14 = vrot.slane %v733_v37, 5  ;;  %v11068_v36 = vld [vmem:[%s15801_s1 + $0x160] sm:$0xff]  ;;  %v541_v37 = vshll.u32 %v12180_v38, 16 }
  0xb3   : > { %797 = vst [vmem:[#allocation2 + $0x1b4] sm:$0xf] %v526_v15 }
  0xb4   : > { %v11006_v35 = vld [vmem:[#allocation2 + $0x3f4] sm:$0xf]  ;;  %798 = vst [vmem:[#allocation2 + $0x1d8] sm:$0xf] %v536_v7  ;;  %v551_v45 = vshrl.u32 %v12183_v44, 16  ;;  %v736_v42 = vor.u32 %v735_v14, %v732_v8  ;;  %v540_v8 = vrot.slane %v538_v3, 4 }
  0xb5   : > { %v9575_v48 = vld [vmem:[#allocation2 + $0x414] sm:$0xf0]  ;;  %1112 = vst [vmem:[#allocation2 + $0x178] sm:$0xf] %v526_v15  ;;  %3236 = vmatpush.bf16.msrb.mxu1 %v11068_v36  ;;  %v543_v14 = vrot.slane %v541_v37, 5 }
  0xb6   : > { %v9578_v23 = vor.u32 %v11006_v35, %v9575_v48  ;;  %1113 = vst [vmem:[#allocation2 + $0x19c] sm:$0xf] %v536_v7  ;;  %v547_v35 = vshll.u32 %v12183_v44, 16  ;;  %v553_v33 = vrot.slane %v551_v45, 4  ;;  %v737_v36 = vrot.slane %v736_v42, 4  ;;  %v11079_v37 = vld [vmem:[%s15801_s1 + $0x1b8] sm:$0xff] }
  0xb7   : > { %1244 = vst [vmem:[#allocation2 + $0x13c] sm:$0xf] %v526_v15  ;;  %v249_v15 = vld [vmem:[%s11717_s10 + $0xb8] sm:$0x3]  ;;  %v544_v3 = vor.u32 %v543_v14, %v540_v8  ;;  %v2926_v8 = vpop.f32.mrf.mxu3  ;;  %v12235_v14 = vpop.f32.mrf.mxu0  ;;  %3322 = vmatpush.bf16.msra.mxu2 %v11079_v37 }
  0xb8   : > { %15827 = vst [vmem:[#allocation13_spill] sm:$0xff] %v12191_v24  ;;  %2955 = vmatmul.bf16.gmra.mxu3 %v9578_v23  ;;  %v749_v23 = vshll.u32 %v12191_v24, 16  ;;  %v12215_v6 = vpack.c.bf16 %v249_v15, %v249_v15  ;;  %v549_v32 = vrot.slane %v547_v35, 5  ;;  %v747_v24 = vrot.slane %v746_v56, 4  ;;  %v2886_v15 = vpop.f32.mrf.mxu1 }
  0xb9   : > { %1245 = vst [vmem:[#allocation2 + $0x160] sm:$0xf] %v536_v7  ;;  %v12206_v7 = vld [vmem:[%s15802_s2] ss:$0 sm:$0xff]  ;;  %3237 = vmatpush.bf16.msrb.mxu1 %v11067_v20  ;;  %v742_v50 = vsel %vm11771_vm2, %v737_v36, %v741_v34  ;;  %v545_v34 = vrot.slane %v544_v3, 4 }
  0xba   : > { %348 = vst [vmem:[#allocation2 + $0x1f8] sm:$0xf] %v12180_v38  ;;  %v10934_v46 = vld [vmem:[#allocation2 + $0x1b4] sm:$0xf]  ;;  %v2798_v22 = vadd.f32 %v12206_v7, %v2797_v31  ;;  %v554_v45 = vor.u32 %v553_v33, %v549_v32  ;;  %v557_v42 = vshll.u32 %v12215_v6, 16  ;;  %v11095_v33 = vld [vmem:[%s15801_s1 + $0x238] sm:$0xff] }
  0xbb   : > { %349 = vst [vmem:[#allocation2 + $0x21c] sm:$0xf] %v12183_v44  ;;  %v9287_v48 = vld [vmem:[#allocation2 + $0x1d4] sm:$0xf0]  ;;  %v11066_v31 = vld [vmem:[%s15801_s1 + $0x150] sm:$0xff]  ;;  %3500 = vmatpush.bf16.msra.mxu0 %v11095_v33  ;;  %v873_v33 = vrot.slane %v11741_v19, 5 }
  0xbc   : > { %1056 = vst [vmem:[#allocation2 + $0x1bc] sm:$0xf] %v12180_v38  ;;  %v9290_v28 = vor.u32 %v10934_v46, %v9287_v48  ;;  %v751_v46 = vrot.slane %v749_v23, 5  ;;  %v12229_v56 = vadd.f32 %v2886_v15, %v2798_v22  ;;  %v11087_v23 = vld [vmem:[%s15801_s1 + $0x1f8] sm:$0xff]  ;;  %v555_v36 = vrot.slane %v554_v45, 4 }
  0xbd   : > { %1057 = vst [vmem:[#allocation2 + $0x1e0] sm:$0xf] %v12183_v44  ;;  %3238 = vmatpush.bf16.msrb.mxu1 %v11066_v31  ;;  %3411 = vmatpush.bf16.msra.mxu3 %v11087_v23  ;;  %v559_v37 = vrot.slane %v557_v42, 5  ;;  %v11064_v31 = vld [vmem:[%s15801_s1 + $0x140] sm:$0xff]  ;;  %v877_v23 = vrot.slane %v11800_v1, 5  ;;  %v9050_v1 = vrot.slane %v11777_v49, 9 }
  0xbe   : > { %1188 = vst [vmem:[#allocation2 + $0x180] sm:$0xf] %v12180_v38  ;;  %2915 = vmatmul.bf16.gmra.mxu1 %v9290_v28  ;;  %v2837_v28 = vpop.f32.mrf.mxu2  ;;  %v752_v22 = vsel %vm11771_vm2, %v747_v24, %v751_v46  ;;  %v870_v24 = vrot.slane %v11724_v10, 5 }
  0xbf   : > { %1189 = vst [vmem:[#allocation2 + $0x1a4] sm:$0xf] %v12183_v44  ;;  %v2838_v20 = vadd.f32 %v12206_v7, %v2837_v28  ;;  %v560_v10 = vsel %vm11771_vm2, %v555_v36, %v559_v37  ;;  %v12264_v42 = vpop.f32.mrf.mxu3  ;;  %v878_v49 = vsel %vm12270_vm5, %v9050_v1, %v877_v23 }
  0xc0   : > { %364 = vst [vmem:[#allocation2 + $0x438] sm:$0xf] %v12157_v60  ;;  %v12258_v3 = vpop.f32.mrf.mxu1 }
  0xc1   : > { %v9321_v48 = vld [vmem:[#allocation2 + $0x1f8] sm:$0xf]  ;;  %365 = vst [vmem:[#allocation2 + $0x45c] sm:$0xf] %v12159_v5  ;;  %v12246_v15 = vadd.f32 %v2926_v8, %v2838_v20  ;;  %v2802_v20 = vpop.f32.mrf.mxu0  ;;  %v9049_v8 = vrot.slane %v11722_v9, 9  ;;  %v880_v9 = vrot.slane %v11840_v39, 5 }
  0xc2   : > { %v10947_v35 = vld [vmem:[#allocation2 + $0x218] sm:$0xf0]  ;;  %1072 = vst [vmem:[#allocation2 + $0x3fc] sm:$0xf] %v12157_v60  ;;  %v2803_v19 = vadd.f32 %v12206_v7, %v2802_v20  ;;  %v9051_v39 = vrot.slane %v11889_v26, 9  ;;  %v884_v20 = vrot.slane %v11892_v30, 5 }
  0xc3   : > { %v9322_v25 = vor.u32 %v10947_v35, %v9321_v48  ;;  %1073 = vst [vmem:[#allocation2 + $0x420] sm:$0xf] %v12159_v5  ;;  %v11065_v48 = vld [vmem:[%s15801_s1 + $0x148] sm:$0xff] }
  0xc4   : > { %1204 = vst [vmem:[#allocation2 + $0x3c0] sm:$0xf] %v12157_v60  ;;  %3239 = vmatpush.bf16.msrb.mxu1 %v11065_v48  ;;  %v15830_v48 = vmov 0 }
  0xc5   : > { %2831 = vmatmul.bf16.gmra.mxu0 %v9322_v25  ;;  %1205 = vst [vmem:[#allocation2 + $0x3e4] sm:$0xf] %v12159_v5  ;;  %v550_v25 = vsel %vm11771_vm2, %v545_v34, %v549_v32  ;;  %v872_v32 = vrot.slane %v870_v24, 4  ;;  %v15831_v48 = vsel %vm12270_vm5, 4294967295, %v15830_v48  ;;  %v10886_v34 = vld [vmem:[#allocation2 + $0x30] sm:$0xf0] }
  0xc6   : > { %815 = vst [vmem:[#allocation2 + $0x43c] sm:$0xf] %v742_v50  ;;  %v12260_v45 = vpop.f32.mrf.mxu2 }
  0xc7   : > { %v9609_v28 = vld [vmem:[#allocation2 + $0x438] sm:$0xf]  ;;  %816 = vst [vmem:[#allocation2 + $0x460] sm:$0xf] %v752_v22 }
  0xc8   : > { %v11019_v46 = vld [vmem:[#allocation2 + $0x458] sm:$0xf0]  ;;  %1130 = vst [vmem:[#allocation2 + $0x400] sm:$0xf] %v742_v50  ;;  %3240 = vmatpush.bf16.msrb.mxu1 %v11064_v31  ;;  %v874_v31 = vsel %vm12270_vm5, %v872_v32, %v873_v33  ;;  %v2931_v32 = vpop.f32.mrf.mxu3  ;;  %v887_v33 = vrot.slane %v11909_v59, 5 }
  0xc9   : > { %v9610_v35 = vor.u32 %v11019_v46, %v9609_v28  ;;  %1131 = vst [vmem:[#allocation2 + $0x424] sm:$0xf] %v752_v22  ;;  %v871_v46 = vsel %vm12270_vm5, %v9049_v8, %v870_v24 }
  0xca   : > { %15828 = vst [vmem:[#allocation14_spill] sm:$0xff] %v12260_v45 }
  0xcb   : > { %1262 = vst [vmem:[#allocation2 + $0x3c4] sm:$0xf] %v742_v50  ;;  %2871 = vmatmul.bf16.gmra.mxu2 %v9610_v35  ;;  %v9085_v50 = vld [vmem:[#allocation2 + $0x10] sm:$0xf] }
  0xcc   : > { %15829 = vst [vmem:[#allocation15_spill] sm:$0xff] %v12264_v42  ;;  %v9086_v35 = vor.u32 %v10886_v34, %v9085_v50  ;;  %v2891_v42 = vpop.f32.mrf.mxu1  ;;  %v886_v50 = vrot.slane %v884_v20, 4 }
  0xcd   : > { %1263 = vst [vmem:[#allocation2 + $0x3e8] sm:$0xf] %v752_v22  ;;  %v11015_v36 = vld [vmem:[#allocation2 + $0x43c] sm:$0xf]  ;;  %v879_v22 = vrot.slane %v877_v23, 4 }
  0xce   : > { %799 = vst [vmem:[#allocation2 + $0x1fc] sm:$0xf] %v550_v25  ;;  %v9611_v37 = vld [vmem:[#allocation2 + $0x45c] sm:$0xf0]  ;;  %v2842_v45 = vpop.f32.mrf.mxu2 }
  0xcf   : > { %15832 = vst [vmem:[#allocation16_spill] sm:$0xff] %v15831_v48  ;;  %v9614_v28 = vor.u32 %v11015_v36, %v9611_v37  ;;  %v881_v24 = vsel %vm12270_vm5, %v879_v22, %v880_v9  ;;  %v2843_v8 = vadd.f32 %v12206_v7, %v2842_v45  ;;  %v888_v45 = vsel %vm12270_vm5, %v886_v50, %v887_v33  ;;  %v10881_v36 = vld [vmem:[#allocation2 + $0xc] sm:$0xf]  ;;  %v9079_v9 = vld [vmem:[#allocation2 + $0x2c] sm:$0xf0] }
  0xd0   : > { %800 = vst [vmem:[#allocation2 + $0x220] sm:$0xf] %v560_v10 }
  0xd1   : > { %1114 = vst [vmem:[#allocation2 + $0x1c0] sm:$0xf] %v550_v25  ;;  %2960 = vmatmul.bf16.gmra.mxu3 %v9614_v28  ;;  %v12293_v26 = vadd.f32 %v2931_v32, %v2843_v8  ;;  %v11078_v32 = vld [vmem:[%s15801_s1 + $0x1b0] sm:$0xff] }
  0xd2   : > { %1115 = vst [vmem:[#allocation2 + $0x1e4] sm:$0xf] %v560_v10  ;;  %3323 = vmatpush.bf16.msra.mxu2 %v11078_v32 }
  0xd3   : > { %1246 = vst [vmem:[#allocation2 + $0x184] sm:$0xf] %v550_v25  ;;  %v12287_v25 = vadd.f32 %v2891_v42, %v2803_v19  ;;  %v885_v42 = vsel %vm12270_vm5, %v9051_v39, %v884_v20  ;;  %v12303_v19 = vpop.f32.mrf.mxu3 }
  0xd4   : > { %1247 = vst [vmem:[#allocation2 + $0x1a8] sm:$0xf] %v560_v10  ;;  %v12290_v10 = vpop.f32.mrf.mxu0  ;;  %v12299_v1 = vpop.f32.mrf.mxu1 }
  0xd5   : > { %1012 = vst [vmem:[#allocation2 + $0x8] sm:$0xf] %v871_v46  ;;  %v10943_v23 = vld [vmem:[#allocation2 + $0x1fc] sm:$0xf]  ;;  %3152 = vmatmul.bf16.vlgmr.msrb.gmra.mxu0 %v9086_v35  ;;  %v9121_v35 = vld [vmem:[#allocation2 + $0x58] sm:$0xf] }
  0xd6   : > { %1013 = vst [vmem:[#allocation2 + $0x2c] sm:$0xf] %v874_v31  ;;  %v12301_v37 = vpop.f32.mrf.mxu2  ;;  %v9082_v31 = vor.u32 %v10881_v36, %v9079_v9 }
  0xd7   : > { %v9323_v34 = vld [vmem:[#allocation2 + $0x21c] sm:$0xf0]  ;;  %1146 = vst [vmem:[#allocation2 + $0x14] sm:$0xf] %v878_v49 }
  0xd8   : > { %v9326_v30 = vor.u32 %v10943_v23, %v9323_v34  ;;  %1147 = vst [vmem:[#allocation2 + $0x38] sm:$0xf] %v881_v24  ;;  %v11086_v23 = vld [vmem:[%s15801_s1 + $0x1f0] sm:$0xff] }
  0xd9   : > { %1014 = vst [vmem:[#allocation2 + $0x50] sm:$0xf] %v878_v49  ;;  %v10895_v49 = vld [vmem:[#allocation2 + $0x78] sm:$0xf0]  ;;  %v11094_v34 = vld [vmem:[%s15801_s1 + $0x230] sm:$0xff]  ;;  %3412 = vmatpush.bf16.msra.mxu3 %v11086_v23 }
  0xda   : > { %2920 = vmatmul.bf16.gmra.mxu1 %v9326_v30  ;;  %1015 = vst [vmem:[#allocation2 + $0x74] sm:$0xf] %v881_v24  ;;  %v9122_v8 = vor.u32 %v10895_v49, %v9121_v35  ;;  %v9052_v30 = vrot.slane %v11946_v47, 9  ;;  %3501 = vmatpush.bf16.msra.mxu0 %v11094_v34  ;;  %v9157_v23 = vld [vmem:[#allocation2 + $0xa0] sm:$0xf] }
  0xdb   : > { %1148 = vst [vmem:[#allocation2 + $0x5c] sm:$0xf] %v885_v42  ;;  %v2936_v36 = vpop.f32.mrf.mxu3 }
  0xdc   : > { %v9077_v59 = vld [vmem:[#allocation2 + $0x8] sm:$0xf]  ;;  %1149 = vst [vmem:[#allocation2 + $0x80] sm:$0xf] %v888_v45  ;;  %v2807_v46 = vpop.f32.mrf.mxu0  ;;  %v2896_v33 = vpop.f32.mrf.mxu1 }
  0xdd   : > { %v10885_v22 = vld [vmem:[#allocation2 + $0x28] sm:$0xf0]  ;;  %1280 = vst [vmem:[#allocation2 + $0x20] sm:$0xf] %v885_v42  ;;  %v2808_v39 = vadd.f32 %v12206_v7, %v2807_v46 }
  0xde   : > { %v9078_v28 = vor.u32 %v10885_v22, %v9077_v59  ;;  %1281 = vst [vmem:[#allocation2 + $0x44] sm:$0xf] %v888_v45  ;;  %v10882_v20 = vld [vmem:[#allocation2 + $0x14] sm:$0xf]  ;;  %v2847_v50 = vpop.f32.mrf.mxu2  ;;  %v894_v22 = vrot.slane %v11967_v21, 5 }
  0xdf   : > { %1016 = vst [vmem:[#allocation2 + $0x98] sm:$0xf] %v885_v42  ;;  %v9087_v24 = vld [vmem:[#allocation2 + $0x34] sm:$0xf0]  ;;  %v891_v42 = vrot.slane %v11949_v51, 5  ;;  %v2848_v59 = vadd.f32 %v12206_v7, %v2847_v50 }
  0xe0   : > { %2974 = vmatmul.bf16.vlgmr.msrb.gmra.mxu2 %v9078_v28  ;;  %1017 = vst [vmem:[#allocation2 + $0xbc] sm:$0xf] %v888_v45  ;;  %v12317_v45 = vadd.f32 %v2896_v33, %v2808_v39  ;;  %v9090_v9 = vor.u32 %v10882_v20, %v9087_v24  ;;  %v9113_v51 = vld [vmem:[#allocation2 + $0x50] sm:$0xf]  ;;  %v10890_v20 = vld [vmem:[#allocation2 + $0x54] sm:$0xf] }
  0xe1   : > { %3063 = vmatmul.bf16.vlgmr.msrb.gmra.mxu3 %v9082_v31  ;;  %v892_v28 = vsel %vm12270_vm5, %v9052_v30, %v891_v42  ;;  %v893_v46 = vrot.slane %v891_v42, 4  ;;  %v12323_v31 = vadd.f32 %v2936_v36, %v2848_v59  ;;  %v10894_v35 = vld [vmem:[#allocation2 + $0x70] sm:$0xf0]  ;;  %v9115_v24 = vld [vmem:[#allocation2 + $0x74] sm:$0xf0]  ;;  %v898_v59 = vrot.slane %v12006_v16, 5 }
  0xe2   : > { %1150 = vst [vmem:[#allocation2 + $0xa4] sm:$0xf] %v892_v28  ;;  %v9114_v21 = vor.u32 %v10894_v35, %v9113_v51  ;;  %v9118_v33 = vor.u32 %v10890_v20, %v9115_v24  ;;  %v10904_v50 = vld [vmem:[#allocation2 + $0xc0] sm:$0xf0]  ;;  %v10891_v34 = vld [vmem:[#allocation2 + $0x5c] sm:$0xf] }
  0xe3   : > { %v895_v47 = vsel %vm12270_vm5, %v893_v46, %v894_v22  ;;  %1018 = vst [vmem:[#allocation2 + $0xe0] sm:$0xf] %v892_v28  ;;  %v9123_v30 = vld [vmem:[#allocation2 + $0x7c] sm:$0xf0]  ;;  %v9158_v36 = vor.u32 %v10904_v50, %v9157_v23  ;;  %v901_v46 = vrot.slane %v12024_v54, 5  ;;  %v900_v51 = vrot.slane %v898_v59, 4 }
  0xe4   : > { %v12327_v49 = vpop.f32.mrf.mxu0  ;;  %1151 = vst [vmem:[#allocation2 + $0xc8] sm:$0xf] %v895_v47  ;;  %v12331_v32 = vpop.f32.mrf.mxu1  ;;  %v9126_v35 = vor.u32 %v10891_v34, %v9123_v30  ;;  %v10899_v34 = vld [vmem:[#allocation2 + $0x9c] sm:$0xf]  ;;  %v9151_v30 = vld [vmem:[#allocation2 + $0xbc] sm:$0xf0] }
  0xe5   : > { %3157 = vmatmul.bf16.gmra.mxu0 %v9122_v8  ;;  %1019 = vst [vmem:[#allocation2 + $0x104] sm:$0xf] %v895_v47  ;;  %v12333_v8 = vpop.f32.mrf.mxu3  ;;  %v902_v16 = vsel %vm12270_vm5, %v900_v51, %v901_v46 }
  0xe6   : > { %1282 = vst [vmem:[#allocation2 + $0x68] sm:$0xf] %v892_v28  ;;  %v12329_v39 = vpop.f32.mrf.mxu2  ;;  %v9053_v28 = vrot.slane %v12003_v13, 9  ;;  %v9149_v13 = vld [vmem:[#allocation2 + $0x98] sm:$0xf] }
  0xe7   : > { %1283 = vst [vmem:[#allocation2 + $0x8c] sm:$0xf] %v895_v47  ;;  %v10903_v54 = vld [vmem:[#allocation2 + $0xb8] sm:$0xf0] }
  0xe8   : > { %1153 = vst [vmem:[#allocation2 + $0x110] sm:$0xf] %v902_v16  ;;  %v9150_v50 = vor.u32 %v10903_v54, %v9149_v13 }
  0xe9   : > { %1021 = vst [vmem:[#allocation2 + $0x14c] sm:$0xf] %v902_v16 }
  0xea   : > { %3241 = vmatmul.bf16.vlgmr.msrb.gmra.mxu1 %v9090_v9  ;;  %1285 = vst [vmem:[#allocation2 + $0xd4] sm:$0xf] %v902_v16  ;;  %v908_v16 = vrot.slane %v12081_v41, 5  ;;  %v9185_v41 = vld [vmem:[#allocation2 + $0xe0] sm:$0xf] }
  0xeb   : > { %v9159_v46 = vld [vmem:[#allocation2 + $0xc4] sm:$0xf0] }
  0xec   : > { %v2812_v42 = vpop.f32.mrf.mxu0  ;;  %v2901_v20 = vpop.f32.mrf.mxu1 }
  0xed   : > { %v2813_v22 = vadd.f32 %v12206_v7, %v2812_v42  ;;  %v2941_v24 = vpop.f32.mrf.mxu3 }
  0xee   : > { %v2852_v9 = vpop.f32.mrf.mxu2 }
  0xef   : > { %v2853_v47 = vadd.f32 %v12206_v7, %v2852_v9  ;;  %v10913_v9 = vld [vmem:[#allocation2 + $0x108] sm:$0xf0] }
  0xf0   : > { %2979 = vmatmul.bf16.gmra.mxu2 %v9114_v21  ;;  %v899_v21 = vsel %vm12270_vm5, %v9053_v28, %v898_v59  ;;  %v10900_v28 = vld [vmem:[#allocation2 + $0xa4] sm:$0xf] }
  0xf1   : > { %3068 = vmatmul.bf16.gmra.mxu3 %v9118_v33  ;;  %1152 = vst [vmem:[#allocation2 + $0xec] sm:$0xf] %v899_v21  ;;  %v12344_v33 = vadd.f32 %v2901_v20, %v2813_v22  ;;  %v12346_v23 = vadd.f32 %v2941_v24, %v2853_v47  ;;  %v9193_v22 = vld [vmem:[#allocation2 + $0xe8] sm:$0xf]  ;;  %v905_v47 = vrot.slane %v12063_v63, 5  ;;  %v9054_v24 = vrot.slane %v12060_v57, 9 }
  0xf2   : > { %1020 = vst [vmem:[#allocation2 + $0x128] sm:$0xf] %v899_v21  ;;  %v9194_v51 = vor.u32 %v10913_v9, %v9193_v22  ;;  %v11093_v20 = vld [vmem:[%s15801_s1 + $0x228] sm:$0xff] }
  0xf3   : > { %1284 = vst [vmem:[#allocation2 + $0xb0] sm:$0xf] %v899_v21  ;;  %v11085_v21 = vld [vmem:[%s15801_s1 + $0x1e8] sm:$0xff]  ;;  %v907_v54 = vrot.slane %v905_v47, 4  ;;  %3502 = vmatpush.bf16.msra.mxu0 %v11093_v20 }
  0xf4   : > { %v12348_v42 = vpop.f32.mrf.mxu0  ;;  %v12364_v13 = vpop.f32.mrf.mxu1  ;;  %3413 = vmatpush.bf16.msra.mxu3 %v11085_v21 }
  0xf5   : > { %3162 = vmatmul.bf16.gmra.mxu0 %v9158_v36  ;;  %v9154_v36 = vor.u32 %v10899_v34, %v9151_v30  ;;  %v12366_v63 = vpop.f32.mrf.mxu3  ;;  %v906_v34 = vsel %vm12270_vm5, %v9054_v24, %v905_v47  ;;  %v909_v30 = vsel %vm12270_vm5, %v907_v54, %v908_v16  ;;  %v10908_v47 = vld [vmem:[#allocation2 + $0xe4] sm:$0xf]  ;;  %v9229_v54 = vld [vmem:[#allocation2 + $0x130] sm:$0xf] }
  0xf6   : > { %v12350_v59 = vpop.f32.mrf.mxu2  ;;  %15833 = vst [vmem:[#allocation17_spill] sm:$0xff] %v12366_v63 }
  0xf7   : > { %1154 = vst [vmem:[#allocation2 + $0x134] sm:$0xf] %v906_v34 }
  0xf8   : > { %1155 = vst [vmem:[#allocation2 + $0x158] sm:$0xf] %v909_v30 }
  0xf9   : > { %1022 = vst [vmem:[#allocation2 + $0x170] sm:$0xf] %v906_v34 }
  0xfa   : > { %3246 = vmatmul.bf16.gmra.mxu1 %v9126_v35  ;;  %v11077_v35 = vld [vmem:[%s15801_s1 + $0x1a8] sm:$0xff]  ;;  %1023 = vst [vmem:[#allocation2 + $0x194] sm:$0xf] %v909_v30 }
  0xfb   : > { %3324 = vmatpush.bf16.msra.mxu2 %v11077_v35  ;;  %1286 = vst [vmem:[#allocation2 + $0xf8] sm:$0xf] %v906_v34  ;;  %v9187_v35 = vld [vmem:[#allocation2 + $0x104] sm:$0xf0]  ;;  %v10909_v34 = vld [vmem:[#allocation2 + $0xec] sm:$0xf] }
  0xfc   : > { %v2817_v57 = vpop.f32.mrf.mxu0  ;;  %1287 = vst [vmem:[#allocation2 + $0x11c] sm:$0xf] %v909_v30 }
  0xff   : > { %v2857_v22 = vpop.f32.mrf.mxu2 }
 0x100   : > { %2984 = vmatmul.bf16.gmra.mxu2 %v9150_v50  ;;  %v9162_v50 = vor.u32 %v10900_v28, %v9159_v46  ;;  %v2818_v28 = vadd.f32 %v12206_v7, %v2817_v57  ;;  %v2858_v46 = vadd.f32 %v12206_v7, %v2857_v22  ;;  %v912_v57 = vrot.slane %v12120_v4, 5  ;;  %v9221_v4 = vld [vmem:[#allocation2 + $0x128] sm:$0xf] }
 0x101   : > { %3073 = vmatmul.bf16.gmra.mxu3 %v9154_v36  ;;  %v10912_v36 = vld [vmem:[#allocation2 + $0x100] sm:$0xf0]  ;;  %v915_v22 = vrot.slane %v12141_v2, 5 }
 0x102   : > { %v9186_v9 = vor.u32 %v10912_v36, %v9185_v41  ;;  %v9195_v41 = vld [vmem:[#allocation2 + $0x10c] sm:$0xf0]  ;;  %v9055_v36 = vrot.slane %v12117_v62, 9 }
 0x104   : > { %v12378_v63 = vpop.f32.mrf.mxu0 }
 0x105   : > { %3167 = vmatmul.bf16.gmra.mxu0 %v9194_v51  ;;  %v2946_v20 = vpop.f32.mrf.mxu3  ;;  %v9190_v51 = vor.u32 %v10908_v47, %v9187_v35  ;;  %v9198_v47 = vor.u32 %v10909_v34, %v9195_v41  ;;  %v9265_v41 = vld [vmem:[#allocation2 + $0x178] sm:$0xf] }
 0x106   : > { %v12376_v16 = vadd.f32 %v2946_v20, %v2858_v46  ;;  %v10917_v20 = vld [vmem:[#allocation2 + $0x12c] sm:$0xf] }
 0x107   : > { %v2906_v21 = vpop.f32.mrf.mxu1  ;;  %v12385_v46 = vpop.f32.mrf.mxu2 }
 0x108   : > { %v12374_v24 = vadd.f32 %v2906_v21, %v2818_v28  ;;  %v913_v28 = vsel %vm12270_vm5, %v9055_v36, %v912_v57  ;;  %15834 = vst [vmem:[#allocation18_spill] sm:$0xff] %v12385_v46  ;;  %v10921_v21 = vld [vmem:[#allocation2 + $0x148] sm:$0xf0]  ;;  %v10918_v36 = vld [vmem:[#allocation2 + $0x134] sm:$0xf] }
 0x109   : > { %1156 = vst [vmem:[#allocation2 + $0x17c] sm:$0xf] %v913_v28  ;;  %v9222_v62 = vor.u32 %v10921_v21, %v9221_v4  ;;  %v11076_v4 = vld [vmem:[%s15801_s1 + $0x1a0] sm:$0xff] }
 0x10a   : > { %3251 = vmatmul.bf16.gmra.mxu1 %v9162_v50  ;;  %v10922_v50 = vld [vmem:[#allocation2 + $0x150] sm:$0xf0]  ;;  %1024 = vst [vmem:[#allocation2 + $0x1b8] sm:$0xf] %v913_v28  ;;  %v11084_v21 = vld [vmem:[%s15801_s1 + $0x1e0] sm:$0xff]  ;;  %3325 = vmatpush.bf16.msra.mxu2 %v11076_v4 }
 0x10b   : > { %v9230_v30 = vor.u32 %v10922_v50, %v9229_v54  ;;  %1288 = vst [vmem:[#allocation2 + $0x140] sm:$0xf] %v913_v28  ;;  %3414 = vmatpush.bf16.msra.mxu3 %v11084_v21  ;;  %v10926_v4 = vld [vmem:[#allocation2 + $0x174] sm:$0xf] }
 0x10d   : > { %v12391_v50 = vpop.f32.mrf.mxu3 }
 0x10e   : > { %v2822_v2 = vpop.f32.mrf.mxu0  ;;  %15835 = vst [vmem:[#allocation19_spill] sm:$0xff] %v12391_v50 }
 0x10f   : > { %v12389_v54 = vpop.f32.mrf.mxu1 }
 0x110   : > { %2989 = vmatmul.bf16.gmra.mxu2 %v9186_v9  ;;  %v914_v9 = vrot.slane %v912_v57, 4  ;;  %v10931_v57 = vld [vmem:[#allocation2 + $0x198] sm:$0xf0] }
 0x111   : > { %3078 = vmatmul.bf16.gmra.mxu3 %v9190_v51  ;;  %v9223_v51 = vld [vmem:[#allocation2 + $0x14c] sm:$0xf0]  ;;  %v9266_v28 = vor.u32 %v10931_v57, %v9265_v41 }
 0x112   : > { %v916_v35 = vsel %vm12270_vm5, %v914_v9, %v915_v22  ;;  %v9226_v34 = vor.u32 %v10917_v20, %v9223_v51  ;;  %v9231_v22 = vld [vmem:[#allocation2 + $0x154] sm:$0xf0]  ;;  %v919_v9 = vrot.slane %v12183_v44, 5  ;;  %v922_v51 = vrot.slane %v12215_v6, 5  ;;  %v11092_v6 = vld [vmem:[%s15801_s1 + $0x220] sm:$0xff] }
 0x113   : > { %1157 = vst [vmem:[#allocation2 + $0x1a0] sm:$0xf] %v916_v35  ;;  %v9234_v44 = vor.u32 %v10918_v36, %v9231_v22  ;;  %v9257_v36 = vld [vmem:[#allocation2 + $0x170] sm:$0xf]  ;;  %v10930_v22 = vld [vmem:[#allocation2 + $0x190] sm:$0xf0]  ;;  %3503 = vmatpush.bf16.msra.mxu0 %v11092_v6 }
 0x114   : > { %1025 = vst [vmem:[#allocation2 + $0x1dc] sm:$0xf] %v916_v35  ;;  %v921_v20 = vrot.slane %v919_v9, 4 }
 0x115   : > { %3172 = vmatmul.bf16.gmra.mxu0 %v9230_v30  ;;  %1289 = vst [vmem:[#allocation2 + $0x164] sm:$0xf] %v916_v35 }
 0x11a   : > { %3256 = vmatmul.bf16.gmra.mxu1 %v9198_v47  ;;  %v2862_v30 = vpop.f32.mrf.mxu2  ;;  %v2823_v47 = vadd.f32 %v12206_v7, %v2822_v2 }
 0x11b   : > { %v2863_v35 = vadd.f32 %v12206_v7, %v2862_v30  ;;  %v923_v30 = vsel %vm12270_vm5, %v921_v20, %v922_v51  ;;  %v10940_v20 = vld [vmem:[#allocation2 + $0x1e0] sm:$0xf0]  ;;  %v10927_v51 = vld [vmem:[#allocation2 + $0x17c] sm:$0xf] }
 0x11c   : > { %1159 = vst [vmem:[#allocation2 + $0x1e8] sm:$0xf] %v923_v30 }
 0x11d   : > { %1027 = vst [vmem:[#allocation2 + $0x224] sm:$0xf] %v923_v30 }
 0x11e   : > { %1291 = vst [vmem:[#allocation2 + $0x1ac] sm:$0xf] %v923_v30 }
 0x120   : > { %2994 = vmatmul.bf16.gmra.mxu2 %v9222_v62  ;;  %v9056_v62 = vrot.slane %v12180_v38, 9  ;;  %v2951_v41 = vpop.f32.mrf.mxu3 }
 0x121   : > { %3083 = vmatmul.bf16.gmra.mxu3 %v9226_v34  ;;  %v12404_v34 = vpop.f32.mrf.mxu0  ;;  %v12412_v38 = vadd.f32 %v2951_v41, %v2863_v35  ;;  %v926_v41 = vrot.slane %v11737_v17, 5  ;;  %v9293_v17 = vld [vmem:[#allocation2 + $0x1b8] sm:$0xf] }
 0x122   : > { %v2911_v2 = vpop.f32.mrf.mxu1  ;;  %v920_v57 = vsel %vm12270_vm5, %v9056_v62, %v919_v9  ;;  %v9258_v9 = vor.u32 %v10930_v22, %v9257_v36  ;;  %v9301_v62 = vld [vmem:[#allocation2 + $0x1c0] sm:$0xf]  ;;  %v929_v22 = vrot.slane %v11739_v18, 5 }
 0x123   : > { %v12410_v50 = vadd.f32 %v2911_v2, %v2823_v47  ;;  %15836 = vst [vmem:[#allocation20_spill] sm:$0xff] %v12412_v38  ;;  %v12417_v47 = vpop.f32.mrf.mxu2  ;;  %v9267_v2 = vld [vmem:[#allocation2 + $0x19c] sm:$0xf0]  ;;  %v928_v30 = vrot.slane %v926_v41, 4  ;;  %v10949_v38 = vld [vmem:[#allocation2 + $0x228] sm:$0xf0] }
 0x124   : > { %1158 = vst [vmem:[#allocation2 + $0x1c4] sm:$0xf] %v920_v57 }
 0x125   : > { %3177 = vmatmul.bf16.gmra.mxu0 %v9266_v28  ;;  %1026 = vst [vmem:[#allocation2 + $0x200] sm:$0xf] %v920_v57  ;;  %v9259_v28 = vld [vmem:[#allocation2 + $0x194] sm:$0xf0] }
 0x126   : > { %1290 = vst [vmem:[#allocation2 + $0x188] sm:$0xf] %v920_v57  ;;  %v9262_v35 = vor.u32 %v10926_v4, %v9259_v28  ;;  %v9057_v57 = vrot.slane %v11727_v12, 9  ;;  %v930_v28 = vsel %vm12270_vm5, %v928_v30, %v929_v22 }
 0x127   : > { %15837 = vst [vmem:[#allocation21_spill] sm:$0xff] %v12417_v47  ;;  %v9337_v47 = vld [vmem:[#allocation2 + $0x208] sm:$0xf] }
 0x128   : > { %v12422_v36 = vpop.f32.mrf.mxu3  ;;  %v927_v4 = vsel %vm12270_vm5, %v9057_v57, %v926_v41  ;;  %1161 = vst [vmem:[#allocation2 + $0x230] sm:$0xf] %v930_v28  ;;  %v9295_v41 = vld [vmem:[#allocation2 + $0x1dc] sm:$0xf0] }
 0x129   : > { %v2827_v21 = vpop.f32.mrf.mxu0  ;;  %15838 = vst [vmem:[#allocation22_spill] sm:$0xff] %v12422_v36 }
 0x12a   : > { %3261 = vmatmul.bf16.gmra.mxu1 %v9234_v44  ;;  %v9302_v44 = vor.u32 %v10940_v20, %v9301_v62  ;;  %v12420_v6 = vpop.f32.mrf.mxu1  ;;  %1160 = vst [vmem:[#allocation2 + $0x20c] sm:$0xf] %v927_v4  ;;  %v2828_v12 = vadd.f32 %v12206_v7, %v2827_v21  ;;  %v9303_v21 = vld [vmem:[#allocation2 + $0x1e4] sm:$0xf0] }
 0x12b   : > { %1028 = vst [vmem:[#allocation2 + $0x248] sm:$0xf] %v927_v4  ;;  %v10936_v46 = vld [vmem:[#allocation2 + $0x1c4] sm:$0xf] }
 0x12c   : > { %1029 = vst [vmem:[#allocation2 + $0x26c] sm:$0xf] %v930_v28 }
 0x12d   : > { %1292 = vst [vmem:[#allocation2 + $0x1d0] sm:$0xf] %v927_v4 }
 0x12e   : > { %1293 = vst [vmem:[#allocation2 + $0x1f4] sm:$0xf] %v930_v28  ;;  %v11075_v28 = vld [vmem:[%s15801_s1 + $0x198] sm:$0xff] }
 0x12f   : > { %3326 = vmatpush.bf16.msra.mxu2 %v11075_v28  ;;  %v9373_v28 = vld [vmem:[#allocation2 + $0x250] sm:$0xf] }
 0x130   : > { %2999 = vmatmul.bf16.gmra.mxu2 %v9258_v9  ;;  %v9270_v9 = vor.u32 %v10927_v51, %v9267_v2  ;;  %v10935_v2 = vld [vmem:[#allocation2 + $0x1bc] sm:$0xf] }
 0x131   : > { %3088 = vmatmul.bf16.gmra.mxu3 %v9262_v35  ;;  %v10939_v35 = vld [vmem:[#allocation2 + $0x1d8] sm:$0xf0]  ;;  %v12430_v20 = vpop.f32.mrf.mxu0  ;;  %v9298_v30 = vor.u32 %v10935_v2, %v9295_v41  ;;  %v936_v2 = vrot.slane %v11813_v11, 5  ;;  %v9306_v41 = vor.u32 %v10936_v46, %v9303_v21  ;;  %v9331_v21 = vld [vmem:[#allocation2 + $0x224] sm:$0xf0] }
 0x132   : > { %v9294_v18 = vor.u32 %v10939_v35, %v9293_v17  ;;  %v933_v17 = vrot.slane %v11783_v53, 5  ;;  %v9338_v35 = vor.u32 %v10949_v38, %v9337_v47  ;;  %v11091_v11 = vld [vmem:[%s15801_s1 + $0x218] sm:$0xff] }
 0x133   : > { %3504 = vmatpush.bf16.msra.mxu0 %v11091_v11 }
 0x135   : > { %3182 = vmatmul.bf16.gmra.mxu0 %v9302_v44  ;;  %v2867_v62 = vpop.f32.mrf.mxu2 }
 0x136   : > { %v2868_v51 = vadd.f32 %v12206_v7, %v2867_v62  ;;  %v11083_v62 = vld [vmem:[%s15801_s1 + $0x1d8] sm:$0xff] }
 0x137   : > { %3415 = vmatpush.bf16.msra.mxu3 %v11083_v62  ;;  %v10958_v62 = vld [vmem:[#allocation2 + $0x270] sm:$0xf0] }
 0x13a   : > { %3266 = vmatmul.bf16.gmra.mxu1 %v9270_v9 }
 0x13b   : > { %v2916_v44 = vpop.f32.mrf.mxu1  ;;  %v2956_v57 = vpop.f32.mrf.mxu3 }
 0x13c   : > { %v12434_v22 = vadd.f32 %v2916_v44, %v2828_v12  ;;  %v12436_v9 = vadd.f32 %v2956_v57, %v2868_v51  ;;  %v935_v51 = vrot.slane %v933_v17, 4  ;;  %v9329_v44 = vld [vmem:[#allocation2 + $0x200] sm:$0xf]  ;;  %v10948_v57 = vld [vmem:[#allocation2 + $0x220] sm:$0xf0] }
 0x13d   : > { %v2869_v36 = vpop.f32.mrf.mxu2 }
 0x13e   : > { %v2870_v4 = vadd.f32 %v12206_v7, %v2869_v36  ;;  %v937_v47 = vsel %vm12270_vm5, %v935_v51, %v936_v2  ;;  %v9339_v51 = vld [vmem:[#allocation2 + $0x22c] sm:$0xf0]  ;;  %v940_v2 = vrot.slane %v11864_v0, 5 }
 0x13f   : > { %1163 = vst [vmem:[#allocation2 + $0x278] sm:$0xf] %v937_v47 }
 0x140   : > { %3004 = vmatmul.bf16.gmra.mxu2 %v9294_v18  ;;  %v9058_v18 = vrot.slane %v11781_v52, 9  ;;  %1031 = vst [vmem:[#allocation2 + $0x2b4] sm:$0xf] %v937_v47  ;;  %v9330_v52 = vor.u32 %v10948_v57, %v9329_v44  ;;  %v942_v57 = vrot.slane %v940_v2, 4 }
 0x141   : > { %3093 = vmatmul.bf16.gmra.mxu3 %v9298_v30  ;;  %v10944_v30 = vld [vmem:[#allocation2 + $0x204] sm:$0xf]  ;;  %1295 = vst [vmem:[#allocation2 + $0x23c] sm:$0xf] %v937_v47  ;;  %v9059_v47 = vrot.slane %v11858_v61, 9 }
 0x142   : > { %v2832_v12 = vpop.f32.mrf.mxu0  ;;  %v934_v38 = vsel %vm12270_vm5, %v9058_v18, %v933_v17  ;;  %v10945_v18 = vld [vmem:[#allocation2 + $0x20c] sm:$0xf]  ;;  %v9365_v61 = vld [vmem:[#allocation2 + $0x248] sm:$0xf] }
 0x143   : > { %v2958_v53 = vpop.f32.mrf.mxu3  ;;  %1162 = vst [vmem:[#allocation2 + $0x254] sm:$0xf] %v934_v38  ;;  %v12457_v46 = vpop.f32.mrf.mxu1  ;;  %v9342_v11 = vor.u32 %v10945_v18, %v9339_v51  ;;  %v10953_v51 = vld [vmem:[#allocation2 + $0x24c] sm:$0xf] }
 0x144   : > { %v12452_v36 = vadd.f32 %v2958_v53, %v2870_v4  ;;  %1030 = vst [vmem:[#allocation2 + $0x290] sm:$0xf] %v934_v38  ;;  %v9334_v4 = vor.u32 %v10944_v30, %v9331_v21 }
 0x145   : > { %3187 = vmatmul.bf16.gmra.mxu0 %v9338_v35  ;;  %1294 = vst [vmem:[#allocation2 + $0x218] sm:$0xf] %v934_v38  ;;  %v9374_v38 = vor.u32 %v10958_v62, %v9373_v28  ;;  %v10957_v28 = vld [vmem:[#allocation2 + $0x268] sm:$0xf0] }
 0x146   : > { %15839 = vst [vmem:[#allocation23_spill] sm:$0xff] %v12452_v36  ;;  %v941_v36 = vsel %vm12270_vm5, %v9059_v47, %v940_v2  ;;  %v9366_v18 = vor.u32 %v10957_v28, %v9365_v61  ;;  %v9367_v2 = vld [vmem:[#allocation2 + $0x26c] sm:$0xf0] }
 0x147   : > { %1164 = vst [vmem:[#allocation2 + $0x29c] sm:$0xf] %v941_v36  ;;  %v11082_v28 = vld [vmem:[%s15801_s1 + $0x1d0] sm:$0xff] }
 0x148   : > { %1032 = vst [vmem:[#allocation2 + $0x2d8] sm:$0xf] %v941_v36  ;;  %3416 = vmatpush.bf16.msra.mxu3 %v11082_v28 }
 0x149   : > { %1296 = vst [vmem:[#allocation2 + $0x260] sm:$0xf] %v941_v36 }
 0x14a   : > { %3271 = vmatmul.bf16.gmra.mxu1 %v9306_v41  ;;  %v2834_v17 = vpop.f32.mrf.mxu0  ;;  %v2833_v41 = vadd.f32 %v12206_v7, %v2832_v12 }
 0x14e   : > { %v2872_v35 = vpop.f32.mrf.mxu2 }
 0x14f   : > { %v2873_v53 = vadd.f32 %v12206_v7, %v2872_v35 }
 0x150   : > { %3009 = vmatmul.bf16.gmra.mxu2 %v9330_v52  ;;  %v943_v52 = vrot.slane %v11897_v40, 5  ;;  %v2835_v40 = vadd.f32 %v12206_v7, %v2834_v17  ;;  %v10954_v17 = vld [vmem:[#allocation2 + $0x254] sm:$0xf] }
 0x151   : > { %3098 = vmatmul.bf16.gmra.mxu3 %v9334_v4 }
 0x152   : > { %v12462_v44 = vpop.f32.mrf.mxu0  ;;  %v944_v0 = vsel %vm12270_vm5, %v942_v57, %v943_v52  ;;  %v9370_v52 = vor.u32 %v10953_v51, %v9367_v2  ;;  %v950_v51 = vrot.slane %v11954_v58, 5 }
 0x153   : > { %1165 = vst [vmem:[#allocation2 + $0x2c0] sm:$0xf] %v944_v0 }
 0x154   : > { %v2961_v21 = vpop.f32.mrf.mxu3  ;;  %1033 = vst [vmem:[#allocation2 + $0x2fc] sm:$0xf] %v944_v0 }
 0x155   : > { %v12472_v4 = vadd.f32 %v2961_v21, %v2873_v53  ;;  %3192 = vmatmul.bf16.gmra.mxu0 %v9374_v38  ;;  %1297 = vst [vmem:[#allocation2 + $0x284] sm:$0xf] %v944_v0  ;;  %v11074_v0 = vld [vmem:[%s15801_s1 + $0x190] sm:$0xff] }
 0x156   : > { %v2874_v35 = vpop.f32.mrf.mxu2  ;;  %3327 = vmatpush.bf16.msra.mxu2 %v11074_v0 }
 0x157   : > { %v2921_v30 = vpop.f32.mrf.mxu1  ;;  %15840 = vst [vmem:[#allocation24_spill] sm:$0xff] %v12472_v4  ;;  %v2875_v62 = vadd.f32 %v12206_v7, %v2874_v35  ;;  %v9375_v4 = vld [vmem:[#allocation2 + $0x274] sm:$0xf0]  ;;  %v947_v35 = vrot.slane %v11928_v29, 5  ;;  %v2800_v29 = vadd.f32 %v12206_v7, %v12235_v14 }
 0x158   : > { %v12470_v12 = vadd.f32 %v2921_v30, %v2833_v41  ;;  %v10967_v30 = vld [vmem:[#allocation2 + $0x2b8] sm:$0xf0] }
 0x159   : > { %v2889_v58 = vadd.f32 %v12258_v3, %v2800_v29 }
 0x15a   : > { %3276 = vmatmul.bf16.gmra.mxu1 %v9342_v11  ;;  %v3155_v41 = vpop.f32.mrf.mxu0  ;;  %v9409_v11 = vld [vmem:[#allocation2 + $0x298] sm:$0xf] }
 0x15b   : > { %v9410_v61 = vor.u32 %v10967_v30, %v9409_v11  ;;  %v10966_v30 = vld [vmem:[#allocation2 + $0x2b0] sm:$0xf0] }
 0x15c   : > { %v2963_v38 = vpop.f32.mrf.mxu3 }
 0x15d   : > { %v12478_v57 = vadd.f32 %v2963_v38, %v2875_v62  ;;  %v9060_v62 = vrot.slane %v11926_v27, 9  ;;  %v9401_v27 = vld [vmem:[#allocation2 + $0x290] sm:$0xf] }
 0x15f   : > { %v2923_v53 = vpop.f32.mrf.mxu1  ;;  %v948_v38 = vsel %vm12270_vm5, %v9060_v62, %v947_v35 }
 0x160   : > { %v12476_v47 = vadd.f32 %v2923_v53, %v2835_v40  ;;  %3014 = vmatmul.bf16.gmra.mxu2 %v9366_v18  ;;  %v949_v18 = vrot.slane %v947_v35, 4  ;;  %1166 = vst [vmem:[#allocation2 + $0x2e4] sm:$0xf] %v948_v38  ;;  %v11090_v35 = vld [vmem:[%s15801_s1 + $0x210] sm:$0xff] }
 0x161   : > { %3103 = vmatmul.bf16.gmra.mxu3 %v9370_v52  ;;  %1034 = vst [vmem:[#allocation2 + $0x320] sm:$0xf] %v948_v38  ;;  %3505 = vmatpush.bf16.msra.mxu0 %v11090_v35 }
 0x162   : > { %v12488_v40 = vpop.f32.mrf.mxu0  ;;  %v951_v52 = vsel %vm12270_vm5, %v949_v18, %v950_v51  ;;  %1298 = vst [vmem:[#allocation2 + $0x2a8] sm:$0xf] %v948_v38  ;;  %v9445_v18 = vld [vmem:[#allocation2 + $0x2e0] sm:$0xf]  ;;  %v10976_v51 = vld [vmem:[#allocation2 + $0x300] sm:$0xf0] }
 0x163   : > { %v2975_v21 = vpop.f32.mrf.mxu2  ;;  %1167 = vst [vmem:[#allocation2 + $0x308] sm:$0xf] %v951_v52 }
 0x164   : > { %v2976_v36 = vadd.f32 %v2975_v21, %v12229_v56  ;;  %v9378_v56 = vor.u32 %v10954_v17, %v9375_v4  ;;  %v3064_v2 = vpop.f32.mrf.mxu3  ;;  %1035 = vst [vmem:[#allocation2 + $0x344] sm:$0xf] %v951_v52  ;;  %v9402_v17 = vor.u32 %v10966_v30, %v9401_v27 }
 0x165   : > { %3197 = vmatmul.bf16.gmra.mxu0 %v9410_v61  ;;  %v9403_v61 = vld [vmem:[#allocation2 + $0x2b4] sm:$0xf0]  ;;  %1299 = vst [vmem:[#allocation2 + $0x2cc] sm:$0xf] %v951_v52  ;;  %v9446_v52 = vor.u32 %v10976_v51, %v9445_v18 }
 0x166   : > { %v3065_v11 = vadd.f32 %v3064_v2, %v2976_v36  ;;  %v10962_v36 = vld [vmem:[#allocation2 + $0x294] sm:$0xf]  ;;  %v10963_v2 = vld [vmem:[#allocation2 + $0x29c] sm:$0xf] }
 0x167   : > { %v3242_v53 = vpop.f32.mrf.mxu1  ;;  %v9406_v62 = vor.u32 %v10962_v36, %v9403_v61 }
 0x168   : > { %v3154_v7 = vadd.f32 %v12462_v44, %v3065_v11  ;;  %v954_v11 = vrot.slane %v11985_v55, 5 }
 0x16a   : > { %3281 = vmatmul.bf16.gmra.mxu1 %v9378_v56  ;;  %v12500_v4 = vadd.f32 %v3242_v53, %v3154_v7  ;;  %v3160_v0 = vpop.f32.mrf.mxu0  ;;  %v9411_v53 = vld [vmem:[#allocation2 + $0x2bc] sm:$0xf0] }
 0x16b   : > { %v2977_v14 = vpop.f32.mrf.mxu2  ;;  %v9414_v35 = vor.u32 %v10963_v2, %v9411_v53  ;;  %v10971_v53 = vld [vmem:[#allocation2 + $0x2dc] sm:$0xf] }
 0x16c   : > { %v2978_v21 = vadd.f32 %v2977_v14, %v2889_v58  ;;  %v3066_v3 = vpop.f32.mrf.mxu3  ;;  %v15841_v58 = vld [vmem:[#allocation5_spill] sm:$0xff]  ;;  %v956_v14 = vrot.slane %v954_v11, 4 }
 0x16d   : > { %v9061_v7 = vrot.slane %v15841_v58, 9 }
 0x16e   : > { %v3067_v28 = vadd.f32 %v3066_v3, %v2978_v21  ;;  %v15842_v21 = vld [vmem:[#allocation6_spill] sm:$0xff] }
 0x16f   : > { %v3244_v44 = vpop.f32.mrf.mxu1 }
 0x170   : > { %3019 = vmatmul.bf16.gmra.mxu2 %v9402_v17  ;;  %v3156_v29 = vadd.f32 %v3155_v41, %v3067_v28  ;;  %v957_v17 = vrot.slane %v15842_v21, 5  ;;  %v12516_v41 = vld [vmem:[%s15802_s2] ss:$0 sm:$0xff]  ;;  %v9437_v28 = vld [vmem:[#allocation2 + $0x2d8] sm:$0xf] }
 0x171   : > { %3108 = vmatmul.bf16.gmra.mxu3 %v9406_v62  ;;  %v2805_v55 = vadd.f32 %v12516_v41, %v12290_v10  ;;  %v10975_v62 = vld [vmem:[#allocation2 + $0x2f8] sm:$0xf0]  ;;  %v10985_v21 = vld [vmem:[#allocation2 + $0x348] sm:$0xf0] }
 0x172   : > { %v12506_v38 = vadd.f32 %v3244_v44, %v3156_v29  ;;  %v12509_v30 = vpop.f32.mrf.mxu0  ;;  %v958_v3 = vsel %vm12270_vm5, %v956_v14, %v957_v17  ;;  %v9438_v2 = vor.u32 %v10975_v62, %v9437_v28  ;;  %v9481_v14 = vld [vmem:[#allocation2 + $0x328] sm:$0xf] }
 0x173   : > { %v2980_v56 = vpop.f32.mrf.mxu2  ;;  %1169 = vst [vmem:[#allocation2 + $0x350] sm:$0xf] %v958_v3  ;;  %v2894_v18 = vadd.f32 %v12299_v1, %v2805_v55  ;;  %v9482_v28 = vor.u32 %v10985_v21, %v9481_v14  ;;  %v11073_v62 = vld [vmem:[%s15801_s1 + $0x188] sm:$0xff]  ;;  %v9473_v14 = vld [vmem:[#allocation2 + $0x320] sm:$0xf] }
 0x174   : > { %v2981_v27 = vadd.f32 %v2980_v56, %v12287_v25  ;;  %v3069_v36 = vpop.f32.mrf.mxu3  ;;  %v955_v25 = vsel %vm12270_vm5, %v9061_v7, %v954_v11  ;;  %1037 = vst [vmem:[#allocation2 + $0x38c] sm:$0xf] %v958_v3  ;;  %v9439_v11 = vld [vmem:[#allocation2 + $0x2fc] sm:$0xf0]  ;;  %3328 = vmatpush.bf16.msra.mxu2 %v11073_v62  ;;  %v10984_v21 = vld [vmem:[#allocation2 + $0x340] sm:$0xf0] }
 0x175   : > { %3202 = vmatmul.bf16.gmra.mxu0 %v9446_v52  ;;  %1168 = vst [vmem:[#allocation2 + $0x32c] sm:$0xf] %v955_v25  ;;  %v9442_v1 = vor.u32 %v10971_v53, %v9439_v11  ;;  %v2810_v11 = vadd.f32 %v12516_v41, %v12327_v49 }
 0x176   : > { %v3070_v44 = vadd.f32 %v3069_v36, %v2981_v27  ;;  %1036 = vst [vmem:[#allocation2 + $0x368] sm:$0xf] %v955_v25  ;;  %v9447_v36 = vld [vmem:[#allocation2 + $0x304] sm:$0xf0] }
 0x177   : > { %v3247_v61 = vpop.f32.mrf.mxu1  ;;  %1300 = vst [vmem:[#allocation2 + $0x2f0] sm:$0xf] %v955_v25 }
 0x178   : > { %v3159_v51 = vadd.f32 %v12488_v40, %v3070_v44  ;;  %1301 = vst [vmem:[#allocation2 + $0x314] sm:$0xf] %v958_v3  ;;  %v11247_v40 = vld [vmem:[%s15803_s3 + $0x38] sm:$0xff] }
 0x179   : > { %7320 = vmatpush.bf16.msra.mxu1 %v11247_v40 }
 0x17a   : > { %3286 = vmatmul.bf16.gmra.mxu1 %v9414_v35  ;;  %v12526_v29 = vadd.f32 %v3247_v61, %v3159_v51  ;;  %v12528_v27 = vpop.f32.mrf.mxu0  ;;  %v10972_v35 = vld [vmem:[#allocation2 + $0x2e4] sm:$0xf]  ;;  %v15843_v61 = vld [vmem:[#allocation8_spill] sm:$0xff]  ;;  %v15844_v51 = vld [vmem:[#allocation7_spill] sm:$0xff] }
 0x17b   : > { %v2982_v10 = vpop.f32.mrf.mxu2  ;;  %v961_v25 = vrot.slane %v15843_v61, 5  ;;  %v9474_v61 = vor.u32 %v10984_v21, %v9473_v14  ;;  %v15847_v21 = vld [vmem:[#allocation10_spill] sm:$0xff] }
 0x17c   : > { %v2983_v56 = vadd.f32 %v2982_v10, %v2894_v18  ;;  %v3071_v52 = vpop.f32.mrf.mxu3  ;;  %v9062_v10 = vrot.slane %v15844_v51, 9 }
 0x17e   : > { %v3072_v7 = vadd.f32 %v3071_v52, %v2983_v56  ;;  %v963_v56 = vrot.slane %v961_v25, 4 }
 0x17f   : > { %v3249_v58 = vpop.f32.mrf.mxu1 }
 0x180   : > { %3024 = vmatmul.bf16.gmra.mxu2 %v9438_v2  ;;  %v3161_v17 = vadd.f32 %v3160_v0, %v3072_v7  ;;  %v11081_v0 = vld [vmem:[%s15801_s1 + $0x1c8] sm:$0xff]  ;;  %v15845_v2 = vld [vmem:[#allocation9_spill] sm:$0xff]  ;;  %v962_v7 = vsel %vm12270_vm5, %v9062_v10, %v961_v25  ;;  %v9517_v10 = vld [vmem:[#allocation2 + $0x370] sm:$0xf] }
 0x181   : > { %3113 = vmatmul.bf16.gmra.mxu3 %v9442_v1  ;;  %v964_v53 = vrot.slane %v15845_v2, 5  ;;  %1170 = vst [vmem:[#allocation2 + $0x374] sm:$0xf] %v962_v7  ;;  %v11089_v25 = vld [vmem:[%s15801_s1 + $0x208] sm:$0xff] }
 0x182   : > { %v12534_v3 = vadd.f32 %v3249_v58, %v3161_v17  ;;  %v12543_v18 = vpop.f32.mrf.mxu0  ;;  %3417 = vmatpush.bf16.msra.mxu3 %v11081_v0  ;;  %v2899_v17 = vadd.f32 %v12331_v32, %v2810_v11  ;;  %1038 = vst [vmem:[#allocation2 + $0x3b0] sm:$0xf] %v962_v7  ;;  %3506 = vmatpush.bf16.msra.mxu0 %v11089_v25  ;;  %v10981_v11 = vld [vmem:[#allocation2 + $0x32c] sm:$0xf] }
 0x183   : > { %v2985_v55 = vpop.f32.mrf.mxu2  ;;  %v965_v1 = vsel %vm12270_vm5, %v963_v56, %v964_v53  ;;  %1302 = vst [vmem:[#allocation2 + $0x338] sm:$0xf] %v962_v7  ;;  %v10994_v56 = vld [vmem:[#allocation2 + $0x390] sm:$0xf0] }
 0x184   : > { %v2986_v44 = vadd.f32 %v2985_v55, %v12317_v45  ;;  %v9450_v45 = vor.u32 %v10972_v35, %v9447_v36  ;;  %v3074_v52 = vpop.f32.mrf.mxu3  ;;  %1171 = vst [vmem:[#allocation2 + $0x398] sm:$0xf] %v965_v1 }
 0x185   : > { %3207 = vmatmul.bf16.gmra.mxu0 %v9482_v28  ;;  %1039 = vst [vmem:[#allocation2 + $0x3d4] sm:$0xf] %v965_v1  ;;  %v9475_v28 = vld [vmem:[#allocation2 + $0x344] sm:$0xf0] }
 0x186   : > { %v3075_v40 = vadd.f32 %v3074_v52, %v2986_v44  ;;  %v10980_v44 = vld [vmem:[#allocation2 + $0x324] sm:$0xf]  ;;  %1303 = vst [vmem:[#allocation2 + $0x35c] sm:$0xf] %v965_v1  ;;  %v15846_v52 = vld [vmem:[#allocation11_spill] sm:$0xff] }
 0x187   : > { %v3252_v58 = vpop.f32.mrf.mxu1  ;;  %v9478_v51 = vor.u32 %v10980_v44, %v9475_v28 }
 0x188   : > { %v3164_v49 = vadd.f32 %v12509_v30, %v3075_v40  ;;  %v9518_v40 = vor.u32 %v10994_v56, %v9517_v10 }
 0x18a   : > { %3291 = vmatmul.bf16.gmra.mxu1 %v9450_v45  ;;  %v12555_v35 = vadd.f32 %v3252_v58, %v3164_v49  ;;  %v3170_v62 = vpop.f32.mrf.mxu0  ;;  %v9483_v45 = vld [vmem:[#allocation2 + $0x34c] sm:$0xf0]  ;;  %v968_v58 = vrot.slane %v15846_v52, 5 }
 0x18b   : > { %v2987_v55 = vpop.f32.mrf.mxu2 }
 0x18c   : > { %v2988_v36 = vadd.f32 %v2987_v55, %v2899_v17  ;;  %v3076_v32 = vpop.f32.mrf.mxu3  ;;  %v9063_v17 = vrot.slane %v15847_v21, 9  ;;  %v970_v49 = vrot.slane %v968_v58, 4  ;;  %v15848_v55 = vld [vmem:[#allocation12_spill] sm:$0xff]  ;;  %v9519_v21 = vld [vmem:[#allocation2 + $0x394] sm:$0xf0] }
 0x18e   : > { %v3077_v0 = vadd.f32 %v3076_v32, %v2988_v36  ;;  %v971_v36 = vrot.slane %v15848_v55, 5  ;;  %v969_v28 = vsel %vm12270_vm5, %v9063_v17, %v968_v58  ;;  %v11246_v17 = vld [vmem:[%s15803_s3 + $0x30] sm:$0xff]  ;;  %v11003_v55 = vld [vmem:[#allocation2 + $0x3d8] sm:$0xf0] }
 0x18f   : > { %v3254_v30 = vpop.f32.mrf.mxu1  ;;  %1172 = vst [vmem:[#allocation2 + $0x3bc] sm:$0xf] %v969_v28  ;;  %7321 = vmatpush.bf16.msra.mxu1 %v11246_v17 }
 0x190   : > { %3029 = vmatmul.bf16.gmra.mxu2 %v9474_v61  ;;  %v3166_v2 = vadd.f32 %v12528_v27, %v3077_v0  ;;  %v2815_v27 = vadd.f32 %v12516_v41, %v12348_v42  ;;  %v9486_v61 = vor.u32 %v10981_v11, %v9483_v45  ;;  %v10993_v0 = vld [vmem:[#allocation2 + $0x388] sm:$0xf0]  ;;  %1040 = vst [vmem:[#allocation2 + $0x3f8] sm:$0xf] %v969_v28  ;;  %v9511_v45 = vld [vmem:[#allocation2 + $0x38c] sm:$0xf0] }
 0x191   : > { %3118 = vmatmul.bf16.gmra.mxu3 %v9478_v51  ;;  %1304 = vst [vmem:[#allocation2 + $0x380] sm:$0xf] %v969_v28  ;;  %v10989_v11 = vld [vmem:[#allocation2 + $0x36c] sm:$0xf] }
 0x192   : > { %v12562_v7 = vadd.f32 %v3254_v30, %v3166_v2  ;;  %v12565_v14 = vpop.f32.mrf.mxu0  ;;  %v9509_v30 = vld [vmem:[#allocation2 + $0x368] sm:$0xf]  ;;  %v2904_v51 = vadd.f32 %v12364_v13, %v2815_v27 }
 0x193   : > { %v2990_v53 = vpop.f32.mrf.mxu2 }
 0x194   : > { %v2991_v1 = vadd.f32 %v2990_v53, %v12344_v33  ;;  %v3079_v25 = vpop.f32.mrf.mxu3  ;;  %v972_v33 = vsel %vm12270_vm5, %v970_v49, %v971_v36  ;;  %v9510_v53 = vor.u32 %v10993_v0, %v9509_v30  ;;  %v9553_v49 = vld [vmem:[#allocation2 + $0x3b8] sm:$0xf]  ;;  %v274_v36 = vld [vmem:[%s11717_s10 + $0x180] sm:$0xff] }
 0x195   : > { %3212 = vmatmul.bf16.gmra.mxu0 %v9518_v40  ;;  %1173 = vst [vmem:[#allocation2 + $0x3e0] sm:$0xf] %v972_v33  ;;  %v10990_v40 = vld [vmem:[#allocation2 + $0x374] sm:$0xf] }
 0x196   : > { %v3080_v32 = vadd.f32 %v3079_v25, %v2991_v1  ;;  %1041 = vst [vmem:[#allocation2 + $0x41c] sm:$0xf] %v972_v33  ;;  %v12586_v25 = vpack.c.bf16 %v274_v36, %v274_v36 }
 0x197   : > { %v3257_v44 = vpop.f32.mrf.mxu1  ;;  %1305 = vst [vmem:[#allocation2 + $0x3a4] sm:$0xf] %v972_v33  ;;  %v9522_v33 = vor.u32 %v10990_v40, %v9519_v21  ;;  %v9545_v21 = vld [vmem:[#allocation2 + $0x3b0] sm:$0xf] }
 0x198   : > { %v3169_v10 = vadd.f32 %v12543_v18, %v3080_v32  ;;  %v9514_v18 = vor.u32 %v10989_v11, %v9511_v45  ;;  %v975_v32 = vrot.slane %v12159_v5, 5  ;;  %1074 = vst [vmem:[#allocation2 + $0x444] sm:$0xf] %v12586_v25  ;;  %v15849_v11 = vld [vmem:[#allocation13_spill] sm:$0xff] }
 0x199   : > { %v978_v45 = vrot.slane %v15849_v11, 5  ;;  %1206 = vst [vmem:[#allocation2 + $0x408] sm:$0xf] %v12586_v25 }
 0x19a   : > { %3296 = vmatmul.bf16.gmra.mxu1 %v9486_v61  ;;  %v12577_v56 = vadd.f32 %v3257_v44, %v3169_v10  ;;  %v12579_v52 = vpop.f32.mrf.mxu0  ;;  %v275_v61 = vld [vmem:[%s11717_s10 + $0x188] sm:$0xff]  ;;  %v2820_v44 = vadd.f32 %v12516_v41, %v12378_v63  ;;  %v11072_v10 = vld [vmem:[%s15801_s1 + $0x180] sm:$0xff] }
 0x19b   : > { %v2992_v42 = vpop.f32.mrf.mxu2  ;;  %v12591_v30 = vpack.c.bf16 %v275_v61, %v275_v61  ;;  %v11080_v63 = vld [vmem:[%s15801_s1 + $0x1c0] sm:$0xff]  ;;  %3329 = vmatpush.bf16.msra.mxu2 %v11072_v10  ;;  %v11002_v10 = vld [vmem:[#allocation2 + $0x3d0] sm:$0xf0] }
 0x19c   : > { %v2993_v2 = vadd.f32 %v2992_v42, %v2904_v51  ;;  %v3081_v58 = vpop.f32.mrf.mxu3  ;;  %v276_v42 = vld [vmem:[%s11717_s10 + $0x190] sm:$0x3]  ;;  %3418 = vmatpush.bf16.msra.mxu3 %v11080_v63 }
 0x19d   : > { %1075 = vst [vmem:[#allocation2 + $0x468] sm:$0xf] %v12591_v30 }
 0x19e   : > { %v3082_v1 = vadd.f32 %v3081_v58, %v2993_v2  ;;  %v9064_v2 = vrot.slane %v12157_v60, 9  ;;  %v1077_v58 = vshrl.u32 %v12586_v25, 16  ;;  %1207 = vst [vmem:[#allocation2 + $0x42c] sm:$0xf] %v12591_v30 }
 0x19f   : > { %v3259_v13 = vpop.f32.mrf.mxu1 }
 0x1a0   : > { %3034 = vmatmul.bf16.gmra.mxu2 %v9510_v53  ;;  %v3171_v27 = vadd.f32 %v3170_v62, %v3082_v1  ;;  %v9554_v62 = vor.u32 %v11003_v55, %v9553_v49  ;;  %v977_v53 = vrot.slane %v975_v32, 4  ;;  %v1086_v1 = vshll.u32 %v12591_v30, 16 }
 0x1a1   : > { %3123 = vmatmul.bf16.gmra.mxu3 %v9514_v18  ;;  %v1090_v18 = vshrl.u32 %v12591_v30, 16  ;;  %v976_v17 = vsel %vm12270_vm5, %v9064_v2, %v975_v32 }
 0x1a2   : > { %v12593_v0 = vadd.f32 %v3259_v13, %v3171_v27  ;;  %v12604_v5 = vpop.f32.mrf.mxu0  ;;  %v1080_v13 = vshll.u32 %v12586_v25, 16  ;;  %v979_v49 = vsel %vm12270_vm5, %v977_v53, %v978_v45  ;;  %1174 = vst [vmem:[#allocation2 + $0x404] sm:$0xf] %v976_v17  ;;  %v1079_v27 = vrot.slane %v1077_v58, 4  ;;  %v10998_v58 = vld [vmem:[#allocation2 + $0x3b4] sm:$0xf] }
 0x1a3   : > { %v2995_v28 = vpop.f32.mrf.mxu2  ;;  %1175 = vst [vmem:[#allocation2 + $0x428] sm:$0xf] %v979_v49  ;;  %v1092_v63 = vrot.slane %v1090_v18, 4  ;;  %v9546_v45 = vor.u32 %v11002_v10, %v9545_v21 }
 0x1a4   : > { %v2996_v51 = vadd.f32 %v2995_v28, %v12374_v24  ;;  %v12609_v24 = vpack.c.bf16 %v276_v42, %v276_v42  ;;  %v3084_v60 = vpop.f32.mrf.mxu3  ;;  %v1082_v61 = vrot.slane %v1080_v13, 5  ;;  %v1088_v28 = vrot.slane %v1086_v1, 5  ;;  %1042 = vst [vmem:[#allocation2 + $0x440] sm:$0xf] %v976_v17  ;;  %v11088_v13 = vld [vmem:[%s15801_s1 + $0x200] sm:$0xff] }
 0x1a5   : > { %3217 = vmatmul.bf16.gmra.mxu0 %v9554_v62  ;;  %v2909_v42 = vadd.f32 %v12389_v54, %v2820_v44  ;;  %1043 = vst [vmem:[#allocation2 + $0x464] sm:$0xf] %v979_v49  ;;  %v9547_v54 = vld [vmem:[#allocation2 + $0x3d4] sm:$0xf0] }
 0x1a6   : > { %v1096_v55 = vshll.u32 %v12609_v24, 16  ;;  %v3085_v36 = vadd.f32 %v3084_v60, %v2996_v51  ;;  %v1083_v2 = vor.u32 %v1082_v61, %v1079_v27  ;;  %v1093_v11 = vor.u32 %v1092_v63, %v1088_v28  ;;  %1306 = vst [vmem:[#allocation2 + $0x3c8] sm:$0xf] %v976_v17  ;;  %3507 = vmatpush.bf16.msra.mxu0 %v11088_v13  ;;  %v9589_v17 = vld [vmem:[#allocation2 + $0x400] sm:$0xf] }
 0x1a7   : > { %v12616_v40 = vpop.f32.mrf.mxu1  ;;  %1307 = vst [vmem:[#allocation2 + $0x3ec] sm:$0xf] %v979_v49  ;;  %v11012_v27 = vld [vmem:[#allocation2 + $0x420] sm:$0xf0]  ;;  %v10999_v61 = vld [vmem:[#allocation2 + $0x3bc] sm:$0xf] }
 0x1a8   : > { %v12626_v32 = vadd.f32 %v12565_v14, %v3085_v36  ;;  %v1098_v51 = vrot.slane %v1096_v55, 5  ;;  %v1084_v1 = vrot.slane %v1083_v2, 4  ;;  %v1094_v14 = vrot.slane %v1093_v11, 4 }
 0x1a9   : > { %v9550_v36 = vor.u32 %v10998_v58, %v9547_v54  ;;  %v1139_v63 = vrot.slane %v12591_v30, 5  ;;  %v9590_v2 = vor.u32 %v11012_v27, %v9589_v17  ;;  %v9065_v11 = vrot.slane %v12586_v25, 9  ;;  %v9581_v25 = vld [vmem:[#allocation2 + $0x3f8] sm:$0xf]  ;;  %v11011_v54 = vld [vmem:[#allocation2 + $0x418] sm:$0xf0] }
 0x1aa   : > { %3301 = vmatmul.bf16.gmra.mxu1 %v9522_v33  ;;  %v3180_v44 = vpop.f32.mrf.mxu0  ;;  %v1089_v33 = vsel %vm11771_vm2, %v1084_v1, %v1088_v28  ;;  %v1099_v21 = vsel %vm11771_vm2, %v1094_v14, %v1098_v51  ;;  %v9555_v28 = vld [vmem:[#allocation2 + $0x3dc] sm:$0xf0] }
 0x1ab   : > { %v2997_v53 = vpop.f32.mrf.mxu2  ;;  %1132 = vst [vmem:[#allocation2 + $0x448] sm:$0xf] %v1089_v33  ;;  %v1141_v51 = vrot.slane %v1139_v63, 4  ;;  %v1140_v30 = vsel %vm12270_vm5, %v9065_v11, %v1139_v63  ;;  %v9591_v11 = vld [vmem:[#allocation2 + $0x424] sm:$0xf0] }
 0x1ac   : > { %v2998_v62 = vadd.f32 %v2997_v53, %v2909_v42  ;;  %v3086_v18 = vpop.f32.mrf.mxu3  ;;  %1133 = vst [vmem:[#allocation2 + $0x46c] sm:$0xf] %v1099_v21 }
 0x1ad   : > { %1264 = vst [vmem:[#allocation2 + $0x40c] sm:$0xf] %v1089_v33 }
 0x1ae   : > { %v3087_v55 = vadd.f32 %v3086_v18, %v2998_v62  ;;  %1265 = vst [vmem:[#allocation2 + $0x430] sm:$0xf] %v1099_v21  ;;  %v1142_v62 = vrot.slane %v12609_v24, 5  ;;  %v9582_v18 = vor.u32 %v11011_v54, %v9581_v25  ;;  %v11007_v21 = vld [vmem:[#allocation2 + $0x3fc] sm:$0xf] }
 0x1af   : > { %v12633_v60 = vpop.f32.mrf.mxu1  ;;  %1176 = vst [vmem:[#allocation2 + $0x44c] sm:$0xf] %v1140_v30  ;;  %v11020_v25 = vld [vmem:[#allocation2 + $0x460] sm:$0xf0] }
 0x1b0   : > { %3039 = vmatmul.bf16.gmra.mxu2 %v9546_v45  ;;  %v12638_v49 = vadd.f32 %v12579_v52, %v3087_v55  ;;  %v2825_v52 = vadd.f32 %v12516_v41, %v12404_v34  ;;  %v9558_v45 = vor.u32 %v10999_v61, %v9555_v28  ;;  %1308 = vst [vmem:[#allocation2 + $0x410] sm:$0xf] %v1140_v30  ;;  %v9583_v55 = vld [vmem:[#allocation2 + $0x41c] sm:$0xf0] }
 0x1b1   : > { %3128 = vmatmul.bf16.gmra.mxu3 %v9550_v36 }
 0x1b2   : > { %v3183_v53 = vpop.f32.mrf.mxu0  ;;  %v2914_v24 = vadd.f32 %v12420_v6, %v2825_v52  ;;  %v11245_v6 = vld [vmem:[%s15803_s3 + $0x28] sm:$0xff] }
 0x1b3   : > { %v3000_v10 = vpop.f32.mrf.mxu2  ;;  %v11021_v28 = vld [vmem:[#allocation2 + $0x468] sm:$0xf0]  ;;  %7322 = vmatpush.bf16.msra.mxu1 %v11245_v6  ;;  %v9101_v6 = vld [vmem:[#allocation2 + $0x20] sm:$0xf] }
 0x1b4   : > { %v3001_v42 = vadd.f32 %v3000_v10, %v12410_v50  ;;  %v3089_v58 = vpop.f32.mrf.mxu3  ;;  %v1143_v50 = vsel %vm12270_vm5, %v1141_v51, %v1142_v62  ;;  %v9586_v10 = vor.u32 %v11007_v21, %v9583_v55  ;;  %v9619_v21 = vld [vmem:[#allocation2 + $0x464] sm:$0xf0] }
 0x1b5   : > { %3222 = vmatmul.bf16.gmra.mxu0 %v9590_v2  ;;  %1177 = vst [vmem:[#allocation2 + $0x470] sm:$0xf] %v1143_v50  ;;  %v11008_v2 = vld [vmem:[#allocation2 + $0x404] sm:$0xf] }
 0x1b6   : > { %v3090_v1 = vadd.f32 %v3089_v58, %v3001_v42  ;;  %1309 = vst [vmem:[#allocation2 + $0x434] sm:$0xf] %v1143_v50  ;;  %v9594_v58 = vor.u32 %v11008_v2, %v9591_v11 }
 0x1b7   : > { %v12646_v13 = vpop.f32.mrf.mxu1 }
 0x1b8   : > { %v12654_v34 = vadd.f32 %v12604_v5, %v3090_v1  ;;  %v9625_v5 = vld [vmem:[#allocation2 + $0x448] sm:$0xf] }
 0x1b9   : > { %v9626_v62 = vor.u32 %v11021_v28, %v9625_v5  ;;  %v10888_v5 = vld [vmem:[#allocation2 + $0x40] sm:$0xf0] }
 0x1ba   : > { %3306 = vmatmul.bf16.gmra.mxu1 %v9558_v45  ;;  %v3185_v36 = vpop.f32.mrf.mxu0  ;;  %v2830_v45 = vadd.f32 %v12516_v41, %v12430_v20  ;;  %v9102_v11 = vor.u32 %v10888_v5, %v9101_v6  ;;  %v10897_v6 = vld [vmem:[#allocation2 + $0x88] sm:$0xf0] }
 0x1bb   : > { %v3002_v14 = vpop.f32.mrf.mxu2 }
 0x1bc   : > { %v3003_v33 = vadd.f32 %v3002_v14, %v2914_v24  ;;  %v3091_v17 = vpop.f32.mrf.mxu3  ;;  %v2919_v54 = vadd.f32 %v12457_v46, %v2830_v45 }
 0x1be   : > { %v3092_v61 = vadd.f32 %v3091_v17, %v3003_v33 }
 0x1bf   : > { %v12656_v27 = vpop.f32.mrf.mxu1 }
 0x1c0   : > { %3044 = vmatmul.bf16.gmra.mxu2 %v9582_v18  ;;  %v12661_v63 = vadd.f32 %v3180_v44, %v3092_v61  ;;  %v9617_v44 = vld [vmem:[#allocation2 + $0x440] sm:$0xf]  ;;  %v11016_v18 = vld [vmem:[#allocation2 + $0x444] sm:$0xf] }
 0x1c1   : > { %3133 = vmatmul.bf16.gmra.mxu3 %v9586_v10  ;;  %v9618_v33 = vor.u32 %v11020_v25, %v9617_v44  ;;  %v9622_v10 = vor.u32 %v11016_v18, %v9619_v21  ;;  %v10887_v44 = vld [vmem:[#allocation2 + $0x38] sm:$0xf0] }
 0x1c2   : > { %v3188_v52 = vpop.f32.mrf.mxu0 }
 0x1c3   : > { %v3005_v42 = vpop.f32.mrf.mxu2 }
 0x1c4   : > { %v3006_v51 = vadd.f32 %v3005_v42, %v12434_v22  ;;  %v3094_v30 = vpop.f32.mrf.mxu3  ;;  %v9627_v42 = vld [vmem:[#allocation2 + $0x46c] sm:$0xf0] }
 0x1c5   : > { %3227 = vmatmul.bf16.gmra.mxu0 %v9626_v62 }
 0x1c6   : > { %v3095_v1 = vadd.f32 %v3094_v30, %v3006_v51 }
 0x1c7   : > { %v12666_v50 = vpop.f32.mrf.mxu1 }
 0x1c8   : > { %v12669_v24 = vadd.f32 %v3183_v53, %v3095_v1  ;;  %v11017_v53 = vld [vmem:[#allocation2 + $0x44c] sm:$0xf]  ;;  %v9093_v1 = vld [vmem:[#allocation2 + $0x18] sm:$0xf] }
 0x1c9   : > { %v9630_v62 = vor.u32 %v11017_v53, %v9627_v42 }
 0x1ca   : > { %3311 = vmatmul.bf16.gmra.mxu1 %v9594_v58  ;;  %v3190_v55 = vpop.f32.mrf.mxu0 }
 0x1cb   : > { %v3007_v14 = vpop.f32.mrf.mxu2 }
 0x1cc   : > { %v3008_v22 = vadd.f32 %v3007_v14, %v2919_v54  ;;  %v3096_v20 = vpop.f32.mrf.mxu3  ;;  %v9094_v14 = vor.u32 %v10887_v44, %v9093_v1  ;;  %v9129_v1 = vld [vmem:[#allocation2 + $0x60] sm:$0xf]  ;;  %v10896_v44 = vld [vmem:[#allocation2 + $0x80] sm:$0xf0] }
 0x1ce   : > { %v3097_v61 = vadd.f32 %v3096_v20, %v3008_v22  ;;  %v10883_v22 = vld [vmem:[#allocation2 + $0x1c] sm:$0xf] }
 0x1cf   : > { %v12671_v17 = vpop.f32.mrf.mxu1 }
 0x1d0   : > { %3049 = vmatmul.bf16.gmra.mxu2 %v9618_v33  ;;  %v12673_v28 = vadd.f32 %v3185_v36, %v3097_v61  ;;  %v9095_v33 = vld [vmem:[#allocation2 + $0x3c] sm:$0xf0] }
 0x1d1   : > { %3138 = vmatmul.bf16.gmra.mxu3 %v9622_v10  ;;  %v9098_v61 = vor.u32 %v10883_v22, %v9095_v33  ;;  %v11244_v10 = vld [vmem:[%s15803_s3 + $0x20] sm:$0xff]  ;;  %v9130_v33 = vor.u32 %v10896_v44, %v9129_v1 }
 0x1d2   : > { %v3193_v51 = vpop.f32.mrf.mxu0  ;;  %7323 = vmatpush.bf16.msra.mxu1 %v11244_v10 }
 0x1d3   : > { %v3010_v46 = vpop.f32.mrf.mxu2 }
 0x1d4   : > { %v3011_v2 = vadd.f32 %v3010_v46, %v12470_v12  ;;  %v3099_v45 = vpop.f32.mrf.mxu3 }
 0x1d5   : > { %3508 = vmatmul.bf16.vlgmr.msra.gmra.mxu0 %v9102_v11 }
 0x1d6   : > { %v3100_v30 = vadd.f32 %v3099_v45, %v3011_v2  ;;  %v15850_v2 = vld [vmem:[#allocation14_spill] sm:$0xff] }
 0x1d7   : > { %v12676_v58 = vpop.f32.mrf.mxu1  ;;  %v2840_v11 = vadd.f32 %v12516_v41, %v15850_v2 }
 0x1d8   : > { %v12678_v25 = vadd.f32 %v3188_v52, %v3100_v30  ;;  %v9137_v52 = vld [vmem:[#allocation2 + $0x68] sm:$0xf] }
 0x1d9   : > { %v9138_v53 = vor.u32 %v10897_v6, %v9137_v52 }
 0x1da   : > { %3316 = vmatmul.bf16.gmra.mxu1 %v9630_v62  ;;  %v3195_v12 = vpop.f32.mrf.mxu0 }
 0x1db   : > { %v3012_v36 = vpop.f32.mrf.mxu2 }
 0x1dc   : > { %v3013_v54 = vadd.f32 %v3012_v36, %v12476_v47  ;;  %v3101_v18 = vpop.f32.mrf.mxu3  ;;  %v15851_v36 = vld [vmem:[#allocation15_spill] sm:$0xff] }
 0x1de   : > { %v3102_v20 = vadd.f32 %v3101_v18, %v3013_v54  ;;  %v9131_v18 = vld [vmem:[#allocation2 + $0x84] sm:$0xf0] }
 0x1df   : > { %v12681_v21 = vpop.f32.mrf.mxu1 }
 0x1e0   : > { %3330 = vmatmul.bf16.vlgmr.msra.gmra.mxu2 %v9094_v14  ;;  %v12686_v5 = vadd.f32 %v3190_v55, %v3102_v20  ;;  %v2929_v55 = vadd.f32 %v15851_v36, %v2840_v11 }
 0x1e1   : > { %3419 = vmatmul.bf16.vlgmr.msra.gmra.mxu3 %v9098_v61 }
 0x1e2   : > { %v3198_v42 = vpop.f32.mrf.mxu0 }
 0x1e3   : > { %v3015_v47 = vpop.f32.mrf.mxu2 }
 0x1e4   : > { %v3016_v46 = vadd.f32 %v3015_v47, %v12246_v15  ;;  %v3104_v62 = vpop.f32.mrf.mxu3  ;;  %v10892_v15 = vld [vmem:[#allocation2 + $0x64] sm:$0xf]  ;;  %v9173_v47 = vld [vmem:[#allocation2 + $0xb0] sm:$0xf] }
 0x1e5   : > { %3513 = vmatmul.bf16.gmra.mxu0 %v9138_v53  ;;  %v9134_v6 = vor.u32 %v10892_v15, %v9131_v18 }
 0x1e6   : > { %v3105_v30 = vadd.f32 %v3104_v62, %v3016_v46  ;;  %v10906_v46 = vld [vmem:[#allocation2 + $0xd0] sm:$0xf0] }
 0x1e7   : > { %v12691_v45 = vpop.f32.mrf.mxu1  ;;  %v9174_v11 = vor.u32 %v10906_v46, %v9173_v47 }
 0x1e8   : > { %v12694_v54 = vadd.f32 %v3193_v51, %v3105_v30  ;;  %v2845_v30 = vadd.f32 %v12516_v41, %v12301_v37 }
 0x1ea   : > { %v3200_v20 = vpop.f32.mrf.mxu0 }
 0x1eb   : > { %v3017_v14 = vpop.f32.mrf.mxu2 }
 0x1ec   : > { %v3018_v22 = vadd.f32 %v3017_v14, %v2929_v55  ;;  %v3106_v61 = vpop.f32.mrf.mxu3  ;;  %v9165_v55 = vld [vmem:[#allocation2 + $0xa8] sm:$0xf]  ;;  %v10905_v14 = vld [vmem:[#allocation2 + $0xc8] sm:$0xf0] }
 0x1ed   : > { %v9166_v18 = vor.u32 %v10905_v14, %v9165_v55  ;;  %v2850_v55 = vadd.f32 %v12516_v41, %v12329_v39 }
 0x1ee   : > { %v3107_v52 = vadd.f32 %v3106_v61, %v3018_v22  ;;  %v2934_v22 = vadd.f32 %v12303_v19, %v2845_v30  ;;  %v9167_v61 = vld [vmem:[#allocation2 + $0xcc] sm:$0xf0]  ;;  %v10915_v19 = vld [vmem:[#allocation2 + $0x118] sm:$0xf0] }
 0x1ef   : > { %v12696_v10 = vpop.f32.mrf.mxu1 }
 0x1f0   : > { %3335 = vmatmul.bf16.gmra.mxu2 %v9130_v33  ;;  %v12698_v53 = vadd.f32 %v3195_v12, %v3107_v52 }
 0x1f1   : > { %3424 = vmatmul.bf16.gmra.mxu3 %v9134_v6 }
 0x1f2   : > { %v3203_v62 = vpop.f32.mrf.mxu0 }
 0x1f3   : > { %v3020_v2 = vpop.f32.mrf.mxu2 }
 0x1f4   : > { %v3021_v51 = vadd.f32 %v3020_v2, %v12293_v26  ;;  %v3109_v1 = vpop.f32.mrf.mxu3  ;;  %v10901_v26 = vld [vmem:[#allocation2 + $0xac] sm:$0xf]  ;;  %v11243_v2 = vld [vmem:[%s15803_s3 + $0x18] sm:$0xff] }
 0x1f5   : > { %3518 = vmatmul.bf16.gmra.mxu0 %v9174_v11  ;;  %v9170_v46 = vor.u32 %v10901_v26, %v9167_v61  ;;  %7324 = vmatpush.bf16.msra.mxu1 %v11243_v2 }
 0x1f6   : > { %v3110_v36 = vadd.f32 %v3109_v1, %v3021_v51  ;;  %v9209_v51 = vld [vmem:[#allocation2 + $0xf8] sm:$0xf] }
 0x1f7   : > { %v12703_v44 = vpop.f32.mrf.mxu1  ;;  %v9210_v1 = vor.u32 %v10915_v19, %v9209_v51 }
 0x1f8   : > { %v12706_v12 = vadd.f32 %v3198_v42, %v3110_v36 }
 0x1fa   : > { %v3205_v52 = vpop.f32.mrf.mxu0 }
 0x1fb   : > { %v3022_v33 = vpop.f32.mrf.mxu2 }
 0x1fc   : > { %v3023_v15 = vadd.f32 %v3022_v33, %v2934_v22  ;;  %v3111_v6 = vpop.f32.mrf.mxu3 }
 0x1fe   : > { %v3112_v37 = vadd.f32 %v3111_v6, %v3023_v15  ;;  %v9201_v15 = vld [vmem:[#allocation2 + $0xf0] sm:$0xf] }
 0x1ff   : > { %v12708_v47 = vpop.f32.mrf.mxu1 }
 0x200   : > { %15852 = vst [vmem:[#allocation5_spill] sm:$0xff] %v12708_v47  ;;  %3340 = vmatmul.bf16.gmra.mxu2 %v9166_v18  ;;  %v12713_v42 = vadd.f32 %v3200_v20, %v3112_v37  ;;  %v10914_v18 = vld [vmem:[#allocation2 + $0x110] sm:$0xf0]  ;;  %v2939_v20 = vadd.f32 %v12333_v8, %v2850_v55 }
 0x201   : > { %3429 = vmatmul.bf16.gmra.mxu3 %v9170_v46  ;;  %v9202_v37 = vor.u32 %v10914_v18, %v9201_v15  ;;  %v9203_v46 = vld [vmem:[#allocation2 + $0x114] sm:$0xf0] }
 0x202   : > { %15853 = vst [vmem:[#allocation6_spill] sm:$0xff] %v12713_v42  ;;  %v3208_v36 = vpop.f32.mrf.mxu0 }
 0x203   : > { %v3025_v11 = vpop.f32.mrf.mxu2 }
 0x204   : > { %v3026_v30 = vadd.f32 %v3025_v11, %v12323_v31  ;;  %v3114_v14 = vpop.f32.mrf.mxu3  ;;  %v10910_v31 = vld [vmem:[#allocation2 + $0xf4] sm:$0xf] }
 0x205   : > { %3523 = vmatmul.bf16.gmra.mxu0 %v9210_v1  ;;  %v9206_v11 = vor.u32 %v10910_v31, %v9203_v46  ;;  %v10924_v1 = vld [vmem:[#allocation2 + $0x160] sm:$0xf0] }
 0x206   : > { %v3115_v33 = vadd.f32 %v3114_v14, %v3026_v30  ;;  %v9245_v30 = vld [vmem:[#allocation2 + $0x140] sm:$0xf] }
 0x207   : > { %v12718_v22 = vpop.f32.mrf.mxu1 }
 0x208   : > { %15854 = vst [vmem:[#allocation8_spill] sm:$0xff] %v12718_v22  ;;  %v12721_v26 = vadd.f32 %v3203_v62, %v3115_v33  ;;  %v9246_v62 = vor.u32 %v10924_v1, %v9245_v30  ;;  %v2855_v33 = vadd.f32 %v12516_v41, %v12350_v59 }
 0x20a   : > { %15855 = vst [vmem:[#allocation7_spill] sm:$0xff] %v12721_v26  ;;  %v3210_v2 = vpop.f32.mrf.mxu0 }
 0x20b   : > { %v3027_v61 = vpop.f32.mrf.mxu2 }
 0x20c   : > { %v3028_v6 = vadd.f32 %v3027_v61, %v2939_v20  ;;  %v3116_v51 = vpop.f32.mrf.mxu3  ;;  %v9237_v61 = vld [vmem:[#allocation2 + $0x138] sm:$0xf] }
 0x20e   : > { %v3117_v39 = vadd.f32 %v3116_v51, %v3028_v6  ;;  %v10923_v6 = vld [vmem:[#allocation2 + $0x158] sm:$0xf0] }
 0x20f   : > { %v12723_v19 = vpop.f32.mrf.mxu1 }
 0x210   : > { %15856 = vst [vmem:[#allocation9_spill] sm:$0xff] %v12723_v19  ;;  %3345 = vmatmul.bf16.gmra.mxu2 %v9202_v37  ;;  %v12725_v14 = vadd.f32 %v3205_v52, %v3117_v39  ;;  %v15859_v37 = vld [vmem:[#allocation17_spill] sm:$0xff]  ;;  %v9238_v39 = vor.u32 %v10923_v6, %v9237_v61 }
 0x211   : > { %3434 = vmatmul.bf16.gmra.mxu3 %v9206_v11  ;;  %v2944_v31 = vadd.f32 %v15859_v37, %v2855_v33  ;;  %v10933_v33 = vld [vmem:[#allocation2 + $0x1a8] sm:$0xf0]  ;;  %v15863_v37 = vld [vmem:[#allocation18_spill] sm:$0xff] }
 0x212   : > { %15857 = vst [vmem:[#allocation11_spill] sm:$0xff] %v12725_v14  ;;  %v3213_v55 = vpop.f32.mrf.mxu0 }
 0x213   : > { %v3030_v22 = vpop.f32.mrf.mxu2 }
 0x214   : > { %v3031_v8 = vadd.f32 %v3030_v22, %v12346_v23  ;;  %v3119_v15 = vpop.f32.mrf.mxu3  ;;  %v10919_v23 = vld [vmem:[#allocation2 + $0x13c] sm:$0xf]  ;;  %v9239_v22 = vld [vmem:[#allocation2 + $0x15c] sm:$0xf0] }
 0x215   : > { %3528 = vmatmul.bf16.gmra.mxu0 %v9246_v62  ;;  %v9281_v62 = vld [vmem:[#allocation2 + $0x188] sm:$0xf] }
 0x216   : > { %v3120_v20 = vadd.f32 %v3119_v15, %v3031_v8  ;;  %v11242_v8 = vld [vmem:[%s15803_s3 + $0x10] sm:$0xff]  ;;  %v9282_v61 = vor.u32 %v10933_v33, %v9281_v62  ;;  %v9275_v62 = vld [vmem:[#allocation2 + $0x1a4] sm:$0xf0] }
 0x217   : > { %v12730_v18 = vpop.f32.mrf.mxu1  ;;  %7325 = vmatpush.bf16.msra.mxu1 %v11242_v8 }
 0x218   : > { %15858 = vst [vmem:[#allocation10_spill] sm:$0xff] %v12730_v18  ;;  %v12733_v52 = vadd.f32 %v3208_v36, %v3120_v20  ;;  %v9242_v18 = vor.u32 %v10919_v23, %v9239_v22  ;;  %v9273_v23 = vld [vmem:[#allocation2 + $0x180] sm:$0xf]  ;;  %v10932_v22 = vld [vmem:[#allocation2 + $0x1a0] sm:$0xf0] }
 0x21a   : > { %15860 = vst [vmem:[#allocation12_spill] sm:$0xff] %v12733_v52  ;;  %v3215_v11 = vpop.f32.mrf.mxu0 }
 0x21b   : > { %v3032_v46 = vpop.f32.mrf.mxu2 }
 0x21c   : > { %v3033_v51 = vadd.f32 %v3032_v46, %v2944_v31  ;;  %v3121_v30 = vpop.f32.mrf.mxu3  ;;  %v2860_v31 = vadd.f32 %v12516_v41, %v15863_v37 }
 0x21e   : > { %v3122_v59 = vadd.f32 %v3121_v30, %v3033_v51  ;;  %v15865_v30 = vld [vmem:[#allocation19_spill] sm:$0xff] }
 0x21f   : > { %v12735_v1 = vpop.f32.mrf.mxu1 }
 0x220   : > { %15861 = vst [vmem:[#allocation13_spill] sm:$0xff] %v12735_v1  ;;  %3350 = vmatmul.bf16.gmra.mxu2 %v9238_v39  ;;  %v12740_v36 = vadd.f32 %v3210_v2, %v3122_v59  ;;  %v2949_v2 = vadd.f32 %v15865_v30, %v2860_v31  ;;  %v9274_v1 = vor.u32 %v10932_v22, %v9273_v23  ;;  %v15870_v23 = vld [vmem:[#allocation21_spill] sm:$0xff] }
 0x221   : > { %3439 = vmatmul.bf16.gmra.mxu3 %v9242_v18  ;;  %v2865_v22 = vadd.f32 %v12516_v41, %v15870_v23 }
 0x222   : > { %15862 = vst [vmem:[#allocation14_spill] sm:$0xff] %v12740_v36  ;;  %v3218_v6 = vpop.f32.mrf.mxu0 }
 0x223   : > { %v3035_v15 = vpop.f32.mrf.mxu2 }
 0x224   : > { %v3036_v20 = vadd.f32 %v3035_v15, %v12376_v16  ;;  %v3124_v46 = vpop.f32.mrf.mxu3  ;;  %v10928_v16 = vld [vmem:[#allocation2 + $0x184] sm:$0xf] }
 0x225   : > { %3533 = vmatmul.bf16.gmra.mxu0 %v9282_v61  ;;  %v10942_v61 = vld [vmem:[#allocation2 + $0x1f0] sm:$0xf0] }
 0x226   : > { %v3125_v39 = vadd.f32 %v3124_v46, %v3036_v20  ;;  %v9317_v20 = vld [vmem:[#allocation2 + $0x1d0] sm:$0xf] }
 0x227   : > { %v12745_v51 = vpop.f32.mrf.mxu1 }
 0x228   : > { %15864 = vst [vmem:[#allocation15_spill] sm:$0xff] %v12745_v51  ;;  %v12748_v59 = vadd.f32 %v3213_v55, %v3125_v39  ;;  %v9278_v51 = vor.u32 %v10928_v16, %v9275_v62  ;;  %v15869_v55 = vld [vmem:[#allocation20_spill] sm:$0xff]  ;;  %v9318_v39 = vor.u32 %v10942_v61, %v9317_v20  ;;  %v15872_v16 = vld [vmem:[#allocation22_spill] sm:$0xff] }
 0x229   : > { %v2954_v62 = vadd.f32 %v15872_v16, %v2865_v22  ;;  %v9311_v20 = vld [vmem:[#allocation2 + $0x1ec] sm:$0xf0]  ;;  %v10951_v22 = vld [vmem:[#allocation2 + $0x238] sm:$0xf0] }
 0x22a   : > { %15866 = vst [vmem:[#allocation17_spill] sm:$0xff] %v12748_v59  ;;  %v3220_v33 = vpop.f32.mrf.mxu0 }
 0x22b   : > { %v3037_v8 = vpop.f32.mrf.mxu2 }
 0x22c   : > { %v3038_v18 = vadd.f32 %v3037_v8, %v2949_v2  ;;  %v3126_v15 = vpop.f32.mrf.mxu3 }
 0x22e   : > { %v3127_v37 = vadd.f32 %v3126_v15, %v3038_v18  ;;  %v10941_v18 = vld [vmem:[#allocation2 + $0x1e8] sm:$0xf0] }
 0x22f   : > { %v12750_v36 = vpop.f32.mrf.mxu1 }
 0x230   : > { %15867 = vst [vmem:[#allocation18_spill] sm:$0xff] %v12750_v36  ;;  %3355 = vmatmul.bf16.gmra.mxu2 %v9274_v1  ;;  %v12752_v46 = vadd.f32 %v3215_v11, %v3127_v37  ;;  %v9309_v1 = vld [vmem:[#allocation2 + $0x1c8] sm:$0xf] }
 0x231   : > { %3444 = vmatmul.bf16.gmra.mxu3 %v9278_v51  ;;  %v9310_v37 = vor.u32 %v10941_v18, %v9309_v1 }
 0x232   : > { %15868 = vst [vmem:[#allocation19_spill] sm:$0xff] %v12752_v46  ;;  %v3223_v30 = vpop.f32.mrf.mxu0 }
 0x233   : > { %v3040_v52 = vpop.f32.mrf.mxu2 }
 0x234   : > { %v3041_v31 = vadd.f32 %v3040_v52, %v15869_v55  ;;  %v3129_v2 = vpop.f32.mrf.mxu3  ;;  %v10937_v52 = vld [vmem:[#allocation2 + $0x1cc] sm:$0xf] }
 0x235   : > { %3538 = vmatmul.bf16.gmra.mxu0 %v9318_v39  ;;  %v9314_v23 = vor.u32 %v10937_v52, %v9311_v20  ;;  %v9353_v39 = vld [vmem:[#allocation2 + $0x218] sm:$0xf] }
 0x236   : > { %v3130_v36 = vadd.f32 %v3129_v2, %v3041_v31  ;;  %v11241_v31 = vld [vmem:[%s15803_s3 + $0x8] sm:$0xff]  ;;  %v9354_v1 = vor.u32 %v10951_v22, %v9353_v39 }
 0x237   : > { %v12757_v8 = vpop.f32.mrf.mxu1  ;;  %7326 = vmatpush.bf16.msra.mxu1 %v11241_v31  ;;  %v10946_v31 = vld [vmem:[#allocation2 + $0x214] sm:$0xf] }
 0x238   : > { %15871 = vst [vmem:[#allocation20_spill] sm:$0xff] %v12757_v8  ;;  %v12760_v11 = vadd.f32 %v3218_v6, %v3130_v36  ;;  %v10959_v8 = vld [vmem:[#allocation2 + $0x278] sm:$0xf0] }
 0x23a   : > { %15873 = vst [vmem:[#allocation21_spill] sm:$0xff] %v12760_v11  ;;  %v3225_v61 = vpop.f32.mrf.mxu0  ;;  %v4301_v11 = vld [vmem:[#allocation3 + $0x20] sm:$0x1] }
 0x23b   : > { %v3042_v15 = vpop.f32.mrf.mxu2 }
 0x23c   : > { %v3043_v51 = vadd.f32 %v3042_v15, %v2954_v62  ;;  %v3131_v55 = vpop.f32.mrf.mxu3 }
 0x23e   : > { %v3132_v41 = vadd.f32 %v3131_v55, %v3043_v51  ;;  %v9345_v51 = vld [vmem:[#allocation2 + $0x210] sm:$0xf]  ;;  %v15878_v55 = vld [vmem:[#allocation23_spill] sm:$0xff] }
 0x23f   : > { %v12762_v46 = vpop.f32.mrf.mxu1 }
 0x240   : > { %15874 = vst [vmem:[#allocation22_spill] sm:$0xff] %v12762_v46  ;;  %3360 = vmatmul.bf16.gmra.mxu2 %v9310_v37  ;;  %v12767_v36 = vadd.f32 %v3220_v33, %v3132_v41  ;;  %v10950_v37 = vld [vmem:[#allocation2 + $0x230] sm:$0xf0]  ;;  %v9347_v46 = vld [vmem:[#allocation2 + $0x234] sm:$0xf0] }
 0x241   : > { %3449 = vmatmul.bf16.gmra.mxu3 %v9314_v23  ;;  %v9346_v41 = vor.u32 %v10950_v37, %v9345_v51  ;;  %v9350_v22 = vor.u32 %v10946_v31, %v9347_v46  ;;  %v9383_v31 = vld [vmem:[#allocation2 + $0x27c] sm:$0xf0] }
 0x242   : > { %15875 = vst [vmem:[#allocation25_spill] sm:$0xff] %v12767_v36  ;;  %v3228_v18 = vpop.f32.mrf.mxu0 }
 0x243   : > { %v3045_v6 = vpop.f32.mrf.mxu2 }
 0x244   : > { %v3046_v2 = vadd.f32 %v3045_v6, %v12436_v9  ;;  %v3134_v16 = vpop.f32.mrf.mxu3  ;;  %v9389_v6 = vld [vmem:[#allocation2 + $0x260] sm:$0xf] }
 0x245   : > { %3543 = vmatmul.bf16.gmra.mxu0 %v9354_v1 }
 0x246   : > { %v3135_v15 = vadd.f32 %v3134_v16, %v3046_v2  ;;  %v10960_v2 = vld [vmem:[#allocation2 + $0x280] sm:$0xf0] }
 0x247   : > { %v12770_v62 = vpop.f32.mrf.mxu1 }
 0x248   : > { %15876 = vst [vmem:[#allocation26_spill] sm:$0xff] %v12770_v62  ;;  %v12772_v52 = vadd.f32 %v3223_v30, %v3135_v15  ;;  %v15881_v30 = vld [vmem:[#allocation24_spill] sm:$0xff]  ;;  %v9390_v62 = vor.u32 %v10960_v2, %v9389_v6 }
 0x24a   : > { %15877 = vst [vmem:[#allocation27_spill] sm:$0xff] %v12772_v52  ;;  %v3230_v23 = vpop.f32.mrf.mxu0  ;;  %v9381_v52 = vld [vmem:[#allocation2 + $0x258] sm:$0xf] }
 0x24b   : > { %v3047_v20 = vpop.f32.mrf.mxu2 }
 0x24c   : > { %v3048_v33 = vadd.f32 %v3047_v20, %v15878_v55  ;;  %v3136_v36 = vpop.f32.mrf.mxu3 }
 0x24e   : > { %v3137_v39 = vadd.f32 %v3136_v36, %v3048_v33 }
 0x24f   : > { %v12775_v9 = vpop.f32.mrf.mxu1 }
 0x250   : > { %15879 = vst [vmem:[#allocation23_spill] sm:$0xff] %v12775_v9  ;;  %3365 = vmatmul.bf16.gmra.mxu2 %v9346_v41  ;;  %v12777_v1 = vadd.f32 %v3225_v61, %v3137_v39  ;;  %v9382_v61 = vor.u32 %v10959_v8, %v9381_v52  ;;  %v10955_v41 = vld [vmem:[#allocation2 + $0x25c] sm:$0xf] }
 0x251   : > { %3454 = vmatmul.bf16.gmra.mxu3 %v9350_v22  ;;  %v9386_v2 = vor.u32 %v10955_v41, %v9383_v31  ;;  %v9417_v41 = vld [vmem:[#allocation2 + $0x2a0] sm:$0xf]  ;;  %v10968_v31 = vld [vmem:[#allocation2 + $0x2c0] sm:$0xf0] }
 0x252   : > { %15880 = vst [vmem:[#allocation28_spill] sm:$0xff] %v12777_v1  ;;  %v3509_v20 = vpop.f32.mrf.mxu0  ;;  %v9455_v1 = vld [vmem:[#allocation2 + $0x30c] sm:$0xf0] }
 0x253   : > { %v3050_v16 = vpop.f32.mrf.mxu2 }
 0x254   : > { %v3051_v15 = vadd.f32 %v3050_v16, %v15881_v30  ;;  %v3139_v51 = vpop.f32.mrf.mxu3  ;;  %v11654_v16 = vmov 0   ;;  %v9425_v30 = vld [vmem:[#allocation2 + $0x2a8] sm:$0xf] }
 0x255   : > { %3548 = vmatmul.bf16.gmra.mxu0 %v9390_v62  ;;  %4229 = vst [vmem:[#allocation3] sm:$0xf] %v11654_v16  ;;  %v10969_v62 = vld [vmem:[#allocation2 + $0x2c8] sm:$0xf0] }
 0x256   : > { %v3140_v55 = vadd.f32 %v3139_v51, %v3051_v15  ;;  %4230 = vst [vmem:[#allocation3 + $0x4] sm:$0xf] %v11654_v16  ;;  %v9426_v51 = vor.u32 %v10969_v62, %v9425_v30  ;;  %v9418_v30 = vor.u32 %v10968_v31, %v9417_v41  ;;  %v10964_v62 = vld [vmem:[#allocation2 + $0x2a4] sm:$0xf] }
 0x257   : > { %v3317_v37 = vpop.f32.mrf.mxu1  ;;  %4231 = vst [vmem:[#allocation3 + $0x8] sm:$0x1] %v11654_v16 }
 0x258   : > { %v3229_v9 = vadd.f32 %v3228_v18, %v3140_v55  ;;  %4233 = vst [vmem:[#allocation3 + $0xcc] sm:$0xf] %v11654_v16 }
 0x259   : > { %4234 = vst [vmem:[#allocation3 + $0xd0] sm:$0xf] %v11654_v16 }
 0x25a   : > { %v12780_v33 = vadd.f32 %v3317_v37, %v3229_v9  ;;  %v3511_v39 = vpop.f32.mrf.mxu0  ;;  %4235 = vst [vmem:[#allocation3 + $0xd4] sm:$0x1] %v11654_v16 }
 0x25b   : > { %v3052_v36 = vpop.f32.mrf.mxu2 }
 0x25c   : > { %15882 = vst [vmem:[#allocation24_spill] sm:$0xff] %v12780_v33  ;;  %v3053_v46 = vadd.f32 %v3052_v36, %v12478_v57  ;;  %v3141_v22 = vpop.f32.mrf.mxu3  ;;  %v4239_v55 = vld [vmem:[#allocation3] sm:$0x1] }
 0x25d   : > { %v4240_v36 = vsel %vm12788_vm8, 0, %v4239_v55 }
 0x25e   : > { %v3142_v6 = vadd.f32 %v3141_v22, %v3053_v46  ;;  %4241 = vst [vmem:[#allocation3] sm:$0x1] %v4240_v36  ;;  %v10978_v36 = vld [vmem:[#allocation2 + $0x310] sm:$0xf0] }
 0x25f   : > { %v3319_v15 = vpop.f32.mrf.mxu1 }
 0x260   : > { %3370 = vmatmul.bf16.gmra.mxu2 %v9382_v61  ;;  %v3231_v18 = vadd.f32 %v3230_v23, %v3142_v6  ;;  %v4242_v61 = vld [vmem:[#allocation3 + $0xc] sm:$0x1] }
 0x261   : > { %3459 = vmatmul.bf16.gmra.mxu3 %v9386_v2 }
 0x262   : > { %v12783_v57 = vadd.f32 %v3319_v15, %v3231_v18  ;;  %v3514_v37 = vpop.f32.mrf.mxu0  ;;  %v9419_v15 = vld [vmem:[#allocation2 + $0x2c4] sm:$0xf0] }
 0x263   : > { %v3331_v9 = vpop.f32.mrf.mxu2  ;;  %v9422_v55 = vor.u32 %v10964_v62, %v9419_v15 }
 0x264   : > { %15883 = vst [vmem:[#allocation29_spill] sm:$0xff] %v12783_v57  ;;  %v3332_v8 = vadd.f32 %v3331_v9, %v12500_v4  ;;  %v3420_v23 = vpop.f32.mrf.mxu3  ;;  %v4243_v4 = vsel %vm12788_vm8, 0, %v4242_v61  ;;  %v4298_v61 = vld [vmem:[#allocation3 + $0x14] sm:$0x1] }
 0x265   : > { %3553 = vmatmul.bf16.gmra.mxu0 %v9426_v51  ;;  %4244 = vst [vmem:[#allocation3 + $0xc] sm:$0x1] %v4243_v4  ;;  %v12802_v51 = vld [vmem:[#allocation3] sm:$0xf] }
 0x266   : > { %v3421_v46 = vadd.f32 %v3420_v23, %v3332_v8  ;;  %v12804_v8 = vld [vmem:[#allocation3 + $0x4] sm:$0xf]  ;;  %4872 = vst [vmem:[#allocation4] sm:$0xf] %v12802_v51  ;;  %v9461_v23 = vld [vmem:[#allocation2 + $0x2f0] sm:$0xf] }
 0x267   : > { %4873 = vst [vmem:[#allocation4 + $0x24] sm:$0xf] %v12804_v8 }
 0x268   : > { %v12796_v22 = vadd.f32 %v3509_v20, %v3421_v46 }
 0x26a   : > { %v9931_v2 = vmul.f32 -1.442695, %v12796_v22  ;;  %v12800_v9 = vpop.f32.mrf.mxu0 }
 0x26b   : > { %v3333_v6 = vpop.f32.mrf.mxu2 }
 0x26c   : > { %v3334_v16 = vadd.f32 %v3333_v6, %v12506_v38  ;;  %11340 = vpow2.f32 %v9931_v2  ;;  %v3422_v18 = vpop.f32.mrf.mxu3  ;;  %v4299_v6 = vsel %vm12809_vm10, 0, %v4298_v61  ;;  %v10977_v61 = vld [vmem:[#allocation2 + $0x308] sm:$0xf0] }
 0x26d   : > { %4300 = vst [vmem:[#allocation3 + $0x14] sm:$0x1] %v4299_v6 }
 0x26e   : > { %v3423_v20 = vadd.f32 %v3422_v18, %v3334_v16  ;;  %v11240_v16 = vld [vmem:[%s15803_s3] sm:$0xff]  ;;  %v9983_v18 = vld [vmem:[#allocation4] sm:$0xf] }
 0x26f   : > { %7327 = vmatpush.bf16.msra.mxu1 %v11240_v16 }
 0x270   : > { %3375 = vmatmul.bf16.gmra.mxu2 %v9418_v30  ;;  %v12814_v46 = vadd.f32 %v3511_v39, %v3423_v20  ;;  %v9462_v30 = vor.u32 %v10978_v36, %v9461_v23  ;;  %v11100_v20 = vld [vmem:[#allocation4 + $0x20] sm:$0xf0] }
 0x271   : > { %3464 = vmatmul.bf16.gmra.mxu3 %v9422_v55  ;;  %v9453_v55 = vld [vmem:[#allocation2 + $0x2e8] sm:$0xf] }
 0x272   : > { %v11341_v41 = vpop.eup %11340  ;;  %v9932_v31 = vmul.f32 -1.442695, %v12814_v46  ;;  %v12823_v57 = vpop.f32.mrf.mxu0  ;;  %v9454_v6 = vor.u32 %v10977_v61, %v9453_v55 }
 0x273   : > { %v3336_v4 = vpop.f32.mrf.mxu2  ;;  %v3685_v62 = vadd.f32 1.0, %v11341_v41  ;;  %v4245_v41 = vld [vmem:[#allocation3 + $0x18] sm:$0x1] }
 0x274   : > { %v3337_v2 = vadd.f32 %v3336_v4, %v12526_v29  ;;  %11342 = vpow2.f32 %v9932_v31  ;;  %v3425_v39 = vpop.f32.mrf.mxu3  ;;  %v9984_v29 = vor.u32 %v11100_v20, %v9983_v18 }
 0x275   : > { %11344 = vrcp.f32 %v3685_v62  ;;  %3558 = vmatmul.bf16.gmra.mxu0 %v9462_v30  ;;  %v4246_v30 = vsel %vm12788_vm8, 0, %v4245_v41  ;;  %v3728_v55 = vand.u32 2147483648, %v3685_v62  ;;  %vm3722_vm12 = vweird.f32 %v3685_v62 }
 0x276   : > { %v3426_v15 = vadd.f32 %v3425_v39, %v3337_v2  ;;  %7328 = vmatmul.bf16.vlgmr.msra.gmra.mxu1 %v9984_v29  ;;  %v10973_v39 = vld [vmem:[#allocation2 + $0x2ec] sm:$0xf]  ;;  %4247 = vst [vmem:[#allocation3 + $0x18] sm:$0x1] %v4246_v30 }
 0x277   : > { %v9458_v29 = vor.u32 %v10973_v39, %v9455_v1  ;;  %v4302_v1 = vsel %vm12809_vm10, 0, %v4301_v11  ;;  %v9489_v11 = vld [vmem:[#allocation2 + $0x330] sm:$0xf] }
 0x278   : > { %v12825_v4 = vadd.f32 %v3514_v37, %v3426_v15  ;;  %4303 = vst [vmem:[#allocation3 + $0x20] sm:$0x1] %v4302_v1 }
 0x27a   : > { %v11343_v23 = vpop.eup %11342  ;;  %v9933_v36 = vmul.f32 -1.442695, %v12825_v4  ;;  %v12837_v30 = vpop.f32.mrf.mxu0 }
 0x27b   : > { %v3338_v33 = vpop.f32.mrf.mxu2  ;;  %v11345_v2 = vpop.eup %11344  ;;  %v12829_v16 = vadd.f32 1.0, %v11343_v23  ;;  %v3726_v23 = vand.u32 2147483647, %v3685_v62 }
 0x27c   : > { %v3339_v31 = vadd.f32 %v3338_v33, %v12534_v3  ;;  %v3718_v18 = vmul.f32 %v11345_v2, %v3685_v62  ;;  %11346 = vpow2.f32 %v9933_v36  ;;  %v3427_v37 = vpop.f32.mrf.mxu3  ;;  %v9497_v3 = vld [vmem:[#allocation2 + $0x338] sm:$0xf]  ;;  %v10987_v33 = vld [vmem:[#allocation2 + $0x358] sm:$0xf0]  ;;  %vm3723_vm11 = vweird.f32 %v11345_v2 }
 0x27d   : > { %11348 = vrcp.f32 %v12829_v16  ;;  %v9498_v59 = vor.u32 %v10987_v33, %v9497_v3  ;;  %vm3724_vm13 = vmor %vm3722_vm12, %vm3723_vm11  ;;  %vm3727_vm14 = vcmp.eq.f32.partialorder %v3726_v23, 8.507059e+37  ;;  %v3741_v33 = vand.u32 2147483647, %v12829_v16 }
 0x27e   : > { %v3719_v15 = vsub.f32 1.0, %v3718_v18  ;;  %v3428_v20 = vadd.f32 %v3427_v37, %v3339_v31  ;;  %vm3737_vm1 = vweird.f32 %v12829_v16  ;;  %vm4381_vm11 = vsmask.f32 4368 }
 0x27f   : > { %vm12855_vm3 = vcmp.eq.f32.partialorder %v3741_v33, 8.507059e+37  ;;  %v4248_v33 = vld [vmem:[#allocation3 + $0x24] sm:$0x1] }
 0x280   : > { %3380 = vmatmul.bf16.gmra.mxu2 %v9454_v6  ;;  %v3720_v61 = vmul.f32 %v11345_v2, %v3719_v15  ;;  %v12835_v41 = vadd.f32 %v12800_v9, %v3428_v20  ;;  %v3729_v9 = vor.u32 1.1754944e-38, %v3728_v55  ;;  %v10986_v55 = vld [vmem:[#allocation2 + $0x350] sm:$0xf0] }
 0x281   : > { %3469 = vmatmul.bf16.gmra.mxu3 %v9458_v29 }
 0x282   : > { %v11347_v19 = vpop.eup %11346  ;;  %v3721_v18 = vadd.f32 %v11345_v2, %v3720_v61  ;;  %v9934_v31 = vmul.f32 -1.442695, %v12835_v41 }
 0x283   : > { %v3341_v36 = vpop.f32.mrf.mxu2  ;;  %v11349_v39 = vpop.eup %11348  ;;  %v12844_v62 = vadd.f32 1.0, %v11347_v19  ;;  %v3743_v19 = vand.u32 2147483648, %v12829_v16 }
 0x284   : > { %v3342_v6 = vadd.f32 %v3341_v36, %v12555_v35  ;;  %v3725_v37 = vsel %vm3724_vm13, %v11345_v2, %v3721_v18  ;;  %v3733_v15 = vmul.f32 %v11349_v39, %v12829_v16  ;;  %11350 = vpow2.f32 %v9934_v31  ;;  %v3430_v3 = vpop.f32.mrf.mxu3 }
 0x285   : > { %v3730_v20 = vsel %vm3727_vm14, %v3729_v9, %v3725_v37  ;;  %11352 = vrcp.f32 %v12844_v62  ;;  %3563 = vmatmul.bf16.gmra.mxu0 %v9498_v59  ;;  %vm3738_vm15 = vweird.f32 %v11349_v39  ;;  %v9490_v31 = vor.u32 %v10986_v55, %v9489_v11  ;;  %v10982_v59 = vld [vmem:[#allocation2 + $0x334] sm:$0xf]  ;;  %v9491_v37 = vld [vmem:[#allocation2 + $0x354] sm:$0xf0]  ;;  %v12862_v11 = vpop.f32.mrf.mxu0 }
 0x286   : > { %v4197_v29 = vmul.f32 %v3730_v20, %v12796_v22  ;;  %v3734_v35 = vsub.f32 1.0, %v3733_v15  ;;  %v3431_v61 = vadd.f32 %v3430_v3, %v3342_v6  ;;  %vm3739_vm4 = vmor %vm3737_vm1, %vm3738_vm15  ;;  %v3744_v3 = vor.u32 1.1754944e-38, %v3743_v19  ;;  %v4706_v19 = vld [vmem:[#allocation3 + $0xc] sm:$0xf] }
 0x287   : > { %v3758_v14 = vand.u32 2147483648, %v12844_v62  ;;  %v4249_v6 = vsel %vm12788_vm8, 0, %v4248_v33  ;;  %vm3752_vm12 = vweird.f32 %v12844_v62  ;;  %vm12903_vm15 = vmor %vm4237_vm7, %vm4381_vm11 }
 0x288   : > { %v4349_v2 = vpack.c.bf16 %v4197_v29, %v4197_v29  ;;  %v3735_v23 = vmul.f32 %v11349_v39, %v3734_v35  ;;  %v12852_v36 = vadd.f32 %v12823_v57, %v3431_v61  ;;  %4250 = vst [vmem:[#allocation3 + $0x24] sm:$0x1] %v4249_v6  ;;  %v9525_v6 = vld [vmem:[#allocation2 + $0x378] sm:$0xf] }
 0x28a   : > { %v11351_v1 = vpop.eup %11350  ;;  %v4384_v9 = vshrl.u32 %v4349_v2, 16  ;;  %v3736_v22 = vadd.f32 %v11349_v39, %v3735_v23  ;;  %v4387_v20 = vshll.u32 %v4349_v2, 16  ;;  %v9935_v29 = vmul.f32 -1.442695, %v12852_v36 }
 0x28b   : > { %v3343_v18 = vpop.f32.mrf.mxu2  ;;  %v11353_v15 = vpop.eup %11352  ;;  %v12859_v57 = vadd.f32 1.0, %v11351_v1  ;;  %v3756_v1 = vand.u32 2147483647, %v12844_v62 }
 0x28c   : > { %v12864_v35 = vrot.slane %v4384_v9, 7  ;;  %v3740_v61 = vsel %vm3739_vm4, %v11349_v39, %v3736_v22  ;;  %v3748_v16 = vmul.f32 %v11353_v15, %v12844_v62  ;;  %v3344_v55 = vadd.f32 %v3343_v18, %v12562_v7  ;;  %v3432_v39 = vpop.f32.mrf.mxu3 }
 0x28d   : > { %v3745_v23 = vsel %vm12855_vm3, %v3744_v3, %v3740_v61  ;;  %11354 = vrcp.f32 %v12859_v57  ;;  %v9494_v18 = vor.u32 %v10982_v59, %v9491_v37  ;;  %vm3753_vm9 = vweird.f32 %v11353_v15  ;;  %v9533_v3 = vld [vmem:[#allocation2 + $0x380] sm:$0xf]  ;;  %v10996_v61 = vld [vmem:[#allocation2 + $0x3a0] sm:$0xf0] }
 0x28e   : > { %v4389_v9 = vor.u32 %v4387_v20, %v12864_v35  ;;  %v4198_v22 = vmul.f32 %v3745_v23, %v12814_v46  ;;  %v3749_v7 = vsub.f32 1.0, %v3748_v16  ;;  %11356 = vpow2.f32 %v9935_v29  ;;  %vm3754_vm14 = vmor %vm3752_vm12, %vm3753_vm9 }
 0x28f   : > { %v3433_v20 = vadd.f32 %v3432_v39, %v3344_v55  ;;  %vm12886_vm13 = vcmp.eq.f32.partialorder %v3756_v1, 8.507059e+37  ;;  %v9534_v16 = vor.u32 %v10996_v61, %v9533_v3  ;;  %v4390_v55 = vrot.slane %v12864_v35, 4 }
 0x290   : > { %3385 = vmatmul.bf16.gmra.mxu2 %v9490_v31  ;;  %v4707_v26 = vsel %vm12870_vm6, %v4389_v9, %v4706_v19  ;;  %v4350_v47 = vpack.c.bf16 %v4198_v22, %v4198_v22  ;;  %v3750_v42 = vmul.f32 %v11353_v15, %v3749_v7  ;;  %v3771_v62 = vand.u32 2147483647, %v12859_v57  ;;  %v4304_v19 = vld [vmem:[#allocation3 + $0x2c] sm:$0x1] }
 0x291   : > { %4708 = vst [vmem:[#allocation3 + $0xc] sm:$0xf] %v4707_v26  ;;  %v12891_v29 = vadd.f32 %v12837_v30, %v3433_v20  ;;  %3474 = vmatmul.bf16.gmra.mxu3 %v9494_v18  ;;  %v3759_v26 = vor.u32 1.1754944e-38, %v3758_v14  ;;  %v3773_v7 = vand.u32 2147483648, %v12859_v57  ;;  %v12913_v18 = vpop.f32.mrf.mxu0  ;;  %vm3767_vm0 = vweird.f32 %v12859_v57 }
 0x292   : > { %v4392_v59 = vshrl.u32 %v4350_v47, 16  ;;  %v3751_v37 = vadd.f32 %v11353_v15, %v3750_v42  ;;  %v4395_v39 = vshll.u32 %v4350_v47, 16  ;;  %v4710_v42 = vld [vmem:[#allocation3 + $0x14] sm:$0x1]  ;;  %v4305_v47 = vsel %vm12809_vm10, 0, %v4304_v19 }
 0x293   : > { %v3346_v31 = vpop.f32.mrf.mxu2  ;;  %v12893_v33 = vpop.eup %11354  ;;  %4306 = vst [vmem:[#allocation3 + $0x2c] sm:$0x1] %v4305_v47  ;;  %vm12929_vm1 = vcmp.eq.f32.partialorder %v3771_v62, 8.507059e+37  ;;  %v4251_v47 = vld [vmem:[#allocation3 + $0x30] sm:$0x1] }
 0x294   : > { %v3347_v23 = vadd.f32 %v3346_v31, %v12577_v56  ;;  %v4394_v1 = vrot.slane %v4392_v59, 7  ;;  %v3755_v9 = vsel %vm3754_vm14, %v11353_v15, %v3751_v37  ;;  %v3763_v30 = vmul.f32 %v12893_v33, %v12859_v57  ;;  %v11357_v22 = vpop.eup %11356  ;;  %v3435_v15 = vpop.f32.mrf.mxu3  ;;  %v10995_v59 = vld [vmem:[#allocation2 + $0x398] sm:$0xf0] }
 0x295   : > { %v3760_v14 = vsel %vm12886_vm13, %v3759_v26, %v3755_v9  ;;  %v9936_v56 = vmul.f32 -1.442695, %v12891_v29  ;;  %3568 = vmatmul.bf16.gmra.mxu0 %v9534_v16  ;;  %vm3768_vm7 = vweird.f32 %v12893_v33  ;;  %v12917_v46 = vadd.f32 1.0, %v11357_v22  ;;  %v9569_v22 = vld [vmem:[#allocation2 + $0x3c8] sm:$0xf] }
 0x296   : > { %v4397_v3 = vor.u32 %v4395_v39, %v4394_v1  ;;  %v4399_v61 = vrot.slane %v4394_v1, 4  ;;  %v4199_v20 = vmul.f32 %v3760_v14, %v12825_v4  ;;  %v3764_v31 = vsub.f32 1.0, %v3763_v30  ;;  %v10991_v30 = vld [vmem:[#allocation2 + $0x37c] sm:$0xf]  ;;  %v9527_v14 = vld [vmem:[#allocation2 + $0x39c] sm:$0xf0]  ;;  %vm3769_vm3 = vmor %vm3767_vm0, %vm3768_vm7 }
 0x297   : > { %11358 = vpow2.f32 %v9936_v56  ;;  %v3436_v37 = vadd.f32 %v3435_v15, %v3347_v23  ;;  %v9526_v9 = vor.u32 %v10995_v59, %v9525_v6  ;;  %v3774_v57 = vor.u32 1.1754944e-38, %v3773_v7 }
 0x298   : > { %v4398_v26 = vsel %vm12903_vm15, %v4390_v55, %v4397_v3  ;;  %v4711_v19 = vsel %vm12788_vm8, %v4399_v61, %v4710_v42  ;;  %v4351_v39 = vpack.c.bf16 %v4199_v20, %v4199_v20  ;;  %v3765_v1 = vmul.f32 %v12893_v33, %v3764_v31  ;;  %v12924_v4 = vld [vmem:[#allocation3 + $0xc] sm:$0xf]  ;;  %v4713_v20 = vld [vmem:[#allocation3 + $0x18] sm:$0xf] }
 0x299   : > { %4709 = vst [vmem:[#allocation3 + $0x10] sm:$0xf] %v4398_v26  ;;  %11360 = vrcp.f32 %v12917_v46  ;;  %v12934_v42 = vadd.f32 %v12862_v11, %v3436_v37  ;;  %v4252_v11 = vsel %vm12788_vm8, 0, %v4251_v47  ;;  %v3263_v7 = vadd.f32 %v12616_v40, %v12626_v32  ;;  %v11255_v26 = vld [vmem:[%s15803_s3 + $0x78] sm:$0xff] }
 0x29a   : > { %4712 = vst [vmem:[#allocation3 + $0x14] sm:$0x1] %v4711_v19  ;;  %v4401_v23 = vshrl.u32 %v4351_v39, 16  ;;  %v3766_v55 = vadd.f32 %v12893_v33, %v3765_v1  ;;  %v4404_v56 = vshll.u32 %v4351_v39, 16  ;;  %v11263_v40 = vld [vmem:[%s15803_s3 + $0xb8] sm:$0xff]  ;;  %v9530_v32 = vor.u32 %v10991_v30, %v9527_v14  ;;  %7409 = vmatpush.bf16.msrb.mxu2 %v11255_v26 }
 0x29b   : > { %v3348_v16 = vpop.f32.mrf.mxu2  ;;  %4874 = vst [vmem:[#allocation4 + $0x48] sm:$0xf] %v12924_v4  ;;  %v9937_v3 = vmul.f32 -1.442695, %v12934_v42  ;;  %v12965_v39 = vadd.f32 %v12633_v60, %v12638_v49  ;;  %7498 = vmatpush.bf16.msrb.mxu3 %v11263_v40  ;;  %v11005_v60 = vld [vmem:[#allocation2 + $0x3e8] sm:$0xf0]  ;;  %v12978_v49 = vadd.f32 %v12646_v13, %v12654_v34  ;;  %v12982_v14 = vadd.f32 %v12656_v27, %v12661_v63 }
 0x29c   : > { %v3349_v15 = vadd.f32 %v3348_v16, %v12593_v0  ;;  %v12940_v6 = vrot.slane %v4401_v23, 7  ;;  %v3770_v62 = vsel %vm3769_vm3, %v12893_v33, %v3766_v55  ;;  %5576 = vst [vmem:[#allocation4 + $0xc] sm:$0xf] %v12924_v4  ;;  %v3437_v31 = vpop.f32.mrf.mxu3  ;;  %v12968_v16 = vpop.f32.mrf.mxu0  ;;  %v12988_v47 = vadd.f32 %v12666_v50, %v12669_v24  ;;  %v4717_v13 = vld [vmem:[#allocation3 + $0x20] sm:$0x1] }
 0x29d   : > { %v11359_v61 = vpop.eup %11358  ;;  %v3775_v0 = vsel %vm12929_vm1, %v3774_v57, %v3770_v62  ;;  %4253 = vst [vmem:[#allocation3 + $0x30] sm:$0x1] %v4252_v11  ;;  %11362 = vpow2.f32 %v9937_v3  ;;  %v9570_v63 = vor.u32 %v11005_v60, %v9569_v22  ;;  %vm3782_vm11 = vweird.f32 %v12917_v46  ;;  %v11004_v22 = vld [vmem:[#allocation2 + $0x3e0] sm:$0xf0] }
 0x29e   : > { %v4406_v59 = vor.u32 %v4404_v56, %v12940_v6  ;;  %v4200_v33 = vmul.f32 %v3775_v0, %v12835_v41  ;;  %v12953_v37 = vadd.f32 1.0, %v11359_v61  ;;  %v3786_v41 = vand.u32 2147483647, %v12917_v46 }
 0x29f   : > { %v12961_v19 = vpop.eup %11360  ;;  %v3438_v1 = vadd.f32 %v3437_v31, %v3349_v15  ;;  %v3788_v56 = vand.u32 2147483648, %v12917_v46  ;;  %v4407_v0 = vrot.slane %v12940_v6, 4 }
 0x2a0   : > { %3390 = vmatmul.bf16.gmra.mxu2 %v9526_v9  ;;  %v4714_v23 = vsel %vm12870_vm6, %v4406_v59, %v4713_v20  ;;  %v4352_v55 = vpack.c.bf16 %v4200_v33, %v4200_v33  ;;  %v3778_v9 = vmul.f32 %v12961_v19, %v12917_v46  ;;  %v12974_v30 = vld [vmem:[#allocation3 + $0x10] sm:$0xf]  ;;  %11364 = vrcp.f32 %v12953_v37  ;;  %v4307_v59 = vld [vmem:[#allocation3 + $0x38] sm:$0x1] }
 0x2a1   : > { %4715 = vst [vmem:[#allocation3 + $0x18] sm:$0xf] %v4714_v23  ;;  %v12991_v3 = vadd.f32 %v12913_v18, %v3438_v1  ;;  %3479 = vmatmul.bf16.gmra.mxu3 %v9530_v32  ;;  %vm3783_vm4 = vweird.f32 %v12961_v19  ;;  %vm12995_vm9 = vcmp.eq.f32.partialorder %v3786_v41, 8.507059e+37  ;;  %v11271_v18 = vld [vmem:[%s15803_s3 + $0xf8] sm:$0xff]  ;;  %v3789_v31 = vor.u32 1.1754944e-38, %v3788_v56 }
 0x2a2   : > { %v4409_v15 = vshrl.u32 %v4352_v55, 16  ;;  %v3779_v62 = vsub.f32 1.0, %v3778_v9  ;;  %4875 = vst [vmem:[#allocation4 + $0x6c] sm:$0xf] %v12974_v30  ;;  %v4412_v24 = vshll.u32 %v4352_v55, 16  ;;  %7587 = vmatpush.bf16.msrb.mxu0 %v11271_v18  ;;  %vm13015_vm12 = vmor %vm3782_vm11, %vm3783_vm4  ;;  %v3803_v46 = vand.u32 2147483648, %v12953_v37 }
 0x2a3   : > { %v3351_v57 = vpop.f32.mrf.mxu2  ;;  %5577 = vst [vmem:[#allocation4 + $0x30] sm:$0xf] %v12974_v30  ;;  %v9938_v61 = vmul.f32 -1.442695, %v12991_v3  ;;  %v11363_v20 = vpop.eup %11362  ;;  %v4308_v23 = vsel %vm12809_vm10, 0, %v4307_v59  ;;  %vm3797_vm7 = vweird.f32 %v12953_v37 }
 0x2a4   : > { %v3352_v27 = vadd.f32 %v3351_v57, %v3263_v7  ;;  %v4411_v50 = vrot.slane %v4409_v15, 7  ;;  %v3780_v11 = vmul.f32 %v12961_v19, %v3779_v62  ;;  %v3801_v7 = vand.u32 2147483647, %v12953_v37  ;;  %v3440_v33 = vpop.f32.mrf.mxu3  ;;  %v13022_v9 = vld [vmem:[#allocation2 + $0x3c0] sm:$0xf] }
 0x2a5   : > { %v13009_v41 = vadd.f32 1.0, %v11363_v20  ;;  %11366 = vpow2.f32 %v9938_v61  ;;  %3573 = vmatmul.bf16.gmra.mxu0 %v9570_v63  ;;  %4309 = vst [vmem:[#allocation3 + $0x38] sm:$0x1] %v4308_v23  ;;  %v13033_v62 = vld [vmem:[#allocation2 + $0x3c4] sm:$0xf]  ;;  %v13039_v63 = vadd.f32 %v12671_v17, %v12673_v28  ;;  %v13054_v17 = vadd.f32 %v12681_v21, %v12686_v5 }
 0x2a6   : > { %v4414_v26 = vor.u32 %v4412_v24, %v4411_v50  ;;  %v4416_v40 = vrot.slane %v4411_v50, 4  ;;  %v3781_v32 = vadd.f32 %v12961_v19, %v3780_v11  ;;  %v13011_v1 = vpop.eup %11364  ;;  %v3441_v55 = vadd.f32 %v3440_v33, %v3352_v27  ;;  %v13050_v18 = vld [vmem:[#allocation2 + $0x3e4] sm:$0xf0]  ;;  %v10019_v34 = vld [vmem:[#allocation4 + $0x48] sm:$0xf] }
 0x2a7   : > { %v3793_v15 = vmul.f32 %v13011_v1, %v12953_v37  ;;  %v13043_v50 = vadd.f32 %v12676_v58, %v12678_v25  ;;  %11368 = vrcp.f32 %v13009_v41  ;;  %vm13057_vm13 = vcmp.eq.f32.partialorder %v3801_v7, 8.507059e+37  ;;  %v13067_v21 = vld [vmem:[#allocation2 + $0x408] sm:$0xf]  ;;  %v13069_v5 = vld [vmem:[#allocation2 + $0x428] sm:$0xf0]  ;;  %v278_v25 = vld [vmem:[%s11717_s10 + $0x1a0] sm:$0xff] }
 0x2a8   : > { %v4415_v60 = vsel %vm12903_vm15, %v4407_v0, %v4414_v26  ;;  %v4718_v56 = vsel %vm12788_vm8, %v4416_v40, %v4717_v13  ;;  %v3785_v57 = vsel %vm13015_vm12, %v12961_v19, %v3781_v32  ;;  %v13035_v27 = vld [vmem:[#allocation3 + $0x18] sm:$0xf]  ;;  %v13048_v13 = vpop.f32.mrf.mxu0  ;;  %v13062_v61 = vadd.f32 %v12968_v16, %v3441_v55  ;;  %v4254_v33 = vld [vmem:[#allocation3 + $0x3c] sm:$0x1]  ;;  %v11262_v16 = vld [vmem:[%s15803_s3 + $0xb0] sm:$0xff] }
 0x2a9   : > { %4716 = vst [vmem:[#allocation3 + $0x1c] sm:$0xf] %v4415_v60  ;;  %v3790_v19 = vsel %vm12995_vm9, %v3789_v31, %v3785_v57  ;;  %v11109_v11 = vld [vmem:[#allocation4 + $0x68] sm:$0xf0]  ;;  %v3794_v58 = vsub.f32 1.0, %v3793_v15  ;;  %v9562_v31 = vor.u32 %v11004_v22, %v13022_v9  ;;  %vm3798_vm14 = vweird.f32 %v13011_v1  ;;  %v11270_v55 = vld [vmem:[%s15803_s3 + $0xf0] sm:$0xff]  ;;  %7499 = vmatpush.bf16.msrb.mxu3 %v11262_v16 }
 0x2aa   : > { %4719 = vst [vmem:[#allocation3 + $0x20] sm:$0x1] %v4718_v56  ;;  %v4201_v28 = vmul.f32 %v3790_v19, %v12852_v36  ;;  %v10020_v0 = vor.u32 %v11109_v11, %v10019_v34  ;;  %v3804_v59 = vor.u32 1.1754944e-38, %v3803_v46  ;;  %v13081_v40 = vadd.f32 %v12691_v45, %v12694_v54  ;;  %v11279_v22 = vld [vmem:[%s15803_s3 + $0x138] sm:$0xff]  ;;  %v13099_v60 = vld [vmem:[#allocation2 + $0x410] sm:$0xf]  ;;  %vm13106_vm0 = vmor %vm3797_vm7, %vm3798_vm14  ;;  %7588 = vmatpush.bf16.msrb.mxu0 %v11270_v55 }
 0x2ab   : > { %v3353_v24 = vpop.f32.mrf.mxu2  ;;  %4876 = vst [vmem:[#allocation4 + $0x90] sm:$0xf] %v13035_v27  ;;  %v3795_v7 = vmul.f32 %v13011_v1, %v3794_v58  ;;  %v11367_v26 = vpop.eup %11366  ;;  %v9939_v32 = vmul.f32 -1.442695, %v13062_v61  ;;  %v4255_v6 = vsel %vm12788_vm8, 0, %v4254_v33  ;;  %v9566_v23 = vor.u32 %v13033_v62, %v13050_v18  ;;  %v277_v56 = vld [vmem:[%s11717_s10 + $0x198] sm:$0xff]  ;;  %7676 = vmatpush.bf16.msrb.mxu1 %v11279_v22 }
 0x2ac   : > { %v3354_v20 = vadd.f32 %v3353_v24, %v12965_v39  ;;  %v4353_v36 = vpack.c.bf16 %v4201_v28, %v4201_v28  ;;  %v11254_v39 = vld [vmem:[%s15803_s3 + $0x70] sm:$0xff]  ;;  %v3442_v46 = vpop.f32.mrf.mxu3  ;;  %7333 = vmatmul.bf16.gmra.mxu1 %v10020_v0  ;;  %5578 = vst [vmem:[#allocation4 + $0x54] sm:$0xf] %v13035_v27  ;;  %v13094_v54 = vadd.f32 1.0, %v11367_v26  ;;  %v3816_v37 = vand.u32 2147483647, %v13009_v41 }
 0x2ad   : > { %v3796_v45 = vadd.f32 %v13011_v1, %v3795_v7  ;;  %4256 = vst [vmem:[#allocation3 + $0x3c] sm:$0x1] %v4255_v6  ;;  %7410 = vmatpush.bf16.msrb.mxu2 %v11254_v39  ;;  %v13102_v57 = vpop.eup %11368  ;;  %11370 = vpow2.f32 %v9939_v32  ;;  %v9598_v19 = vor.u32 %v13069_v5, %v13067_v21  ;;  %v11014_v24 = vld [vmem:[#allocation2 + $0x430] sm:$0xf0]  ;;  %v11261_v0 = vld [vmem:[%s15803_s3 + $0xa8] sm:$0xff]  ;;  %v13137_v39 = vpack.c.bf16 %v277_v56, %v277_v56 }
 0x2ae   : > { %v4418_v9 = vshrl.u32 %v4353_v36, 16  ;;  %v3443_v62 = vadd.f32 %v3442_v46, %v3354_v20  ;;  %5710 = vst [vmem:[#allocation4 + $0x18] sm:$0xf] %v13035_v27  ;;  %v4421_v18 = vshll.u32 %v4353_v36, 16  ;;  %v3808_v58 = vmul.f32 %v13102_v57, %v13009_v41  ;;  %v11253_v20 = vld [vmem:[%s15803_s3 + $0x68] sm:$0xff]  ;;  %7500 = vmatpush.bf16.msrb.mxu3 %v11261_v0 }
 0x2af   : > { %v3800_v28 = vsel %vm13106_vm0, %v13011_v1, %v3796_v45  ;;  %v3818_v1 = vand.u32 2147483648, %v13009_v41  ;;  %11372 = vrcp.f32 %v13094_v54  ;;  %v11269_v33 = vld [vmem:[%s15803_s3 + $0xe8] sm:$0xff]  ;;  %vm3813_vm1 = vweird.f32 %v13102_v57  ;;  %1208 = vst [vmem:[#allocation2 + $0x450] sm:$0xf] %v13137_v39 }
 0x2b0   : > { %3395 = vmatmul.bf16.gmra.mxu2 %v9562_v31  ;;  %v13114_v11 = vrot.slane %v4418_v9, 7  ;;  %v13121_v34 = vld [vmem:[#allocation3 + $0x1c] sm:$0xf]  ;;  %v4720_v31 = vld [vmem:[#allocation3 + $0x24] sm:$0xf]  ;;  %v3805_v36 = vsel %vm13057_vm13, %v3804_v59, %v3800_v28  ;;  %v3809_v32 = vsub.f32 1.0, %v3808_v58  ;;  %v13145_v6 = vadd.f32 %v13048_v13, %v3443_v62  ;;  %v3534_v46 = vpop.f32.mrf.mxu0  ;;  %7589 = vmatpush.bf16.msrb.mxu0 %v11269_v33 }
 0x2b1   : > { %4877 = vst [vmem:[#allocation4 + $0xb4] sm:$0xf] %v13121_v34  ;;  %v4202_v26 = vmul.f32 %v3805_v36, %v12891_v29  ;;  %3484 = vmatmul.bf16.gmra.mxu3 %v9566_v23  ;;  %7411 = vmatpush.bf16.msrb.mxu2 %v11253_v20  ;;  %v4929_v59 = vshrl.u32 %v12924_v4, 16  ;;  %v9606_v9 = vor.u32 %v11014_v24, %v13099_v60  ;;  %v13154_v22 = vld [vmem:[#allocation2 + $0x40c] sm:$0xf]  ;;  %vm3812_vm3 = vweird.f32 %v13009_v41  ;;  %v11252_v62 = vld [vmem:[%s15803_s3 + $0x60] sm:$0xff] }
 0x2b2   : > { %v4423_v16 = vor.u32 %v4421_v18, %v13114_v11  ;;  %5579 = vst [vmem:[#allocation4 + $0x78] sm:$0xf] %v13121_v34  ;;  %v3810_v45 = vmul.f32 %v13102_v57, %v3809_v32  ;;  %v13156_v13 = vld [vmem:[#allocation2 + $0x42c] sm:$0xf0]  ;;  %vm13160_vm4 = vcmp.eq.f32.partialorder %v3816_v37, 8.507059e+37  ;;  %v3819_v56 = vor.u32 1.1754944e-38, %v3818_v1  ;;  %vm13180_vm9 = vmor %vm3812_vm3, %vm3813_vm1 }
 0x2b3   : > { %v3356_v7 = vpop.f32.mrf.mxu2  ;;  %5711 = vst [vmem:[#allocation4 + $0x3c] sm:$0xf] %v13121_v34  ;;  %v4354_v23 = vpack.c.bf16 %v4202_v26, %v4202_v26  ;;  %v13167_v24 = vpack.c.bf16 %v278_v25, %v278_v25  ;;  %v4310_v20 = vld [vmem:[#allocation3 + $0x44] sm:$0x1]  ;;  %v1211_v37 = vshrl.u32 %v13137_v39, 16  ;;  %v9602_v33 = vor.u32 %v13154_v22, %v13156_v13 }
 0x2b4   : > { %v3357_v55 = vadd.f32 %v3356_v7, %v12978_v49  ;;  %v4721_v29 = vsel %vm12870_vm6, %v4423_v16, %v4720_v31  ;;  %v11371_v49 = vpop.eup %11370  ;;  %v3445_v15 = vpop.f32.mrf.mxu3  ;;  %v3811_v28 = vadd.f32 %v13102_v57, %v3810_v45  ;;  %v11260_v41 = vld [vmem:[%s15803_s3 + $0xa0] sm:$0xff]  ;;  %v9940_v36 = vmul.f32 -1.442695, %v13145_v6  ;;  %v4313_v22 = vld [vmem:[#allocation3 + $0x50] sm:$0x1] }
 0x2b5   : > { %4722 = vst [vmem:[#allocation3 + $0x24] sm:$0xf] %v4721_v29  ;;  %v4426_v18 = vshrl.u32 %v4354_v23, 16  ;;  %v13170_v58 = vadd.f32 1.0, %v11371_v49  ;;  %v13176_v0 = vpop.eup %11372  ;;  %v4311_v1 = vsel %vm12809_vm10, 0, %v4310_v20  ;;  %3578 = vmatmul.bf16.gmra.mxu0 %v9606_v9  ;;  %7412 = vmatpush.bf16.msrb.mxu2 %v11252_v62  ;;  %v11268_v16 = vld [vmem:[%s15803_s3 + $0xe0] sm:$0xff]  ;;  %vm3827_vm12 = vweird.f32 %v13094_v54 }
 0x2b6   : > { %v3446_v7 = vadd.f32 %v3445_v15, %v3357_v55  ;;  %1209 = vst [vmem:[#allocation2 + $0x474] sm:$0xf] %v13167_v24  ;;  %v4429_v32 = vshll.u32 %v4354_v23, 16  ;;  %v3815_v25 = vsel %vm13180_vm9, %v13102_v57, %v3811_v28  ;;  %v3823_v55 = vmul.f32 %v13176_v0, %v13094_v54  ;;  %7501 = vmatpush.bf16.msrb.mxu3 %v11260_v41  ;;  %v4724_v29 = vld [vmem:[#allocation3 + $0x2c] sm:$0x1] }
 0x2b7   : > { %v4428_v26 = vrot.slane %v4426_v18, 7  ;;  %4312 = vst [vmem:[#allocation3 + $0x44] sm:$0x1] %v4311_v1  ;;  %v4424_v9 = vrot.slane %v13114_v11, 4  ;;  %v3820_v45 = vsel %vm13160_vm4, %v3819_v56, %v3815_v25  ;;  %v3831_v49 = vand.u32 2147483647, %v13094_v54  ;;  %7590 = vmatpush.bf16.msrb.mxu0 %v11268_v16 }
 0x2b8   : > { %11374 = vrcp.f32 %v13170_v58  ;;  %v4203_v57 = vmul.f32 %v3820_v45, %v12934_v42  ;;  %v3824_v18 = vsub.f32 1.0, %v3823_v55  ;;  %v11118_v28 = vld [vmem:[#allocation4 + $0xb0] sm:$0xf0]  ;;  %vm3828_vm11 = vweird.f32 %v13176_v0  ;;  %v10055_v42 = vld [vmem:[#allocation4 + $0x90] sm:$0xf] }
 0x2b9   : > { %v4431_v15 = vor.u32 %v4429_v32, %v4428_v26  ;;  %v4433_v62 = vrot.slane %v4428_v26, 4  ;;  %v3833_v11 = vand.u32 2147483648, %v13094_v54  ;;  %11376 = vpow2.f32 %v9940_v36  ;;  %v3536_v36 = vpop.f32.mrf.mxu0  ;;  %v279_v32 = vld [vmem:[%s11717_s10 + $0x1a8] sm:$0x3]  ;;  %vm13229_vm14 = vmor %vm3827_vm12, %vm3828_vm11 }
 0x2ba   : > { %v13206_v60 = vadd.f32 %v3534_v46, %v3446_v7  ;;  %v4355_v41 = vpack.c.bf16 %v4203_v57, %v4203_v57  ;;  %v3825_v31 = vmul.f32 %v13176_v0, %v3824_v18  ;;  %v10056_v26 = vor.u32 %v11118_v28, %v10055_v42  ;;  %v4727_v18 = vld [vmem:[#allocation3 + $0x30] sm:$0xf] }
 0x2bb   : > { %v3358_v23 = vpop.f32.mrf.mxu2  ;;  %v4432_v56 = vsel %vm12903_vm15, %v4424_v9, %v4431_v15  ;;  %v4725_v20 = vsel %vm12788_vm8, %v4433_v62, %v4724_v29  ;;  %vm13220_vm13 = vcmp.eq.f32.partialorder %v3831_v49, 8.507059e+37  ;;  %v3846_v29 = vand.u32 2147483647, %v13170_v58  ;;  %v4257_v15 = vld [vmem:[#allocation3 + $0x48] sm:$0x1] }
 0x2bc   : > { %v13213_v1 = vld [vmem:[#allocation3 + $0x24] sm:$0xf]  ;;  %4723 = vst [vmem:[#allocation3 + $0x28] sm:$0xf] %v4432_v56  ;;  %v9941_v16 = vmul.f32 -1.442695, %v13206_v60  ;;  %v3359_v46 = vadd.f32 %v3358_v23, %v12982_v14  ;;  %v3447_v7 = vpop.f32.mrf.mxu3  ;;  %v3826_v55 = vadd.f32 %v13176_v0, %v3825_v31  ;;  %7338 = vmatmul.bf16.gmra.mxu1 %v10056_v26  ;;  %vm3842_vm7 = vweird.f32 %v13170_v58 }
 0x2bd   : > { %4726 = vst [vmem:[#allocation3 + $0x2c] sm:$0x1] %v4725_v20  ;;  %v4435_v25 = vshrl.u32 %v4355_v41, 16  ;;  %v3834_v14 = vor.u32 1.1754944e-38, %v3833_v11  ;;  %v3848_v23 = vand.u32 2147483648, %v13170_v58  ;;  %v4438_v57 = vshll.u32 %v4355_v41, 16 }
 0x2be   : > { %v13225_v45 = vpop.eup %11374  ;;  %11378 = vpow2.f32 %v9941_v16  ;;  %v3448_v62 = vadd.f32 %v3447_v7, %v3359_v46  ;;  %4878 = vst [vmem:[#allocation4 + $0xd8] sm:$0xf] %v13213_v1  ;;  %v3830_v28 = vsel %vm13229_vm14, %v13176_v0, %v3826_v55  ;;  %v4258_v5 = vsel %vm12788_vm8, 0, %v4257_v15  ;;  %v13253_v41 = vld [vmem:[#allocation2 + $0x450] sm:$0xf] }
 0x2bf   : > { %v13238_v49 = vrot.slane %v4435_v25, 7  ;;  %v3838_v11 = vmul.f32 %v13225_v45, %v13170_v58  ;;  %5580 = vst [vmem:[#allocation4 + $0x9c] sm:$0xf] %v13213_v1  ;;  %v11377_v56 = vpop.eup %11376  ;;  %v3835_v21 = vsel %vm13220_vm13, %v3834_v14, %v3830_v28  ;;  %v13255_v0 = vpack.c.bf16 %v279_v32, %v279_v32  ;;  %v4731_v58 = vld [vmem:[#allocation3 + $0x38] sm:$0x1] }
 0x2c0   : > { %3400 = vmatmul.bf16.gmra.mxu2 %v9598_v19  ;;  %v13250_v19 = vadd.f32 %v3536_v36, %v3448_v62  ;;  %5712 = vst [vmem:[#allocation4 + $0x60] sm:$0xf] %v13213_v1  ;;  %v4204_v42 = vmul.f32 %v3835_v21, %v12991_v3  ;;  %v13263_v36 = vld [vmem:[#allocation2 + $0x470] sm:$0xf0]  ;;  %vm13265_vm0 = vcmp.eq.f32.partialorder %v3846_v29, 8.507059e+37  ;;  %v3849_v7 = vor.u32 1.1754944e-38, %v3848_v23 }
 0x2c1   : > { %v4440_v31 = vor.u32 %v4438_v57, %v13238_v49  ;;  %v3839_v16 = vsub.f32 1.0, %v3838_v11  ;;  %4259 = vst [vmem:[#allocation3 + $0x48] sm:$0x1] %v4258_v5  ;;  %3489 = vmatmul.bf16.gmra.mxu3 %v9602_v33  ;;  %v13269_v26 = vadd.f32 1.0, %v11377_v56  ;;  %vm3843_vm1 = vweird.f32 %v13225_v45  ;;  %v3539_v11 = vpop.f32.mrf.mxu0 }
 0x2c2   : > { %v9942_v32 = vmul.f32 -1.442695, %v13250_v19  ;;  %v4356_v25 = vpack.c.bf16 %v4204_v42, %v4204_v42  ;;  %v9634_v54 = vor.u32 %v13263_v36, %v13253_v41  ;;  %v1214_v14 = vshll.u32 %v13137_v39, 16  ;;  %vm3844_vm3 = vmor %vm3842_vm7, %vm3843_vm1 }
 0x2c3   : > { %v3361_v20 = vpop.f32.mrf.mxu2  ;;  %v4728_v3 = vsel %vm12870_vm6, %v4440_v31, %v4727_v18  ;;  %v3840_v55 = vmul.f32 %v13225_v45, %v3839_v16  ;;  %v13276_v13 = vld [vmem:[#allocation3 + $0x28] sm:$0xf]  ;;  %11380 = vrcp.f32 %v13269_v26  ;;  %v13289_v57 = vrot.slane %v1211_v37, 4 }
 0x2c4   : > { %v11379_v33 = vpop.eup %11378  ;;  %4729 = vst [vmem:[#allocation3 + $0x30] sm:$0xf] %v4728_v3  ;;  %v3362_v9 = vadd.f32 %v3361_v20, %v12988_v47  ;;  %v3450_v29 = vpop.f32.mrf.mxu3  ;;  %v4443_v23 = vshrl.u32 %v4356_v25, 16  ;;  %v3861_v47 = vand.u32 2147483647, %v13269_v26  ;;  %v3863_v18 = vand.u32 2147483648, %v13269_v26 }
 0x2c5   : > { %v3841_v15 = vadd.f32 %v13225_v45, %v3840_v55  ;;  %v13284_v62 = vadd.f32 1.0, %v11379_v33  ;;  %4879 = vst [vmem:[#allocation4 + $0xfc] sm:$0xf] %v13276_v13  ;;  %11382 = vpow2.f32 %v9942_v32  ;;  %v4314_v28 = vsel %vm12809_vm10, 0, %v4313_v22 }
 0x2c6   : > { %v4445_v56 = vrot.slane %v4443_v23, 7  ;;  %v4446_v21 = vshll.u32 %v4356_v25, 16  ;;  %4315 = vst [vmem:[#allocation3 + $0x50] sm:$0x1] %v4314_v28  ;;  %v4441_v37 = vrot.slane %v13238_v49, 4  ;;  %v3451_v31 = vadd.f32 %v3450_v29, %v3362_v9 }
 0x2c7   : > { %v3845_v5 = vsel %vm3844_vm3, %v13225_v45, %v3841_v15  ;;  %11384 = vrcp.f32 %v13284_v62  ;;  %v1216_v16 = vrot.slane %v1214_v14, 5  ;;  %5581 = vst [vmem:[#allocation4 + $0xc0] sm:$0xf] %v13276_v13  ;;  %v1220_v45 = vshll.u32 %v13167_v24, 16 }
 0x2c8   : > { %v3850_v20 = vsel %vm13265_vm0, %v3849_v7, %v3845_v5  ;;  %v4448_v32 = vor.u32 %v4446_v21, %v4445_v56  ;;  %v4450_v3 = vrot.slane %v4445_v56, 4  ;;  %v13309_v22 = vor.u32 1.1754944e-38, %v3863_v18  ;;  %5713 = vst [vmem:[#allocation4 + $0x84] sm:$0xf] %v13276_v13  ;;  %v11278_v18 = vld [vmem:[%s15803_s3 + $0x130] sm:$0xff] }
 0x2c9   : > { %v4205_v55 = vmul.f32 %v3850_v20, %v13062_v61  ;;  %v13307_v25 = vpop.eup %11380  ;;  %v3876_v49 = vand.u32 2147483647, %v13284_v62  ;;  %v13312_v33 = vadd.f32 %v3539_v11, %v3451_v31  ;;  %vm13322_vm4 = vcmp.eq.f32.partialorder %v3861_v47, 8.507059e+37  ;;  %7677 = vmatpush.bf16.msrb.mxu1 %v11278_v18 }
 0x2ca   : > { %v4449_v7 = vsel %vm12903_vm15, %v4441_v37, %v4448_v32  ;;  %v4732_v61 = vsel %vm12788_vm8, %v4450_v3, %v4731_v58  ;;  %v3853_v29 = vmul.f32 %v13307_v25, %v13269_v26  ;;  %vm3857_vm9 = vweird.f32 %v13269_v26  ;;  %v4734_v58 = vld [vmem:[#allocation3 + $0x3c] sm:$0xf] }
 0x2cb   : > { %v3363_v42 = vpop.f32.mrf.mxu2  ;;  %v4357_v9 = vpack.c.bf16 %v4205_v55, %v4205_v55  ;;  %v13326_v23 = vld [vmem:[#allocation3 + $0x30] sm:$0xf]  ;;  %v11383_v15 = vpop.eup %11382  ;;  %4730 = vst [vmem:[#allocation3 + $0x34] sm:$0xf] %v4449_v7  ;;  %v9943_v28 = vmul.f32 -1.442695, %v13312_v33  ;;  %v1217_v11 = vor.u32 %v1216_v16, %v13289_v57  ;;  %vm3872_vm11 = vweird.f32 %v13284_v62 }
 0x2cc   : > { %v3364_v46 = vadd.f32 %v3363_v42, %v13039_v63  ;;  %v3878_v63 = vand.u32 2147483648, %v13284_v62  ;;  %4733 = vst [vmem:[#allocation3 + $0x38] sm:$0x1] %v4732_v61  ;;  %v3854_v21 = vsub.f32 1.0, %v3853_v29  ;;  %v13338_v5 = vadd.f32 1.0, %v11383_v15  ;;  %v3452_v37 = vpop.f32.mrf.mxu3 }
 0x2cd   : > { %v13335_v47 = vpop.eup %11384  ;;  %v4452_v56 = vshrl.u32 %v4357_v9, 16  ;;  %vm3858_vm12 = vweird.f32 %v13307_v25  ;;  %vm13343_vm13 = vcmp.eq.f32.partialorder %v3876_v49, 8.507059e+37  ;;  %11386 = vpow2.f32 %v9943_v28  ;;  %v4260_v57 = vld [vmem:[#allocation3 + $0x54] sm:$0x1]  ;;  %v11251_v49 = vld [vmem:[%s15803_s3 + $0x58] sm:$0xff] }
 0x2ce   : > { %v3868_v20 = vmul.f32 %v13335_v47, %v13284_v62  ;;  %v3453_v42 = vadd.f32 %v3452_v37, %v3364_v46  ;;  %v11127_v16 = vld [vmem:[#allocation4 + $0xf8] sm:$0xf0]  ;;  %v4455_v3 = vshll.u32 %v4357_v9, 16  ;;  %v3855_v55 = vmul.f32 %v13307_v25, %v3854_v21  ;;  %v11259_v46 = vld [vmem:[%s15803_s3 + $0x98] sm:$0xff]  ;;  %4880 = vst [vmem:[#allocation4 + $0x120] sm:$0xf] %v13326_v23  ;;  %7413 = vmatpush.bf16.msrb.mxu2 %v11251_v49  ;;  %vm13375_vm7 = vmor %vm3857_vm9, %vm3858_vm12 }
 0x2cf   : > { %v13350_v32 = vrot.slane %v4452_v56, 7  ;;  %11388 = vrcp.f32 %v13338_v5  ;;  %v3879_v41 = vor.u32 1.1754944e-38, %v3878_v63  ;;  %v4261_v36 = vsel %vm12788_vm8, 0, %v4260_v57  ;;  %v11267_v9 = vld [vmem:[%s15803_s3 + $0xd8] sm:$0xff]  ;;  %v10091_v28 = vld [vmem:[#allocation4 + $0xd8] sm:$0xf]  ;;  %7502 = vmatpush.bf16.msrb.mxu3 %v11259_v46 }
 0x2d0   : > { %3405 = vmatmul.bf16.gmra.mxu2 %v9634_v54  ;;  %v3869_v7 = vsub.f32 1.0, %v3868_v20  ;;  %v3541_v54 = vpop.f32.mrf.mxu0  ;;  %v1218_v61 = vrot.slane %v1217_v11, 4  ;;  %v3856_v15 = vadd.f32 %v13307_v25, %v3855_v55  ;;  %vm3873_vm14 = vweird.f32 %v13335_v47  ;;  %4262 = vst [vmem:[#allocation3 + $0x54] sm:$0x1] %v4261_v36  ;;  %7591 = vmatpush.bf16.msrb.mxu0 %v11267_v9 }
 0x2d1   : > { %v4457_v29 = vor.u32 %v4455_v3, %v13350_v32  ;;  %v13369_v18 = vadd.f32 %v3541_v54, %v3453_v42  ;;  %v3891_v56 = vand.u32 2147483647, %v13338_v5  ;;  %v3893_v21 = vand.u32 2147483648, %v13338_v5  ;;  %5582 = vst [vmem:[#allocation4 + $0xe4] sm:$0xf] %v13326_v23  ;;  %vm13414_vm0 = vmor %vm3872_vm11, %vm3873_vm14 }
 0x2d2   : > { %v3870_v11 = vmul.f32 %v13335_v47, %v3869_v7  ;;  %v10092_v37 = vor.u32 %v11127_v16, %v10091_v28  ;;  %v3860_v26 = vsel %vm13375_vm7, %v13307_v25, %v3856_v15  ;;  %v4316_v42 = vld [vmem:[#allocation3 + $0x5c] sm:$0x1]  ;;  %v1222_v3 = vrot.slane %v1220_v45, 5  ;;  %v11250_v16 = vld [vmem:[%s15803_s3 + $0x50] sm:$0xff]  ;;  %5714 = vst [vmem:[#allocation4 + $0xa8] sm:$0xf] %v13326_v23 }
 0x2d3   : > { %v4735_v20 = vsel %vm12870_vm6, %v4457_v29, %v4734_v58  ;;  %v9944_v57 = vmul.f32 -1.442695, %v13369_v18  ;;  %v11387_v55 = vpop.eup %11386  ;;  %v3865_v58 = vsel %vm13322_vm4, %v13309_v22, %v3860_v26  ;;  %v4317_v25 = vsel %vm12809_vm10, 0, %v4316_v42  ;;  %v11258_v45 = vld [vmem:[%s15803_s3 + $0x90] sm:$0xff]  ;;  %v13422_v29 = vpop.f32.mrf.mxu2  ;;  %7414 = vmatpush.bf16.msrb.mxu2 %v11250_v16  ;;  %v11265_v16 = vld [vmem:[%s15803_s3 + $0xc8] sm:$0xff] }
 0x2d4   : > { %4736 = vst [vmem:[#allocation3 + $0x3c] sm:$0xf] %v4735_v20  ;;  %v3871_v49 = vadd.f32 %v13335_v47, %v3870_v11  ;;  %7343 = vmatmul.bf16.gmra.mxu1 %v10092_v37  ;;  %v1224_v46 = vshrl.u32 %v13167_v24, 16  ;;  %v11266_v7 = vld [vmem:[%s15803_s3 + $0xd0] sm:$0xff]  ;;  %v4206_v22 = vmul.f32 %v3865_v58, %v13145_v6  ;;  %v13418_v54 = vadd.f32 1.0, %v11387_v55  ;;  %7503 = vmatpush.bf16.msrb.mxu3 %v11258_v45  ;;  %v11257_v37 = vld [vmem:[%s15803_s3 + $0x88] sm:$0xff]  ;;  %v13457_v58 = vpop.f32.mrf.mxu3 }
 0x2d5   : > { %v13407_v36 = vpop.eup %11388  ;;  %11390 = vpow2.f32 %v9944_v57  ;;  %4318 = vst [vmem:[#allocation3 + $0x5c] sm:$0x1] %v4317_v25  ;;  %v1223_v9 = vsel %vm11771_vm2, %v1218_v61, %v1222_v3  ;;  %v13424_v15 = vld [vmem:[#allocation3 + $0x34] sm:$0xf]  ;;  %vm3887_vm1 = vweird.f32 %v13338_v5  ;;  %7592 = vmatpush.bf16.msrb.mxu0 %v11266_v7  ;;  %v4458_v61 = vrot.slane %v13350_v32, 4 }
 0x2d6   : > { %v3875_v6 = vsel %vm13414_vm0, %v13335_v47, %v3871_v49  ;;  %v3883_v62 = vmul.f32 %v13407_v36, %v13338_v5  ;;  %v1226_v28 = vrot.slane %v1224_v46, 4  ;;  %1266 = vst [vmem:[#allocation2 + $0x454] sm:$0xf] %v1223_v9  ;;  %v4358_v63 = vpack.c.bf16 %v4206_v22, %v4206_v22  ;;  %v11249_v47 = vld [vmem:[%s15803_s3 + $0x48] sm:$0xff]  ;;  %v4738_v7 = vld [vmem:[#allocation3 + $0x44] sm:$0x1] }
 0x2d7   : > { %v3880_v11 = vsel %vm13343_vm13, %v3879_v41, %v3875_v6  ;;  %11392 = vrcp.f32 %v13418_v54  ;;  %4881 = vst [vmem:[#allocation4 + $0x144] sm:$0xf] %v13424_v15  ;;  %vm13444_vm3 = vcmp.eq.f32.partialorder %v3891_v56, 8.507059e+37  ;;  %v3894_v31 = vor.u32 1.1754944e-38, %v3893_v21  ;;  %7415 = vmatpush.bf16.msrb.mxu2 %v11249_v47 }
 0x2d8   : > { %v4207_v20 = vmul.f32 %v3880_v11, %v13206_v60  ;;  %v3884_v26 = vsub.f32 1.0, %v3883_v62  ;;  %v4460_v41 = vshrl.u32 %v4358_v63, 16  ;;  %vm3888_vm4 = vweird.f32 %v13407_v36  ;;  %5583 = vst [vmem:[#allocation4 + $0x108] sm:$0xf] %v13424_v15  ;;  %7504 = vmatpush.bf16.msrb.mxu3 %v11257_v37  ;;  %v11248_v62 = vld [vmem:[%s15803_s3 + $0x40] sm:$0xff] }
 0x2d9   : > { %v1227_v57 = vor.u32 %v1226_v28, %v1222_v3  ;;  %v1230_v42 = vshll.u32 %v13255_v0, 16  ;;  %v3906_v55 = vand.u32 2147483647, %v13418_v54  ;;  %v3908_v21 = vand.u32 2147483648, %v13418_v54  ;;  %7593 = vmatpush.bf16.msrb.mxu0 %v11265_v16  ;;  %5715 = vst [vmem:[#allocation4 + $0xcc] sm:$0xf] %v13424_v15  ;;  %vm13475_vm11 = vmor %vm3887_vm1, %vm3888_vm4 }
 0x2da   : > { %v4359_v60 = vpack.c.bf16 %v4207_v20, %v4207_v20  ;;  %v3885_v56 = vmul.f32 %v13407_v36, %v3884_v26  ;;  %v4462_v49 = vrot.slane %v4460_v41, 7  ;;  %v4463_v25 = vshll.u32 %v4358_v63, 16  ;;  %v13479_v20 = vpop.f32.mrf.mxu0  ;;  %v11256_v26 = vld [vmem:[%s15803_s3 + $0x80] sm:$0xff] }
 0x2db   : > { %v11391_v3 = vpop.eup %11390  ;;  %v1228_v46 = vrot.slane %v1227_v57, 4  ;;  %v1232_v45 = vrot.slane %v1230_v42, 5  ;;  %vm3902_vm9 = vweird.f32 %v13418_v54  ;;  %v9066_v6 = vrot.slane %v13137_v39, 9  ;;  %v11264_v41 = vld [vmem:[%s15803_s3 + $0xc0] sm:$0xff]  ;;  %7416 = vmatpush.bf16.msrb.mxu2 %v11248_v62 }
 0x2dc   : > { %v4469_v22 = vshrl.u32 %v4359_v60, 16  ;;  %v3886_v14 = vadd.f32 %v13407_v36, %v3885_v56  ;;  %v13463_v9 = vadd.f32 1.0, %v11391_v3  ;;  %v4465_v63 = vor.u32 %v4463_v25, %v4462_v49  ;;  %7505 = vmatpush.bf16.msrb.mxu3 %v11256_v26 }
 0x2dd   : > { %v13469_v28 = vpop.eup %11392  ;;  %v4467_v11 = vrot.slane %v4462_v49, 4  ;;  %v4472_v47 = vshll.u32 %v4359_v60, 16  ;;  %v1233_v39 = vsel %vm11771_vm2, %v1228_v46, %v1232_v45  ;;  %vm13496_vm12 = vcmp.eq.f32.partialorder %v3906_v55, 8.507059e+37  ;;  %v4741_v49 = vld [vmem:[#allocation3 + $0x48] sm:$0xf]  ;;  %v3368_v55 = vpop.f32.mrf.mxu2  ;;  %7594 = vmatpush.bf16.msrb.mxu0 %v11264_v41 }
 0x2de   : > { %v13489_v57 = vrot.slane %v4469_v22, 7  ;;  %v3890_v5 = vsel %vm13475_vm11, %v13407_v36, %v3886_v14  ;;  %v3898_v42 = vmul.f32 %v13469_v28, %v13418_v54  ;;  %1267 = vst [vmem:[#allocation2 + $0x478] sm:$0xf] %v1233_v39  ;;  %v1273_v60 = vrot.slane %v13167_v24, 5  ;;  %v13510_v22 = vld [vmem:[#allocation3 + $0x3c] sm:$0xf] }
 0x2df   : > { %v4466_v56 = vsel %vm12903_vm15, %v4458_v61, %v4465_v63  ;;  %v4739_v3 = vsel %vm12788_vm8, %v4467_v11, %v4738_v7  ;;  %v3895_v36 = vsel %vm13444_vm3, %v3894_v31, %v3890_v5  ;;  %11394 = vrcp.f32 %v13463_v9  ;;  %v4295_v61 = vld [vmem:[#allocation3 + $0x8] sm:$0x1]  ;;  %v10127_v63 = vld [vmem:[#allocation4 + $0x120] sm:$0xf]  ;;  %v11136_v11 = vld [vmem:[#allocation4 + $0x140] sm:$0xf0] }
 0x2e0   : > { %4737 = vst [vmem:[#allocation3 + $0x40] sm:$0xf] %v4466_v56  ;;  %v4474_v25 = vor.u32 %v4472_v47, %v13489_v57  ;;  %v4208_v24 = vmul.f32 %v3895_v36, %v13250_v19  ;;  %v3899_v46 = vsub.f32 1.0, %v3898_v42  ;;  %v3909_v45 = vor.u32 1.1754944e-38, %v3908_v21  ;;  %v11018_v42 = vld [vmem:[#allocation2 + $0x454] sm:$0xf]  ;;  %v3457_v56 = vpop.f32.mrf.mxu3 }
 0x2e1   : > { %4740 = vst [vmem:[#allocation3 + $0x44] sm:$0x1] %v4739_v3  ;;  %vm3903_vm13 = vweird.f32 %v13469_v28  ;;  %v3921_v32 = vand.u32 2147483647, %v13463_v9  ;;  %v3923_v31 = vand.u32 2147483648, %v13463_v9  ;;  %v1274_v7 = vsel %vm12270_vm5, %v9066_v6, %v1273_v60 }
 0x2e2   : > { %v4742_v14 = vsel %vm12870_vm6, %v4474_v25, %v4741_v49  ;;  %v4360_v62 = vpack.c.bf16 %v4208_v24, %v4208_v24  ;;  %v3900_v19 = vmul.f32 %v13469_v28, %v3899_v46  ;;  %v1275_v21 = vrot.slane %v1273_v60, 4  ;;  %1310 = vst [vmem:[#allocation2 + $0x458] sm:$0xf] %v1274_v7  ;;  %vm3904_vm7 = vmor %vm3902_vm9, %vm3903_vm13  ;;  %v4263_v3 = vld [vmem:[#allocation3 + $0x60] sm:$0x1] }
 0x2e3   : > { %v4475_v47 = vrot.slane %v13489_v57, 4  ;;  %4743 = vst [vmem:[#allocation3 + $0x48] sm:$0xf] %v4742_v14  ;;  %v13521_v37 = vor.u32 1.1754944e-38, %v3923_v31  ;;  %v1276_v39 = vrot.slane %v13255_v0, 5  ;;  %v3367_v6 = vadd.f32 %v13422_v29, %v13043_v50  ;;  %v3546_v31 = vpop.f32.mrf.mxu0 }
 0x2e4   : > { %v4477_v26 = vshrl.u32 %v4360_v62, 16  ;;  %v4480_v41 = vshll.u32 %v4360_v62, 16  ;;  %v3901_v5 = vadd.f32 %v13469_v28, %v3900_v19  ;;  %vm3917_vm14 = vweird.f32 %v13463_v9  ;;  %4882 = vst [vmem:[#allocation4 + $0x168] sm:$0xf] %v13510_v22 }
 0x2e5   : > { %v3369_v60 = vadd.f32 %v3368_v55, %v13054_v17  ;;  %v13530_v57 = vpop.eup %11394  ;;  %v9635_v50 = vld [vmem:[#allocation2 + $0x474] sm:$0xf0]  ;;  %v1277_v0 = vsel %vm12270_vm5, %v1275_v21, %v1276_v39  ;;  %v3456_v29 = vadd.f32 %v13457_v58, %v3367_v6  ;;  %v10128_v49 = vor.u32 %v11136_v11, %v10127_v63  ;;  %v4745_v55 = vld [vmem:[#allocation3 + $0x50] sm:$0x1]  ;;  %v13562_v63 = vpop.f32.mrf.mxu2  ;;  %5584 = vst [vmem:[#allocation4 + $0x12c] sm:$0xf] %v13510_v22 }
 0x2e6   : > { %v4296_v17 = vsel %vm12809_vm10, 0, %v4295_v61  ;;  %v4479_v36 = vrot.slane %v4477_v26, 7  ;;  %v3905_v25 = vsel %vm3904_vm7, %v13469_v28, %v3901_v5  ;;  %v3913_v24 = vmul.f32 %v13530_v57, %v13463_v9  ;;  %1311 = vst [vmem:[#allocation2 + $0x47c] sm:$0xf] %v1277_v0  ;;  %v4748_v9 = vld [vmem:[#allocation3 + $0x54] sm:$0xf] }
 0x2e7   : > { %vm3918_vm0 = vweird.f32 %v13530_v57  ;;  %vm13545_vm1 = vcmp.eq.f32.partialorder %v3921_v32, 8.507059e+37  ;;  %v3910_v58 = vsel %vm13496_vm12, %v3909_v45, %v3905_v25  ;;  %v9638_v46 = vor.u32 %v11018_v42, %v9635_v50  ;;  %7348 = vmatmul.bf16.gmra.mxu1 %v10128_v49  ;;  %4297 = vst [vmem:[#allocation3 + $0x8] sm:$0x1] %v4296_v17  ;;  %v13556_v7 = vld [vmem:[#allocation3 + $0x40] sm:$0xf] }
 0x2e8   : > { %v13552_v61 = vadd.f32 %v13479_v20, %v3456_v29  ;;  %v4264_v28 = vsel %vm12788_vm8, 0, %v4263_v3  ;;  %v4482_v32 = vor.u32 %v4480_v41, %v4479_v36  ;;  %v4484_v14 = vrot.slane %v4479_v36, 4  ;;  %4883 = vst [vmem:[#allocation4 + $0x18c] sm:$0xf] %v13556_v7  ;;  %vm3919_vm3 = vmor %vm3917_vm14, %vm3918_vm0 }
 0x2e9   : > { %v4209_v62 = vmul.f32 %v3910_v58, %v13312_v33  ;;  %v3914_v19 = vsub.f32 1.0, %v3913_v24  ;;  %4265 = vst [vmem:[#allocation3 + $0x60] sm:$0x1] %v4264_v28  ;;  %3494 = vmatmul.bf16.gmra.mxu3 %v9638_v46  ;;  %v3458_v45 = vadd.f32 %v3457_v56, %v3369_v60  ;;  %v4905_v20 = vshrl.u32 %v12802_v51, 16  ;;  %v9641_v26 = vld [vmem:[#allocation2 + $0x458] sm:$0xf]  ;;  %v13584_v46 = vpop.f32.mrf.mxu3 }
 0x2ea   : > { %v9945_v16 = vmul.f32 -1.442695, %v13552_v61  ;;  %v4908_v21 = vshll.u32 %v12802_v51, 16  ;;  %v4483_v11 = vsel %vm12903_vm15, %v4475_v47, %v4482_v32  ;;  %v4746_v39 = vsel %vm12788_vm8, %v4484_v14, %v4745_v55  ;;  %5585 = vst [vmem:[#allocation4 + $0x150] sm:$0xf] %v13556_v7 }
 0x2eb   : > { %v4361_v6 = vpack.c.bf16 %v4209_v62, %v4209_v62  ;;  %v3915_v33 = vmul.f32 %v13530_v57, %v3914_v19  ;;  %4744 = vst [vmem:[#allocation3 + $0x4c] sm:$0xf] %v4483_v11  ;;  %v13570_v41 = vadd.f32 %v3546_v31, %v3458_v45  ;;  %v4907_v5 = vrot.slane %v4905_v20, 4  ;;  %v4319_v14 = vld [vmem:[#allocation3 + $0x68] sm:$0x1]  ;;  %v13597_v54 = vpop.f32.mrf.mxu0 }
 0x2ec   : > { %11396 = vpow2.f32 %v9945_v16  ;;  %v4910_v42 = vrot.slane %v4908_v21, 5  ;;  %4747 = vst [vmem:[#allocation3 + $0x50] sm:$0x1] %v4746_v39  ;;  %v4914_v50 = vshll.u32 %v12804_v8, 16  ;;  %v4918_v49 = vshrl.u32 %v12804_v8, 16 }
 0x2ed   : > { %v4486_v60 = vshrl.u32 %v4361_v6, 16  ;;  %v4489_v56 = vshll.u32 %v4361_v6, 16  ;;  %v3916_v47 = vadd.f32 %v13530_v57, %v3915_v33  ;;  %v11023_v0 = vld [vmem:[#allocation2 + $0x478] sm:$0xf0]  ;;  %v9946_v29 = vmul.f32 -1.442695, %v13570_v41 }
 0x2ee   : > { %v4911_v3 = vor.u32 %v4910_v42, %v4907_v5  ;;  %v9963_v17 = vrot.slane %v12802_v51, 9  ;;  %v9642_v25 = vor.u32 %v11023_v0, %v9641_v26  ;;  %v4820_v24 = vld [vmem:[#allocation3 + $0x8] sm:$0x1]  ;;  %v4916_v58 = vrot.slane %v4914_v50, 5  ;;  %5716 = vst [vmem:[#allocation4 + $0xf0] sm:$0xf] %v13510_v22 }
 0x2ef   : > { %v13581_v36 = vrot.slane %v4486_v60, 7  ;;  %v3920_v55 = vsel %vm3919_vm3, %v13530_v57, %v3916_v47  ;;  %11398 = vpow2.f32 %v9946_v29  ;;  %v4920_v32 = vrot.slane %v4918_v49, 4  ;;  %5717 = vst [vmem:[#allocation4 + $0x114] sm:$0xf] %v13556_v7  ;;  %v3373_v60 = vpop.f32.mrf.mxu2  ;;  %v11145_v47 = vld [vmem:[#allocation4 + $0x188] sm:$0xf0] }
 0x2f0   : > { %v3925_v28 = vsel %vm13545_vm1, %v13521_v37, %v3920_v55  ;;  %v4912_v31 = vrot.slane %v4911_v3, 4  ;;  %3583 = vmatmul.bf16.gmra.mxu0 %v9642_v25  ;;  %v4924_v62 = vshll.u32 %v4820_v24, 16  ;;  %v4932_v19 = vshll.u32 %v12924_v4, 16  ;;  %v4752_v3 = vld [vmem:[#allocation3 + $0x5c] sm:$0x1] }
 0x2f1   : > { %v4491_v51 = vor.u32 %v4489_v56, %v13581_v36  ;;  %v4210_v57 = vmul.f32 %v3925_v28, %v13369_v18  ;;  %v4320_v37 = vsel %vm12809_vm10, 0, %v4319_v14  ;;  %v4921_v20 = vor.u32 %v4920_v32, %v4916_v58  ;;  %v3462_v14 = vpop.f32.mrf.mxu3 }
 0x2f2   : > { %v11397_v16 = vpop.eup %11396  ;;  %v4917_v45 = vsel %vm11771_vm2, %v4912_v31, %v4916_v58  ;;  %v5402_v21 = vrot.slane %v12804_v8, 5  ;;  %4321 = vst [vmem:[#allocation3 + $0x68] sm:$0x1] %v4320_v37  ;;  %v4926_v6 = vrot.slane %v4924_v62, 5  ;;  %v5405_v42 = vrot.slane %v4820_v24, 5 }
 0x2f3   : > { %v4749_v18 = vsel %vm12870_vm6, %v4491_v51, %v4748_v9  ;;  %v4362_v11 = vpack.c.bf16 %v4210_v57, %v4210_v57  ;;  %v13605_v39 = vadd.f32 1.0, %v11397_v16  ;;  %v4922_v33 = vrot.slane %v4921_v20, 4  ;;  %5320 = vst [vmem:[#allocation4 + $0x4] sm:$0xf] %v4917_v45  ;;  %v10163_v58 = vld [vmem:[#allocation4 + $0x168] sm:$0xf] }
 0x2f4   : > { %4750 = vst [vmem:[#allocation3 + $0x54] sm:$0xf] %v4749_v18  ;;  %v5403_v26 = vsel %vm12270_vm5, %v9963_v17, %v5402_v21  ;;  %v5404_v5 = vrot.slane %v5402_v21, 4  ;;  %v3285_v8 = vadd.f32 %v12696_v10, %v12698_v53  ;;  %v4931_v50 = vrot.slane %v4929_v59, 4  ;;  %v11277_v17 = vld [vmem:[%s15803_s3 + $0x128] sm:$0xff] }
 0x2f5   : > { %v4494_v56 = vshrl.u32 %v4362_v11, 16  ;;  %11400 = vrcp.f32 %v13605_v39  ;;  %v11399_v0 = vpop.eup %11398  ;;  %v4497_v29 = vshll.u32 %v4362_v11, 16  ;;  %v3938_v49 = vand.u32 2147483648, %v13605_v39  ;;  %5544 = vst [vmem:[#allocation4 + $0x8] sm:$0xf] %v5403_v26  ;;  %7678 = vmatpush.bf16.msrb.mxu1 %v11277_v17 }
 0x2f6   : > { %v4927_v10 = vsel %vm11771_vm2, %v4922_v33, %v4926_v6  ;;  %v5406_v53 = vsel %vm12270_vm5, %v5404_v5, %v5405_v42  ;;  %v13622_v25 = vadd.f32 1.0, %v11399_v0  ;;  %v3372_v59 = vadd.f32 %v13562_v63, %v13081_v40  ;;  %v11097_v45 = vld [vmem:[#allocation4 + $0xc] sm:$0xf]  ;;  %v4266_v20 = vld [vmem:[#allocation3 + $0x6c] sm:$0x1]  ;;  %v3551_v5 = vpop.f32.mrf.mxu0 }
 0x2f7   : > { %v4496_v55 = vrot.slane %v4494_v56, 7  ;;  %5321 = vst [vmem:[#allocation4 + $0x28] sm:$0xf] %v4927_v10  ;;  %v3374_v24 = vadd.f32 %v3373_v60, %v3285_v8  ;;  %v3936_v9 = vand.u32 2147483647, %v13605_v39  ;;  %v10164_v28 = vor.u32 %v11145_v47, %v10163_v58 }
 0x2f8   : > { %5545 = vst [vmem:[#allocation4 + $0x2c] sm:$0xf] %v5406_v53  ;;  %v4934_v31 = vrot.slane %v4932_v19, 5  ;;  %v4492_v32 = vrot.slane %v13581_v36, 4  ;;  %11402 = vrcp.f32 %v13622_v25  ;;  %v13629_v62 = vor.u32 1.1754944e-38, %v3938_v49 }
 0x2f9   : > { %v4499_v51 = vor.u32 %v4497_v29, %v4496_v55  ;;  %v4501_v57 = vrot.slane %v4496_v55, 4  ;;  %v3461_v16 = vadd.f32 %v13584_v46, %v3372_v59  ;;  %v3463_v40 = vadd.f32 %v3462_v14, %v3374_v24  ;;  %7353 = vmatmul.bf16.gmra.mxu1 %v10164_v28  ;;  %v9993_v36 = vld [vmem:[#allocation4 + $0x2c] sm:$0xf0]  ;;  %v4823_v8 = vld [vmem:[#allocation3 + $0x14] sm:$0x1] }
 0x2fa   : > { %v4935_v21 = vor.u32 %v4934_v31, %v4931_v50  ;;  %v4938_v18 = vshll.u32 %v12974_v30, 16  ;;  %v13639_v11 = vadd.f32 %v12703_v44, %v12706_v12  ;;  %vm13642_vm4 = vcmp.eq.f32.partialorder %v3936_v9, 8.507059e+37  ;;  %v11096_v26 = vld [vmem:[#allocation4 + $0x4] sm:$0xf] }
 0x2fb   : > { %v11401_v63 = vpop.eup %11400  ;;  %v4500_v37 = vsel %vm12903_vm15, %v4492_v32, %v4499_v51  ;;  %v4753_v19 = vsel %vm12788_vm8, %v4501_v57, %v4752_v3  ;;  %v3951_v33 = vand.u32 2147483647, %v13622_v25  ;;  %v13648_v60 = vadd.f32 %v13597_v54, %v3461_v16 }
 0x2fc   : > { %4751 = vst [vmem:[#allocation3 + $0x58] sm:$0xf] %v4500_v37  ;;  %v3928_v46 = vmul.f32 %v11401_v63, %v13605_v39  ;;  %v9991_v42 = vld [vmem:[#allocation4 + $0x8] sm:$0xf]  ;;  %v4267_v44 = vsel %vm12788_vm8, 0, %v4266_v20  ;;  %v13652_v12 = vadd.f32 %v3551_v5, %v3463_v40  ;;  %v4936_v56 = vrot.slane %v4935_v21, 4 }
 0x2fd   : > { %4754 = vst [vmem:[#allocation3 + $0x5c] sm:$0x1] %v4753_v19  ;;  %vm3932_vm9 = vweird.f32 %v13605_v39  ;;  %v9996_v0 = vor.u32 %v11097_v45, %v9993_v36  ;;  %v4940_v29 = vrot.slane %v4938_v18, 5  ;;  %vm3947_vm11 = vweird.f32 %v13622_v25 }
 0x2fe   : > { %v3929_v47 = vsub.f32 1.0, %v3928_v46  ;;  %v9985_v50 = vld [vmem:[#allocation4 + $0x24] sm:$0xf0]  ;;  %4268 = vst [vmem:[#allocation3 + $0x6c] sm:$0x1] %v4267_v44  ;;  %v11403_v3 = vpop.eup %11402  ;;  %vm3933_vm12 = vweird.f32 %v11401_v63  ;;  %v3953_v24 = vand.u32 2147483648, %v13622_v25 }
 0x2ff   : > { %v9988_v49 = vor.u32 %v11096_v26, %v9985_v50  ;;  %v11101_v54 = vld [vmem:[#allocation4 + $0x28] sm:$0xf0]  ;;  %v9947_v17 = vmul.f32 -1.442695, %v13648_v60  ;;  %v9948_v10 = vmul.f32 -1.442695, %v13652_v12  ;;  %v3943_v55 = vmul.f32 %v11403_v3, %v13622_v25  ;;  %vm3934_vm13 = vmor %vm3932_vm9, %vm3933_vm12 }
 0x300   : > { %v3930_v53 = vmul.f32 %v11401_v63, %v3929_v47  ;;  %v9992_v59 = vor.u32 %v11101_v54, %v9991_v42  ;;  %7595 = vmatmul.bf16.vlgmr.msrb.gmra.mxu0 %v9996_v0  ;;  %v4941_v58 = vsel %vm11771_vm2, %v4936_v56, %v4940_v29  ;;  %v4942_v9 = vshrl.u32 %v12974_v30, 16  ;;  %v11106_v54 = vld [vmem:[#allocation4 + $0x54] sm:$0xf] }
 0x301   : > { %7417 = vmatmul.bf16.vlgmr.msrb.gmra.mxu2 %v9988_v49  ;;  %11404 = vpow2.f32 %v9947_v17  ;;  %v3944_v31 = vsub.f32 1.0, %v3943_v55  ;;  %v4948_v32 = vshll.u32 %v4823_v8, 16  ;;  %5322 = vst [vmem:[#allocation4 + $0x4c] sm:$0xf] %v4941_v58  ;;  %vm13666_vm14 = vcmp.eq.f32.partialorder %v3951_v33, 8.507059e+37 }
 0x302   : > { %v3931_v28 = vadd.f32 %v11401_v63, %v3930_v53  ;;  %7506 = vmatmul.bf16.vlgmr.msrb.gmra.mxu3 %v9992_v59  ;;  %11406 = vpow2.f32 %v9948_v10  ;;  %v4944_v57 = vrot.slane %v4942_v9, 4  ;;  %5634 = vst [vmem:[#allocation4 + $0x10] sm:$0xf] %v4941_v58  ;;  %v9964_v14 = vrot.slane %v12924_v4, 9  ;;  %v4322_v4 = vld [vmem:[#allocation3 + $0x74] sm:$0x1] }
 0x303   : > { %v5409_v16 = vrot.slane %v12974_v30, 5  ;;  %v3945_v37 = vmul.f32 %v11403_v3, %v3944_v31  ;;  %vm3948_vm7 = vweird.f32 %v11403_v3  ;;  %v5412_v19 = vrot.slane %v4823_v8, 5  ;;  %v3376_v8 = vpop.f32.mrf.mxu2  ;;  %v10029_v49 = vld [vmem:[#allocation4 + $0x74] sm:$0xf0]  ;;  %v15936_v58 = vld [vmem:[#allocation6_spill] sm:$0xff]  ;;  %v15937_v9 = vld [vmem:[#allocation5_spill] sm:$0xff] }
 0x304   : > { %v3935_v40 = vsel %vm3934_vm13, %v11401_v63, %v3931_v28  ;;  %v4945_v39 = vor.u32 %v4944_v57, %v4940_v29  ;;  %v3954_v46 = vor.u32 1.1754944e-38, %v3953_v24  ;;  %v4950_v33 = vrot.slane %v4948_v32, 5  ;;  %vm3949_vm0 = vmor %vm3947_vm11, %vm3948_vm7  ;;  %v3465_v24 = vpop.f32.mrf.mxu3  ;;  %v4755_v28 = vld [vmem:[#allocation3 + $0x60] sm:$0xf] }
 0x305   : > { %v3940_v45 = vsel %vm13642_vm4, %v13629_v62, %v3935_v40  ;;  %v5410_v36 = vsel %vm12270_vm5, %v9964_v14, %v5409_v16  ;;  %v5411_v20 = vrot.slane %v5409_v16, 4  ;;  %v3946_v18 = vadd.f32 %v11403_v3, %v3945_v37  ;;  %v3554_v37 = vpop.f32.mrf.mxu0 }
 0x306   : > { %v4211_v21 = vmul.f32 %v3940_v45, %v13552_v61  ;;  %5546 = vst [vmem:[#allocation4 + $0x50] sm:$0xf] %v5410_v36  ;;  %v4323_v63 = vsel %vm12809_vm10, 0, %v4322_v4  ;;  %v4946_v62 = vrot.slane %v4945_v39, 4  ;;  %v4953_v26 = vshrl.u32 %v13035_v27, 16 }
 0x307   : > { %v11405_v30 = vpop.eup %11404  ;;  %v5413_v6 = vsel %vm12270_vm5, %v5411_v20, %v5412_v19  ;;  %5678 = vst [vmem:[#allocation4 + $0x14] sm:$0xf] %v5410_v36  ;;  %v3950_v42 = vsel %vm3949_vm0, %v11403_v3, %v3946_v18  ;;  %v4956_v25 = vshll.u32 %v13035_v27, 16  ;;  %v3377_v0 = vadd.f32 %v3376_v8, %v13639_v11  ;;  %v4269_v19 = vld [vmem:[#allocation3 + $0x78] sm:$0x1] }
 0x308   : > { %v11407_v61 = vpop.eup %11406  ;;  %v4363_v5 = vpack.c.bf16 %v4211_v21, %v4211_v21  ;;  %v13685_v44 = vadd.f32 1.0, %v11405_v30  ;;  %4324 = vst [vmem:[#allocation3 + $0x74] sm:$0x1] %v4323_v63  ;;  %v3955_v56 = vsel %vm13666_vm14, %v3954_v46, %v3950_v42  ;;  %v4951_v50 = vsel %vm11771_vm2, %v4946_v62, %v4950_v33  ;;  %v4759_v39 = vld [vmem:[#allocation3 + $0x68] sm:$0x1] }
 0x309   : > { %v13690_v47 = vadd.f32 1.0, %v11407_v61  ;;  %5547 = vst [vmem:[#allocation4 + $0x74] sm:$0xf] %v5413_v6  ;;  %v4212_v3 = vmul.f32 %v3955_v56, %v13570_v41  ;;  %v4955_v17 = vrot.slane %v4953_v26, 4  ;;  %v4962_v10 = vshll.u32 %v13121_v34, 16 }
 0x30a   : > { %v4503_v29 = vshrl.u32 %v4363_v5, 16  ;;  %11408 = vrcp.f32 %v13685_v44  ;;  %5323 = vst [vmem:[#allocation4 + $0x70] sm:$0xf] %v4951_v50  ;;  %v4506_v55 = vshll.u32 %v4363_v5, 16  ;;  %v4958_v11 = vrot.slane %v4956_v25, 5 }
 0x30b   : > { %11410 = vrcp.f32 %v13690_v47  ;;  %5635 = vst [vmem:[#allocation4 + $0x34] sm:$0xf] %v4951_v50  ;;  %v4364_v59 = vpack.c.bf16 %v4212_v3, %v4212_v3  ;;  %v13701_v41 = vadd.f32 %v15937_v9, %v15936_v58  ;;  %v3966_v31 = vand.u32 2147483647, %v13685_v44 }
 0x30c   : > { %v4505_v53 = vrot.slane %v4503_v29, 7  ;;  %5679 = vst [vmem:[#allocation4 + $0x38] sm:$0xf] %v5413_v6  ;;  %v10032_v32 = vor.u32 %v11106_v54, %v10029_v49  ;;  %v3466_v51 = vadd.f32 %v3465_v24, %v3377_v0  ;;  %v3968_v16 = vand.u32 2147483648, %v13685_v44  ;;  %v11105_v29 = vld [vmem:[#allocation4 + $0x4c] sm:$0xf] }
 0x30d   : > { %v4511_v14 = vshrl.u32 %v4364_v59, 16  ;;  %v3981_v40 = vand.u32 2147483647, %v13690_v47  ;;  %v4514_v45 = vshll.u32 %v4364_v59, 16  ;;  %vm3962_vm1 = vweird.f32 %v13685_v44  ;;  %v10027_v20 = vld [vmem:[#allocation4 + $0x50] sm:$0xf] }
 0x30e   : > { %v4508_v57 = vor.u32 %v4506_v55, %v4505_v53  ;;  %v3983_v36 = vand.u32 2147483648, %v13690_v47  ;;  %v13708_v21 = vadd.f32 %v3554_v37, %v3466_v51  ;;  %v4270_v18 = vsel %vm12788_vm8, 0, %v4269_v19  ;;  %v4826_v59 = vld [vmem:[#allocation3 + $0x20] sm:$0x1]  ;;  %v3378_v19 = vpop.f32.mrf.mxu2 }
 0x30f   : > { %v4513_v33 = vrot.slane %v4511_v14, 7  ;;  %4271 = vst [vmem:[#allocation3 + $0x78] sm:$0x1] %v4270_v18  ;;  %v4959_v63 = vor.u32 %v4958_v11, %v4955_v17  ;;  %v4964_v62 = vrot.slane %v4962_v10, 5  ;;  %vm13720_vm3 = vcmp.eq.f32.partialorder %v3966_v31, 8.507059e+37 }
 0x310   : > { %v13712_v46 = vpop.eup %11408  ;;  %v4756_v4 = vsel %vm12870_vm6, %v4508_v57, %v4755_v28  ;;  %v11110_v30 = vld [vmem:[#allocation4 + $0x70] sm:$0xf0]  ;;  %vm3977_vm4 = vweird.f32 %v13690_v47  ;;  %7600 = vmatmul.bf16.gmra.mxu0 %v10032_v32  ;;  %v9949_v8 = vmul.f32 -1.442695, %v13708_v21  ;;  %v4509_v25 = vrot.slane %v4505_v53, 4 }
 0x311   : > { %v13716_v6 = vpop.eup %11410  ;;  %4757 = vst [vmem:[#allocation3 + $0x60] sm:$0xf] %v4756_v4  ;;  %v3958_v26 = vmul.f32 %v13712_v46, %v13685_v44  ;;  %v10021_v5 = vld [vmem:[#allocation4 + $0x6c] sm:$0xf0]  ;;  %v10028_v42 = vor.u32 %v11110_v30, %v10027_v20  ;;  %v4516_v56 = vor.u32 %v4514_v45, %v4513_v33  ;;  %v4518_v50 = vrot.slane %v4513_v33, 4  ;;  %v3467_v30 = vpop.f32.mrf.mxu3 }
 0x312   : > { %v3973_v0 = vmul.f32 %v13716_v6, %v13690_v47  ;;  %v10024_v49 = vor.u32 %v11105_v29, %v10021_v5  ;;  %11412 = vpow2.f32 %v9949_v8  ;;  %v4960_v54 = vrot.slane %v4959_v63, 4  ;;  %v10065_v5 = vld [vmem:[#allocation4 + $0xbc] sm:$0xf0] }
 0x313   : > { %v3959_v3 = vsub.f32 1.0, %v3958_v26  ;;  %7511 = vmatmul.bf16.gmra.mxu3 %v10028_v42  ;;  %v4517_v17 = vsel %vm12903_vm15, %v4509_v25, %v4516_v56  ;;  %v4760_v10 = vsel %vm12788_vm8, %v4518_v50, %v4759_v39  ;;  %v4966_v53 = vshrl.u32 %v13121_v34, 16  ;;  %v3556_v26 = vpop.f32.mrf.mxu0  ;;  %v11115_v50 = vld [vmem:[#allocation4 + $0x9c] sm:$0xf] }
 0x314   : > { %v3974_v55 = vsub.f32 1.0, %v3973_v0  ;;  %4758 = vst [vmem:[#allocation3 + $0x64] sm:$0xf] %v4517_v17  ;;  %vm3963_vm9 = vweird.f32 %v13712_v46  ;;  %vm3978_vm11 = vweird.f32 %v13716_v6  ;;  %7422 = vmatmul.bf16.gmra.mxu2 %v10024_v49  ;;  %v4965_v11 = vsel %vm11771_vm2, %v4960_v54, %v4964_v62 }
 0x315   : > { %v3960_v24 = vmul.f32 %v13712_v46, %v3959_v3  ;;  %4761 = vst [vmem:[#allocation3 + $0x68] sm:$0x1] %v4760_v10  ;;  %v4968_v9 = vrot.slane %v4966_v53, 4  ;;  %v9965_v28 = vrot.slane %v13035_v27, 9  ;;  %v5416_v31 = vrot.slane %v13121_v34, 5  ;;  %vm3964_vm13 = vmor %vm3962_vm1, %vm3963_vm9 }
 0x316   : > { %v3975_v58 = vmul.f32 %v13716_v6, %v3974_v55  ;;  %v3969_v51 = vor.u32 1.1754944e-38, %v3968_v16  ;;  %vm13742_vm12 = vcmp.eq.f32.partialorder %v3981_v40, 8.507059e+37  ;;  %v4972_v14 = vshll.u32 %v4826_v59, 16  ;;  %5324 = vst [vmem:[#allocation4 + $0x94] sm:$0xf] %v4965_v11  ;;  %vm3979_vm14 = vmor %vm3977_vm4, %vm3978_vm11 }
 0x317   : > { %v3961_v32 = vadd.f32 %v13712_v46, %v3960_v24  ;;  %v4969_v45 = vor.u32 %v4968_v9, %v4964_v62  ;;  %5768 = vst [vmem:[#allocation4 + $0x1c] sm:$0xf] %v4965_v11  ;;  %v13751_v27 = vsel %vm12270_vm5, %v9965_v28, %v5416_v31  ;;  %v5418_v34 = vrot.slane %v5416_v31, 4  ;;  %v4762_v10 = vld [vmem:[#allocation3 + $0x6c] sm:$0xf] }
 0x318   : > { %v3976_v37 = vadd.f32 %v13716_v6, %v3975_v58  ;;  %v11413_v16 = vpop.eup %11412  ;;  %v3984_v44 = vor.u32 1.1754944e-38, %v3983_v36  ;;  %v3379_v39 = vadd.f32 %v3378_v19, %v13701_v41  ;;  %5636 = vst [vmem:[#allocation4 + $0x58] sm:$0xf] %v4965_v11  ;;  %v5419_v20 = vrot.slane %v4826_v59, 5  ;;  %v4325_v41 = vld [vmem:[#allocation3 + $0x80] sm:$0x1] }
 0x319   : > { %v3965_v40 = vsel %vm3964_vm13, %v13712_v46, %v3961_v32  ;;  %v13762_v33 = vadd.f32 1.0, %v11413_v16  ;;  %v4970_v63 = vrot.slane %v4969_v45, 4  ;;  %5548 = vst [vmem:[#allocation4 + $0x98] sm:$0xf] %v13751_v27  ;;  %v4974_v61 = vrot.slane %v4972_v14, 5  ;;  %v15942_v14 = vld [vmem:[#allocation7_spill] sm:$0xff] }
 0x31a   : > { %v3970_v18 = vsel %vm13720_vm3, %v3969_v51, %v3965_v40  ;;  %v3980_v4 = vsel %vm3979_vm14, %v13716_v6, %v3976_v37  ;;  %v3468_v36 = vadd.f32 %v3467_v30, %v3379_v39  ;;  %v5420_v62 = vsel %vm12270_vm5, %v5418_v34, %v5419_v20  ;;  %5812 = vst [vmem:[#allocation4 + $0x20] sm:$0xf] %v13751_v27  ;;  %v4766_v58 = vld [vmem:[#allocation3 + $0x74] sm:$0x1]  ;;  %v13784_v9 = vld [vmem:[#allocation3 + $0x2c] sm:$0x1] }
 0x31b   : > { %v4213_v46 = vmul.f32 %v3970_v18, %v13648_v60  ;;  %v3985_v47 = vsel %vm13742_vm12, %v3984_v44, %v3980_v4  ;;  %11414 = vrcp.f32 %v13762_v33  ;;  %5549 = vst [vmem:[#allocation4 + $0xbc] sm:$0xf] %v5420_v62  ;;  %v4977_v60 = vshrl.u32 %v13213_v1, 16  ;;  %v15943_v37 = vld [vmem:[#allocation8_spill] sm:$0xff] }
 0x31c   : > { %v4214_v6 = vmul.f32 %v3985_v47, %v13652_v12  ;;  %v13774_v8 = vadd.f32 %v3556_v26, %v3468_v36  ;;  %v4326_v25 = vsel %vm12809_vm10, 0, %v4325_v41  ;;  %5813 = vst [vmem:[#allocation4 + $0x44] sm:$0xf] %v5420_v62  ;;  %v4975_v12 = vsel %vm11771_vm2, %v4970_v63, %v4974_v61  ;;  %v13799_v61 = vld [vmem:[#allocation3 + $0x48] sm:$0xf] }
 0x31d   : > { %v4365_v42 = vpack.c.bf16 %v4213_v46, %v4213_v46  ;;  %4327 = vst [vmem:[#allocation3 + $0x80] sm:$0x1] %v4326_v25  ;;  %v4980_v0 = vshll.u32 %v13213_v1, 16  ;;  %v3996_v3 = vand.u32 2147483647, %v13762_v33  ;;  %v10068_v54 = vor.u32 %v11115_v50, %v10065_v5 }
 0x31e   : > { %v4366_v56 = vpack.c.bf16 %v4214_v6, %v4214_v6  ;;  %v9950_v49 = vmul.f32 -1.442695, %v13774_v8  ;;  %5325 = vst [vmem:[#allocation4 + $0xb8] sm:$0xf] %v4975_v12  ;;  %v4979_v59 = vrot.slane %v4977_v60, 4  ;;  %v4986_v53 = vshll.u32 %v13276_v13, 16  ;;  %v3381_v60 = vpop.f32.mrf.mxu2 }
 0x31f   : > { %v4520_v29 = vshrl.u32 %v4365_v42, 16  ;;  %v4523_v17 = vshll.u32 %v4365_v42, 16  ;;  %5769 = vst [vmem:[#allocation4 + $0x40] sm:$0xf] %v4975_v12  ;;  %v4990_v28 = vshrl.u32 %v13276_v13, 16  ;;  %v4982_v57 = vrot.slane %v4980_v0, 5 }
 0x320   : > { %v4528_v55 = vshrl.u32 %v4366_v56, 16  ;;  %v4531_v11 = vshll.u32 %v4366_v56, 16  ;;  %11416 = vpow2.f32 %v9950_v49  ;;  %7605 = vmatmul.bf16.gmra.mxu0 %v10068_v54  ;;  %5637 = vst [vmem:[#allocation4 + $0x7c] sm:$0xf] %v4975_v12  ;;  %v10063_v51 = vld [vmem:[#allocation4 + $0x98] sm:$0xf]  ;;  %v3293_v19 = vadd.f32 %v15943_v37, %v15942_v14 }
 0x321   : > { %v4522_v24 = vrot.slane %v4520_v29, 7  ;;  %v11415_v31 = vpop.eup %11414  ;;  %5680 = vst [vmem:[#allocation4 + $0x5c] sm:$0xf] %v13751_v27  ;;  %v4988_v40 = vrot.slane %v4986_v53, 5  ;;  %v3998_v63 = vand.u32 2147483648, %v13762_v33  ;;  %v4992_v46 = vrot.slane %v4990_v28, 4  ;;  %v3559_v28 = vpop.f32.mrf.mxu0 }
 0x322   : > { %v4530_v32 = vrot.slane %v4528_v55, 7  ;;  %v3988_v34 = vmul.f32 %v11415_v31, %v13762_v33  ;;  %v11119_v16 = vld [vmem:[#allocation4 + $0xb8] sm:$0xf0]  ;;  %5681 = vst [vmem:[#allocation4 + $0x80] sm:$0xf] %v5420_v62  ;;  %v4983_v41 = vor.u32 %v4982_v57, %v4979_v59  ;;  %v4996_v6 = vshll.u32 %v13784_v9, 16 }
 0x323   : > { %v4525_v45 = vor.u32 %v4523_v17, %v4522_v24  ;;  %v4526_v44 = vrot.slane %v4522_v24, 4  ;;  %v10064_v18 = vor.u32 %v11119_v16, %v10063_v51  ;;  %v11114_v36 = vld [vmem:[#allocation4 + $0x94] sm:$0xf]  ;;  %vm3993_vm7 = vweird.f32 %v11415_v31  ;;  %v11276_v56 = vld [vmem:[%s15803_s3 + $0x120] sm:$0xff]  ;;  %4884 = vst [vmem:[#allocation4 + $0x1b0] sm:$0xf] %v13799_v61  ;;  %v3470_v17 = vpop.f32.mrf.mxu3 }
 0x324   : > { %v4533_v39 = vor.u32 %v4531_v11, %v4530_v32  ;;  %v4535_v20 = vrot.slane %v4530_v32, 4  ;;  %v3989_v30 = vsub.f32 1.0, %v3988_v34  ;;  %v13801_v5 = vld [vmem:[#allocation3 + $0x4c] sm:$0xf]  ;;  %v4993_v42 = vor.u32 %v4992_v46, %v4988_v40  ;;  %7679 = vmatpush.bf16.msrb.mxu1 %v11276_v56  ;;  %5586 = vst [vmem:[#allocation4 + $0x174] sm:$0xf] %v13799_v61 }
 0x325   : > { %v4763_v4 = vsel %vm12870_vm6, %v4525_v45, %v4762_v10  ;;  %7516 = vmatmul.bf16.gmra.mxu3 %v10064_v18  ;;  %vm3992_vm0 = vweird.f32 %v13762_v33  ;;  %v10057_v12 = vld [vmem:[#allocation4 + $0xb4] sm:$0xf0]  ;;  %v3382_v50 = vadd.f32 %v3381_v60, %v3293_v19  ;;  %vm13809_vm1 = vcmp.eq.f32.partialorder %v3996_v3, 8.507059e+37  ;;  %4885 = vst [vmem:[#allocation4 + $0x1d4] sm:$0xf] %v13801_v5 }
 0x326   : > { %4764 = vst [vmem:[#allocation3 + $0x6c] sm:$0xf] %v4763_v4  ;;  %v4534_v47 = vsel %vm12903_vm15, %v4526_v44, %v4533_v39  ;;  %v4767_v27 = vsel %vm12788_vm8, %v4535_v20, %v4766_v58  ;;  %v11417_v62 = vpop.eup %11416  ;;  %v3990_v26 = vmul.f32 %v11415_v31, %v3989_v30  ;;  %v10060_v49 = vor.u32 %v11114_v36, %v10057_v12  ;;  %vm3994_vm3 = vmor %vm3992_vm0, %vm3993_vm7  ;;  %v4272_v32 = vld [vmem:[#allocation3 + $0x84] sm:$0x1]  ;;  %v11124_v19 = vld [vmem:[#allocation4 + $0xe4] sm:$0xf] }
 0x327   : > { %4765 = vst [vmem:[#allocation3 + $0x70] sm:$0xf] %v4534_v47  ;;  %v13804_v25 = vadd.f32 1.0, %v11417_v62  ;;  %v4994_v54 = vrot.slane %v4993_v42, 4  ;;  %v3999_v33 = vor.u32 1.1754944e-38, %v3998_v63  ;;  %v4984_v10 = vrot.slane %v4983_v41, 4 }
 0x328   : > { %4768 = vst [vmem:[#allocation3 + $0x74] sm:$0x1] %v4767_v27  ;;  %v3991_v0 = vadd.f32 %v11415_v31, %v3990_v26  ;;  %v4998_v55 = vrot.slane %v4996_v6, 5  ;;  %7427 = vmatmul.bf16.gmra.mxu2 %v10060_v49  ;;  %v3471_v53 = vadd.f32 %v3470_v17, %v3382_v50  ;;  %v9966_v24 = vrot.slane %v13213_v1, 9  ;;  %v10101_v44 = vld [vmem:[#allocation4 + $0x104] sm:$0xf0] }
 0x329   : > { %11418 = vrcp.f32 %v13804_v25  ;;  %v4011_v3 = vand.u32 2147483647, %v13804_v25  ;;  %v4013_v58 = vand.u32 2147483648, %v13804_v25  ;;  %5587 = vst [vmem:[#allocation4 + $0x198] sm:$0xf] %v13801_v5  ;;  %v5423_v51 = vrot.slane %v13276_v13, 5 }
 0x32a   : > { %v3995_v59 = vsel %vm3994_vm3, %v11415_v31, %v3991_v0  ;;  %v4989_v31 = vsel %vm11771_vm2, %v4984_v10, %v4988_v40  ;;  %5718 = vst [vmem:[#allocation4 + $0x138] sm:$0xf] %v13799_v61  ;;  %v13829_v14 = vadd.f32 %v3559_v28, %v3471_v53  ;;  %v4273_v1 = vsel %vm12788_vm8, 0, %v4272_v32  ;;  %v10199_v20 = vld [vmem:[#allocation4 + $0x1b0] sm:$0xf] }
 0x32b   : > { %v4000_v11 = vsel %vm13809_vm1, %v3999_v33, %v3995_v59  ;;  %v4999_v37 = vsel %vm11771_vm2, %v4994_v54, %v4998_v55  ;;  %5719 = vst [vmem:[#allocation4 + $0x15c] sm:$0xf] %v13801_v5  ;;  %v5001_v45 = vshrl.u32 %v13326_v23, 16  ;;  %v5004_v34 = vshll.u32 %v13326_v23, 16  ;;  %v4769_v56 = vld [vmem:[#allocation3 + $0x78] sm:$0xf] }
 0x32c   : > { %v4215_v57 = vmul.f32 %v4000_v11, %v13708_v21  ;;  %v5010_v13 = vshll.u32 %v13424_v15, 16  ;;  %v5014_v21 = vshrl.u32 %v13424_v15, 16  ;;  %v9951_v40 = vmul.f32 -1.442695, %v13829_v14  ;;  %4274 = vst [vmem:[#allocation3 + $0x84] sm:$0x1] %v4273_v1  ;;  %v3383_v11 = vpop.f32.mrf.mxu2  ;;  %v3472_v1 = vpop.f32.mrf.mxu3 }
 0x32d   : > { %5326 = vst [vmem:[#allocation4 + $0xdc] sm:$0xf] %v4989_v31  ;;  %v5425_v18 = vrot.slane %v5423_v51, 4  ;;  %v5426_v4 = vrot.slane %v13784_v9, 5  ;;  %v10104_v30 = vor.u32 %v11124_v19, %v10101_v44  ;;  %v11154_v47 = vld [vmem:[#allocation4 + $0x1d0] sm:$0xf0]  ;;  %v5424_v27 = vsel %vm12270_vm5, %v9966_v24, %v5423_v51 }
 0x32e   : > { %v4367_v16 = vpack.c.bf16 %v4215_v57, %v4215_v57  ;;  %5327 = vst [vmem:[#allocation4 + $0x100] sm:$0xf] %v4999_v37  ;;  %v5003_v36 = vrot.slane %v5001_v45, 4  ;;  %v10200_v41 = vor.u32 %v11154_v47, %v10199_v20  ;;  %11420 = vpow2.f32 %v9951_v40  ;;  %v13849_v50 = vld [vmem:[#allocation3 + $0x38] sm:$0x1]  ;;  %v15946_v54 = vld [vmem:[#allocation11_spill] sm:$0xff] }
 0x32f   : > { %v11419_v39 = vpop.eup %11418  ;;  %5638 = vst [vmem:[#allocation4 + $0xa0] sm:$0xf] %v4989_v31  ;;  %v5006_v6 = vrot.slane %v5004_v34, 5  ;;  %v5012_v62 = vrot.slane %v5010_v13, 5  ;;  %v5016_v42 = vrot.slane %v5014_v21, 4  ;;  %v5427_v12 = vsel %vm12270_vm5, %v5425_v18, %v5426_v4  ;;  %v15947_v33 = vld [vmem:[#allocation9_spill] sm:$0xff] }
 0x330   : > { %v4537_v63 = vshrl.u32 %v4367_v16, 16  ;;  %v4003_v46 = vmul.f32 %v11419_v39, %v13804_v25  ;;  %7610 = vmatmul.bf16.gmra.mxu0 %v10104_v30  ;;  %v4540_v60 = vshll.u32 %v4367_v16, 16  ;;  %5639 = vst [vmem:[#allocation4 + $0xc4] sm:$0xf] %v4999_v37  ;;  %7358 = vmatmul.bf16.gmra.mxu1 %v10200_v41  ;;  %vm4008_vm4 = vweird.f32 %v11419_v39  ;;  %v4328_v34 = vld [vmem:[#allocation3 + $0x8c] sm:$0x1]  ;;  %v3561_v16 = vpop.f32.mrf.mxu0 }
 0x331   : > { %5770 = vst [vmem:[#allocation4 + $0x64] sm:$0xf] %v4989_v31  ;;  %v5017_v49 = vor.u32 %v5016_v42, %v5012_v62  ;;  %v3295_v17 = vadd.f32 %v15947_v33, %v15946_v54  ;;  %vm4007_vm9 = vweird.f32 %v13804_v25  ;;  %vm13855_vm11 = vcmp.eq.f32.partialorder %v4011_v3, 8.507059e+37 }
 0x332   : > { %v13845_v26 = vrot.slane %v4537_v63, 7  ;;  %v4004_v9 = vsub.f32 1.0, %v4003_v46  ;;  %5771 = vst [vmem:[#allocation4 + $0x88] sm:$0xf] %v4999_v37  ;;  %v5007_v55 = vor.u32 %v5006_v6, %v5003_v36  ;;  %v4014_v24 = vor.u32 1.1754944e-38, %v4013_v58  ;;  %vm4009_vm12 = vmor %vm4007_vm9, %vm4008_vm4 }
 0x333   : > { %5550 = vst [vmem:[#allocation4 + $0xe0] sm:$0xf] %v5424_v27  ;;  %v5020_v28 = vshll.u32 %v13849_v50, 16  ;;  %v3384_v25 = vadd.f32 %v3383_v11, %v3295_v17  ;;  %v5018_v19 = vrot.slane %v5017_v49, 4  ;;  %v5430_v4 = vrot.slane %v13424_v15, 5 }
 0x334   : > { %v4542_v0 = vor.u32 %v4540_v60, %v13845_v26  ;;  %v4005_v29 = vmul.f32 %v11419_v39, %v4004_v9  ;;  %5551 = vst [vmem:[#allocation4 + $0x104] sm:$0xf] %v5427_v12  ;;  %v11421_v32 = vpop.eup %11420  ;;  %v11123_v3 = vld [vmem:[#allocation4 + $0xdc] sm:$0xf]  ;;  %v5008_v13 = vrot.slane %v5007_v55, 4  ;;  %v9967_v36 = vrot.slane %v13326_v23, 9 }
 0x335   : > { %v10093_v31 = vld [vmem:[#allocation4 + $0xfc] sm:$0xf0]  ;;  %v13863_v57 = vadd.f32 1.0, %v11421_v32  ;;  %5682 = vst [vmem:[#allocation4 + $0xa4] sm:$0xf] %v5424_v27  ;;  %v3473_v45 = vadd.f32 %v3472_v1, %v3384_v25  ;;  %v5022_v40 = vrot.slane %v5020_v28, 5 }
 0x336   : > { %v4770_v59 = vsel %vm12870_vm6, %v4542_v0, %v4769_v56  ;;  %v4006_v53 = vadd.f32 %v11419_v39, %v4005_v29  ;;  %v10096_v37 = vor.u32 %v11123_v3, %v10093_v31  ;;  %5683 = vst [vmem:[#allocation4 + $0xc8] sm:$0xf] %v5427_v12  ;;  %v5013_v20 = vsel %vm11771_vm2, %v5008_v13, %v5012_v62  ;;  %v4773_v56 = vld [vmem:[#allocation3 + $0x80] sm:$0x1]  ;;  %v15950_v28 = vld [vmem:[#allocation12_spill] sm:$0xff] }
 0x337   : > { %4771 = vst [vmem:[#allocation3 + $0x78] sm:$0xf] %v4770_v59  ;;  %11422 = vrcp.f32 %v13863_v57  ;;  %v13869_v44 = vadd.f32 %v3561_v16, %v3473_v45  ;;  %v5433_v41 = vrot.slane %v13849_v50, 5  ;;  %v5034_v15 = vshll.u32 %v13556_v7, 16  ;;  %v15951_v32 = vld [vmem:[#allocation10_spill] sm:$0xff] }
 0x338   : > { %v4010_v51 = vsel %vm4009_vm12, %v11419_v39, %v4006_v53  ;;  %7432 = vmatmul.bf16.gmra.mxu2 %v10096_v37  ;;  %5814 = vst [vmem:[#allocation4 + $0x68] sm:$0xf] %v5424_v27  ;;  %v4329_v39 = vsel %vm12809_vm10, 0, %v4328_v34  ;;  %v5038_v9 = vshrl.u32 %v13556_v7, 16  ;;  %v4543_v42 = vrot.slane %v13845_v26, 4  ;;  %v3386_v37 = vpop.f32.mrf.mxu2 }
 0x339   : > { %v4015_v58 = vsel %vm13855_vm11, %v4014_v24, %v4010_v51  ;;  %5815 = vst [vmem:[#allocation4 + $0x8c] sm:$0xf] %v5427_v12  ;;  %v9952_v30 = vmul.f32 -1.442695, %v13869_v44  ;;  %v13887_v23 = vsel %vm12270_vm5, %v9967_v36, %v5430_v4  ;;  %v5432_v0 = vrot.slane %v5430_v4, 4 }
 0x33a   : > { %v4216_v21 = vmul.f32 %v4015_v58, %v13774_v8  ;;  %4330 = vst [vmem:[#allocation3 + $0x8c] sm:$0x1] %v4329_v39  ;;  %v5023_v8 = vsel %vm11771_vm2, %v5018_v19, %v5022_v40  ;;  %v10099_v63 = vld [vmem:[#allocation4 + $0xe0] sm:$0xf]  ;;  %v5025_v54 = vshrl.u32 %v13510_v22, 16  ;;  %v5028_v33 = vshll.u32 %v13510_v22, 16 }
 0x33b   : > { %v11128_v46 = vld [vmem:[#allocation4 + $0x100] sm:$0xf0]  ;;  %5328 = vst [vmem:[#allocation4 + $0x124] sm:$0xf] %v5013_v20  ;;  %11424 = vpow2.f32 %v9952_v30  ;;  %v4026_v10 = vand.u32 2147483647, %v13863_v57  ;;  %v3298_v25 = vadd.f32 %v15951_v32, %v15950_v28  ;;  %vm4022_vm14 = vweird.f32 %v13863_v57 }
 0x33c   : > { %v4368_v18 = vpack.c.bf16 %v4216_v21, %v4216_v21  ;;  %v10100_v27 = vor.u32 %v11128_v46, %v10099_v63  ;;  %5329 = vst [vmem:[#allocation4 + $0x148] sm:$0xf] %v5023_v8  ;;  %v4028_v26 = vand.u32 2147483648, %v13863_v57  ;;  %v13898_v53 = vrot.slane %v5034_v15, 5  ;;  %v13902_v31 = vld [vmem:[#allocation3 + $0x54] sm:$0xf] }
 0x33d   : > { %v11423_v6 = vpop.eup %11422  ;;  %5640 = vst [vmem:[#allocation4 + $0xe8] sm:$0xf] %v5013_v20  ;;  %v5040_v24 = vrot.slane %v5038_v9, 4  ;;  %v13904_v51 = vld [vmem:[#allocation3 + $0x58] sm:$0xf]  ;;  %v5027_v19 = vrot.slane %v5025_v54, 4  ;;  %v3387_v21 = vadd.f32 %v3386_v37, %v3298_v25  ;;  %v5434_v36 = vsel %vm12270_vm5, %v5432_v0, %v5433_v41 }
 0x33e   : > { %v4545_v47 = vshrl.u32 %v4368_v18, 16  ;;  %v4548_v60 = vshll.u32 %v4368_v18, 16  ;;  %7521 = vmatmul.bf16.gmra.mxu3 %v10100_v27  ;;  %v4018_v12 = vmul.f32 %v11423_v6, %v13863_v57  ;;  %5641 = vst [vmem:[#allocation4 + $0x10c] sm:$0xf] %v5023_v8  ;;  %vm4023_vm13 = vweird.f32 %v11423_v6  ;;  %v3475_v57 = vpop.f32.mrf.mxu3  ;;  %v13917_v39 = vld [vmem:[#allocation3 + $0x44] sm:$0x1] }
 0x33f   : > { %5772 = vst [vmem:[#allocation4 + $0xac] sm:$0xf] %v5013_v20  ;;  %v5030_v58 = vrot.slane %v5028_v33, 5  ;;  %vm13909_vm7 = vcmp.eq.f32.partialorder %v4026_v10, 8.507059e+37  ;;  %v4029_v13 = vor.u32 1.1754944e-38, %v4028_v26  ;;  %vm4024_vm0 = vmor %vm4022_vm14, %vm4023_vm13  ;;  %v3476_v18 = vadd.f32 %v3475_v57, %v3387_v21 }
 0x340   : > { %v4547_v62 = vrot.slane %v4545_v47, 7  ;;  %v4019_v17 = vsub.f32 1.0, %v4018_v12  ;;  %5773 = vst [vmem:[#allocation4 + $0xd0] sm:$0xf] %v5023_v8  ;;  %v11133_v4 = vld [vmem:[#allocation4 + $0x12c] sm:$0xf]  ;;  %v5041_v63 = vor.u32 %v5040_v24, %v13898_v53  ;;  %v3564_v47 = vpop.f32.mrf.mxu0 }
 0x341   : > { %5552 = vst [vmem:[#allocation4 + $0x128] sm:$0xf] %v13887_v23  ;;  %v11425_v11 = vpop.eup %11424  ;;  %v10137_v30 = vld [vmem:[#allocation4 + $0x14c] sm:$0xf0]  ;;  %v4275_v27 = vld [vmem:[#allocation3 + $0x90] sm:$0x1]  ;;  %v13930_v15 = vadd.f32 %v3564_v47, %v3476_v18 }
 0x342   : > { %v4550_v29 = vor.u32 %v4548_v60, %v4547_v62  ;;  %v4552_v49 = vrot.slane %v4547_v62, 4  ;;  %v4020_v3 = vmul.f32 %v11423_v6, %v4019_v17  ;;  %v13907_v1 = vadd.f32 1.0, %v11425_v11  ;;  %4886 = vst [vmem:[#allocation4 + $0x1f8] sm:$0xf] %v13902_v31  ;;  %v11132_v40 = vld [vmem:[#allocation4 + $0x124] sm:$0xf] }
 0x343   : > { %v10129_v16 = vld [vmem:[#allocation4 + $0x144] sm:$0xf0]  ;;  %4887 = vst [vmem:[#allocation4 + $0x21c] sm:$0xf] %v13904_v51  ;;  %v5031_v62 = vor.u32 %v5030_v58, %v5027_v19  ;;  %v4276_v9 = vsel %vm12788_vm8, 0, %v4275_v27  ;;  %v15955_v58 = vld [vmem:[#allocation13_spill] sm:$0xff] }
 0x344   : > { %v4551_v55 = vsel %vm12903_vm15, %v4543_v42, %v4550_v29  ;;  %v4774_v59 = vsel %vm12788_vm8, %v4552_v49, %v4773_v56  ;;  %v4021_v45 = vadd.f32 %v11423_v6, %v4020_v3  ;;  %11426 = vrcp.f32 %v13907_v1  ;;  %5588 = vst [vmem:[#allocation4 + $0x1bc] sm:$0xf] %v13902_v31  ;;  %v4776_v17 = vld [vmem:[#allocation3 + $0x84] sm:$0xf] }
 0x345   : > { %4772 = vst [vmem:[#allocation3 + $0x7c] sm:$0xf] %v4551_v55  ;;  %v10132_v8 = vor.u32 %v11132_v40, %v10129_v16  ;;  %v5044_v42 = vshll.u32 %v13917_v39, 16  ;;  %v9953_v41 = vmul.f32 -1.442695, %v13930_v15  ;;  %v5042_v56 = vrot.slane %v5041_v63, 4  ;;  %v3388_v40 = vpop.f32.mrf.mxu2 }
 0x346   : > { %4775 = vst [vmem:[#allocation3 + $0x80] sm:$0x1] %v4774_v59  ;;  %v4025_v20 = vsel %vm4024_vm0, %v11423_v6, %v4021_v45  ;;  %v10140_v6 = vor.u32 %v11133_v4, %v10137_v30  ;;  %v5032_v0 = vrot.slane %v5031_v62, 4  ;;  %v5437_v55 = vrot.slane %v13556_v7, 5  ;;  %v15954_v19 = vld [vmem:[#allocation14_spill] sm:$0xff] }
 0x347   : > { %v4030_v46 = vsel %vm13909_vm7, %v4029_v13, %v4025_v20  ;;  %5589 = vst [vmem:[#allocation4 + $0x1e0] sm:$0xf] %v13904_v51  ;;  %v5046_v33 = vrot.slane %v5044_v42, 5  ;;  %11428 = vpow2.f32 %v9953_v41  ;;  %v4041_v32 = vand.u32 2147483647, %v13907_v1 }
 0x348   : > { %v4217_v60 = vmul.f32 %v4030_v46, %v13829_v14  ;;  %5720 = vst [vmem:[#allocation4 + $0x180] sm:$0xf] %v13902_v31  ;;  %7437 = vmatmul.bf16.gmra.mxu2 %v10132_v8  ;;  %7615 = vmatmul.bf16.gmra.mxu0 %v10140_v6  ;;  %v5037_v26 = vsel %vm11771_vm2, %v5032_v0, %v13898_v53  ;;  %v4043_v25 = vand.u32 2147483648, %v13907_v1  ;;  %v9968_v7 = vrot.slane %v13510_v22, 9  ;;  %v10135_v21 = vld [vmem:[#allocation4 + $0x128] sm:$0xf] }
 0x349   : > { %5721 = vst [vmem:[#allocation4 + $0x1a4] sm:$0xf] %v13904_v51  ;;  %v10235_v14 = vld [vmem:[#allocation4 + $0x1f8] sm:$0xf]  ;;  %v5047_v28 = vsel %vm11771_vm2, %v5042_v56, %v5046_v33  ;;  %v5439_v37 = vrot.slane %v5437_v55, 4  ;;  %v3300_v45 = vadd.f32 %v15955_v58, %v15954_v19  ;;  %vm4037_vm3 = vweird.f32 %v13907_v1  ;;  %v3566_v56 = vpop.f32.mrf.mxu0 }
 0x34a   : > { %v4369_v50 = vpack.c.bf16 %v4217_v60, %v4217_v60  ;;  %4277 = vst [vmem:[#allocation3 + $0x90] sm:$0x1] %v4276_v9  ;;  %v11427_v12 = vpop.eup %11426  ;;  %v11163_v54 = vld [vmem:[#allocation4 + $0x218] sm:$0xf0]  ;;  %vm4042_vm9 = vcmp.eq.f32.partialorder %v4041_v32, 8.507059e+37  ;;  %v4044_v22 = vor.u32 1.1754944e-38, %v4043_v25  ;;  %v5438_v63 = vsel %vm12270_vm5, %v9968_v7, %v5437_v55 }
 0x34b   : > { %5553 = vst [vmem:[#allocation4 + $0x14c] sm:$0xf] %v5434_v36  ;;  %v4033_v49 = vmul.f32 %v11427_v12, %v13907_v1  ;;  %v10236_v10 = vor.u32 %v11163_v54, %v10235_v14  ;;  %vm4038_vm1 = vweird.f32 %v11427_v12  ;;  %v5049_v20 = vshrl.u32 %v13799_v61, 16  ;;  %v4331_v9 = vld [vmem:[#allocation3 + $0x98] sm:$0x1] }
 0x34c   : > { %v4554_v29 = vshrl.u32 %v4369_v50, 16  ;;  %5684 = vst [vmem:[#allocation4 + $0xec] sm:$0xf] %v13887_v23  ;;  %v4557_v24 = vshll.u32 %v4369_v50, 16  ;;  %vm4039_vm4 = vmor %vm4037_vm3, %vm4038_vm1  ;;  %v3389_v4 = vadd.f32 %v3388_v40, %v3300_v45  ;;  %v5052_v1 = vshll.u32 %v13799_v61, 16 }
 0x34d   : > { %5685 = vst [vmem:[#allocation4 + $0x110] sm:$0xf] %v5434_v36  ;;  %v4034_v11 = vsub.f32 1.0, %v4033_v49  ;;  %7363 = vmatmul.bf16.gmra.mxu1 %v10236_v10  ;;  %v11429_v57 = vpop.eup %11428  ;;  %v9969_v46 = vrot.slane %v13799_v61, 9  ;;  %v5444_v47 = vrot.slane %v13801_v5, 5  ;;  %v5058_v6 = vshll.u32 %v13801_v5, 16 }
 0x34e   : > { %v13943_v59 = vrot.slane %v4554_v29, 7  ;;  %5816 = vst [vmem:[#allocation4 + $0xb0] sm:$0xf] %v13887_v23  ;;  %v5440_v23 = vrot.slane %v13917_v39, 5  ;;  %v13960_v8 = vadd.f32 1.0, %v11429_v57  ;;  %v5062_v62 = vshrl.u32 %v13801_v5, 16 }
 0x34f   : > { %5817 = vst [vmem:[#allocation4 + $0xd4] sm:$0xf] %v5434_v36  ;;  %v4035_v53 = vmul.f32 %v11427_v12, %v4034_v11  ;;  %v3477_v36 = vpop.f32.mrf.mxu3  ;;  %v5051_v61 = vrot.slane %v5049_v20, 4  ;;  %v5054_v14 = vrot.slane %v5052_v1, 5  ;;  %v13981_v0 = vsel %vm12270_vm5, %v9969_v46, %v5444_v47  ;;  %v11142_v54 = vld [vmem:[#allocation4 + $0x174] sm:$0xf] }
 0x350   : > { %v4559_v3 = vor.u32 %v4557_v24, %v13943_v59  ;;  %5330 = vst [vmem:[#allocation4 + $0x16c] sm:$0xf] %v5037_v26  ;;  %11430 = vrcp.f32 %v13960_v8  ;;  %v3478_v60 = vadd.f32 %v3477_v36, %v3389_v4  ;;  %v13973_v50 = vsel %vm12270_vm5, %v5439_v37, %v5440_v23  ;;  %v10173_v33 = vld [vmem:[#allocation4 + $0x194] sm:$0xf0]  ;;  %v13987_v11 = vld [vmem:[#allocation3 + $0x60] sm:$0xf]  ;;  %v3391_v36 = vpop.f32.mrf.mxu2 }
 0x351   : > { %5331 = vst [vmem:[#allocation4 + $0x190] sm:$0xf] %v5047_v28  ;;  %v4036_v13 = vadd.f32 %v11427_v12, %v4035_v53  ;;  %v10176_v10 = vor.u32 %v11142_v54, %v10173_v33  ;;  %v5064_v55 = vrot.slane %v5062_v62, 4  ;;  %v13992_v7 = vld [vmem:[#allocation3 + $0x50] sm:$0x1]  ;;  %v4560_v37 = vrot.slane %v13943_v59, 4 }
 0x352   : > { %v4777_v34 = vsel %vm12870_vm6, %v4559_v3, %v4776_v17  ;;  %v11137_v16 = vld [vmem:[#allocation4 + $0x148] sm:$0xf0]  ;;  %5642 = vst [vmem:[#allocation4 + $0x130] sm:$0xf] %v5037_v26  ;;  %v13983_v29 = vadd.f32 %v3566_v56, %v3478_v60  ;;  %v4780_v3 = vld [vmem:[#allocation3 + $0x8c] sm:$0x1]  ;;  %v5055_v58 = vor.u32 %v5054_v14, %v5051_v61  ;;  %vm4052_vm12 = vweird.f32 %v13960_v8 }
 0x353   : > { %4778 = vst [vmem:[#allocation3 + $0x84] sm:$0xf] %v4777_v34  ;;  %v10136_v39 = vor.u32 %v11137_v16, %v10135_v21  ;;  %v4040_v18 = vsel %vm4039_vm4, %v11427_v12, %v4036_v13  ;;  %v4058_v16 = vand.u32 2147483648, %v13960_v8  ;;  %v5068_v59 = vshll.u32 %v13992_v7, 16  ;;  %v15957_v20 = vld [vmem:[#allocation15_spill] sm:$0xff] }
 0x354   : > { %5643 = vst [vmem:[#allocation4 + $0x154] sm:$0xf] %v5047_v28  ;;  %v4045_v30 = vsel %vm4042_vm9, %v4044_v22, %v4040_v18  ;;  %v9954_v24 = vmul.f32 -1.442695, %v13983_v29  ;;  %v4056_v22 = vand.u32 2147483647, %v13960_v8 }
 0x355   : > { %7526 = vmatmul.bf16.gmra.mxu3 %v10136_v39  ;;  %5774 = vst [vmem:[#allocation4 + $0xf4] sm:$0xf] %v5037_v26  ;;  %v4218_v27 = vmul.f32 %v4045_v30, %v13869_v44  ;;  %v4332_v44 = vsel %vm12809_vm10, 0, %v4331_v9  ;;  %v5060_v26 = vrot.slane %v5058_v6, 5  ;;  %v15956_v39 = vld [vmem:[#allocation17_spill] sm:$0xff]  ;;  %v5056_v1 = vrot.slane %v5055_v58, 4 }
 0x356   : > { %5775 = vst [vmem:[#allocation4 + $0x118] sm:$0xf] %v5047_v28  ;;  %v11431_v28 = vpop.eup %11430  ;;  %11432 = vpow2.f32 %v9954_v24  ;;  %v3303_v18 = vadd.f32 %v15957_v20, %v15956_v39  ;;  %v4059_v60 = vor.u32 1.1754944e-38, %v4058_v16  ;;  %vm4057_vm14 = vcmp.eq.f32.partialorder %v4056_v22, 8.507059e+37  ;;  %v4783_v58 = vld [vmem:[#allocation3 + $0x90] sm:$0xf] }
 0x357   : > { %v11141_v42 = vld [vmem:[#allocation4 + $0x16c] sm:$0xf]  ;;  %v4370_v41 = vpack.c.bf16 %v4218_v27, %v4218_v27  ;;  %5554 = vst [vmem:[#allocation4 + $0x170] sm:$0xf] %v5438_v63  ;;  %v4048_v53 = vmul.f32 %v11431_v28, %v13960_v8  ;;  %v5065_v34 = vor.u32 %v5064_v55, %v5060_v26  ;;  %vm4053_vm11 = vweird.f32 %v11431_v28  ;;  %v10209_v39 = vld [vmem:[#allocation4 + $0x1dc] sm:$0xf0] }
 0x358   : > { %v10165_v12 = vld [vmem:[#allocation4 + $0x18c] sm:$0xf0]  ;;  %4333 = vst [vmem:[#allocation3 + $0x98] sm:$0x1] %v4332_v44  ;;  %7620 = vmatmul.bf16.gmra.mxu0 %v10176_v10  ;;  %v14007_v27 = vld [vmem:[#allocation3 + $0x64] sm:$0xf]  ;;  %vm4054_vm13 = vmor %vm4052_vm12, %vm4053_vm11  ;;  %v5061_v8 = vsel %vm11771_vm2, %v5056_v1, %v5060_v26  ;;  %v3480_v44 = vpop.f32.mrf.mxu3 }
 0x359   : > { %v10168_v49 = vor.u32 %v11141_v42, %v10165_v12  ;;  %v4562_v17 = vshrl.u32 %v4370_v41, 16  ;;  %5555 = vst [vmem:[#allocation4 + $0x194] sm:$0xf] %v13973_v50  ;;  %v4565_v25 = vshll.u32 %v4370_v41, 16  ;;  %v4049_v45 = vsub.f32 1.0, %v4048_v53 }
 0x35a   : > { %5686 = vst [vmem:[#allocation4 + $0x134] sm:$0xf] %v5438_v63  ;;  %v5066_v62 = vrot.slane %v5065_v34, 4  ;;  %v3392_v42 = vadd.f32 %v3391_v36, %v3303_v18  ;;  %v5070_v41 = vrot.slane %v5068_v59, 5  ;;  %v5446_v33 = vrot.slane %v5444_v47, 4  ;;  %v15959_v36 = vld [vmem:[#allocation18_spill] sm:$0xff] }
 0x35b   : > { %7442 = vmatmul.bf16.gmra.mxu2 %v10168_v49  ;;  %v4564_v32 = vrot.slane %v4562_v17, 7  ;;  %4888 = vst [vmem:[#allocation4 + $0x240] sm:$0xf] %v13987_v11  ;;  %v4050_v57 = vmul.f32 %v11431_v28, %v4049_v45  ;;  %v4278_v49 = vld [vmem:[#allocation3 + $0x9c] sm:$0x1]  ;;  %v3569_v17 = vpop.f32.mrf.mxu0  ;;  %v5082_v53 = vshll.u32 %v13904_v51, 16 }
 0x35c   : > { %5590 = vst [vmem:[#allocation4 + $0x204] sm:$0xf] %v13987_v11  ;;  %v11433_v30 = vpop.eup %11432  ;;  %v3481_v14 = vadd.f32 %v3480_v44, %v3392_v42  ;;  %v5071_v54 = vsel %vm11771_vm2, %v5066_v62, %v5070_v41  ;;  %v4279_v10 = vsel %vm12788_vm8, 0, %v4278_v49  ;;  %v14063_v62 = vld [vmem:[#allocation3 + $0x6c] sm:$0xf] }
 0x35d   : > { %v4567_v23 = vor.u32 %v4565_v25, %v4564_v32  ;;  %v4569_v19 = vrot.slane %v4564_v32, 4  ;;  %5722 = vst [vmem:[#allocation4 + $0x1c8] sm:$0xf] %v13987_v11  ;;  %v4051_v46 = vadd.f32 %v11431_v28, %v4050_v57  ;;  %v14013_v9 = vadd.f32 1.0, %v11433_v30  ;;  %v14067_v44 = vld [vmem:[#allocation3 + $0x5c] sm:$0x1] }
 0x35e   : > { %5687 = vst [vmem:[#allocation4 + $0x158] sm:$0xf] %v13973_v50  ;;  %v10171_v4 = vld [vmem:[#allocation4 + $0x170] sm:$0xf]  ;;  %v14029_v55 = vadd.f32 %v3569_v17, %v3481_v14  ;;  %v14056_v20 = vrot.slane %v5082_v53, 5 }
 0x35f   : > { %v4568_v13 = vsel %vm12903_vm15, %v4560_v37, %v4567_v23  ;;  %v4781_v21 = vsel %vm12788_vm8, %v4569_v19, %v4780_v3  ;;  %5818 = vst [vmem:[#allocation4 + $0xf8] sm:$0xf] %v5438_v63  ;;  %v11275_v63 = vld [vmem:[%s15803_s3 + $0x118] sm:$0xff]  ;;  %v4055_v61 = vsel %vm4054_vm13, %v11431_v28, %v4051_v46  ;;  %11434 = vrcp.f32 %v14013_v9 }
 0x360   : > { %4779 = vst [vmem:[#allocation3 + $0x88] sm:$0xf] %v4568_v13  ;;  %v11146_v40 = vld [vmem:[#allocation4 + $0x190] sm:$0xf0]  ;;  %7680 = vmatpush.bf16.msrb.mxu1 %v11275_v63  ;;  %v4060_v56 = vsel %vm4057_vm14, %v4059_v60, %v4055_v61  ;;  %v9955_v5 = vmul.f32 -1.442695, %v14029_v55  ;;  %vm4067_vm0 = vweird.f32 %v14013_v9 }
 0x361   : > { %4782 = vst [vmem:[#allocation3 + $0x8c] sm:$0x1] %v4781_v21  ;;  %v10172_v6 = vor.u32 %v11146_v40, %v10171_v4  ;;  %v4219_v12 = vmul.f32 %v4060_v56, %v13930_v15  ;;  %v5447_v15 = vrot.slane %v13992_v7, 5  ;;  %v5086_v37 = vshrl.u32 %v13904_v51, 16  ;;  %v11151_v40 = vld [vmem:[#allocation4 + $0x1bc] sm:$0xf]  ;;  %v3393_v56 = vpop.f32.mrf.mxu2 }
 0x362   : > { %4889 = vst [vmem:[#allocation4 + $0x264] sm:$0xf] %v14007_v27  ;;  %v10271_v24 = vld [vmem:[#allocation4 + $0x240] sm:$0xf]  ;;  %v9970_v7 = vrot.slane %v13902_v31, 9  ;;  %11436 = vpow2.f32 %v9955_v5  ;;  %v5073_v13 = vshrl.u32 %v13902_v31, 16  ;;  %v10212_v46 = vor.u32 %v11151_v40, %v10209_v39 }
 0x363   : > { %5591 = vst [vmem:[#allocation4 + $0x228] sm:$0xf] %v14007_v27  ;;  %v4371_v26 = vpack.c.bf16 %v4219_v12, %v4219_v12  ;;  %v14036_v47 = vsel %vm12270_vm5, %v5446_v33, %v5447_v15  ;;  %v4071_v34 = vand.u32 2147483647, %v14013_v9  ;;  %v5076_v21 = vshll.u32 %v13902_v31, 16  ;;  %v15958_v63 = vld [vmem:[#allocation19_spill] sm:$0xff] }
 0x364   : > { %5723 = vst [vmem:[#allocation4 + $0x1ec] sm:$0xf] %v14007_v27  ;;  %v4073_v22 = vand.u32 2147483648, %v14013_v9  ;;  %v5088_v18 = vrot.slane %v5086_v37, 4  ;;  %v5075_v42 = vrot.slane %v5073_v13, 4  ;;  %v5092_v15 = vshll.u32 %v14067_v44, 16 }
 0x365   : > { %7531 = vmatmul.bf16.gmra.mxu3 %v10172_v6  ;;  %5819 = vst [vmem:[#allocation4 + $0x11c] sm:$0xf] %v13973_v50  ;;  %v5451_v50 = vrot.slane %v13904_v51, 5  ;;  %v4571_v28 = vshrl.u32 %v4371_v26, 16  ;;  %v11435_v25 = vpop.eup %11434  ;;  %v4574_v19 = vshll.u32 %v4371_v26, 16  ;;  %v3305_v6 = vadd.f32 %v15959_v36, %v15958_v63 }
 0x366   : > { %5332 = vst [vmem:[#allocation4 + $0x1b4] sm:$0xf] %v5061_v8  ;;  %v4063_v45 = vmul.f32 %v11435_v25, %v14013_v9  ;;  %vm4068_vm7 = vweird.f32 %v11435_v25  ;;  %v5078_v61 = vrot.slane %v5076_v21, 5  ;;  %v4074_v12 = vor.u32 1.1754944e-38, %v4073_v22  ;;  %v14075_v9 = vpop.f32.mrf.mxu1  ;;  %v4787_v39 = vld [vmem:[#allocation3 + $0x98] sm:$0x1] }
 0x367   : > { %4280 = vst [vmem:[#allocation3 + $0x9c] sm:$0x1] %v4279_v10  ;;  %v14041_v23 = vrot.slane %v4571_v28, 7  ;;  %v14051_v16 = vsel %vm12270_vm5, %v9970_v7, %v5451_v50  ;;  %vm4069_vm1 = vmor %vm4067_vm0, %vm4068_vm7  ;;  %v3394_v49 = vadd.f32 %v3393_v56, %v3305_v6  ;;  %vm4072_vm3 = vcmp.eq.f32.partialorder %v4071_v34, 8.507059e+37  ;;  %v3482_v10 = vpop.f32.mrf.mxu3 }
 0x368   : > { %5333 = vst [vmem:[#allocation4 + $0x1d8] sm:$0xf] %v5071_v54  ;;  %v4064_v57 = vsub.f32 1.0, %v4063_v45  ;;  %7625 = vmatmul.bf16.gmra.mxu0 %v10212_v46  ;;  %v5079_v26 = vor.u32 %v5078_v61, %v5075_v42  ;;  %v14086_v45 = vld [vmem:[#allocation3 + $0x70] sm:$0xf]  ;;  %v5094_v34 = vrot.slane %v5092_v15, 5 }
 0x369   : > { %v11172_v32 = vld [vmem:[#allocation4 + $0x260] sm:$0xf0]  ;;  %5644 = vst [vmem:[#allocation4 + $0x178] sm:$0xf] %v5061_v8  ;;  %v4576_v59 = vor.u32 %v4574_v19, %v14041_v23  ;;  %v3483_v28 = vadd.f32 %v3482_v10, %v3394_v49  ;;  %v15961_v61 = vld [vmem:[#allocation20_spill] sm:$0xff]  ;;  %v5106_v10 = vshll.u32 %v14007_v27, 16  ;;  %v3396_v15 = vpop.f32.mrf.mxu2 }
 0x36a   : > { %v10272_v3 = vor.u32 %v11172_v32, %v10271_v24  ;;  %5645 = vst [vmem:[#allocation4 + $0x19c] sm:$0xf] %v5071_v54  ;;  %v4065_v4 = vmul.f32 %v11435_v25, %v4064_v57  ;;  %v4334_v32 = vld [vmem:[#allocation3 + $0xa4] sm:$0x1]  ;;  %v15960_v42 = vld [vmem:[#allocation21_spill] sm:$0xff] }
 0x36b   : > { %5776 = vst [vmem:[#allocation4 + $0x13c] sm:$0xf] %v5061_v8  ;;  %v4784_v31 = vsel %vm12870_vm6, %v4576_v59, %v4783_v58  ;;  %v11437_v8 = vpop.eup %11436 }
 0x36c   : > { %7368 = vmatmul.bf16.gmra.mxu1 %v10272_v3  ;;  %5777 = vst [vmem:[#allocation4 + $0x160] sm:$0xf] %v5071_v54  ;;  %v4066_v41 = vadd.f32 %v11435_v25, %v4065_v4  ;;  %v14070_v14 = vadd.f32 1.0, %v11437_v8  ;;  %v5089_v54 = vor.u32 %v5088_v18, %v14056_v20  ;;  %v4335_v3 = vsel %vm12809_vm10, 0, %v4334_v32 }
 0x36d   : > { %5556 = vst [vmem:[#allocation4 + $0x1b8] sm:$0xf] %v13981_v0  ;;  %v11150_v1 = vld [vmem:[#allocation4 + $0x1b4] sm:$0xf]  ;;  %v14103_v4 = vrot.slane %v5451_v50, 4  ;;  %v3308_v8 = vadd.f32 %v15961_v61, %v15960_v42 }
 0x36e   : > { %5557 = vst [vmem:[#allocation4 + $0x1dc] sm:$0xf] %v14036_v47  ;;  %v4070_v33 = vsel %vm4069_vm1, %v11435_v25, %v4066_v41  ;;  %11438 = vrcp.f32 %v14070_v14  ;;  %v3571_v25 = vpop.f32.mrf.mxu0  ;;  %v5090_v37 = vrot.slane %v5089_v54, 4  ;;  %v4088_v63 = vand.u32 2147483648, %v14070_v14  ;;  %v14107_v36 = vpop.f32.mrf.mxu1 }
 0x36f   : > { %v10201_v30 = vld [vmem:[#allocation4 + $0x1d4] sm:$0xf0]  ;;  %4785 = vst [vmem:[#allocation3 + $0x90] sm:$0xf] %v4784_v31  ;;  %v4075_v17 = vsel %vm4072_vm3, %v4074_v12, %v4070_v33  ;;  %v14084_v19 = vadd.f32 %v3571_v25, %v3483_v28  ;;  %v4577_v31 = vrot.slane %v14041_v23, 4  ;;  %v5097_v23 = vshrl.u32 %v13987_v11, 16 }
 0x370   : > { %v10204_v60 = vor.u32 %v11150_v1, %v10201_v30  ;;  %4890 = vst [vmem:[#allocation4 + $0x288] sm:$0xf] %v14063_v62  ;;  %v4220_v24 = vmul.f32 %v4075_v17, %v13983_v29  ;;  %v5080_v29 = vrot.slane %v5079_v26, 4  ;;  %v5095_v22 = vsel %vm11771_vm2, %v5090_v37, %v5094_v34  ;;  %v11160_v17 = vld [vmem:[#allocation4 + $0x204] sm:$0xf] }
 0x371   : > { %5592 = vst [vmem:[#allocation4 + $0x24c] sm:$0xf] %v14063_v62  ;;  %v9956_v21 = vmul.f32 -1.442695, %v14084_v19  ;;  %v4086_v6 = vand.u32 2147483647, %v14070_v14  ;;  %vm4082_vm9 = vweird.f32 %v14070_v14 }
 0x372   : > { %7447 = vmatmul.bf16.gmra.mxu2 %v10204_v60  ;;  %5724 = vst [vmem:[#allocation4 + $0x210] sm:$0xf] %v14063_v62  ;;  %v4372_v7 = vpack.c.bf16 %v4220_v24, %v4220_v24  ;;  %v5085_v57 = vsel %vm11771_vm2, %v5080_v29, %v14056_v20  ;;  %v5454_v20 = vrot.slane %v14067_v44, 5  ;;  %v4089_v54 = vor.u32 1.1754944e-38, %v4088_v63  ;;  %v10245_v24 = vld [vmem:[#allocation4 + $0x224] sm:$0xf0] }
 0x373   : > { %5688 = vst [vmem:[#allocation4 + $0x17c] sm:$0xf] %v13981_v0  ;;  %11440 = vpow2.f32 %v9956_v21  ;;  %v5110_v28 = vshrl.u32 %v14007_v27, 16  ;;  %vm4087_vm12 = vcmp.eq.f32.partialorder %v4086_v6, 8.507059e+37  ;;  %v4281_v29 = vld [vmem:[#allocation3 + $0xa8] sm:$0x1] }
 0x374   : > { %v10207_v5 = vld [vmem:[#allocation4 + $0x1b8] sm:$0xf]  ;;  %5689 = vst [vmem:[#allocation4 + $0x1a0] sm:$0xf] %v14036_v47  ;;  %v4579_v13 = vshrl.u32 %v4372_v7, 16  ;;  %v11439_v59 = vpop.eup %11438 }
 0x375   : > { %v11155_v53 = vld [vmem:[#allocation4 + $0x1d8] sm:$0xf0]  ;;  %4336 = vst [vmem:[#allocation3 + $0xa4] sm:$0x1] %v4335_v3  ;;  %v4078_v18 = vmul.f32 %v11439_v59, %v14070_v14  ;;  %vm4083_vm4 = vweird.f32 %v11439_v59  ;;  %v3397_v14 = vadd.f32 %v3396_v15, %v3308_v8  ;;  %v3485_v3 = vpop.f32.mrf.mxu3 }
 0x376   : > { %v10208_v58 = vor.u32 %v11155_v53, %v10207_v5  ;;  %5820 = vst [vmem:[#allocation4 + $0x140] sm:$0xf] %v13981_v0  ;;  %v4581_v40 = vrot.slane %v4579_v13, 7  ;;  %v4582_v0 = vshll.u32 %v4372_v7, 16  ;;  %vm4084_vm11 = vmor %vm4082_vm9, %vm4083_vm4  ;;  %v10248_v5 = vor.u32 %v11160_v17, %v10245_v24  ;;  %v14125_v21 = vpop.f32.mrf.mxu1 }
 0x377   : > { %4891 = vst [vmem:[#allocation4 + $0x2ac] sm:$0xf] %v14086_v45  ;;  %v4079_v46 = vsub.f32 1.0, %v4078_v18  ;;  %v10307_v41 = vld [vmem:[#allocation4 + $0x288] sm:$0xf]  ;;  %v5099_v53 = vrot.slane %v5097_v23, 4 }
 0x378   : > { %7536 = vmatmul.bf16.gmra.mxu3 %v10208_v58  ;;  %5593 = vst [vmem:[#allocation4 + $0x270] sm:$0xf] %v14086_v45  ;;  %v4584_v1 = vor.u32 %v4582_v0, %v4581_v40  ;;  %v4586_v30 = vrot.slane %v4581_v40, 4  ;;  %v3486_v58 = vadd.f32 %v3485_v3, %v3397_v14  ;;  %7630 = vmatmul.bf16.gmra.mxu0 %v10248_v5  ;;  %v5108_v0 = vrot.slane %v5106_v10, 5  ;;  %v3398_v14 = vpop.f32.mrf.mxu2 }
 0x379   : > { %5725 = vst [vmem:[#allocation4 + $0x234] sm:$0xf] %v14086_v45  ;;  %v4080_v60 = vmul.f32 %v11439_v59, %v4079_v46  ;;  %v11441_v12 = vpop.eup %11440 }
 0x37a   : > { %5821 = vst [vmem:[#allocation4 + $0x164] sm:$0xf] %v14036_v47  ;;  %v5100_v47 = vshll.u32 %v13987_v11, 16  ;;  %v4585_v51 = vsel %vm12903_vm15, %v4577_v31, %v4584_v1  ;;  %v4788_v50 = vsel %vm12788_vm8, %v4586_v30, %v4787_v39  ;;  %v14120_v26 = vadd.f32 1.0, %v11441_v12  ;;  %v14140_v1 = vld [vmem:[#allocation3 + $0x68] sm:$0x1] }
 0x37b   : > { %5334 = vst [vmem:[#allocation4 + $0x1fc] sm:$0xf] %v5085_v57  ;;  %v4081_v49 = vadd.f32 %v11439_v59, %v4080_v60  ;;  %v5455_v31 = vsel %vm12270_vm5, %v14103_v4, %v5454_v20  ;;  %v4790_v4 = vld [vmem:[#allocation3 + $0x9c] sm:$0xf]  ;;  %v5116_v20 = vshll.u32 %v14140_v1, 16 }
 0x37c   : > { %5335 = vst [vmem:[#allocation4 + $0x220] sm:$0xf] %v5095_v22  ;;  %11442 = vrcp.f32 %v14120_v26  ;;  %v5102_v37 = vrot.slane %v5100_v47, 5  ;;  %v4103_v42 = vand.u32 2147483648, %v14120_v26  ;;  %v4101_v12 = vand.u32 2147483647, %v14120_v26 }
 0x37d   : > { %5646 = vst [vmem:[#allocation4 + $0x1c0] sm:$0xf] %v5085_v57  ;;  %v4085_v32 = vsel %vm4084_vm11, %v11439_v59, %v4081_v49  ;;  %v3574_v59 = vpop.f32.mrf.mxu0  ;;  %v14156_v49 = vld [vmem:[#allocation3 + $0x7c] sm:$0xf]  ;;  %v5118_v15 = vrot.slane %v5116_v20, 5  ;;  %vm4097_vm14 = vweird.f32 %v14120_v26 }
 0x37e   : > { %4786 = vst [vmem:[#allocation3 + $0x94] sm:$0xf] %v4585_v51  ;;  %v11181_v56 = vld [vmem:[#allocation4 + $0x2a8] sm:$0xf0]  ;;  %v4090_v25 = vsel %vm4087_vm12, %v4089_v54, %v4085_v32  ;;  %v14130_v18 = vadd.f32 %v3574_v59, %v3486_v58  ;;  %v5103_v6 = vor.u32 %v5102_v37, %v5099_v53  ;;  %v15962_v54 = vld [vmem:[#allocation25_spill] sm:$0xff]  ;;  %v14160_v10 = vpop.f32.mrf.mxu1  ;;  %v4104_v32 = vor.u32 1.1754944e-38, %v4103_v42 }
 0x37f   : > { %4789 = vst [vmem:[#allocation3 + $0x98] sm:$0x1] %v4788_v50  ;;  %v10308_v33 = vor.u32 %v11181_v56, %v10307_v41  ;;  %v4221_v7 = vmul.f32 %v4090_v25, %v14029_v55  ;;  %v14132_v55 = vld [vmem:[#allocation3 + $0x78] sm:$0xf]  ;;  %vm4102_vm0 = vcmp.eq.f32.partialorder %v4101_v12, 8.507059e+37 }
 0x380   : > { %5647 = vst [vmem:[#allocation4 + $0x1e4] sm:$0xf] %v5095_v22  ;;  %v9957_v46 = vmul.f32 -1.442695, %v14130_v18  ;;  %v5104_v61 = vrot.slane %v5103_v6, 4 }
 0x381   : > { %7373 = vmatmul.bf16.gmra.mxu1 %v10308_v33  ;;  %5778 = vst [vmem:[#allocation4 + $0x184] sm:$0xf] %v5085_v57  ;;  %v4282_v57 = vsel %vm12788_vm8, 0, %v4281_v29  ;;  %v4373_v39 = vpack.c.bf16 %v4221_v7, %v4221_v7  ;;  %v15963_v33 = vld [vmem:[#allocation22_spill] sm:$0xff]  ;;  %v10281_v20 = vld [vmem:[#allocation4 + $0x26c] sm:$0xf0] }
 0x382   : > { %5779 = vst [vmem:[#allocation4 + $0x1a8] sm:$0xf] %v5095_v22  ;;  %v11159_v34 = vld [vmem:[#allocation4 + $0x1fc] sm:$0xf]  ;;  %v5112_v22 = vrot.slane %v5110_v28, 4  ;;  %v11443_v63 = vpop.eup %11442  ;;  %11444 = vpow2.f32 %v9957_v46  ;;  %v3310_v17 = vadd.f32 %v15963_v33, %v15962_v54  ;;  %v5109_v25 = vsel %vm11771_vm2, %v5104_v61, %v5108_v0 }
 0x383   : > { %v10237_v13 = vld [vmem:[#allocation4 + $0x21c] sm:$0xf0]  ;;  %5558 = vst [vmem:[#allocation4 + $0x200] sm:$0xf] %v14051_v16  ;;  %v4588_v30 = vshrl.u32 %v4373_v39, 16  ;;  %v4591_v51 = vshll.u32 %v4373_v39, 16  ;;  %v4093_v44 = vmul.f32 %v11443_v63, %v14120_v26  ;;  %vm4098_vm13 = vweird.f32 %v11443_v63 }
 0x384   : > { %v10240_v40 = vor.u32 %v11159_v34, %v10237_v13  ;;  %4283 = vst [vmem:[#allocation3 + $0xa8] sm:$0x1] %v4282_v57  ;;  %v5113_v23 = vor.u32 %v5112_v22, %v5108_v0  ;;  %vm4099_vm7 = vmor %vm4097_vm14, %vm4098_vm13  ;;  %v3399_v53 = vadd.f32 %v3398_v14, %v3310_v17  ;;  %v5121_v26 = vshrl.u32 %v14063_v62, 16  ;;  %v3487_v34 = vpop.f32.mrf.mxu3  ;;  %v4337_v0 = vld [vmem:[#allocation3 + $0xb0] sm:$0x1] }
 0x385   : > { %4892 = vst [vmem:[#allocation4 + $0x2d0] sm:$0xf] %v14132_v55  ;;  %v14145_v47 = vrot.slane %v4588_v30, 7  ;;  %v4094_v60 = vsub.f32 1.0, %v4093_v44  ;;  %v9971_v13 = vrot.slane %v13987_v11, 9  ;;  %v5461_v22 = vrot.slane %v14140_v1, 5 }
 0x386   : > { %7452 = vmatmul.bf16.gmra.mxu2 %v10240_v40  ;;  %5594 = vst [vmem:[#allocation4 + $0x294] sm:$0xf] %v14132_v55  ;;  %v5114_v8 = vrot.slane %v5113_v23, 4  ;;  %v3488_v40 = vadd.f32 %v3487_v34, %v3399_v53  ;;  %v5124_v39 = vshll.u32 %v14063_v62, 16  ;;  %v4338_v30 = vsel %vm12809_vm10, 0, %v4337_v0  ;;  %v15965_v34 = vld [vmem:[#allocation26_spill] sm:$0xff] }
 0x387   : > { %5726 = vst [vmem:[#allocation4 + $0x258] sm:$0xf] %v14132_v55  ;;  %v4593_v50 = vor.u32 %v4591_v51, %v14145_v47  ;;  %v4095_v56 = vmul.f32 %v11443_v63, %v4094_v60  ;;  %v14182_v46 = vrot.slane %v5121_v26, 4  ;;  %v5130_v11 = vshll.u32 %v14086_v45, 16  ;;  %v11169_v51 = vld [vmem:[#allocation4 + $0x24c] sm:$0xf] }
 0x388   : > { %5559 = vst [vmem:[#allocation4 + $0x224] sm:$0xf] %v5455_v31  ;;  %v11445_v24 = vpop.eup %11444  ;;  %v5119_v37 = vsel %vm11771_vm2, %v5114_v8, %v5118_v15  ;;  %v10284_v12 = vor.u32 %v11169_v51, %v10281_v20  ;;  %v11274_v0 = vld [vmem:[%s15803_s3 + $0x110] sm:$0xff]  ;;  %v11140_v43 = vld [vmem:[#allocation4 + $0x160] sm:$0xf0] }
 0x389   : > { %5690 = vst [vmem:[#allocation4 + $0x1c4] sm:$0xf] %v14051_v16  ;;  %v4791_v41 = vsel %vm12870_vm6, %v4593_v50, %v4790_v4  ;;  %v4096_v28 = vadd.f32 %v11443_v63, %v4095_v56  ;;  %v14168_v3 = vadd.f32 1.0, %v11445_v24  ;;  %v4594_v50 = vrot.slane %v14145_v47, 4  ;;  %v14199_v56 = vpop.f32.mrf.mxu1  ;;  %7681 = vmatpush.bf16.msrb.mxu1 %v11274_v0  ;;  %v15967_v0 = vld [vmem:[#allocation23_spill] sm:$0xff] }
 0x38a   : > { %5691 = vst [vmem:[#allocation4 + $0x1e8] sm:$0xf] %v5455_v31  ;;  %v10243_v5 = vld [vmem:[#allocation4 + $0x200] sm:$0xf]  ;;  %v14201_v54 = vrot.slane %v5130_v11, 5  ;;  %7635 = vmatmul.bf16.gmra.mxu0 %v10284_v12 }
 0x38b   : > { %5822 = vst [vmem:[#allocation4 + $0x188] sm:$0xf] %v14051_v16  ;;  %v5458_v16 = vrot.slane %v14007_v27, 5  ;;  %v4100_v7 = vsel %vm4099_vm7, %v11443_v63, %v4096_v28  ;;  %11446 = vrcp.f32 %v14168_v3  ;;  %v5134_v63 = vshrl.u32 %v14086_v45, 16 }
 0x38c   : > { %5823 = vst [vmem:[#allocation4 + $0x1ac] sm:$0xf] %v5455_v31  ;;  %v4105_v29 = vsel %vm4102_vm0, %v4104_v32, %v4100_v7  ;;  %v3576_v31 = vpop.f32.mrf.mxu0  ;;  %v10343_v23 = vld [vmem:[#allocation4 + $0x2d0] sm:$0xf]  ;;  %v4118_v53 = vand.u32 2147483648, %v14168_v3  ;;  %vm4112_vm3 = vweird.f32 %v14168_v3 }
 0x38d   : > { %4792 = vst [vmem:[#allocation3 + $0x9c] sm:$0xf] %v4791_v41  ;;  %v5460_v59 = vrot.slane %v5458_v16, 4  ;;  %v4222_v57 = vmul.f32 %v4105_v29, %v14084_v19  ;;  %v14186_v6 = vadd.f32 %v3576_v31, %v3488_v40  ;;  %v14190_v44 = vsel %vm12270_vm5, %v9971_v13, %v5458_v16  ;;  %v4794_v16 = vld [vmem:[#allocation3 + $0xa4] sm:$0x1]  ;;  %v15964_v29 = vld [vmem:[#allocation27_spill] sm:$0xff] }
 0x38e   : > { %4893 = vst [vmem:[#allocation4 + $0x2f4] sm:$0xf] %v14156_v49  ;;  %v4116_v41 = vand.u32 2147483647, %v14168_v3  ;;  %v5136_v33 = vrot.slane %v5134_v63, 4  ;;  %v3313_v13 = vadd.f32 %v15965_v34, %v15964_v29  ;;  %v4119_v31 = vor.u32 1.1754944e-38, %v4118_v53 }
 0x38f   : > { %5595 = vst [vmem:[#allocation4 + $0x2b8] sm:$0xf] %v14156_v49  ;;  %v11164_v27 = vld [vmem:[#allocation4 + $0x220] sm:$0xf0]  ;;  %v4374_v19 = vpack.c.bf16 %v4222_v57, %v4222_v57  ;;  %v14194_v4 = vsel %vm12270_vm5, %v5460_v59, %v5461_v22  ;;  %v9958_v42 = vmul.f32 -1.442695, %v14186_v6  ;;  %v3401_v22 = vpop.f32.mrf.mxu2 }
 0x390   : > { %5727 = vst [vmem:[#allocation4 + $0x27c] sm:$0xf] %v14156_v49  ;;  %v10244_v58 = vor.u32 %v11164_v27, %v10243_v5  ;;  %v14208_v27 = vld [vmem:[#allocation3 + $0x84] sm:$0xf]  ;;  %v14218_v59 = vld [vmem:[#allocation3 + $0x74] sm:$0x1]  ;;  %v3402_v11 = vadd.f32 %v3401_v22, %v3313_v13 }
 0x391   : > { %5336 = vst [vmem:[#allocation4 + $0x244] sm:$0xf] %v5109_v25  ;;  %v4596_v60 = vshrl.u32 %v4374_v19, 16  ;;  %v11447_v8 = vpop.eup %11446  ;;  %v4599_v15 = vshll.u32 %v4374_v19, 16  ;;  %11448 = vpow2.f32 %v9958_v42  ;;  %vm4117_vm9 = vcmp.eq.f32.partialorder %v4116_v41, 8.507059e+37  ;;  %v14232_v20 = vpop.f32.mrf.mxu1 }
 0x392   : > { %7541 = vmatmul.bf16.gmra.mxu3 %v10244_v58  ;;  %5337 = vst [vmem:[#allocation4 + $0x268] sm:$0xf] %v5119_v37  ;;  %v4108_v47 = vmul.f32 %v11447_v8, %v14168_v3  ;;  %vm4113_vm1 = vweird.f32 %v11447_v8  ;;  %v5140_v51 = vshll.u32 %v14218_v59, 16  ;;  %v9972_v34 = vrot.slane %v14063_v62, 9 }
 0x393   : > { %5648 = vst [vmem:[#allocation4 + $0x208] sm:$0xf] %v5109_v25  ;;  %v4598_v17 = vrot.slane %v4596_v60, 7  ;;  %vm4114_vm4 = vmor %vm4112_vm3, %vm4113_vm1 }
 0x394   : > { %4339 = vst [vmem:[#allocation3 + $0xb0] sm:$0x1] %v4338_v30  ;;  %v4109_v5 = vsub.f32 1.0, %v4108_v47  ;;  %v3579_v3 = vpop.f32.mrf.mxu0 }
 0x395   : > { %v11190_v1 = vld [vmem:[#allocation4 + $0x2f0] sm:$0xf0]  ;;  %5649 = vst [vmem:[#allocation4 + $0x22c] sm:$0xf] %v5119_v37  ;;  %v4601_v32 = vor.u32 %v4599_v15, %v4598_v17  ;;  %v4603_v14 = vrot.slane %v4598_v17, 4 }
 0x396   : > { %v10344_v61 = vor.u32 %v11190_v1, %v10343_v23  ;;  %5780 = vst [vmem:[#allocation4 + $0x1cc] sm:$0xf] %v5109_v25  ;;  %v4110_v58 = vmul.f32 %v11447_v8, %v4109_v5 }
 0x397   : > { %5781 = vst [vmem:[#allocation4 + $0x1f0] sm:$0xf] %v5119_v37  ;;  %v5126_v37 = vrot.slane %v5124_v39, 5  ;;  %v4602_v26 = vsel %vm12903_vm15, %v4594_v50, %v4601_v32  ;;  %v4795_v7 = vsel %vm12788_vm8, %v4603_v14, %v4794_v16  ;;  %v11449_v57 = vpop.eup %11448  ;;  %v5137_v39 = vor.u32 %v5136_v33, %v14201_v54  ;;  %v3490_v50 = vpop.f32.mrf.mxu3  ;;  %v14239_v33 = vld [vmem:[#allocation3 + $0x88] sm:$0xf] }
 0x398   : > { %7378 = vmatmul.bf16.gmra.mxu1 %v10344_v61  ;;  %5560 = vst [vmem:[#allocation4 + $0x248] sm:$0xf] %v14190_v44  ;;  %v11168_v24 = vld [vmem:[#allocation4 + $0x244] sm:$0xf]  ;;  %v4111_v40 = vadd.f32 %v11447_v8, %v4110_v58  ;;  %v14225_v30 = vadd.f32 1.0, %v11449_v57  ;;  %v3491_v42 = vadd.f32 %v3490_v50, %v3402_v11  ;;  %v5465_v32 = vrot.slane %v14086_v45, 5  ;;  %v3403_v62 = vpop.f32.mrf.mxu2 }
 0x399   : > { %v10273_v28 = vld [vmem:[#allocation4 + $0x264] sm:$0xf0]  ;;  %5561 = vst [vmem:[#allocation4 + $0x26c] sm:$0xf] %v14194_v4  ;;  %v5127_v63 = vor.u32 %v5126_v37, %v14182_v46  ;;  %v4284_v61 = vld [vmem:[#allocation3 + $0xb4] sm:$0x1]  ;;  %v14260_v29 = vpop.f32.mrf.mxu1 }
 0x39a   : > { %v10276_v25 = vor.u32 %v11168_v24, %v10273_v28  ;;  %5692 = vst [vmem:[#allocation4 + $0x20c] sm:$0xf] %v14190_v44  ;;  %v4115_v19 = vsel %vm4114_vm4, %v11447_v8, %v4111_v40  ;;  %11450 = vrcp.f32 %v14225_v30  ;;  %v5138_v41 = vrot.slane %v5137_v39, 4  ;;  %v15966_v40 = vld [vmem:[#allocation28_spill] sm:$0xff] }
 0x39b   : > { %5693 = vst [vmem:[#allocation4 + $0x230] sm:$0xf] %v14194_v4  ;;  %v4120_v1 = vsel %vm4117_vm9, %v4119_v31, %v4115_v19  ;;  %v4285_v12 = vsel %vm12788_vm8, 0, %v4284_v61  ;;  %v5128_v17 = vrot.slane %v5127_v63, 4  ;;  %v14241_v16 = vadd.f32 %v3579_v3, %v3491_v42 }
 0x39c   : > { %4894 = vst [vmem:[#allocation4 + $0x318] sm:$0xf] %v14208_v27  ;;  %7457 = vmatmul.bf16.gmra.mxu2 %v10276_v25  ;;  %v4223_v46 = vmul.f32 %v4120_v1, %v14130_v18  ;;  %v4131_v53 = vand.u32 2147483647, %v14225_v30  ;;  %v3581_v58 = vpop.f32.mrf.mxu0  ;;  %v5145_v45 = vshrl.u32 %v14132_v55, 16  ;;  %v5467_v13 = vrot.slane %v5465_v32, 4 }
 0x39d   : > { %4793 = vst [vmem:[#allocation3 + $0xa0] sm:$0xf] %v4602_v26  ;;  %v5133_v18 = vsel %vm11771_vm2, %v5128_v17, %v14201_v54  ;;  %v9959_v47 = vmul.f32 -1.442695, %v14241_v16  ;;  %v4797_v54 = vld [vmem:[#allocation3 + $0xa8] sm:$0xf]  ;;  %v3315_v22 = vadd.f32 %v15967_v0, %v15966_v40  ;;  %vm4127_vm12 = vweird.f32 %v14225_v30 }
 0x39e   : > { %4796 = vst [vmem:[#allocation3 + $0xa4] sm:$0x1] %v4795_v7  ;;  %v4375_v15 = vpack.c.bf16 %v4223_v46, %v4223_v46  ;;  %v4133_v7 = vand.u32 2147483648, %v14225_v30  ;;  %v5148_v57 = vshll.u32 %v14132_v55, 16  ;;  %vm14269_vm13 = vcmp.eq.f32.partialorder %v4131_v53, 8.507059e+37 }
 0x39f   : > { %5596 = vst [vmem:[#allocation4 + $0x2dc] sm:$0xf] %v14208_v27  ;;  %v10279_v60 = vld [vmem:[#allocation4 + $0x248] sm:$0xf]  ;;  %11452 = vpow2.f32 %v9959_v47  ;;  %v5147_v46 = vrot.slane %v5145_v45, 4  ;;  %v3492_v61 = vpop.f32.mrf.mxu3 }
 0x3a0   : > { %5728 = vst [vmem:[#allocation4 + $0x2a0] sm:$0xf] %v14208_v27  ;;  %v11173_v23 = vld [vmem:[#allocation4 + $0x268] sm:$0xf0]  ;;  %v11451_v28 = vpop.eup %11450  ;;  %v4608_v5 = vshll.u32 %v4375_v15, 16  ;;  %v4134_v50 = vor.u32 1.1754944e-38, %v4133_v7 }
 0x3a1   : > { %5824 = vst [vmem:[#allocation4 + $0x1d0] sm:$0xf] %v14190_v44  ;;  %v10280_v8 = vor.u32 %v11173_v23, %v10279_v60  ;;  %v5142_v44 = vrot.slane %v5140_v51, 5  ;;  %v4123_v25 = vmul.f32 %v11451_v28, %v14225_v30  ;;  %vm4128_vm11 = vweird.f32 %v11451_v28  ;;  %v14277_v30 = vld [vmem:[#allocation3 + $0x90] sm:$0xf] }
 0x3a2   : > { %5825 = vst [vmem:[#allocation4 + $0x1f4] sm:$0xf] %v14194_v4  ;;  %v4605_v4 = vshrl.u32 %v4375_v15, 16  ;;  %v5468_v23 = vrot.slane %v14218_v59, 5  ;;  %v3404_v60 = vadd.f32 %v3403_v62, %v3315_v22  ;;  %vm4129_vm14 = vmor %vm4127_vm12, %vm4128_vm11  ;;  %v4340_v15 = vld [vmem:[#allocation3 + $0xbc] sm:$0x1] }
 0x3a3   : > { %4286 = vst [vmem:[#allocation3 + $0xb4] sm:$0x1] %v4285_v12  ;;  %7546 = vmatmul.bf16.gmra.mxu3 %v10280_v8  ;;  %v5143_v24 = vsel %vm11771_vm2, %v5138_v41, %v5142_v44  ;;  %v4124_v26 = vsub.f32 1.0, %v4123_v25  ;;  %v10379_v11 = vld [vmem:[#allocation4 + $0x318] sm:$0xf]  ;;  %v5150_v8 = vrot.slane %v5148_v57, 5  ;;  %v14299_v57 = vpop.f32.mrf.mxu1 }
 0x3a4   : > { %4895 = vst [vmem:[#allocation4 + $0x33c] sm:$0xf] %v14239_v33  ;;  %v14253_v14 = vrot.slane %v4605_v4, 7  ;;  %v5154_v41 = vshll.u32 %v14156_v49, 16  ;;  %v5158_v12 = vshrl.u32 %v14156_v49, 16  ;;  %v3493_v17 = vadd.f32 %v3492_v61, %v3404_v60  ;;  %v3406_v60 = vpop.f32.mrf.mxu2 }
 0x3a5   : > { %5597 = vst [vmem:[#allocation4 + $0x300] sm:$0xf] %v14239_v33  ;;  %v4125_v31 = vmul.f32 %v11451_v28, %v4124_v26  ;;  %v11453_v51 = vpop.eup %11452  ;;  %v5466_v4 = vsel %vm12270_vm5, %v9972_v34, %v5465_v32  ;;  %v11178_v47 = vld [vmem:[#allocation4 + $0x294] sm:$0xf]  ;;  %v4341_v25 = vsel %vm12809_vm10, 0, %v4340_v15  ;;  %v5469_v53 = vsel %vm12270_vm5, %v5467_v13, %v5468_v23 }
 0x3a6   : > { %5729 = vst [vmem:[#allocation4 + $0x2c4] sm:$0xf] %v14239_v33  ;;  %v4610_v37 = vor.u32 %v4608_v5, %v14253_v14  ;;  %v14275_v42 = vadd.f32 1.0, %v11453_v51  ;;  %v14296_v7 = vld [vmem:[#allocation3 + $0x80] sm:$0x1]  ;;  %v5156_v32 = vrot.slane %v5154_v41, 5  ;;  %v5151_v40 = vor.u32 %v5150_v8, %v5147_v46 }
 0x3a7   : > { %5338 = vst [vmem:[#allocation4 + $0x28c] sm:$0xf] %v5133_v18  ;;  %v4126_v1 = vadd.f32 %v11451_v28, %v4125_v31  ;;  %v5160_v45 = vrot.slane %v5158_v12, 4  ;;  %v5164_v13 = vshll.u32 %v14296_v7, 16  ;;  %v4611_v62 = vrot.slane %v14253_v14, 4  ;;  %v3495_v46 = vpop.f32.mrf.mxu3  ;;  %v15970_v12 = vld [vmem:[#allocation24_spill] sm:$0xff] }
 0x3a8   : > { %5339 = vst [vmem:[#allocation4 + $0x2b0] sm:$0xf] %v5143_v24  ;;  %v4798_v39 = vsel %vm12870_vm6, %v4610_v37, %v4797_v54  ;;  %11454 = vrcp.f32 %v14275_v42  ;;  %v5152_v23 = vrot.slane %v5151_v40, 4  ;;  %v4146_v8 = vand.u32 2147483647, %v14275_v42 }
 0x3a9   : > { %5650 = vst [vmem:[#allocation4 + $0x250] sm:$0xf] %v5133_v18  ;;  %v4130_v59 = vsel %vm4129_vm14, %v11451_v28, %v4126_v1  ;;  %v14289_v28 = vadd.f32 %v3581_v58, %v3493_v17  ;;  %v3584_v58 = vpop.f32.mrf.mxu0  ;;  %v5161_v31 = vor.u32 %v5160_v45, %v5156_v32  ;;  %v5166_v61 = vrot.slane %v5164_v13, 5 }
 0x3aa   : > { %5651 = vst [vmem:[#allocation4 + $0x274] sm:$0xf] %v5143_v24  ;;  %v4148_v41 = vand.u32 2147483648, %v14275_v42  ;;  %vm4142_vm0 = vweird.f32 %v14275_v42  ;;  %vm4147_vm3 = vcmp.eq.f32.partialorder %v4146_v8, 8.507059e+37 }
 0x3ab   : > { %v11199_v63 = vld [vmem:[#allocation4 + $0x338] sm:$0xf0]  ;;  %5782 = vst [vmem:[#allocation4 + $0x214] sm:$0xf] %v5133_v18  ;;  %v4135_v18 = vsel %vm14269_vm13, %v4134_v50, %v4130_v59  ;;  %v3407_v59 = vadd.f32 %v3406_v60, %v15970_v12  ;;  %v5162_v14 = vrot.slane %v5161_v31, 4  ;;  %v9973_v12 = vrot.slane %v14132_v55, 9 }
 0x3ac   : > { %4799 = vst [vmem:[#allocation3 + $0xa8] sm:$0xf] %v4798_v39  ;;  %v10380_v3 = vor.u32 %v11199_v63, %v10379_v11  ;;  %v4224_v5 = vmul.f32 %v4135_v18, %v14186_v6  ;;  %v9960_v6 = vmul.f32 -1.442695, %v14289_v28  ;;  %v14302_v39 = vld [vmem:[#allocation3 + $0x94] sm:$0xf] }
 0x3ad   : > { %5783 = vst [vmem:[#allocation4 + $0x238] sm:$0xf] %v5143_v24  ;;  %v10317_v24 = vld [vmem:[#allocation4 + $0x2b4] sm:$0xf0]  ;;  %v5167_v40 = vsel %vm11771_vm2, %v5162_v14, %v5166_v61  ;;  %v14334_v60 = vld [vmem:[#allocation3 + $0x9c] sm:$0xf] }
 0x3ae   : > { %7383 = vmatmul.bf16.gmra.mxu1 %v10380_v3  ;;  %4896 = vst [vmem:[#allocation4 + $0x360] sm:$0xf] %v14277_v30  ;;  %v11177_v54 = vld [vmem:[#allocation4 + $0x28c] sm:$0xf]  ;;  %v10320_v26 = vor.u32 %v11178_v47, %v10317_v24  ;;  %v4376_v34 = vpack.c.bf16 %v4224_v5, %v4224_v5  ;;  %11456 = vpow2.f32 %v9960_v6  ;;  %v11455_v22 = vpop.eup %11454  ;;  %v4801_v3 = vld [vmem:[#allocation3 + $0xb0] sm:$0x1]  ;;  %v14322_v6 = vpop.f32.mrf.mxu1 }
 0x3af   : > { %v10309_v44 = vld [vmem:[#allocation4 + $0x2ac] sm:$0xf0]  ;;  %5598 = vst [vmem:[#allocation4 + $0x324] sm:$0xf] %v14277_v30  ;;  %v4138_v19 = vmul.f32 %v11455_v22, %v14275_v42  ;;  %vm4143_vm7 = vweird.f32 %v11455_v22  ;;  %v4804_v61 = vld [vmem:[#allocation3 + $0xb4] sm:$0xf] }
 0x3b0   : > { %5730 = vst [vmem:[#allocation4 + $0x2e8] sm:$0xf] %v14277_v30  ;;  %v10312_v37 = vor.u32 %v11177_v54, %v10309_v44  ;;  %7640 = vmatmul.bf16.gmra.mxu0 %v10320_v26  ;;  %v4613_v0 = vshrl.u32 %v4376_v34, 16  ;;  %v4616_v63 = vshll.u32 %v4376_v34, 16  ;;  %v4287_v26 = vld [vmem:[#allocation3 + $0xc0] sm:$0x1]  ;;  %vm4144_vm1 = vmor %vm4142_vm0, %vm4143_vm7 }
 0x3b1   : > { %4342 = vst [vmem:[#allocation3 + $0xbc] sm:$0x1] %v4341_v25  ;;  %v4139_v50 = vsub.f32 1.0, %v4138_v19  ;;  %v3496_v25 = vadd.f32 %v3495_v46, %v3407_v59  ;;  %v3586_v45 = vpop.f32.mrf.mxu0  ;;  %v4149_v34 = vor.u32 1.1754944e-38, %v4148_v41  ;;  %v4288_v42 = vsel %vm12788_vm8, 0, %v4287_v26 }
 0x3b2   : > { %5562 = vst [vmem:[#allocation4 + $0x290] sm:$0xf] %v5466_v4  ;;  %7462 = vmatmul.bf16.gmra.mxu2 %v10312_v37  ;;  %v4615_v11 = vrot.slane %v4613_v0, 7  ;;  %v5475_v59 = vrot.slane %v14296_v7, 5 }
 0x3b3   : > { %5563 = vst [vmem:[#allocation4 + $0x2b4] sm:$0xf] %v5469_v53  ;;  %v4140_v18 = vmul.f32 %v11455_v22, %v4139_v50 }
 0x3b4   : > { %5694 = vst [vmem:[#allocation4 + $0x254] sm:$0xf] %v5466_v4  ;;  %v4618_v51 = vor.u32 %v4616_v63, %v4615_v11  ;;  %v4620_v1 = vrot.slane %v4615_v11, 4  ;;  %v11457_v17 = vpop.eup %11456  ;;  %v5472_v63 = vrot.slane %v14156_v49, 5 }
 0x3b5   : > { %5695 = vst [vmem:[#allocation4 + $0x278] sm:$0xf] %v5469_v53  ;;  %v14316_v5 = vadd.f32 1.0, %v11457_v17  ;;  %v4141_v37 = vadd.f32 %v11455_v22, %v4140_v18  ;;  %v10415_v13 = vld [vmem:[#allocation4 + $0x360] sm:$0xf] }
 0x3b6   : > { %4897 = vst [vmem:[#allocation4 + $0x384] sm:$0xf] %v14302_v39  ;;  %v4619_v15 = vsel %vm12903_vm15, %v4611_v62, %v4618_v51  ;;  %v4802_v44 = vsel %vm12788_vm8, %v4620_v1, %v4801_v3  ;;  %v3408_v3 = vpop.f32.mrf.mxu2  ;;  %v3497_v51 = vpop.f32.mrf.mxu3  ;;  %v5474_v49 = vrot.slane %v5472_v63, 4  ;;  %v14355_v55 = vsel %vm12270_vm5, %v9973_v12, %v5472_v63 }
 0x3b7   : > { %5599 = vst [vmem:[#allocation4 + $0x348] sm:$0xf] %v14302_v39  ;;  %11458 = vrcp.f32 %v14316_v5  ;;  %v4145_v0 = vsel %vm4144_vm1, %v11455_v22, %v4141_v37  ;;  %v15971_v22 = vld [vmem:[#allocation29_spill] sm:$0xff]  ;;  %v4161_v8 = vand.u32 2147483647, %v14316_v5  ;;  %vm4157_vm9 = vweird.f32 %v14316_v5 }
 0x3b8   : > { %5731 = vst [vmem:[#allocation4 + $0x30c] sm:$0xf] %v14302_v39  ;;  %v4150_v31 = vsel %vm4147_vm3, %v4149_v34, %v4145_v0  ;;  %v14359_v7 = vsel %vm12270_vm5, %v5474_v49, %v5475_v59 }
 0x3b9   : > { %5826 = vst [vmem:[#allocation4 + $0x218] sm:$0xf] %v5466_v4  ;;  %v10315_v47 = vld [vmem:[#allocation4 + $0x290] sm:$0xf]  ;;  %v5157_v4 = vsel %vm11771_vm2, %v5152_v23, %v5156_v32  ;;  %v14326_v32 = vadd.f32 %v3584_v58, %v3496_v25  ;;  %v4225_v19 = vmul.f32 %v4150_v31, %v14241_v16  ;;  %v3409_v23 = vadd.f32 %v3408_v3, %v15971_v22  ;;  %v14347_v18 = vpop.f32.mrf.mxu0 }
 0x3ba   : > { %v11182_v24 = vld [vmem:[#allocation4 + $0x2b0] sm:$0xf0]  ;;  %5827 = vst [vmem:[#allocation4 + $0x23c] sm:$0xf] %v5469_v53  ;;  %v4343_v25 = vld [vmem:[#allocation3 + $0xc8] sm:$0x1] }
 0x3bb   : > { %4800 = vst [vmem:[#allocation3 + $0xac] sm:$0xf] %v4619_v15  ;;  %v10316_v54 = vor.u32 %v11182_v24, %v10315_v47  ;;  %v9961_v62 = vmul.f32 -1.442695, %v14326_v32  ;;  %v4377_v58 = vpack.c.bf16 %v4225_v19, %v4225_v19  ;;  %v3498_v50 = vadd.f32 %v3497_v51, %v3409_v23  ;;  %v14349_v47 = vpop.f32.mrf.mxu1 }
 0x3bc   : > { %4803 = vst [vmem:[#allocation3 + $0xb0] sm:$0x1] %v4802_v44  ;;  %v4163_v44 = vand.u32 2147483648, %v14316_v5  ;;  %vm4162_vm12 = vcmp.eq.f32.partialorder %v4161_v8, 8.507059e+37  ;;  %v9974_v23 = vrot.slane %v14208_v27, 9  ;;  %v5178_v8 = vshll.u32 %v14239_v33, 16 }
 0x3bd   : > { %v11208_v53 = vld [vmem:[#allocation4 + $0x380] sm:$0xf0]  ;;  %7551 = vmatmul.bf16.gmra.mxu3 %v10316_v54  ;;  %5340 = vst [vmem:[#allocation4 + $0x2d4] sm:$0xf] %v5157_v4  ;;  %11460 = vpow2.f32 %v9961_v62  ;;  %v11459_v1 = vpop.eup %11458  ;;  %v4622_v46 = vshrl.u32 %v4377_v58, 16  ;;  %v14339_v41 = vadd.f32 %v3586_v45, %v3498_v50  ;;  %v4625_v17 = vshll.u32 %v4377_v58, 16 }
 0x3be   : > { %4289 = vst [vmem:[#allocation3 + $0xc0] sm:$0x1] %v4288_v42  ;;  %v10416_v11 = vor.u32 %v11208_v53, %v10415_v13  ;;  %v4153_v16 = vmul.f32 %v11459_v1, %v14316_v5  ;;  %vm4158_vm4 = vweird.f32 %v11459_v1  ;;  %v4344_v45 = vsel %vm12809_vm10, 0, %v4343_v25  ;;  %v14367_v53 = vld [vmem:[%s15804_s4] ss:$0 sm:$0xff]  ;;  %v7418_v51 = vpop.f32.mrf.mxu2  ;;  %v7507_v50 = vpop.f32.mrf.mxu3 }
 0x3bf   : > { %5341 = vst [vmem:[#allocation4 + $0x2f8] sm:$0xf] %v5167_v40  ;;  %v14344_v14 = vrot.slane %v4622_v46, 7  ;;  %v9962_v24 = vmul.f32 -1.442695, %v14339_v41  ;;  %v5169_v13 = vshrl.u32 %v14208_v27, 16  ;;  %vm4159_vm11 = vmor %vm4157_vm9, %vm4158_vm4  ;;  %v7330_v5 = vadd.f32 %v14367_v53, %v14075_v9 }
 0x3c0   : > { %7388 = vmatmul.bf16.gmra.mxu1 %v10416_v11  ;;  %5652 = vst [vmem:[#allocation4 + $0x298] sm:$0xf] %v5157_v4  ;;  %v4154_v15 = vsub.f32 1.0, %v4153_v16  ;;  %v4164_v63 = vor.u32 1.1754944e-38, %v4163_v44  ;;  %v14379_v62 = vld [vmem:[#allocation3 + $0xa0] sm:$0xf] }
 0x3c1   : > { %5653 = vst [vmem:[#allocation4 + $0x2bc] sm:$0xf] %v5167_v40  ;;  %v4627_v37 = vor.u32 %v4625_v17, %v14344_v14  ;;  %11462 = vpow2.f32 %v9962_v24  ;;  %v14385_v22 = vrot.slane %v5169_v13, 4  ;;  %v5479_v46 = vrot.slane %v14239_v33, 5  ;;  %v11273_v17 = vld [vmem:[%s15803_s3 + $0x108] sm:$0xff] }
 0x3c2   : > { %5784 = vst [vmem:[#allocation4 + $0x25c] sm:$0xf] %v5157_v4  ;;  %v4155_v26 = vmul.f32 %v11459_v1, %v4154_v15  ;;  %v7419_v9 = vadd.f32 %v7418_v51, %v7330_v5  ;;  %v14402_v15 = vpop.f32.mrf.mxu0  ;;  %v14406_v24 = vld [vmem:[#allocation3 + $0xa8] sm:$0xf]  ;;  %7682 = vmatpush.bf16.msrb.mxu1 %v11273_v17  ;;  %v7332_v51 = vadd.f32 %v14367_v53, %v14107_v36 }
 0x3c3   : > { %4898 = vst [vmem:[#allocation4 + $0x3a8] sm:$0xf] %v14334_v60  ;;  %v11461_v4 = vpop.eup %11460  ;;  %v4805_v31 = vsel %vm12870_vm6, %v4627_v37, %v4804_v61  ;;  %v10353_v61 = vld [vmem:[#allocation4 + $0x2fc] sm:$0xf0]  ;;  %v14404_v44 = vpop.f32.mrf.mxu1 }
 0x3c4   : > { %5600 = vst [vmem:[#allocation4 + $0x36c] sm:$0xf] %v14334_v60  ;;  %v11186_v34 = vld [vmem:[#allocation4 + $0x2d4] sm:$0xf]  ;;  %v14369_v0 = vadd.f32 1.0, %v11461_v4  ;;  %v4156_v11 = vadd.f32 %v11459_v1, %v4155_v26  ;;  %v4628_v4 = vrot.slane %v14344_v14, 4  ;;  %v14412_v26 = vadd.f32 %v7507_v50, %v7419_v9 }
 0x3c5   : > { %5732 = vst [vmem:[#allocation4 + $0x330] sm:$0xf] %v14334_v60 }
 0x3c6   : > { %v10345_v54 = vld [vmem:[#allocation4 + $0x2f4] sm:$0xf0]  ;;  %5785 = vst [vmem:[#allocation4 + $0x280] sm:$0xf] %v5167_v40  ;;  %v5172_v40 = vshll.u32 %v14208_v27, 16  ;;  %11464 = vrcp.f32 %v14369_v0  ;;  %v4160_v19 = vsel %vm4159_vm11, %v11459_v1, %v4156_v11  ;;  %v5182_v27 = vshrl.u32 %v14239_v33, 16  ;;  %v7509_v17 = vpop.f32.mrf.mxu3 }
 0x3c7   : > { %4345 = vst [vmem:[#allocation3 + $0xc8] sm:$0x1] %v4344_v45  ;;  %v10348_v42 = vor.u32 %v11186_v34, %v10345_v54  ;;  %v4165_v3 = vsel %vm4162_vm12, %v4164_v63, %v4160_v19  ;;  %v11187_v1 = vld [vmem:[#allocation4 + $0x2dc] sm:$0xf]  ;;  %v11463_v16 = vpop.eup %11462  ;;  %v4178_v37 = vand.u32 2147483648, %v14369_v0  ;;  %v14421_v34 = vsel %vm12270_vm5, %v9974_v23, %v5479_v46 }
 0x3c8   : > { %5564 = vst [vmem:[#allocation4 + $0x2d8] sm:$0xf] %v14355_v55  ;;  %v4226_v58 = vmul.f32 %v4165_v3, %v14289_v28  ;;  %v14390_v49 = vrot.slane %v5172_v40, 5  ;;  %v4176_v28 = vand.u32 2147483647, %v14369_v0  ;;  %v14397_v59 = vadd.f32 1.0, %v11463_v16 }
 0x3c9   : > { %4806 = vst [vmem:[#allocation3 + $0xb4] sm:$0xf] %v4805_v31  ;;  %7467 = vmatmul.bf16.gmra.mxu2 %v10348_v42  ;;  %v10356_v25 = vor.u32 %v11187_v1, %v10353_v61  ;;  %v14414_v45 = vld [vmem:[#allocation3 + $0xac] sm:$0xf]  ;;  %v11272_v31 = vld [vmem:[%s15803_s3 + $0x100] sm:$0xff]  ;;  %v14433_v19 = vrot.slane %v5178_v8, 5  ;;  %vm4172_vm14 = vweird.f32 %v14369_v0 }
 0x3ca   : > { %5565 = vst [vmem:[#allocation4 + $0x2fc] sm:$0xf] %v14359_v7  ;;  %v4378_v12 = vpack.c.bf16 %v4226_v58, %v4226_v58  ;;  %v10451_v14 = vld [vmem:[#allocation4 + $0x3a8] sm:$0xf]  ;;  %v14429_v11 = vld [vmem:[#allocation3 + $0x8c] sm:$0x1]  ;;  %11466 = vrcp.f32 %v14397_v59  ;;  %v5175_v9 = vor.u32 %v14390_v49, %v14385_v22  ;;  %7683 = vmatpush.bf16.msrb.mxu1 %v11272_v31  ;;  %v14454_v31 = vpop.f32.mrf.mxu0  ;;  %vm4187_vm4 = vweird.f32 %v14397_v59 }
 0x3cb   : > { %4899 = vst [vmem:[#allocation4 + $0x3cc] sm:$0xf] %v14379_v62  ;;  %7645 = vmatmul.bf16.gmra.mxu0 %v10356_v25  ;;  %v4808_v63 = vld [vmem:[#allocation3 + $0xbc] sm:$0x1]  ;;  %v5184_v5 = vrot.slane %v5182_v27, 4  ;;  %v5188_v22 = vshll.u32 %v14429_v11, 16 }
 0x3cc   : > { %5601 = vst [vmem:[#allocation4 + $0x390] sm:$0xf] %v14379_v62  ;;  %v14408_v54 = vpop.eup %11464  ;;  %v4630_v42 = vshrl.u32 %v4378_v12, 16  ;;  %v4633_v40 = vshll.u32 %v4378_v12, 16  ;;  %v7420_v12 = vpop.f32.mrf.mxu2  ;;  %v4191_v25 = vand.u32 2147483647, %v14397_v59 }
 0x3cd   : > { %5733 = vst [vmem:[#allocation4 + $0x354] sm:$0xf] %v14379_v62  ;;  %v4168_v13 = vmul.f32 %v14408_v54, %v14369_v0  ;;  %vm4173_vm13 = vweird.f32 %v14408_v54  ;;  %vm4177_vm0 = vcmp.eq.f32.partialorder %v4176_v28, 8.507059e+37  ;;  %v5482_v33 = vrot.slane %v14429_v11, 5  ;;  %v11311_v11 = vld [vmem:[%s15803_s3 + $0x238] sm:$0xff] }
 0x3ce   : > { %4900 = vst [vmem:[#allocation4 + $0x3f0] sm:$0xf] %v14406_v24  ;;  %v4632_v3 = vrot.slane %v4630_v42, 7  ;;  %v7421_v42 = vadd.f32 %v7420_v12, %v7332_v51  ;;  %vm4174_vm7 = vmor %vm4172_vm14, %vm4173_vm13  ;;  %v11295_v51 = vld [vmem:[%s15803_s3 + $0x1b8] sm:$0xff]  ;;  %vm14479_vm1 = vcmp.eq.f32.partialorder %v4191_v25, 8.507059e+37  ;;  %v5196_v12 = vshll.u32 %v14277_v30, 16  ;;  %8032 = vmatpush.bf16.msra.mxu1 %v11311_v11 }
 0x3cf   : > { %4901 = vst [vmem:[#allocation4 + $0x414] sm:$0xf] %v14414_v45  ;;  %v4169_v23 = vsub.f32 1.0, %v4168_v13  ;;  %v10351_v1 = vld [vmem:[#allocation4 + $0x2d8] sm:$0xf]  ;;  %v5185_v13 = vor.u32 %v5184_v5, %v14433_v19  ;;  %7854 = vmatpush.bf16.msra.mxu3 %v11295_v51  ;;  %v5206_v25 = vshrl.u32 %v14302_v39, 16 }
 0x3d0   : > { %5602 = vst [vmem:[#allocation4 + $0x3b4] sm:$0xf] %v14406_v24  ;;  %v4635_v61 = vor.u32 %v4633_v40, %v4632_v3  ;;  %v4637_v8 = vrot.slane %v4632_v3, 4  ;;  %v14456_v3 = vpop.f32.mrf.mxu1  ;;  %v14459_v5 = vpop.eup %11466 }
 0x3d1   : > { %5603 = vst [vmem:[#allocation4 + $0x3d8] sm:$0xf] %v14414_v45  ;;  %v11191_v16 = vld [vmem:[#allocation4 + $0x2f8] sm:$0xf0]  ;;  %v4170_v27 = vmul.f32 %v14408_v54, %v4169_v23  ;;  %v14463_v23 = vadd.f32 %v7509_v17, %v7421_v42  ;;  %v7335_v17 = vadd.f32 %v14367_v53, %v14125_v21  ;;  %vm4188_vm3 = vweird.f32 %v14459_v5  ;;  %v7512_v21 = vpop.f32.mrf.mxu3 }
 0x3d2   : > { %v11217_v58 = vld [vmem:[#allocation4 + $0x3c8] sm:$0xf0]  ;;  %5734 = vst [vmem:[#allocation4 + $0x378] sm:$0xf] %v14406_v24  ;;  %v10352_v36 = vor.u32 %v11191_v16, %v10351_v1  ;;  %v4636_v49 = vsel %vm12903_vm15, %v4628_v4, %v4635_v61  ;;  %v4179_v4 = vor.u32 1.1754944e-38, %v4178_v37  ;;  %v4183_v37 = vmul.f32 %v14459_v5, %v14397_v59  ;;  %vm4189_vm9 = vmor %vm4187_vm4, %vm4188_vm3 }
 0x3d3   : > { %v10452_v50 = vor.u32 %v11217_v58, %v10451_v14  ;;  %5735 = vst [vmem:[#allocation4 + $0x39c] sm:$0xf] %v14414_v45  ;;  %v4809_v14 = vsel %vm12788_vm8, %v4637_v8, %v4808_v63  ;;  %v4171_v40 = vadd.f32 %v14408_v54, %v4170_v27  ;;  %v11287_v63 = vld [vmem:[%s15803_s3 + $0x178] sm:$0xff]  ;;  %v5176_v58 = vrot.slane %v5175_v9, 4  ;;  %v14477_v16 = vld [vmem:[#allocation3 + $0xb4] sm:$0xf] }
 0x3d4   : > { %5696 = vst [vmem:[#allocation4 + $0x29c] sm:$0xf] %v14355_v55  ;;  %7556 = vmatmul.bf16.gmra.mxu3 %v10352_v36  ;;  %v4193_v1 = vand.u32 2147483648, %v14397_v59  ;;  %7765 = vmatpush.bf16.msra.mxu2 %v11287_v63  ;;  %v5186_v8 = vrot.slane %v5185_v13, 4  ;;  %v4184_v28 = vsub.f32 1.0, %v4183_v37  ;;  %v5193_v27 = vshrl.u32 %v14277_v30, 16 }
 0x3d5   : > { %7393 = vmatmul.bf16.gmra.mxu1 %v10452_v50  ;;  %5697 = vst [vmem:[#allocation4 + $0x2c0] sm:$0xf] %v14359_v7  ;;  %v4175_v50 = vsel %vm4174_vm7, %v14408_v54, %v4171_v40  ;;  %v5190_v54 = vrot.slane %v5188_v22, 5  ;;  %v10389_v36 = vld [vmem:[#allocation4 + $0x344] sm:$0xf0]  ;;  %v7423_v22 = vpop.f32.mrf.mxu2 }
 0x3d6   : > { %4807 = vst [vmem:[#allocation3 + $0xb8] sm:$0xf] %v4636_v49  ;;  %v4180_v61 = vsel %vm4177_vm0, %v4179_v4, %v4175_v50  ;;  %v4185_v42 = vmul.f32 %v14459_v5, %v4184_v28  ;;  %v4194_v13 = vor.u32 1.1754944e-38, %v4193_v1  ;;  %v7424_v49 = vadd.f32 %v7423_v22, %v7335_v17  ;;  %v11196_v40 = vld [vmem:[#allocation4 + $0x324] sm:$0xf] }
 0x3d7   : > { %4810 = vst [vmem:[#allocation3 + $0xbc] sm:$0x1] %v4809_v14  ;;  %v4227_v0 = vmul.f32 %v4180_v61, %v14326_v32  ;;  %v5202_v32 = vshll.u32 %v14302_v39, 16  ;;  %v5191_v14 = vsel %vm11771_vm2, %v5186_v8, %v5190_v54  ;;  %v10392_v59 = vor.u32 %v11196_v40, %v10389_v36  ;;  %v11303_v61 = vld [vmem:[%s15803_s3 + $0x1f8] sm:$0xff]  ;;  %v10487_v36 = vld [vmem:[#allocation4 + $0x3f0] sm:$0xf] }
 0x3d8   : > { %5828 = vst [vmem:[#allocation4 + $0x260] sm:$0xf] %v14355_v55  ;;  %v14494_v55 = vsel %vm11771_vm2, %v5176_v58, %v14433_v19  ;;  %v11226_v19 = vld [vmem:[#allocation4 + $0x410] sm:$0xf0]  ;;  %v4186_v63 = vadd.f32 %v14459_v5, %v4185_v42  ;;  %v14506_v58 = vpop.f32.mrf.mxu0  ;;  %v14508_v51 = vpop.f32.mrf.mxu1  ;;  %v5195_v37 = vrot.slane %v5193_v27, 4  ;;  %v14515_v1 = vadd.f32 %v7512_v21, %v7424_v49  ;;  %7943 = vmatpush.bf16.msra.mxu0 %v11303_v61 }
 0x3d9   : > { %5829 = vst [vmem:[#allocation4 + $0x284] sm:$0xf] %v14359_v7  ;;  %v4379_v7 = vpack.c.bf16 %v4227_v0, %v4227_v0  ;;  %v5198_v8 = vrot.slane %v5196_v12, 5  ;;  %v14521_v54 = vrot.slane %v5202_v32, 5  ;;  %v5208_v0 = vrot.slane %v5206_v25, 4 }
 0x3da   : > { %4902 = vst [vmem:[#allocation4 + $0x438] sm:$0xf] %v14477_v16  ;;  %v4190_v27 = vsel %vm4189_vm9, %v14459_v5, %v4186_v63  ;;  %v4811_v42 = vld [vmem:[#allocation3 + $0xc0] sm:$0xf]  ;;  %v10488_v21 = vor.u32 %v11226_v19, %v10487_v36  ;;  %v5481_v5 = vrot.slane %v5479_v46, 4  ;;  %v7337_v25 = vadd.f32 %v14367_v53, %v14160_v10 }
 0x3db   : > { %5604 = vst [vmem:[#allocation4 + $0x3fc] sm:$0xf] %v14477_v16  ;;  %v4639_v4 = vshrl.u32 %v4379_v7, 16  ;;  %v4642_v17 = vshll.u32 %v4379_v7, 16  ;;  %7650 = vmatmul.bf16.gmra.mxu0 %v10392_v59  ;;  %v4195_v22 = vsel %vm14479_vm1, %v4194_v13, %v4190_v27  ;;  %v14537_v7 = vld [vmem:[#allocation3 + $0x98] sm:$0x1]  ;;  %v5199_v9 = vor.u32 %v5198_v8, %v5195_v37 }
 0x3dc   : > { %5736 = vst [vmem:[#allocation4 + $0x3c0] sm:$0xf] %v14477_v16  ;;  %v4228_v32 = vmul.f32 %v4195_v22, %v14339_v41  ;;  %v5209_v13 = vor.u32 %v5208_v0, %v14521_v54  ;;  %v7514_v41 = vpop.f32.mrf.mxu3  ;;  %v5483_v2 = vsel %vm12270_vm5, %v5481_v5, %v5482_v33  ;;  %v5212_v59 = vshll.u32 %v14537_v7, 16  ;;  %v4815_v37 = vld [vmem:[#allocation3 + $0xc8] sm:$0x1] }
 0x3dd   : > { %v14510_v50 = vld [vmem:[#allocation3 + $0xb8] sm:$0xf]  ;;  %5342 = vst [vmem:[#allocation4 + $0x31c] sm:$0xf] %v14494_v55  ;;  %v14523_v28 = vrot.slane %v4639_v4, 7  ;;  %v7425_v40 = vpop.f32.mrf.mxu2  ;;  %v5200_v8 = vrot.slane %v5199_v9, 4 }
 0x3de   : > { %4903 = vst [vmem:[#allocation4 + $0x45c] sm:$0xf] %v14510_v50  ;;  %v4380_v19 = vpack.c.bf16 %v4228_v32, %v4228_v32  ;;  %v7426_v46 = vadd.f32 %v7425_v40, %v7337_v25  ;;  %v5210_v0 = vrot.slane %v5209_v13, 4  ;;  %v7340_v25 = vadd.f32 %v14367_v53, %v14199_v56  ;;  %v10425_v9 = vld [vmem:[#allocation4 + $0x38c] sm:$0xf0] }
 0x3df   : > { %5605 = vst [vmem:[#allocation4 + $0x420] sm:$0xf] %v14510_v50  ;;  %v4644_v12 = vor.u32 %v4642_v17, %v14523_v28  ;;  %v5486_v17 = vrot.slane %v14302_v39, 5  ;;  %v5226_v13 = vshll.u32 %v14379_v62, 16  ;;  %v5214_v33 = vrot.slane %v5212_v59, 5 }
 0x3e0   : > { %5737 = vst [vmem:[#allocation4 + $0x3e4] sm:$0xf] %v14510_v50  ;;  %v4647_v10 = vshrl.u32 %v4380_v19, 16  ;;  %v14543_v4 = vpop.f32.mrf.mxu0  ;;  %v14545_v63 = vpop.f32.mrf.mxu1  ;;  %v14551_v61 = vadd.f32 %v7514_v41, %v7426_v46  ;;  %v4650_v36 = vshll.u32 %v4380_v19, 16  ;;  %v5205_v46 = vsel %vm11771_vm2, %v5200_v8, %v14521_v54 }
 0x3e1   : > { %5343 = vst [vmem:[#allocation4 + $0x340] sm:$0xf] %v5191_v14  ;;  %v4812_v49 = vsel %vm12870_vm6, %v4644_v12, %v4811_v42  ;;  %v5220_v42 = vshll.u32 %v14334_v60, 16  ;;  %v5228_v59 = vrot.slane %v5226_v13, 5  ;;  %v5488_v54 = vrot.slane %v5486_v17, 4 }
 0x3e2   : > { %5654 = vst [vmem:[#allocation4 + $0x2e0] sm:$0xf] %v14494_v55  ;;  %v4649_v27 = vrot.slane %v4647_v10, 7  ;;  %v11205_v10 = vld [vmem:[#allocation4 + $0x36c] sm:$0xf] }
 0x3e3   : > { %5655 = vst [vmem:[#allocation4 + $0x304] sm:$0xf] %v5191_v14 }
 0x3e4   : > { %4813 = vst [vmem:[#allocation3 + $0xc0] sm:$0xf] %v4812_v49  ;;  %v11195_v22 = vld [vmem:[#allocation4 + $0x31c] sm:$0xf]  ;;  %v4652_v12 = vor.u32 %v4650_v36, %v4649_v27  ;;  %v4654_v32 = vrot.slane %v4649_v27, 4  ;;  %v5230_v49 = vshrl.u32 %v14379_v62, 16  ;;  %v7517_v41 = vpop.f32.mrf.mxu3 }
 0x3e5   : > { %7398 = vmatmul.bf16.gmra.mxu1 %v10488_v21  ;;  %5786 = vst [vmem:[#allocation4 + $0x2a4] sm:$0xf] %v14494_v55  ;;  %v5217_v55 = vshrl.u32 %v14334_v60, 16  ;;  %v7428_v40 = vpop.f32.mrf.mxu2  ;;  %v5222_v27 = vrot.slane %v5220_v42, 5 }
 0x3e6   : > { %5787 = vst [vmem:[#allocation4 + $0x2c8] sm:$0xf] %v5191_v14  ;;  %v4645_v14 = vrot.slane %v14523_v28, 4  ;;  %v4816_v28 = vsel %vm12788_vm8, %v4654_v32, %v4815_v37  ;;  %v7429_v56 = vadd.f32 %v7428_v40, %v7340_v25  ;;  %v11235_v37 = vld [vmem:[#allocation4 + $0x458] sm:$0xf0]  ;;  %v14589_v25 = vadd.f32 %v14347_v18, %v14412_v26 }
 0x3e7   : > { %5566 = vst [vmem:[#allocation4 + $0x320] sm:$0xf] %v14421_v34  ;;  %v5219_v11 = vrot.slane %v5217_v55, 4 }
 0x3e8   : > { %v10381_v21 = vld [vmem:[#allocation4 + $0x33c] sm:$0xf0]  ;;  %5567 = vst [vmem:[#allocation4 + $0x344] sm:$0xf] %v5483_v2  ;;  %v4653_v19 = vsel %vm12903_vm15, %v4645_v14, %v4652_v12  ;;  %v14574_v35 = vpop.f32.mrf.mxu0  ;;  %v14576_v36 = vpop.f32.mrf.mxu1  ;;  %v14580_v14 = vadd.f32 %v7517_v41, %v7429_v56  ;;  %v10523_v12 = vld [vmem:[#allocation4 + $0x438] sm:$0xf] }
 0x3e9   : > { %v10384_v5 = vor.u32 %v11195_v22, %v10381_v21  ;;  %5698 = vst [vmem:[#allocation4 + $0x2e4] sm:$0xf] %v14421_v34  ;;  %v5215_v22 = vsel %vm11771_vm2, %v5210_v0, %v5214_v33  ;;  %v5232_v21 = vrot.slane %v5230_v49, 4  ;;  %v10524_v42 = vor.u32 %v11235_v37, %v10523_v12  ;;  %v14585_v0 = vld [vmem:[#allocation3 + $0xa4] sm:$0x1]  ;;  %v11294_v56 = vld [vmem:[%s15803_s3 + $0x1b0] sm:$0xff] }
 0x3ea   : > { %5699 = vst [vmem:[#allocation4 + $0x308] sm:$0xf] %v5483_v2  ;;  %v7342_v49 = vadd.f32 %v14367_v53, %v14232_v20  ;;  %v5236_v26 = vshll.u32 %v14585_v0, 16  ;;  %v5493_v37 = vrot.slane %v14379_v62, 5  ;;  %7855 = vmatpush.bf16.msra.mxu3 %v11294_v56  ;;  %v5254_v62 = vshrl.u32 %v14414_v45, 16  ;;  %v11302_v56 = vld [vmem:[%s15803_s3 + $0x1f0] sm:$0xff] }
 0x3eb   : > { %7472 = vmatmul.bf16.gmra.mxu2 %v10384_v5  ;;  %5830 = vst [vmem:[#allocation4 + $0x2a8] sm:$0xf] %v14421_v34  ;;  %v10428_v34 = vor.u32 %v11205_v10, %v10425_v9  ;;  %v9975_v5 = vrot.slane %v14277_v30, 9  ;;  %v5223_v9 = vor.u32 %v5222_v27, %v5219_v11  ;;  %v5233_v13 = vor.u32 %v5232_v21, %v5228_v59 }
 0x3ec   : > { %4814 = vst [vmem:[#allocation3 + $0xc4] sm:$0xf] %v4653_v19  ;;  %v5244_v10 = vshll.u32 %v14406_v24, 16  ;;  %v5238_v27 = vrot.slane %v5236_v26, 5  ;;  %v14620_v21 = vadd.f32 %v14402_v15, %v14463_v23  ;;  %v9976_v15 = vrot.slane %v14334_v60, 9  ;;  %7944 = vmatpush.bf16.msra.mxu0 %v11302_v56 }
 0x3ed   : > { %4817 = vst [vmem:[#allocation3 + $0xc8] sm:$0x1] %v4816_v28  ;;  %7655 = vmatmul.bf16.gmra.mxu0 %v10428_v34  ;;  %v5487_v30 = vsel %vm12270_vm5, %v9975_v5, %v5486_v17  ;;  %v7430_v19 = vpop.f32.mrf.mxu2  ;;  %v7519_v28 = vpop.f32.mrf.mxu3  ;;  %v5224_v39 = vrot.slane %v5223_v9, 4  ;;  %v5234_v41 = vrot.slane %v5233_v13, 4  ;;  %v11286_v17 = vld [vmem:[%s15803_s3 + $0x170] sm:$0xff]  ;;  %v5495_v23 = vrot.slane %v5493_v37, 4 }
 0x3ee   : > { %5831 = vst [vmem:[#allocation4 + $0x2cc] sm:$0xf] %v5483_v2  ;;  %v10387_v8 = vld [vmem:[#allocation4 + $0x320] sm:$0xf]  ;;  %v5489_v2 = vrot.slane %v14537_v7, 5  ;;  %v7431_v7 = vadd.f32 %v7430_v19, %v7342_v49  ;;  %7766 = vmatpush.bf16.msra.mxu2 %v11286_v17  ;;  %v5256_v13 = vrot.slane %v5254_v62, 4  ;;  %v5494_v17 = vsel %vm12270_vm5, %v9976_v15, %v5493_v37 }
 0x3ef   : > { %v11200_v55 = vld [vmem:[#allocation4 + $0x340] sm:$0xf0]  ;;  %5344 = vst [vmem:[#allocation4 + $0x364] sm:$0xf] %v5205_v46  ;;  %v5229_v34 = vsel %vm11771_vm2, %v5224_v39, %v5228_v59  ;;  %v14629_v19 = vld [vmem:[#allocation3 + $0xb0] sm:$0x1]  ;;  %v14648_v37 = vadd.f32 %v14454_v31, %v14515_v1  ;;  %v7347_v62 = vadd.f32 %v14367_v53, %v14299_v57 }
 0x3f0   : > { %v10388_v32 = vor.u32 %v11200_v55, %v10387_v8  ;;  %5345 = vst [vmem:[#allocation4 + $0x388] sm:$0xf] %v5215_v22  ;;  %v5490_v18 = vsel %vm12270_vm5, %v5488_v54, %v5489_v2  ;;  %v14601_v40 = vpop.f32.mrf.mxu0  ;;  %v14603_v20 = vpop.f32.mrf.mxu1  ;;  %v14605_v33 = vadd.f32 %v7519_v28, %v7431_v7  ;;  %v5239_v54 = vsel %vm11771_vm2, %v5234_v41, %v5238_v27  ;;  %v11102_v60 = vld [vmem:[#allocation4 + $0x30] sm:$0xf0]  ;;  %v9999_v27 = vld [vmem:[#allocation4 + $0x10] sm:$0xf] }
 0x3f1   : > { %5656 = vst [vmem:[#allocation4 + $0x328] sm:$0xf] %v5205_v46  ;;  %v5250_v8 = vshll.u32 %v14414_v45, 16  ;;  %v7345_v55 = vadd.f32 %v14367_v53, %v14260_v29  ;;  %v5496_v26 = vrot.slane %v14585_v0, 5  ;;  %v5260_v0 = vshll.u32 %v14629_v19, 16 }
 0x3f2   : > { %7561 = vmatmul.bf16.gmra.mxu3 %v10388_v32  ;;  %5657 = vst [vmem:[#allocation4 + $0x34c] sm:$0xf] %v5215_v22  ;;  %v5246_v32 = vrot.slane %v5244_v10, 5  ;;  %v5500_v31 = vrot.slane %v14414_v45, 5  ;;  %v11310_v45 = vld [vmem:[%s15803_s3 + $0x230] sm:$0xff] }
 0x3f3   : > { %5788 = vst [vmem:[#allocation4 + $0x2ec] sm:$0xf] %v5205_v46  ;;  %v5241_v46 = vshrl.u32 %v14406_v24, 16  ;;  %v5252_v9 = vrot.slane %v5250_v8, 5  ;;  %v5265_v8 = vshrl.u32 %v14477_v16, 16  ;;  %8033 = vmatpush.bf16.msra.mxu1 %v11310_v45  ;;  %v5507_v45 = vrot.slane %v14510_v50, 5 }
 0x3f4   : > { %5789 = vst [vmem:[#allocation4 + $0x310] sm:$0xf] %v5215_v22 }
 0x3f5   : > { %7403 = vmatmul.bf16.gmra.mxu1 %v10524_v42  ;;  %5568 = vst [vmem:[#allocation4 + $0x368] sm:$0xf] %v5487_v30  ;;  %v10461_v42 = vld [vmem:[#allocation4 + $0x3d4] sm:$0xf0]  ;;  %v5243_v59 = vrot.slane %v5241_v46, 4  ;;  %v7433_v5 = vpop.f32.mrf.mxu2  ;;  %v7522_v2 = vpop.f32.mrf.mxu3  ;;  %v5257_v39 = vor.u32 %v5256_v13, %v5252_v9 }
 0x3f6   : > { %5569 = vst [vmem:[#allocation4 + $0x38c] sm:$0xf] %v5490_v18  ;;  %v11204_v22 = vld [vmem:[#allocation4 + $0x364] sm:$0xf]  ;;  %v7434_v49 = vadd.f32 %v7433_v5, %v7345_v55  ;;  %v10000_v55 = vor.u32 %v11102_v60, %v9999_v27  ;;  %v14674_v60 = vadd.f32 %v14506_v58, %v14551_v61 }
 0x3f7   : > { %v10417_v11 = vld [vmem:[#allocation4 + $0x384] sm:$0xf0]  ;;  %5700 = vst [vmem:[#allocation4 + $0x32c] sm:$0xf] %v5487_v30  ;;  %v5247_v46 = vor.u32 %v5246_v32, %v5243_v59  ;;  %v5262_v32 = vrot.slane %v5260_v0, 5 }
 0x3f8   : > { %5701 = vst [vmem:[#allocation4 + $0x350] sm:$0xf] %v5490_v18  ;;  %v10420_v12 = vor.u32 %v11204_v22, %v10417_v11  ;;  %v14631_v28 = vpop.f32.mrf.mxu0  ;;  %v14633_v29 = vpop.f32.mrf.mxu1  ;;  %v14636_v41 = vadd.f32 %v7522_v2, %v7434_v49  ;;  %v5497_v11 = vsel %vm12270_vm5, %v5495_v23, %v5496_v26  ;;  %v5267_v23 = vrot.slane %v5265_v8, 4 }
 0x3f9   : > { %5832 = vst [vmem:[#allocation4 + $0x2f0] sm:$0xf] %v5487_v30  ;;  %v11214_v30 = vld [vmem:[#allocation4 + $0x3b4] sm:$0xf]  ;;  %v5503_v26 = vrot.slane %v14629_v19, 5 }
 0x3fa   : > { %5833 = vst [vmem:[#allocation4 + $0x314] sm:$0xf] %v5490_v18  ;;  %v10464_v7 = vor.u32 %v11214_v30, %v10461_v42  ;;  %v5248_v42 = vrot.slane %v5247_v46, 4  ;;  %v5274_v46 = vshll.u32 %v14510_v50, 16 }
 0x3fb   : > { %7477 = vmatmul.bf16.gmra.mxu2 %v10420_v12  ;;  %5346 = vst [vmem:[#allocation4 + $0x3ac] sm:$0xf] %v5229_v34  ;;  %v5258_v12 = vrot.slane %v5257_v39, 4  ;;  %v14670_v39 = vld [vmem:[#allocation3 + $0xbc] sm:$0x1] }
 0x3fc   : > { %5347 = vst [vmem:[#allocation4 + $0x3d0] sm:$0xf] %v5239_v54  ;;  %v10423_v10 = vld [vmem:[#allocation4 + $0x368] sm:$0xf]  ;;  %v5253_v5 = vsel %vm11771_vm2, %v5248_v42, %v5252_v9  ;;  %v9977_v9 = vrot.slane %v14406_v24, 9  ;;  %v7350_v24 = vadd.f32 %v14367_v53, %v14322_v6  ;;  %v5276_v61 = vrot.slane %v5274_v46, 5 }
 0x3fd   : > { %v11209_v18 = vld [vmem:[#allocation4 + $0x388] sm:$0xf0]  ;;  %5658 = vst [vmem:[#allocation4 + $0x370] sm:$0xf] %v5229_v34  ;;  %7660 = vmatmul.bf16.gmra.mxu0 %v10464_v7  ;;  %v7435_v59 = vpop.f32.mrf.mxu2  ;;  %v5263_v57 = vsel %vm11771_vm2, %v5258_v12, %v5262_v32  ;;  %v5284_v12 = vshll.u32 %v14670_v39, 16  ;;  %v7352_v46 = vadd.f32 %v14367_v53, %v14349_v47  ;;  %v5510_v47 = vrot.slane %v14670_v39, 5 }
 0x3fe   : > { %5659 = vst [vmem:[#allocation4 + $0x394] sm:$0xf] %v5239_v54  ;;  %v10424_v22 = vor.u32 %v11209_v18, %v10423_v10  ;;  %v7436_v1 = vadd.f32 %v7435_v59, %v7347_v62  ;;  %v5502_v18 = vrot.slane %v5500_v31, 4  ;;  %v5278_v10 = vshrl.u32 %v14510_v50, 16 }
 0x3ff   : > { %5790 = vst [vmem:[#allocation4 + $0x334] sm:$0xf] %v5229_v34  ;;  %v5268_v34 = vshll.u32 %v14477_v16, 16  ;;  %v5501_v19 = vsel %vm12270_vm5, %v9977_v9, %v5500_v31 }
 0x400   : > { %5791 = vst [vmem:[#allocation4 + $0x358] sm:$0xf] %v5239_v54  ;;  %v7524_v54 = vpop.f32.mrf.mxu3  ;;  %v14657_v2 = vpop.f32.mrf.mxu0  ;;  %v5504_v58 = vsel %vm12270_vm5, %v5502_v18, %v5503_v26  ;;  %v14703_v26 = vld [vmem:[#allocation3 + $0xc0] sm:$0xf] }
 0x401   : > { %5570 = vst [vmem:[#allocation4 + $0x3b0] sm:$0xf] %v5494_v17  ;;  %v14659_v15 = vpop.f32.mrf.mxu1  ;;  %v5270_v13 = vrot.slane %v5268_v34, 5  ;;  %v14663_v49 = vadd.f32 %v7524_v54, %v7436_v1  ;;  %v11223_v34 = vld [vmem:[#allocation4 + $0x3fc] sm:$0xf]  ;;  %v5609_v50 = vshrl.u32 %v14703_v26, 16 }
 0x402   : > { %7566 = vmatmul.bf16.gmra.mxu3 %v10424_v22  ;;  %5571 = vst [vmem:[#allocation4 + $0x3d4] sm:$0xf] %v5497_v11  ;;  %v11213_v7 = vld [vmem:[#allocation4 + $0x3ac] sm:$0xf]  ;;  %v5280_v22 = vrot.slane %v5278_v10, 4 }
 0x403   : > { %5702 = vst [vmem:[#allocation4 + $0x374] sm:$0xf] %v5494_v17  ;;  %v10453_v30 = vld [vmem:[#allocation4 + $0x3cc] sm:$0xf0]  ;;  %v5271_v56 = vor.u32 %v5270_v13, %v5267_v23 }
 0x404   : > { %5703 = vst [vmem:[#allocation4 + $0x398] sm:$0xf] %v5497_v11  ;;  %v5281_v32 = vor.u32 %v5280_v22, %v5276_v61  ;;  %v11301_v23 = vld [vmem:[%s15803_s3 + $0x1e8] sm:$0xff] }
 0x405   : > { %7684 = vmatmul.bf16.vlgmr.msrb.gmra.mxu1 %v10000_v55  ;;  %5834 = vst [vmem:[#allocation4 + $0x338] sm:$0xf] %v5494_v17  ;;  %v10456_v17 = vor.u32 %v11213_v7, %v10453_v30  ;;  %v7438_v0 = vpop.f32.mrf.mxu2  ;;  %v11111_v55 = vld [vmem:[#allocation4 + $0x78] sm:$0xf0]  ;;  %v5272_v54 = vrot.slane %v5271_v56, 4  ;;  %v5286_v30 = vrot.slane %v5284_v12, 5  ;;  %v14707_v7 = vadd.f32 %v14543_v4, %v14580_v14  ;;  %7945 = vmatpush.bf16.msra.mxu0 %v11301_v23 }
 0x406   : > { %5835 = vst [vmem:[#allocation4 + $0x35c] sm:$0xf] %v5497_v11  ;;  %v10497_v11 = vld [vmem:[#allocation4 + $0x41c] sm:$0xf0]  ;;  %v7439_v8 = vadd.f32 %v7438_v0, %v7350_v24  ;;  %v5282_v13 = vrot.slane %v5281_v32, 4  ;;  %v5612_v24 = vshll.u32 %v14703_v26, 16 }
 0x407   : > { %5348 = vst [vmem:[#allocation4 + $0x3f4] sm:$0xf] %v5253_v5  ;;  %v10500_v59 = vor.u32 %v11223_v34, %v10497_v11  ;;  %v5277_v18 = vsel %vm11771_vm2, %v5272_v54, %v5276_v61  ;;  %v5509_v4 = vrot.slane %v5507_v45, 4  ;;  %v11292_v34 = vld [vmem:[%s15803_s3 + $0x1a0] sm:$0xff]  ;;  %v11283_v32 = vld [vmem:[%s15803_s3 + $0x158] sm:$0xff] }
 0x408   : > { %5349 = vst [vmem:[#allocation4 + $0x418] sm:$0xf] %v5263_v57  ;;  %v7527_v27 = vpop.f32.mrf.mxu3  ;;  %v14685_v6 = vpop.f32.mrf.mxu0  ;;  %v10459_v1 = vld [vmem:[#allocation4 + $0x3b0] sm:$0xf]  ;;  %v5287_v56 = vsel %vm11771_vm2, %v5282_v13, %v5286_v30  ;;  %v5614_v39 = vrot.slane %v5612_v24, 5  ;;  %v11299_v13 = vld [vmem:[%s15803_s3 + $0x1d8] sm:$0xff] }
 0x409   : > { %5660 = vst [vmem:[#allocation4 + $0x3b8] sm:$0xf] %v5253_v5  ;;  %v14687_v62 = vpop.f32.mrf.mxu1  ;;  %v11218_v42 = vld [vmem:[#allocation4 + $0x3d0] sm:$0xf0]  ;;  %v14689_v31 = vadd.f32 %v7527_v27, %v7439_v8  ;;  %v11284_v8 = vld [vmem:[%s15803_s3 + $0x160] sm:$0xff] }
 0x40a   : > { %5661 = vst [vmem:[#allocation4 + $0x3dc] sm:$0xf] %v5263_v57  ;;  %v10460_v9 = vor.u32 %v11218_v42, %v10459_v1  ;;  %v14736_v54 = vld [vmem:[#allocation3 + $0xc4] sm:$0xf]  ;;  %v11291_v1 = vld [vmem:[%s15803_s3 + $0x198] sm:$0xff] }
 0x40b   : > { %7482 = vmatmul.bf16.gmra.mxu2 %v10456_v17  ;;  %5792 = vst [vmem:[#allocation4 + $0x37c] sm:$0xf] %v5253_v5  ;;  %v11285_v5 = vld [vmem:[%s15803_s3 + $0x168] sm:$0xff]  ;;  %v10035_v17 = vld [vmem:[#allocation4 + $0x58] sm:$0xf]  ;;  %v5618_v30 = vshll.u32 %v14736_v54, 16 }
 0x40c   : > { %5793 = vst [vmem:[#allocation4 + $0x3a0] sm:$0xf] %v5263_v57  ;;  %v11293_v57 = vld [vmem:[%s15803_s3 + $0x1a8] sm:$0xff]  ;;  %7767 = vmatpush.bf16.msra.mxu2 %v11285_v5  ;;  %v10036_v10 = vor.u32 %v11111_v55, %v10035_v17  ;;  %v14746_v5 = vadd.f32 %v14574_v35, %v14605_v33 }
 0x40d   : > { %5572 = vst [vmem:[#allocation4 + $0x3f8] sm:$0xf] %v5501_v19  ;;  %7665 = vmatmul.bf16.gmra.mxu0 %v10500_v59  ;;  %7856 = vmatpush.bf16.msra.mxu3 %v11293_v57  ;;  %v7440_v11 = vpop.f32.mrf.mxu2  ;;  %v5511_v59 = vsel %vm12270_vm5, %v5509_v4, %v5510_v47  ;;  %v14748_v57 = vld [vmem:[#allocation3 + $0xc8] sm:$0x1]  ;;  %v5620_v17 = vrot.slane %v5618_v30, 5  ;;  %v11282_v4 = vld [vmem:[%s15803_s3 + $0x150] sm:$0xff] }
 0x40e   : > { %5573 = vst [vmem:[#allocation4 + $0x41c] sm:$0xf] %v5504_v58  ;;  %v7441_v14 = vadd.f32 %v7440_v11, %v7352_v46  ;;  %v11222_v42 = vld [vmem:[#allocation4 + $0x3f4] sm:$0xf]  ;;  %v11120_v11 = vld [vmem:[#allocation4 + $0xc0] sm:$0xf0] }
 0x40f   : > { %5704 = vst [vmem:[#allocation4 + $0x3bc] sm:$0xf] %v5501_v19  ;;  %v10489_v22 = vld [vmem:[#allocation4 + $0x414] sm:$0xf0] }
 0x410   : > { %5705 = vst [vmem:[#allocation4 + $0x3e0] sm:$0xf] %v5504_v58  ;;  %v7529_v0 = vpop.f32.mrf.mxu3  ;;  %v14716_v27 = vpop.f32.mrf.mxu0  ;;  %7768 = vmatpush.bf16.msra.mxu2 %v11284_v8  ;;  %v10492_v23 = vor.u32 %v11222_v42, %v10489_v22  ;;  %v10071_v42 = vld [vmem:[#allocation4 + $0xa0] sm:$0xf] }
 0x411   : > { %5836 = vst [vmem:[#allocation4 + $0x380] sm:$0xf] %v5501_v19  ;;  %v9978_v19 = vrot.slane %v14477_v16, 9  ;;  %v14718_v61 = vpop.f32.mrf.mxu1  ;;  %v14721_v12 = vadd.f32 %v7529_v0, %v7441_v14  ;;  %v11300_v16 = vld [vmem:[%s15803_s3 + $0x1e0] sm:$0xff]  ;;  %7857 = vmatpush.bf16.msra.mxu3 %v11292_v34  ;;  %v11290_v14 = vld [vmem:[%s15803_s3 + $0x190] sm:$0xff] }
 0x412   : > { %7571 = vmatmul.bf16.gmra.mxu3 %v10460_v9  ;;  %5837 = vst [vmem:[#allocation4 + $0x3a4] sm:$0xf] %v5504_v58  ;;  %v5611_v58 = vrot.slane %v5609_v50, 4  ;;  %7946 = vmatpush.bf16.msra.mxu0 %v11300_v16  ;;  %v7355_v9 = vadd.f32 %v14367_v53, %v14404_v44  ;;  %v5628_v50 = vshll.u32 %v14748_v57, 16  ;;  %v11281_v16 = vld [vmem:[%s15803_s3 + $0x148] sm:$0xff] }
 0x413   : > { %5350 = vst [vmem:[#allocation4 + $0x43c] sm:$0xf] %v5277_v18  ;;  %v5508_v55 = vsel %vm12270_vm5, %v9978_v19, %v5507_v45  ;;  %v5622_v45 = vshrl.u32 %v14736_v54, 16  ;;  %v11298_v19 = vld [vmem:[%s15803_s3 + $0x1d0] sm:$0xff] }
 0x414   : > { %5351 = vst [vmem:[#allocation4 + $0x460] sm:$0xf] %v5287_v56  ;;  %7769 = vmatpush.bf16.msra.mxu2 %v11283_v32  ;;  %v10495_v47 = vld [vmem:[#allocation4 + $0x3f8] sm:$0xf]  ;;  %v5630_v8 = vrot.slane %v5628_v50, 5  ;;  %v11297_v32 = vld [vmem:[%s15803_s3 + $0x1c8] sm:$0xff] }
 0x415   : > { %7689 = vmatmul.bf16.gmra.mxu1 %v10036_v10  ;;  %5662 = vst [vmem:[#allocation4 + $0x400] sm:$0xf] %v5277_v18  ;;  %v7443_v35 = vpop.f32.mrf.mxu2  ;;  %7858 = vmatpush.bf16.msra.mxu3 %v11291_v1  ;;  %v11227_v53 = vld [vmem:[#allocation4 + $0x418] sm:$0xf0] }
 0x416   : > { %5663 = vst [vmem:[#allocation4 + $0x424] sm:$0xf] %v5287_v56  ;;  %v7444_v46 = vadd.f32 %v7443_v35, %v7355_v9  ;;  %7947 = vmatpush.bf16.msra.mxu0 %v11299_v13  ;;  %v10496_v34 = vor.u32 %v11227_v53, %v10495_v47 }
 0x417   : > { %5794 = vst [vmem:[#allocation4 + $0x3c4] sm:$0xf] %v5277_v18  ;;  %v5615_v18 = vor.u32 %v5614_v39, %v5611_v58 }
 0x418   : > { %5795 = vst [vmem:[#allocation4 + $0x3e8] sm:$0xf] %v5287_v56  ;;  %v7532_v33 = vpop.f32.mrf.mxu3  ;;  %v5624_v56 = vrot.slane %v5622_v45, 4  ;;  %v14758_v10 = vpop.f32.mrf.mxu0  ;;  %7770 = vmatpush.bf16.msra.mxu2 %v11282_v4  ;;  %v14821_v4 = vadd.f32 %v14631_v28, %v14663_v49  ;;  %v11129_v28 = vld [vmem:[#allocation4 + $0x108] sm:$0xf0] }
 0x419   : > { %5574 = vst [vmem:[#allocation4 + $0x440] sm:$0xf] %v5508_v55  ;;  %v14760_v24 = vpop.f32.mrf.mxu1  ;;  %v14762_v0 = vadd.f32 %v7532_v33, %v7444_v46  ;;  %v5616_v22 = vrot.slane %v5615_v18, 4  ;;  %7859 = vmatpush.bf16.msra.mxu3 %v11290_v14  ;;  %v11288_v46 = vld [vmem:[%s15803_s3 + $0x180] sm:$0xff] }
 0x41a   : > { %5575 = vst [vmem:[#allocation4 + $0x464] sm:$0xf] %v5511_v59  ;;  %v5625_v44 = vor.u32 %v5624_v56, %v5620_v17  ;;  %7948 = vmatpush.bf16.msra.mxu0 %v11298_v19  ;;  %v11280_v56 = vld [vmem:[%s15803_s3 + $0x140] sm:$0xff]  ;;  %v11231_v53 = vld [vmem:[#allocation4 + $0x43c] sm:$0xf] }
 0x41b   : > { %7487 = vmatmul.bf16.gmra.mxu2 %v10492_v23  ;;  %5706 = vst [vmem:[#allocation4 + $0x404] sm:$0xf] %v5508_v55  ;;  %v5621_v39 = vsel %vm11771_vm2, %v5616_v22, %v5620_v17  ;;  %v10072_v23 = vor.u32 %v11120_v11, %v10071_v42  ;;  %v10525_v35 = vld [vmem:[#allocation4 + $0x45c] sm:$0xf0]  ;;  %v11309_v17 = vld [vmem:[%s15803_s3 + $0x228] sm:$0xff]  ;;  %v11296_v11 = vld [vmem:[%s15803_s3 + $0x1c0] sm:$0xff] }
 0x41c   : > { %5707 = vst [vmem:[#allocation4 + $0x428] sm:$0xf] %v5511_v59  ;;  %v5626_v58 = vrot.slane %v5625_v44, 4  ;;  %7771 = vmatpush.bf16.msra.mxu2 %v11281_v16  ;;  %8034 = vmatpush.bf16.msra.mxu1 %v11309_v17  ;;  %v10528_v14 = vor.u32 %v11231_v53, %v10525_v35  ;;  %v10009_v35 = vld [vmem:[#allocation4 + $0x3c] sm:$0xf0] }
 0x41d   : > { %5838 = vst [vmem:[#allocation4 + $0x3c8] sm:$0xf] %v5508_v55  ;;  %v14780_v55 = vadd.f32 %v14601_v40, %v14636_v41  ;;  %v14796_v40 = vld [vmem:[%s15804_s4] ss:$0 sm:$0xff]  ;;  %v7445_v13 = vpop.f32.mrf.mxu2  ;;  %v10001_v17 = vld [vmem:[#allocation4 + $0x34] sm:$0xf0] }
 0x41e   : > { %5839 = vst [vmem:[#allocation4 + $0x3ec] sm:$0xf] %v5511_v59  ;;  %v11289_v59 = vld [vmem:[%s15803_s3 + $0x188] sm:$0xff]  ;;  %v5631_v1 = vsel %vm11771_vm2, %v5626_v58, %v5630_v8  ;;  %v7357_v41 = vadd.f32 %v14796_v40, %v14456_v3  ;;  %7949 = vmatpush.bf16.msra.mxu0 %v11297_v32  ;;  %v7360_v19 = vadd.f32 %v14796_v40, %v14508_v51  ;;  %v10107_v51 = vld [vmem:[#allocation4 + $0xe8] sm:$0xf] }
 0x41f   : > { %5606 = vst [vmem:[#allocation4 + $0x444] sm:$0xf] %v14703_v26  ;;  %7860 = vmatpush.bf16.msra.mxu3 %v11289_v59  ;;  %v14833_v59 = vadd.f32 %v14657_v2, %v14689_v31  ;;  %v7362_v32 = vadd.f32 %v14796_v40, %v14545_v63  ;;  %v11099_v2 = vld [vmem:[#allocation4 + $0x1c] sm:$0xf]  ;;  %v11098_v31 = vld [vmem:[#allocation4 + $0x14] sm:$0xf]  ;;  %v14845_v63 = vadd.f32 %v14685_v6, %v14721_v12 }
 0x420   : > { %5607 = vst [vmem:[#allocation4 + $0x468] sm:$0xf] %v14736_v54  ;;  %v7534_v30 = vpop.f32.mrf.mxu3  ;;  %v7446_v45 = vadd.f32 %v7445_v13, %v7357_v41  ;;  %v14801_v9 = vpop.f32.mrf.mxu0  ;;  %7772 = vmatpush.bf16.msra.mxu2 %v11280_v56  ;;  %v10531_v49 = vld [vmem:[#allocation4 + $0x440] sm:$0xf]  ;;  %v10012_v56 = vor.u32 %v11099_v2, %v10009_v35  ;;  %v14857_v12 = vadd.f32 %v14716_v27, %v14762_v0  ;;  %v11108_v0 = vld [vmem:[#allocation4 + $0x64] sm:$0xf] }
 0x421   : > { %5738 = vst [vmem:[#allocation4 + $0x408] sm:$0xf] %v14703_v26  ;;  %v14803_v18 = vpop.f32.mrf.mxu1  ;;  %v11236_v16 = vld [vmem:[#allocation4 + $0x460] sm:$0xf0] }
 0x422   : > { %7576 = vmatmul.bf16.gmra.mxu3 %v10496_v34  ;;  %5739 = vst [vmem:[#allocation4 + $0x42c] sm:$0xf] %v14736_v54  ;;  %v14805_v3 = vadd.f32 %v7534_v30, %v7446_v45  ;;  %7950 = vmatpush.bf16.msra.mxu0 %v11296_v11  ;;  %v10532_v42 = vor.u32 %v11236_v16, %v10531_v49  ;;  %v10007_v16 = vld [vmem:[#allocation4 + $0x18] sm:$0xf] }
 0x423   : > { %5664 = vst [vmem:[#allocation4 + $0x448] sm:$0xf] %v5621_v39  ;;  %7861 = vmatpush.bf16.msra.mxu3 %v11288_v46  ;;  %v7365_v46 = vadd.f32 %v14796_v40, %v14576_v36  ;;  %v10143_v36 = vld [vmem:[#allocation4 + $0x130] sm:$0xf] }
 0x424   : > { %5665 = vst [vmem:[#allocation4 + $0x46c] sm:$0xf] %v5631_v1  ;;  %v14872_v2 = vadd.f32 %v14758_v10, %v14805_v3  ;;  %v10179_v3 = vld [vmem:[#allocation4 + $0x178] sm:$0xf] }
 0x425   : > { %7694 = vmatmul.bf16.gmra.mxu1 %v10072_v23  ;;  %5796 = vst [vmem:[#allocation4 + $0x40c] sm:$0xf] %v5621_v39  ;;  %v7448_v22 = vpop.f32.mrf.mxu2 }
 0x426   : > { %v11232_v33 = vld [vmem:[#allocation4 + $0x444] sm:$0xf]  ;;  %5797 = vst [vmem:[#allocation4 + $0x430] sm:$0xf] %v5631_v1  ;;  %v7449_v58 = vadd.f32 %v7448_v22, %v7360_v19  ;;  %v10108_v1 = vor.u32 %v11129_v28, %v10107_v51  ;;  %v11103_v19 = vld [vmem:[#allocation4 + $0x38] sm:$0xf0]  ;;  %v7367_v28 = vadd.f32 %v14796_v40, %v14603_v20 }
 0x427   : > { %v10533_v50 = vld [vmem:[#allocation4 + $0x464] sm:$0xf0]  ;;  %v10008_v6 = vor.u32 %v11103_v19, %v10007_v16  ;;  %v11107_v20 = vld [vmem:[#allocation4 + $0x5c] sm:$0xf] }
 0x428   : > { %v10536_v44 = vor.u32 %v11232_v33, %v10533_v50  ;;  %v7537_v47 = vpop.f32.mrf.mxu3  ;;  %v14825_v8 = vpop.f32.mrf.mxu0  ;;  %v10004_v50 = vor.u32 %v11098_v31, %v10001_v17  ;;  %v11147_v19 = vld [vmem:[#allocation4 + $0x198] sm:$0xf0] }
 0x429   : > { %v14829_v39 = vadd.f32 %v7537_v47, %v7449_v58  ;;  %v11138_v58 = vld [vmem:[#allocation4 + $0x150] sm:$0xf0] }
 0x42a   : > { %7670 = vmatmul.bf16.gmra.mxu0 %v10536_v44  ;;  %v10144_v49 = vor.u32 %v11138_v58, %v10143_v36  ;;  %v10043_v58 = vld [vmem:[#allocation4 + $0x60] sm:$0xf] }
 0x42b   : > { %7492 = vmatmul.bf16.gmra.mxu2 %v10528_v14  ;;  %v14827_v34 = vpop.f32.mrf.mxu1 }
 0x42d   : > { %v7450_v41 = vpop.f32.mrf.mxu2 }
 0x42e   : > { %v7451_v13 = vadd.f32 %v7450_v41, %v7362_v32 }
 0x430   : > { %v7539_v23 = vpop.f32.mrf.mxu3  ;;  %v14837_v30 = vpop.f32.mrf.mxu0 }
 0x431   : > { %v14841_v33 = vadd.f32 %v7539_v23, %v7451_v13  ;;  %v10037_v23 = vld [vmem:[#allocation4 + $0x7c] sm:$0xf0]  ;;  %v11308_v13 = vld [vmem:[%s15803_s3 + $0x220] sm:$0xff] }
 0x432   : > { %7581 = vmatmul.bf16.gmra.mxu3 %v10532_v42  ;;  %8035 = vmatpush.bf16.msra.mxu1 %v11308_v13  ;;  %v10040_v31 = vor.u32 %v11107_v20, %v10037_v23  ;;  %v10073_v23 = vld [vmem:[#allocation4 + $0xc4] sm:$0xf0] }
 0x433   : > { %v14839_v45 = vpop.f32.mrf.mxu1 }
 0x435   : > { %7699 = vmatmul.bf16.gmra.mxu1 %v10108_v1  ;;  %v7453_v11 = vpop.f32.mrf.mxu2  ;;  %v10045_v1 = vld [vmem:[#allocation4 + $0x84] sm:$0xf0] }
 0x436   : > { %v7454_v44 = vadd.f32 %v7453_v11, %v7365_v46  ;;  %v10048_v17 = vor.u32 %v11108_v0, %v10045_v1  ;;  %v14892_v0 = vadd.f32 %v14825_v8, %v14841_v33 }
 0x438   : > { %v7542_v53 = vpop.f32.mrf.mxu3  ;;  %v14853_v47 = vpop.f32.mrf.mxu0 }
 0x439   : > { %v14851_v22 = vadd.f32 %v7542_v53, %v7454_v44  ;;  %v11112_v53 = vld [vmem:[#allocation4 + $0x80] sm:$0xf0] }
 0x43a   : > { %7951 = vmatmul.bf16.vlgmr.msra.gmra.mxu0 %v10012_v56  ;;  %v7370_v56 = vadd.f32 %v14796_v40, %v14633_v29  ;;  %v10044_v16 = vor.u32 %v11112_v53, %v10043_v58  ;;  %v7372_v29 = vadd.f32 %v14796_v40, %v14659_v15  ;;  %v10079_v58 = vld [vmem:[#allocation4 + $0xa8] sm:$0xf] }
 0x43b   : > { %7773 = vmatmul.bf16.vlgmr.msra.gmra.mxu2 %v10004_v50  ;;  %v14904_v33 = vadd.f32 %v14837_v30, %v14851_v22  ;;  %v11307_v30 = vld [vmem:[%s15803_s3 + $0x218] sm:$0xff]  ;;  %v11126_v22 = vld [vmem:[#allocation4 + $0xf4] sm:$0xf] }
 0x43c   : > { %8036 = vmatpush.bf16.msra.mxu1 %v11307_v30  ;;  %v10153_v30 = vld [vmem:[#allocation4 + $0x15c] sm:$0xf0] }
 0x43d   : > { %v14849_v14 = vpop.f32.mrf.mxu1  ;;  %v7455_v42 = vpop.f32.mrf.mxu2 }
 0x43e   : > { %v7456_v32 = vadd.f32 %v7455_v42, %v7367_v28  ;;  %v10180_v28 = vor.u32 %v11147_v19, %v10179_v3  ;;  %v11156_v19 = vld [vmem:[#allocation4 + $0x1e0] sm:$0xf0]  ;;  %v7377_v3 = vadd.f32 %v14796_v40, %v14718_v61 }
 0x440   : > { %v7544_v51 = vpop.f32.mrf.mxu3  ;;  %v14868_v35 = vpop.f32.mrf.mxu0 }
 0x441   : > { %v14861_v41 = vadd.f32 %v7544_v51, %v7456_v32  ;;  %v10081_v32 = vld [vmem:[#allocation4 + $0xcc] sm:$0xf0] }
 0x442   : > { %7862 = vmatmul.bf16.vlgmr.msra.gmra.mxu3 %v10008_v6  ;;  %v14880_v6 = vadd.f32 %v14801_v9, %v14829_v39  ;;  %v11117_v9 = vld [vmem:[#allocation4 + $0xac] sm:$0xf]  ;;  %v11116_v39 = vld [vmem:[#allocation4 + $0xa4] sm:$0xf] }
 0x443   : > { %v10084_v13 = vor.u32 %v11117_v9, %v10081_v32  ;;  %v10076_v20 = vor.u32 %v11116_v39, %v10073_v23  ;;  %v10109_v9 = vld [vmem:[#allocation4 + $0x10c] sm:$0xf0]  ;;  %v11125_v39 = vld [vmem:[#allocation4 + $0xec] sm:$0xf]  ;;  %v14919_v61 = vadd.f32 %v14853_v47, %v14861_v41 }
 0x445   : > { %7704 = vmatmul.bf16.gmra.mxu1 %v10144_v49  ;;  %v14866_v27 = vpop.f32.mrf.mxu1  ;;  %v7458_v50 = vpop.f32.mrf.mxu2 }
 0x446   : > { %v7459_v11 = vadd.f32 %v7458_v50, %v7370_v56 }
 0x448   : > { %v7547_v46 = vpop.f32.mrf.mxu3  ;;  %v14886_v36 = vpop.f32.mrf.mxu0 }
 0x449   : > { %v14876_v44 = vadd.f32 %v7547_v46, %v7459_v11  ;;  %v11121_v11 = vld [vmem:[#allocation4 + $0xc8] sm:$0xf0] }
 0x44a   : > { %7956 = vmatmul.bf16.gmra.mxu0 %v10048_v17  ;;  %v7375_v17 = vadd.f32 %v14796_v40, %v14687_v62  ;;  %v10080_v8 = vor.u32 %v11121_v11, %v10079_v58  ;;  %v10215_v62 = vld [vmem:[#allocation4 + $0x1c0] sm:$0xf] }
 0x44b   : > { %7778 = vmatmul.bf16.gmra.mxu2 %v10040_v31  ;;  %v14931_v41 = vadd.f32 %v14868_v35, %v14876_v44  ;;  %v9979_v44 = vrot.slane %v14703_v26, 9 }
 0x44d   : > { %v7460_v49 = vpop.f32.mrf.mxu2 }
 0x44e   : > { %v7461_v51 = vadd.f32 %v7460_v49, %v7372_v29  ;;  %v10216_v29 = vor.u32 %v11156_v19, %v10215_v62  ;;  %v11130_v19 = vld [vmem:[#allocation4 + $0x110] sm:$0xf0]  ;;  %v10115_v62 = vld [vmem:[#allocation4 + $0xf0] sm:$0xf] }
 0x44f   : > { %v10116_v47 = vor.u32 %v11130_v19, %v10115_v62  ;;  %v5674_v62 = vrot.slane %v14748_v57, 5  ;;  %v7387_v57 = vadd.f32 %v14796_v40, %v14839_v45  ;;  %v11144_v45 = vld [vmem:[#allocation4 + $0x184] sm:$0xf] }
 0x450   : > { %v7549_v42 = vpop.f32.mrf.mxu3  ;;  %v14898_v50 = vpop.f32.mrf.mxu0 }
 0x451   : > { %v14888_v1 = vadd.f32 %v7549_v42, %v7461_v51  ;;  %v10117_v51 = vld [vmem:[#allocation4 + $0x114] sm:$0xf0] }
 0x452   : > { %v14882_v10 = vpop.f32.mrf.mxu1  ;;  %7867 = vmatmul.bf16.gmra.mxu3 %v10044_v16 }
 0x455   : > { %7709 = vmatmul.bf16.gmra.mxu1 %v10180_v28  ;;  %v7463_v31 = vpop.f32.mrf.mxu2 }
 0x456   : > { %v7464_v46 = vadd.f32 %v7463_v31, %v7375_v17  ;;  %v10112_v17 = vor.u32 %v11125_v39, %v10109_v9  ;;  %v7380_v31 = vadd.f32 %v14796_v40, %v14760_v24  ;;  %v10251_v24 = vld [vmem:[#allocation4 + $0x208] sm:$0xf]  ;;  %v10145_v39 = vld [vmem:[#allocation4 + $0x154] sm:$0xf0] }
 0x458   : > { %v7552_v56 = vpop.f32.mrf.mxu3  ;;  %v14910_v32 = vpop.f32.mrf.mxu0 }
 0x459   : > { %v14900_v53 = vadd.f32 %v7552_v56, %v7464_v46 }
 0x45a   : > { %v14894_v15 = vpop.f32.mrf.mxu1  ;;  %7961 = vmatmul.bf16.gmra.mxu0 %v10084_v13  ;;  %v10120_v13 = vor.u32 %v11126_v22, %v10117_v51 }
 0x45b   : > { %7783 = vmatmul.bf16.gmra.mxu2 %v10076_v20 }
 0x45d   : > { %v7465_v28 = vpop.f32.mrf.mxu2 }
 0x45e   : > { %v7466_v42 = vadd.f32 %v7465_v28, %v7377_v3  ;;  %v7382_v28 = vadd.f32 %v14796_v40, %v14803_v18 }
 0x460   : > { %v7554_v49 = vpop.f32.mrf.mxu3  ;;  %v14927_v3 = vpop.f32.mrf.mxu0 }
 0x461   : > { %v14912_v23 = vadd.f32 %v7554_v49, %v7466_v42 }
 0x462   : > { %v14906_v16 = vpop.f32.mrf.mxu1  ;;  %7872 = vmatmul.bf16.gmra.mxu3 %v10080_v8  ;;  %v11165_v8 = vld [vmem:[#allocation4 + $0x228] sm:$0xf0] }
 0x463   : > { %v10252_v49 = vor.u32 %v11165_v8, %v10251_v24 }
 0x465   : > { %7714 = vmatmul.bf16.gmra.mxu1 %v10216_v29  ;;  %v7468_v56 = vpop.f32.mrf.mxu2 }
 0x466   : > { %v7469_v11 = vadd.f32 %v7468_v56, %v7380_v31  ;;  %v5671_v31 = vrot.slane %v14736_v54, 5 }
 0x468   : > { %v7557_v46 = vpop.f32.mrf.mxu3  ;;  %v5672_v19 = vsel %vm12270_vm5, %v9979_v44, %v5671_v31  ;;  %v5673_v8 = vrot.slane %v5671_v31, 4 }
 0x469   : > { %v14925_v58 = vadd.f32 %v7557_v46, %v7469_v11  ;;  %v7385_v46 = vadd.f32 %v14796_v40, %v14827_v34  ;;  %v14945_v11 = vpop.f32.mrf.mxu0  ;;  %5708 = vst [vmem:[#allocation4 + $0x44c] sm:$0xf] %v5672_v19 }
 0x46a   : > { %v14921_v20 = vpop.f32.mrf.mxu1  ;;  %7966 = vmatmul.bf16.gmra.mxu0 %v10120_v13  ;;  %v11135_v13 = vld [vmem:[#allocation4 + $0x13c] sm:$0xf]  ;;  %v5675_v54 = vsel %vm12270_vm5, %v5673_v8, %v5674_v62  ;;  %5840 = vst [vmem:[#allocation4 + $0x410] sm:$0xf] %v5672_v19  ;;  %v10181_v19 = vld [vmem:[#allocation4 + $0x19c] sm:$0xf0] }
 0x46b   : > { %7788 = vmatmul.bf16.gmra.mxu2 %v10112_v17  ;;  %v11134_v17 = vld [vmem:[#allocation4 + $0x134] sm:$0xf]  ;;  %v10156_v35 = vor.u32 %v11135_v13, %v10153_v30  ;;  %5709 = vst [vmem:[#allocation4 + $0x470] sm:$0xf] %v5675_v54  ;;  %v10287_v30 = vld [vmem:[#allocation4 + $0x250] sm:$0xf] }
 0x46c   : > { %v10148_v18 = vor.u32 %v11134_v17, %v10145_v39  ;;  %5841 = vst [vmem:[#allocation4 + $0x434] sm:$0xf] %v5675_v54  ;;  %v11306_v8 = vld [vmem:[%s15803_s3 + $0x210] sm:$0xff] }
 0x46d   : > { %v7470_v42 = vpop.f32.mrf.mxu2  ;;  %v11143_v62 = vld [vmem:[#allocation4 + $0x17c] sm:$0xf]  ;;  %8037 = vmatpush.bf16.msra.mxu1 %v11306_v8 }
 0x46e   : > { %v7471_v9 = vadd.f32 %v7470_v42, %v7382_v28  ;;  %v11139_v28 = vld [vmem:[#allocation4 + $0x158] sm:$0xf0]  ;;  %v10151_v42 = vld [vmem:[#allocation4 + $0x138] sm:$0xf] }
 0x470   : > { %v7559_v51 = vpop.f32.mrf.mxu3 }
 0x471   : > { %v14937_v22 = vadd.f32 %v7559_v51, %v7471_v9  ;;  %v10152_v51 = vor.u32 %v11139_v28, %v10151_v42  ;;  %v14959_v44 = vpop.f32.mrf.mxu0 }
 0x472   : > { %v14933_v29 = vpop.f32.mrf.mxu1  ;;  %7877 = vmatmul.bf16.gmra.mxu3 %v10116_v47 }
 0x475   : > { %7719 = vmatmul.bf16.gmra.mxu1 %v10252_v49  ;;  %v7473_v47 = vpop.f32.mrf.mxu2  ;;  %v11174_v49 = vld [vmem:[#allocation4 + $0x270] sm:$0xf0] }
 0x476   : > { %v7474_v26 = vadd.f32 %v7473_v47, %v7385_v46  ;;  %v10288_v13 = vor.u32 %v11174_v49, %v10287_v30 }
 0x478   : > { %v7562_v24 = vpop.f32.mrf.mxu3 }
 0x479   : > { %v14952_v34 = vadd.f32 %v7562_v24, %v7474_v26  ;;  %v10184_v24 = vor.u32 %v11143_v62, %v10181_v19  ;;  %v7390_v26 = vadd.f32 %v14796_v40, %v14849_v14  ;;  %v7392_v14 = vadd.f32 %v14796_v40, %v14866_v27  ;;  %v10225_v62 = vld [vmem:[#allocation4 + $0x1ec] sm:$0xf0] }
 0x47a   : > { %v14941_v56 = vpop.f32.mrf.mxu1  ;;  %7971 = vmatmul.bf16.gmra.mxu0 %v10156_v35 }
 0x47b   : > { %7793 = vmatmul.bf16.gmra.mxu2 %v10148_v18  ;;  %v10189_v18 = vld [vmem:[#allocation4 + $0x1a4] sm:$0xf0] }
 0x47d   : > { %v7475_v17 = vpop.f32.mrf.mxu2 }
 0x47e   : > { %v7476_v31 = vadd.f32 %v7475_v17, %v7387_v57  ;;  %v11183_v57 = vld [vmem:[#allocation4 + $0x2b8] sm:$0xf0] }
 0x480   : > { %v7564_v35 = vpop.f32.mrf.mxu3 }
 0x481   : > { %v14961_v46 = vadd.f32 %v7564_v35, %v7476_v31  ;;  %v10323_v31 = vld [vmem:[#allocation4 + $0x298] sm:$0xf] }
 0x482   : > { %v7685_v9 = vpop.f32.mrf.mxu1  ;;  %7882 = vmatmul.bf16.gmra.mxu3 %v10152_v51  ;;  %v11148_v51 = vld [vmem:[#allocation4 + $0x1a0] sm:$0xf0] }
 0x483   : > { %v14957_v39 = vadd.f32 %v7685_v9, %v14589_v25  ;;  %v10192_v25 = vor.u32 %v11144_v45, %v10189_v18  ;;  %v14971_v9 = vpop.f32.mrf.mxu0  ;;  %v10324_v18 = vor.u32 %v11183_v57, %v10323_v31 }
 0x485   : > { %7724 = vmatmul.bf16.gmra.mxu1 %v10288_v13  ;;  %v7478_v28 = vpop.f32.mrf.mxu2  ;;  %v10187_v13 = vld [vmem:[#allocation4 + $0x180] sm:$0xf] }
 0x486   : > { %v7479_v42 = vadd.f32 %v7478_v28, %v7390_v26  ;;  %v10188_v17 = vor.u32 %v11148_v51, %v10187_v13  ;;  %v11152_v28 = vld [vmem:[#allocation4 + $0x1c4] sm:$0xf] }
 0x488   : > { %v7567_v49 = vpop.f32.mrf.mxu3 }
 0x489   : > { %v14973_v30 = vadd.f32 %v7567_v49, %v7479_v42 }
 0x48a   : > { %v7687_v47 = vpop.f32.mrf.mxu1  ;;  %7976 = vmatmul.bf16.gmra.mxu0 %v10192_v25 }
 0x48b   : > { %v14969_v54 = vadd.f32 %v7687_v47, %v14620_v21  ;;  %7798 = vmatmul.bf16.gmra.mxu2 %v10184_v24  ;;  %v10217_v47 = vld [vmem:[#allocation4 + $0x1e4] sm:$0xf0]  ;;  %v11153_v24 = vld [vmem:[#allocation4 + $0x1cc] sm:$0xf]  ;;  %v14982_v26 = vpop.f32.mrf.mxu0 }
 0x48c   : > { %v10228_v49 = vor.u32 %v11153_v24, %v10225_v62  ;;  %v10220_v27 = vor.u32 %v11152_v28, %v10217_v47  ;;  %v7397_v62 = vadd.f32 %v14796_v40, %v14894_v15  ;;  %v11162_v15 = vld [vmem:[#allocation4 + $0x214] sm:$0xf] }
 0x48d   : > { %v7480_v19 = vpop.f32.mrf.mxu2 }
 0x48e   : > { %v7481_v45 = vadd.f32 %v7480_v19, %v7392_v14  ;;  %v11192_v14 = vld [vmem:[#allocation4 + $0x300] sm:$0xf0] }
 0x490   : > { %v7569_v8 = vpop.f32.mrf.mxu3 }
 0x491   : > { %v14980_v25 = vadd.f32 %v7569_v8, %v7481_v45  ;;  %v10359_v45 = vld [vmem:[#allocation4 + $0x2e0] sm:$0xf] }
 0x492   : > { %v7690_v35 = vpop.f32.mrf.mxu1  ;;  %7887 = vmatmul.bf16.gmra.mxu3 %v10188_v17  ;;  %v10360_v47 = vor.u32 %v11192_v14, %v10359_v45  ;;  %v7400_v14 = vadd.f32 %v14796_v40, %v14906_v16  ;;  %v7402_v16 = vadd.f32 %v14796_v40, %v14921_v20 }
 0x493   : > { %v14978_v21 = vadd.f32 %v7690_v35, %v14648_v37  ;;  %v7395_v37 = vadd.f32 %v14796_v40, %v14882_v10  ;;  %v11157_v35 = vld [vmem:[#allocation4 + $0x1e8] sm:$0xf0]  ;;  %v14993_v10 = vpop.f32.mrf.mxu0 }
 0x495   : > { %7729 = vmatmul.bf16.gmra.mxu1 %v10324_v18  ;;  %v7483_v57 = vpop.f32.mrf.mxu2  ;;  %v10223_v18 = vld [vmem:[#allocation4 + $0x1c8] sm:$0xf] }
 0x496   : > { %v7484_v17 = vadd.f32 %v7483_v57, %v7395_v37  ;;  %v10224_v19 = vor.u32 %v11157_v35, %v10223_v18  ;;  %v10253_v37 = vld [vmem:[#allocation4 + $0x22c] sm:$0xf0] }
 0x497   : > { %v11305_v57 = vld [vmem:[%s15803_s3 + $0x208] sm:$0xff] }
 0x498   : > { %v7572_v13 = vpop.f32.mrf.mxu3  ;;  %8038 = vmatpush.bf16.msra.mxu1 %v11305_v57  ;;  %v10395_v57 = vld [vmem:[#allocation4 + $0x328] sm:$0xf] }
 0x499   : > { %v14989_v31 = vadd.f32 %v7572_v13, %v7484_v17  ;;  %v11161_v13 = vld [vmem:[#allocation4 + $0x20c] sm:$0xf] }
 0x49a   : > { %v7692_v42 = vpop.f32.mrf.mxu1  ;;  %7981 = vmatmul.bf16.gmra.mxu0 %v10228_v49  ;;  %v10256_v35 = vor.u32 %v11161_v13, %v10253_v37 }
 0x49b   : > { %v14987_v51 = vadd.f32 %v7692_v42, %v14674_v60  ;;  %7803 = vmatmul.bf16.gmra.mxu2 %v10220_v27  ;;  %v10261_v42 = vld [vmem:[#allocation4 + $0x234] sm:$0xf0]  ;;  %v15008_v45 = vpop.f32.mrf.mxu0 }
 0x49c   : > { %v10264_v17 = vor.u32 %v11162_v15, %v10261_v42 }
 0x49d   : > { %v7485_v24 = vpop.f32.mrf.mxu2 }
 0x49e   : > { %v7486_v49 = vadd.f32 %v7485_v24, %v7397_v62 }
 0x4a0   : > { %v7574_v28 = vpop.f32.mrf.mxu3 }
 0x4a1   : > { %v14998_v27 = vadd.f32 %v7574_v28, %v7486_v49  ;;  %v11201_v28 = vld [vmem:[#allocation4 + $0x348] sm:$0xf0]  ;;  %v10259_v49 = vld [vmem:[#allocation4 + $0x210] sm:$0xf] }
 0x4a2   : > { %v7695_v8 = vpop.f32.mrf.mxu1  ;;  %7892 = vmatmul.bf16.gmra.mxu3 %v10224_v19  ;;  %v10396_v15 = vor.u32 %v11201_v28, %v10395_v57 }
 0x4a3   : > { %v14996_v60 = vadd.f32 %v7695_v8, %v14707_v7 }
 0x4a5   : > { %7734 = vmatmul.bf16.gmra.mxu1 %v10360_v47  ;;  %v7488_v19 = vpop.f32.mrf.mxu2  ;;  %v11166_v47 = vld [vmem:[#allocation4 + $0x230] sm:$0xf0] }
 0x4a6   : > { %v7489_v62 = vadd.f32 %v7488_v19, %v7400_v14  ;;  %v10260_v42 = vor.u32 %v11166_v47, %v10259_v49  ;;  %v15017_v14 = vpop.f32.mrf.mxu0  ;;  %v11170_v47 = vld [vmem:[#allocation4 + $0x254] sm:$0xf] }
 0x4a8   : > { %v7577_v8 = vpop.f32.mrf.mxu3 }
 0x4a9   : > { %v15010_v24 = vadd.f32 %v7577_v8, %v7489_v62  ;;  %v10289_v8 = vld [vmem:[#allocation4 + $0x274] sm:$0xf0]  ;;  %v11171_v62 = vld [vmem:[#allocation4 + $0x25c] sm:$0xf] }
 0x4aa   : > { %v7697_v7 = vpop.f32.mrf.mxu1  ;;  %7986 = vmatmul.bf16.gmra.mxu0 %v10264_v17  ;;  %v10292_v20 = vor.u32 %v11170_v47, %v10289_v8 }
 0x4ab   : > { %v15006_v18 = vadd.f32 %v7697_v7, %v14746_v5  ;;  %7808 = vmatmul.bf16.gmra.mxu2 %v10256_v35  ;;  %v10297_v35 = vld [vmem:[#allocation4 + $0x27c] sm:$0xf0] }
 0x4ac   : > { %v10300_v49 = vor.u32 %v11171_v62, %v10297_v35  ;;  %v10431_v62 = vld [vmem:[#allocation4 + $0x370] sm:$0xf] }
 0x4ad   : > { %v7490_v13 = vpop.f32.mrf.mxu2 }
 0x4ae   : > { %v7491_v7 = vadd.f32 %v7490_v13, %v7402_v16  ;;  %v11175_v16 = vld [vmem:[#allocation4 + $0x278] sm:$0xf0]  ;;  %v11210_v13 = vld [vmem:[#allocation4 + $0x390] sm:$0xf0] }
 0x4b0   : > { %v7579_v17 = vpop.f32.mrf.mxu3 }
 0x4b1   : > { %v15019_v19 = vadd.f32 %v7579_v17, %v7491_v7  ;;  %v10295_v17 = vld [vmem:[#allocation4 + $0x258] sm:$0xf]  ;;  %v15028_v7 = vpop.f32.mrf.mxu0 }
 0x4b2   : > { %v7700_v37 = vpop.f32.mrf.mxu1  ;;  %7897 = vmatmul.bf16.gmra.mxu3 %v10260_v42  ;;  %v10296_v35 = vor.u32 %v11175_v16, %v10295_v17  ;;  %v11180_v16 = vld [vmem:[#allocation4 + $0x2a4] sm:$0xf]  ;;  %v11179_v17 = vld [vmem:[#allocation4 + $0x29c] sm:$0xf] }
 0x4b3   : > { %v15015_v5 = vadd.f32 %v7700_v37, %v14780_v55  ;;  %v7405_v55 = vadd.f32 %v14796_v40, %v14933_v29  ;;  %v7407_v29 = vadd.f32 %v14796_v40, %v14941_v56 }
 0x4b5   : > { %7739 = vmatmul.bf16.gmra.mxu1 %v10396_v15  ;;  %v7493_v42 = vpop.f32.mrf.mxu2 }
 0x4b6   : > { %v7494_v57 = vadd.f32 %v7493_v42, %v7405_v55  ;;  %v10333_v55 = vld [vmem:[#allocation4 + $0x2c4] sm:$0xf0] }
 0x4b7   : > { %v10336_v40 = vor.u32 %v11180_v16, %v10333_v55  ;;  %v10467_v16 = vld [vmem:[#allocation4 + $0x3b8] sm:$0xf] }
 0x4b8   : > { %v7582_v37 = vpop.f32.mrf.mxu3 }
 0x4b9   : > { %v15026_v15 = vadd.f32 %v7582_v37, %v7494_v57  ;;  %v10325_v37 = vld [vmem:[#allocation4 + $0x2bc] sm:$0xf0]  ;;  %v11304_v57 = vld [vmem:[%s15803_s3 + $0x200] sm:$0xff] }
 0x4ba   : > { %v7702_v48 = vpop.f32.mrf.mxu1  ;;  %7991 = vmatmul.bf16.gmra.mxu0 %v10300_v49  ;;  %8039 = vmatpush.bf16.msra.mxu1 %v11304_v57  ;;  %v10328_v56 = vor.u32 %v11179_v17, %v10325_v37 }
 0x4bb   : > { %v15024_v28 = vadd.f32 %v7702_v48, %v14821_v4  ;;  %7813 = vmatmul.bf16.gmra.mxu2 %v10292_v20  ;;  %v10432_v4 = vor.u32 %v11210_v13, %v10431_v62  ;;  %v15040_v13 = vpop.f32.mrf.mxu0 }
 0x4bd   : > { %v7495_v47 = vpop.f32.mrf.mxu2 }
 0x4be   : > { %v7496_v20 = vadd.f32 %v7495_v47, %v7407_v29 }
 0x4c0   : > { %v7584_v49 = vpop.f32.mrf.mxu3 }
 0x4c1   : > { %v15035_v42 = vadd.f32 %v7584_v49, %v7496_v20  ;;  %v11219_v49 = vld [vmem:[#allocation4 + $0x3d8] sm:$0xf0]  ;;  %v10331_v20 = vld [vmem:[#allocation4 + $0x2a0] sm:$0xf] }
 0x4c2   : > { %v7705_v8 = vpop.f32.mrf.mxu1  ;;  %7902 = vmatmul.bf16.gmra.mxu3 %v10296_v35  ;;  %v10468_v17 = vor.u32 %v11219_v49, %v10467_v16  ;;  %v11193_v16 = vld [vmem:[#allocation4 + $0x308] sm:$0xf0] }
 0x4c3   : > { %v15033_v48 = vadd.f32 %v7705_v8, %v14833_v59 }
 0x4c5   : > { %15974 = vst [vmem:[#allocation6_spill] sm:$0xff] %v15033_v48  ;;  %7744 = vmatmul.bf16.gmra.mxu1 %v10432_v4  ;;  %v7774_v8 = vpop.f32.mrf.mxu2  ;;  %v11184_v4 = vld [vmem:[#allocation4 + $0x2c0] sm:$0xf0] }
 0x4c6   : > { %v7775_v29 = vadd.f32 %v7774_v8, %v14957_v39  ;;  %v10332_v55 = vor.u32 %v11184_v4, %v10331_v20  ;;  %v11188_v4 = vld [vmem:[#allocation4 + $0x2e4] sm:$0xf] }
 0x4c8   : > { %v7863_v62 = vpop.f32.mrf.mxu3 }
 0x4c9   : > { %v15046_v47 = vadd.f32 %v7863_v62, %v7775_v29  ;;  %v10361_v62 = vld [vmem:[#allocation4 + $0x304] sm:$0xf0]  ;;  %v11189_v29 = vld [vmem:[#allocation4 + $0x2ec] sm:$0xf] }
 0x4ca   : > { %v7707_v59 = vpop.f32.mrf.mxu1  ;;  %7996 = vmatmul.bf16.gmra.mxu0 %v10336_v40  ;;  %v10364_v48 = vor.u32 %v11188_v4, %v10361_v62 }
 0x4cb   : > { %v15043_v35 = vadd.f32 %v7707_v59, %v14845_v63  ;;  %7818 = vmatmul.bf16.gmra.mxu2 %v10328_v56  ;;  %v15051_v59 = vpop.f32.mrf.mxu0  ;;  %v10369_v56 = vld [vmem:[#allocation4 + $0x30c] sm:$0xf0] }
 0x4cc   : > { %v10372_v20 = vor.u32 %v11189_v29, %v10369_v56  ;;  %v10503_v29 = vld [vmem:[#allocation4 + $0x400] sm:$0xf] }
 0x4cd   : > { %15975 = vst [vmem:[#allocation5_spill] sm:$0xff] %v15043_v35  ;;  %v7776_v63 = vpop.f32.mrf.mxu2 }
 0x4ce   : > { %v7777_v39 = vadd.f32 %v7776_v63, %v14969_v54  ;;  %v11228_v63 = vld [vmem:[#allocation4 + $0x420] sm:$0xf0] }
 0x4d0   : > { %v7865_v40 = vpop.f32.mrf.mxu3 }
 0x4d1   : > { %v15054_v8 = vadd.f32 %v7865_v40, %v7777_v39  ;;  %v10367_v40 = vld [vmem:[#allocation4 + $0x2e8] sm:$0xf] }
 0x4d2   : > { %v7710_v57 = vpop.f32.mrf.mxu1  ;;  %7907 = vmatmul.bf16.gmra.mxu3 %v10332_v55  ;;  %v10368_v39 = vor.u32 %v11193_v16, %v10367_v40  ;;  %v11197_v16 = vld [vmem:[#allocation4 + $0x32c] sm:$0xf] }
 0x4d3   : > { %v15049_v37 = vadd.f32 %v7710_v57, %v14857_v12  ;;  %v15060_v54 = vpop.f32.mrf.mxu0 }
 0x4d5   : > { %15976 = vst [vmem:[#allocation7_spill] sm:$0xff] %v15049_v37  ;;  %7749 = vmatmul.bf16.gmra.mxu1 %v10468_v17  ;;  %v7779_v49 = vpop.f32.mrf.mxu2 }
 0x4d6   : > { %v7780_v57 = vadd.f32 %v7779_v49, %v14978_v21  ;;  %v10397_v49 = vld [vmem:[#allocation4 + $0x34c] sm:$0xf0] }
 0x4d7   : > { %v10400_v37 = vor.u32 %v11197_v16, %v10397_v49 }
 0x4d8   : > { %v7868_v55 = vpop.f32.mrf.mxu3 }
 0x4d9   : > { %v15062_v17 = vadd.f32 %v7868_v55, %v7780_v57  ;;  %v11198_v55 = vld [vmem:[#allocation4 + $0x334] sm:$0xf] }
 0x4da   : > { %v7712_v35 = vpop.f32.mrf.mxu1  ;;  %8001 = vmatmul.bf16.gmra.mxu0 %v10372_v20 }
 0x4db   : > { %v15057_v12 = vadd.f32 %v7712_v35, %v14872_v2  ;;  %7823 = vmatmul.bf16.gmra.mxu2 %v10364_v48  ;;  %v10504_v2 = vor.u32 %v11228_v63, %v10503_v29  ;;  %v10405_v48 = vld [vmem:[#allocation4 + $0x354] sm:$0xf0]  ;;  %v15070_v57 = vpop.f32.mrf.mxu0 }
 0x4dc   : > { %v10408_v40 = vor.u32 %v11198_v55, %v10405_v48 }
 0x4dd   : > { %15977 = vst [vmem:[#allocation8_spill] sm:$0xff] %v15057_v12  ;;  %v7781_v35 = vpop.f32.mrf.mxu2 }
 0x4de   : > { %v7782_v21 = vadd.f32 %v7781_v35, %v14987_v51  ;;  %v10403_v35 = vld [vmem:[#allocation4 + $0x330] sm:$0xf] }
 0x4e0   : > { %v7870_v4 = vpop.f32.mrf.mxu3 }
 0x4e1   : > { %v15068_v20 = vadd.f32 %v7870_v4, %v7782_v21 }
 0x4e2   : > { %v7715_v56 = vpop.f32.mrf.mxu1  ;;  %7912 = vmatmul.bf16.gmra.mxu3 %v10368_v39 }
 0x4e3   : > { %v15065_v62 = vadd.f32 %v7715_v56, %v14880_v6  ;;  %v11202_v56 = vld [vmem:[#allocation4 + $0x350] sm:$0xf0]  ;;  %v15078_v48 = vpop.f32.mrf.mxu0 }
 0x4e4   : > { %v10404_v4 = vor.u32 %v11202_v56, %v10403_v35 }
 0x4e5   : > { %15978 = vst [vmem:[#allocation11_spill] sm:$0xff] %v15065_v62  ;;  %7754 = vmatmul.bf16.gmra.mxu1 %v10504_v2  ;;  %v7784_v63 = vpop.f32.mrf.mxu2  ;;  %v11237_v2 = vld [vmem:[#allocation4 + $0x468] sm:$0xf0]  ;;  %v10539_v62 = vld [vmem:[#allocation4 + $0x448] sm:$0xf] }
 0x4e6   : > { %v7785_v51 = vadd.f32 %v7784_v63, %v14996_v60  ;;  %v11207_v63 = vld [vmem:[#allocation4 + $0x37c] sm:$0xf] }
 0x4e8   : > { %v7873_v39 = vpop.f32.mrf.mxu3 }
 0x4e9   : > { %v15076_v29 = vadd.f32 %v7873_v39, %v7785_v51  ;;  %v11206_v39 = vld [vmem:[#allocation4 + $0x374] sm:$0xf] }
 0x4ea   : > { %v7717_v12 = vpop.f32.mrf.mxu1  ;;  %8006 = vmatmul.bf16.gmra.mxu0 %v10408_v40  ;;  %v10433_v40 = vld [vmem:[#allocation4 + $0x394] sm:$0xf0] }
 0x4eb   : > { %v15073_v6 = vadd.f32 %v7717_v12, %v14892_v0  ;;  %7828 = vmatmul.bf16.gmra.mxu2 %v10400_v37  ;;  %v10540_v0 = vor.u32 %v11237_v2, %v10539_v62  ;;  %v10441_v37 = vld [vmem:[#allocation4 + $0x39c] sm:$0xf0]  ;;  %v10436_v35 = vor.u32 %v11206_v39, %v10433_v40  ;;  %v15089_v2 = vpop.f32.mrf.mxu0 }
 0x4ec   : > { %v10444_v51 = vor.u32 %v11207_v63, %v10441_v37  ;;  %v10015_v37 = vld [vmem:[#allocation4 + $0x20] sm:$0xf] }
 0x4ed   : > { %15979 = vst [vmem:[#allocation9_spill] sm:$0xff] %v15073_v6  ;;  %v7786_v12 = vpop.f32.mrf.mxu2 }
 0x4ee   : > { %v7787_v60 = vadd.f32 %v7786_v12, %v15006_v18  ;;  %v10439_v12 = vld [vmem:[#allocation4 + $0x378] sm:$0xf] }
 0x4f0   : > { %v7875_v55 = vpop.f32.mrf.mxu3 }
 0x4f1   : > { %v15084_v16 = vadd.f32 %v7875_v55, %v7787_v60 }
 0x4f2   : > { %v7720_v21 = vpop.f32.mrf.mxu1  ;;  %7917 = vmatmul.bf16.gmra.mxu3 %v10404_v4  ;;  %v11211_v4 = vld [vmem:[#allocation4 + $0x398] sm:$0xf0] }
 0x4f3   : > { %v15081_v49 = vadd.f32 %v7720_v21, %v14904_v33  ;;  %v10440_v55 = vor.u32 %v11211_v4, %v10439_v12  ;;  %v11215_v4 = vld [vmem:[#allocation4 + $0x3bc] sm:$0xf] }
 0x4f5   : > { %7759 = vmatmul.bf16.gmra.mxu1 %v10540_v0  ;;  %v7789_v33 = vpop.f32.mrf.mxu2  ;;  %v11104_v0 = vld [vmem:[#allocation4 + $0x40] sm:$0xf0] }
 0x4f6   : > { %v7790_v18 = vadd.f32 %v7789_v33, %v15015_v5  ;;  %v15098_v5 = vpop.f32.mrf.mxu0  ;;  %v10469_v33 = vld [vmem:[#allocation4 + $0x3dc] sm:$0xf0] }
 0x4f8   : > { %v7878_v62 = vpop.f32.mrf.mxu3 }
 0x4f9   : > { %v15092_v21 = vadd.f32 %v7878_v62, %v7790_v18  ;;  %v11216_v62 = vld [vmem:[#allocation4 + $0x3c4] sm:$0xf]  ;;  %v7639_v18 = vadd.f32 %v14886_v36, %v14888_v1 }
 0x4fa   : > { %v7722_v56 = vpop.f32.mrf.mxu1  ;;  %8011 = vmatmul.bf16.gmra.mxu0 %v10444_v51 }
 0x4fb   : > { %v15087_v6 = vadd.f32 %v7722_v56, %v14919_v61  ;;  %7833 = vmatmul.bf16.gmra.mxu2 %v10436_v35  ;;  %v10016_v61 = vor.u32 %v11104_v0, %v10015_v37  ;;  %v10477_v56 = vld [vmem:[#allocation4 + $0x3e4] sm:$0xf0]  ;;  %v10472_v0 = vor.u32 %v11215_v4, %v10469_v33  ;;  %v10475_v37 = vld [vmem:[#allocation4 + $0x3c0] sm:$0xf]  ;;  %v11224_v4 = vld [vmem:[#allocation4 + $0x404] sm:$0xf] }
 0x4fc   : > { %v10505_v33 = vld [vmem:[#allocation4 + $0x424] sm:$0xf0] }
 0x4fd   : > { %v7791_v63 = vpop.f32.mrf.mxu2 }
 0x4fe   : > { %v7792_v39 = vadd.f32 %v7791_v63, %v15024_v28  ;;  %v11220_v28 = vld [vmem:[#allocation4 + $0x3e0] sm:$0xf0]  ;;  %v7642_v63 = vadd.f32 %v14898_v50, %v14900_v53  ;;  %v4290_v53 = vld [vmem:[#allocation3 + $0xcc] sm:$0x1] }
 0x500   : > { %v7880_v51 = vpop.f32.mrf.mxu3 }
 0x501   : > { %v15100_v35 = vadd.f32 %v7880_v51, %v7792_v39  ;;  %v10476_v39 = vor.u32 %v11220_v28, %v10475_v37  ;;  %v15118_v28 = vld [vmem:[#allocation3 + $0xd0] sm:$0xf]  ;;  %v7647_v37 = vadd.f32 %v14927_v3, %v14925_v58 }
 0x502   : > { %v7725_v60 = vpop.f32.mrf.mxu1  ;;  %7922 = vmatmul.bf16.gmra.mxu3 %v10440_v55  ;;  %5741 = vst [vmem:[#allocation4 + $0x474] sm:$0xf] %v15118_v28  ;;  %v5752_v52 = vshll.u32 %v15118_v28, 16 }
 0x503   : > { %v15095_v40 = vadd.f32 %v7725_v60, %v14931_v41  ;;  %v10480_v41 = vor.u32 %v11216_v62, %v10477_v56  ;;  %v11113_v60 = vld [vmem:[#allocation4 + $0x88] sm:$0xf0]  ;;  %v10513_v56 = vld [vmem:[#allocation4 + $0x42c] sm:$0xf0] }
 0x504   : > { %v11225_v62 = vld [vmem:[#allocation4 + $0x40c] sm:$0xf] }
 0x505   : > { %15980 = vst [vmem:[#allocation12_spill] sm:$0xff] %v15095_v40  ;;  %8040 = vmatmul.bf16.vlgmr.msra.gmra.mxu1 %v10016_v61  ;;  %v15106_v61 = vpop.f32.mrf.mxu0  ;;  %v10051_v40 = vld [vmem:[#allocation4 + $0x68] sm:$0xf] }
 0x506   : > { %v10052_v1 = vor.u32 %v11113_v60, %v10051_v40  ;;  %v4291_v40 = vsel %vm12788_vm8, 0, %v4290_v53  ;;  %v10511_v60 = vld [vmem:[#allocation4 + $0x408] sm:$0xf] }
 0x507   : > { %4292 = vst [vmem:[#allocation3 + $0xcc] sm:$0x1] %v4291_v40 }
 0x50a   : > { %v7727_v12 = vpop.f32.mrf.mxu1  ;;  %8016 = vmatmul.bf16.gmra.mxu0 %v10480_v41  ;;  %v10516_v41 = vor.u32 %v11225_v62, %v10513_v56  ;;  %v5756_v62 = vshrl.u32 %v15118_v28, 16 }
 0x50b   : > { %v15104_v55 = vadd.f32 %v7727_v12, %v7639_v18  ;;  %7838 = vmatmul.bf16.gmra.mxu2 %v10472_v0  ;;  %v7644_v18 = vadd.f32 %v14910_v32, %v14912_v23  ;;  %v10508_v0 = vor.u32 %v11224_v4, %v10505_v33  ;;  %v11229_v32 = vld [vmem:[#allocation4 + $0x428] sm:$0xf0]  ;;  %v11122_v23 = vld [vmem:[#allocation4 + $0xd0] sm:$0xf0]  ;;  %v4346_v33 = vld [vmem:[#allocation3 + $0xd4] sm:$0x1] }
 0x50c   : > { %v4347_v4 = vsel %vm12809_vm10, 0, %v4346_v33  ;;  %v11238_v33 = vld [vmem:[#allocation4 + $0x470] sm:$0xf0]  ;;  %vm8809_vm10 = vcmask 1046528  }
 0x50d   : > { %15981 = vst [vmem:[#allocation10_spill] sm:$0xff] %v15104_v55  ;;  %v15114_v55 = vpop.f32.mrf.mxu0 }
 0x50e   : > { %4348 = vst [vmem:[#allocation3 + $0xd4] sm:$0x1] %v4347_v4 }
 0x512   : > { %v7730_v51 = vpop.f32.mrf.mxu1  ;;  %7927 = vmatmul.bf16.gmra.mxu3 %v10476_v39 }
 0x513   : > { %v15110_v36 = vadd.f32 %v7730_v51, %v7642_v63  ;;  %v10512_v63 = vor.u32 %v11229_v32, %v10511_v60  ;;  %v10087_v51 = vld [vmem:[#allocation4 + $0xb0] sm:$0xf]  ;;  %v7649_v32 = vadd.f32 %v14945_v11, %v14937_v22  ;;  %v11131_v11 = vld [vmem:[#allocation4 + $0x118] sm:$0xf0] }
 0x514   : > { %v10088_v56 = vor.u32 %v11122_v23, %v10087_v51  ;;  %v11233_v23 = vld [vmem:[#allocation4 + $0x44c] sm:$0xf] }
 0x515   : > { %8045 = vmatmul.bf16.gmra.mxu1 %v10052_v1  ;;  %v15140_v4 = vld [vmem:[#allocation3 + $0xd4] sm:$0x1] }
 0x51a   : > { %v7732_v12 = vpop.f32.mrf.mxu1  ;;  %8021 = vmatmul.bf16.gmra.mxu0 %v10516_v41  ;;  %v5754_v41 = vrot.slane %v5752_v52, 5 }
 0x51b   : > { %v15116_v50 = vadd.f32 %v7732_v12, %v7644_v18  ;;  %7843 = vmatmul.bf16.gmra.mxu2 %v10508_v0  ;;  %v15129_v18 = vld [vmem:[#allocation3 + $0xcc] sm:$0xf]  ;;  %v5758_v12 = vrot.slane %v5756_v62, 4  ;;  %v10541_v0 = vld [vmem:[#allocation4 + $0x46c] sm:$0xf0] }
 0x51c   : > { %5740 = vst [vmem:[#allocation4 + $0x450] sm:$0xf] %v15129_v18  ;;  %v5743_v58 = vshrl.u32 %v15129_v18, 16  ;;  %v5746_v3 = vshll.u32 %v15129_v18, 16 }
 0x51e   : > { %v5745_v53 = vrot.slane %v5743_v58, 4  ;;  %v5748_v40 = vrot.slane %v5746_v3, 5  ;;  %v5762_v58 = vshll.u32 %v15140_v4, 16 }
 0x520   : > { %v5749_v60 = vor.u32 %v5748_v40, %v5745_v53  ;;  %v5764_v3 = vrot.slane %v5762_v58, 5  ;;  %v10123_v53 = vld [vmem:[#allocation4 + $0xf8] sm:$0xf] }
 0x522   : > { %v7735_v39 = vpop.f32.mrf.mxu1  ;;  %7932 = vmatmul.bf16.gmra.mxu3 %v10512_v63  ;;  %v5759_v63 = vor.u32 %v5758_v12, %v5754_v41  ;;  %v5750_v51 = vrot.slane %v5749_v60, 4  ;;  %v7652_v12 = vadd.f32 %v14959_v44, %v14952_v34 }
 0x523   : > { %v15125_v1 = vadd.f32 %v7735_v39, %v7647_v37  ;;  %v10544_v37 = vor.u32 %v11233_v23, %v10541_v0 }
 0x524   : > { %v5755_v52 = vsel %vm11771_vm2, %v5750_v51, %v5754_v41  ;;  %v5760_v62 = vrot.slane %v5759_v63, 4  ;;  %v10124_v41 = vor.u32 %v11131_v11, %v10123_v53  ;;  %v11149_v11 = vld [vmem:[#allocation4 + $0x1a8] sm:$0xf0] }
 0x525   : > { %8050 = vmatmul.bf16.gmra.mxu1 %v10088_v56  ;;  %v10547_v56 = vld [vmem:[#allocation4 + $0x450] sm:$0xf]  ;;  %5798 = vst [vmem:[#allocation4 + $0x454] sm:$0xf] %v5755_v52  ;;  %v10159_v52 = vld [vmem:[#allocation4 + $0x140] sm:$0xf] }
 0x526   : > { %v10548_v22 = vor.u32 %v11238_v33, %v10547_v56  ;;  %v5765_v40 = vsel %vm11771_vm2, %v5760_v62, %v5764_v3  ;;  %v7657_v56 = vadd.f32 %v14982_v26, %v14973_v30  ;;  %v10160_v58 = vor.u32 %v11140_v43, %v10159_v52 }
 0x527   : > { %5799 = vst [vmem:[#allocation4 + $0x478] sm:$0xf] %v5765_v40  ;;  %v7662_v3 = vadd.f32 %v15008_v45, %v14989_v31  ;;  %v7664_v26 = vadd.f32 %v15017_v14, %v14998_v27  ;;  %v7669_v45 = vadd.f32 %v15040_v13, %v15019_v19  ;;  %v11167_v27 = vld [vmem:[#allocation4 + $0x238] sm:$0xf0]  ;;  %v7672_v14 = vadd.f32 %v15051_v59, %v15026_v15  ;;  %v11176_v19 = vld [vmem:[#allocation4 + $0x280] sm:$0xf0] }
 0x528   : > { %v7953_v13 = vadd.f32 %v15070_v57, %v15046_v47 }
 0x52a   : > { %v7737_v38 = vpop.f32.mrf.mxu1 }
 0x52b   : > { %v15138_v39 = vadd.f32 %v7737_v38, %v7649_v32  ;;  %7848 = vmatmul.bf16.gmra.mxu2 %v10544_v37  ;;  %v15149_v32 = vpop.f32.mrf.mxu0  ;;  %v7654_v38 = vadd.f32 %v14971_v9, %v14961_v46  ;;  %v7659_v46 = vadd.f32 %v14993_v10, %v14980_v25  ;;  %v11158_v25 = vld [vmem:[#allocation4 + $0x1f0] sm:$0xf0]  ;;  %v7667_v10 = vadd.f32 %v15028_v7, %v15010_v24 }
 0x52c   : > { %v11234_v60 = vld [vmem:[#allocation4 + $0x454] sm:$0xf]  ;;  %v7674_v7 = vadd.f32 %v15060_v54, %v15035_v42 }
 0x52e   : > { %v10549_v63 = vld [vmem:[#allocation4 + $0x474] sm:$0xf0] }
 0x52f   : > { %v10552_v44 = vor.u32 %v11234_v60, %v10549_v63 }
 0x532   : > { %v7740_v0 = vpop.f32.mrf.mxu1  ;;  %7937 = vmatmul.bf16.gmra.mxu3 %v10548_v22 }
 0x533   : > { %v15151_v23 = vadd.f32 %v7740_v0, %v7652_v12  ;;  %v15157_v51 = vpop.f32.mrf.mxu0  ;;  %8026 = vmatmul.bf16.gmra.mxu0 %v10552_v44  ;;  %v10195_v0 = vld [vmem:[#allocation4 + $0x188] sm:$0xf] }
 0x534   : > { %v10196_v30 = vor.u32 %v11149_v11, %v10195_v0 }
 0x535   : > { %8055 = vmatmul.bf16.gmra.mxu1 %v10124_v41 }
 0x53a   : > { %v7742_v37 = vpop.f32.mrf.mxu1 }
 0x53b   : > { %v15155_v34 = vadd.f32 %v7742_v37, %v7654_v38  ;;  %v10231_v38 = vld [vmem:[#allocation4 + $0x1d0] sm:$0xf] }
 0x53c   : > { %v10232_v31 = vor.u32 %v11158_v25, %v10231_v38  ;;  %v15209_v38 = vpop.f32.mrf.mxu0 }
 0x542   : > { %v7745_v33 = vpop.f32.mrf.mxu1 }
 0x543   : > { %v15161_v62 = vadd.f32 %v7745_v33, %v7657_v56  ;;  %v10267_v56 = vld [vmem:[#allocation4 + $0x218] sm:$0xf] }
 0x544   : > { %v10268_v24 = vor.u32 %v11167_v27, %v10267_v56 }
 0x545   : > { %8060 = vmatmul.bf16.gmra.mxu1 %v10160_v58 }
 0x54a   : > { %v7747_v9 = vpop.f32.mrf.mxu1 }
 0x54b   : > { %v15165_v22 = vadd.f32 %v7747_v9, %v7659_v46  ;;  %v10303_v9 = vld [vmem:[#allocation4 + $0x260] sm:$0xf] }
 0x54c   : > { %v10304_v15 = vor.u32 %v11176_v19, %v10303_v9  ;;  %v11599_v9 = vld [vmem:[%s11717_s10 + $0x20] sm:$0xff] }
 0x552   : > { %v7750_v12 = vpop.f32.mrf.mxu1 }
 0x553   : > { %v15169_v53 = vadd.f32 %v7750_v12, %v7662_v3  ;;  %v7955_v3 = vadd.f32 %v15078_v48, %v15054_v8  ;;  %v15200_v12 = vpop.f32.mrf.mxu2 }
 0x555   : > { %8065 = vmatmul.bf16.gmra.mxu1 %v10196_v30  ;;  %v11185_v30 = vld [vmem:[#allocation4 + $0x2c8] sm:$0xf0] }
 0x55a   : > { %v7752_v40 = vpop.f32.mrf.mxu1 }
 0x55b   : > { %v15173_v41 = vadd.f32 %v7752_v40, %v7664_v26  ;;  %v7958_v26 = vadd.f32 %v15089_v2, %v15062_v17  ;;  %v15205_v40 = vpop.f32.mrf.mxu3 }
 0x562   : > { %v7755_v60 = vpop.f32.mrf.mxu1 }
 0x563   : > { %v15177_v37 = vadd.f32 %v7755_v60, %v7667_v10  ;;  %v10339_v10 = vld [vmem:[#allocation4 + $0x2a8] sm:$0xf]  ;;  %v15221_v19 = vpop.f32.mrf.mxu3 }
 0x564   : > { %v10340_v48 = vor.u32 %v11185_v30, %v10339_v10 }
 0x565   : > { %8070 = vmatmul.bf16.gmra.mxu1 %v10232_v31 }
 0x56a   : > { %v7757_v63 = vpop.f32.mrf.mxu1 }
 0x56b   : > { %v15181_v44 = vadd.f32 %v7757_v63, %v7669_v45  ;;  %v15212_v63 = vpop.f32.mrf.mxu2 }
 0x572   : > { %v7760_v43 = vpop.f32.mrf.mxu1 }
 0x573   : > { %v15185_v33 = vadd.f32 %v7760_v43, %v7672_v14  ;;  %v7960_v14 = vadd.f32 %v15098_v5, %v15068_v20  ;;  %v15232_v10 = vpop.f32.mrf.mxu2 }
 0x575   : > { %8075 = vmatmul.bf16.gmra.mxu1 %v10268_v24 }
 0x57a   : > { %v7762_v52 = vpop.f32.mrf.mxu1 }
 0x57b   : > { %v15189_v58 = vadd.f32 %v7762_v52, %v7674_v7 }
 0x582   : > { %v8041_v46 = vpop.f32.mrf.mxu1 }
 0x583   : > { %v15193_v11 = vadd.f32 %v8041_v46, %v7953_v13  ;;  %v11598_v13 = vld [vmem:[%s11717_s10 + $0x18] sm:$0xff] }
 0x584   : > { %v8810_v46 = vrot.slane %v11598_v13, 1  ;;  %v11600_v13 = vld [vmem:[%s11717_s10 + $0x28] sm:$0x3] }
 0x585   : > { %v10845_v59 = vmul.f32 -1.442695, %v15193_v11  ;;  %8080 = vmatmul.bf16.gmra.mxu1 %v10304_v15  ;;  %v8811_v15 = vrot.slane %v11599_v9, 1 }
 0x587   : > { %11468 = vpow2.f32 %v10845_v59 }
 0x58a   : > { %v8043_v42 = vpop.f32.mrf.mxu1 }
 0x58b   : > { %v15198_v54 = vadd.f32 %v8043_v42, %v7955_v3 }
 0x58d   : > { %v11469_v0 = vpop.eup %11468  ;;  %v10846_v47 = vmul.f32 -1.442695, %v15198_v54 }
 0x58e   : > { %v8217_v57 = vadd.f32 1.0, %v11469_v0 }
 0x58f   : > { %11470 = vpow2.f32 %v10846_v47  ;;  %v15228_v47 = vpop.f32.mrf.mxu0 }
 0x590   : > { %11472 = vrcp.f32 %v8217_v57  ;;  %v8260_v43 = vand.u32 2147483648, %v8217_v57  ;;  %v8258_v7 = vand.u32 2147483647, %v8217_v57  ;;  %vm8254_vm8 = vweird.f32 %v8217_v57 }
 0x592   : > { %v8046_v25 = vpop.f32.mrf.mxu1  ;;  %v8261_v42 = vor.u32 1.1754944e-38, %v8260_v43  ;;  %vm8259_vm15 = vcmp.eq.f32.partialorder %v8258_v7, 8.507059e+37 }
 0x593   : > { %v15207_v8 = vadd.f32 %v8046_v25, %v7958_v26  ;;  %v11194_v25 = vld [vmem:[#allocation4 + $0x310] sm:$0xf0] }
 0x595   : > { %v11471_v60 = vpop.eup %11470  ;;  %v10847_v31 = vmul.f32 -1.442695, %v15207_v8  ;;  %8085 = vmatmul.bf16.gmra.mxu1 %v10340_v48  ;;  %v8812_v48 = vsel %vm8809_vm10, %v8810_v46, %v8811_v15 }
 0x596   : > { %v11473_v45 = vpop.eup %11472  ;;  %v15214_v27 = vadd.f32 1.0, %v11471_v60 }
 0x597   : > { %v8250_v17 = vmul.f32 %v11473_v45, %v8217_v57  ;;  %11474 = vpow2.f32 %v10847_v31  ;;  %vm8255_vm2 = vweird.f32 %v11473_v45 }
 0x598   : > { %11476 = vrcp.f32 %v15214_v27  ;;  %vm8256_vm6 = vmor %vm8254_vm8, %vm8255_vm2  ;;  %vm8269_vm12 = vweird.f32 %v15214_v27 }
 0x599   : > { %v8251_v2 = vsub.f32 1.0, %v8250_v17  ;;  %v7963_v17 = vadd.f32 %v15106_v61, %v15076_v29  ;;  %v8813_v29 = vrot.slane %v11600_v13, 1 }
 0x59a   : > { %v8048_v56 = vpop.f32.mrf.mxu1 }
 0x59b   : > { %v8252_v24 = vmul.f32 %v11473_v45, %v8251_v2  ;;  %v15219_v52 = vadd.f32 %v8048_v56, %v7960_v14  ;;  %v8273_v2 = vand.u32 2147483647, %v15214_v27  ;;  %v8275_v14 = vand.u32 2147483648, %v15214_v27 }
 0x59d   : > { %v11475_v59 = vpop.eup %11474  ;;  %v8253_v3 = vadd.f32 %v11473_v45, %v8252_v24  ;;  %v10848_v20 = vmul.f32 -1.442695, %v15219_v52  ;;  %vm8274_vm14 = vcmp.eq.f32.partialorder %v8273_v2, 8.507059e+37 }
 0x59e   : > { %v11477_v5 = vpop.eup %11476  ;;  %v15226_v0 = vadd.f32 1.0, %v11475_v59 }
 0x59f   : > { %v8257_v30 = vsel %vm8256_vm6, %v11473_v45, %v8253_v3  ;;  %v8265_v26 = vmul.f32 %v11477_v5, %v15214_v27  ;;  %11478 = vpow2.f32 %v10848_v20  ;;  %v10375_v45 = vld [vmem:[#allocation4 + $0x2f0] sm:$0xf]  ;;  %vm8270_vm11 = vweird.f32 %v11477_v5  ;;  %v15252_v3 = vpop.f32.mrf.mxu3  ;;  %v15259_v27 = vpop.f32.mrf.mxu0 }
 0x5a0   : > { %v8262_v57 = vsel %vm8259_vm15, %v8261_v42, %v8257_v30  ;;  %11480 = vrcp.f32 %v15226_v0  ;;  %v10376_v56 = vor.u32 %v11194_v25, %v10375_v45  ;;  %vm8271_vm13 = vmor %vm8269_vm12, %vm8270_vm11  ;;  %v8276_v20 = vor.u32 1.1754944e-38, %v8275_v14 }
 0x5a1   : > { %v8729_v60 = vmul.f32 %v8262_v57, %v15193_v11  ;;  %v8266_v31 = vsub.f32 1.0, %v8265_v26  ;;  %v8814_v57 = vsel %vm8809_vm10, %v8811_v15, %v8813_v29  ;;  %v8290_v45 = vand.u32 2147483648, %v15226_v0 }
 0x5a2   : > { %v8051_v43 = vpop.f32.mrf.mxu1  ;;  %vm8284_vm0 = vweird.f32 %v15226_v0 }
 0x5a3   : > { %v8922_v24 = vadd.f32 %v8812_v48, %v8729_v60  ;;  %v8267_v7 = vmul.f32 %v11477_v5, %v8266_v31  ;;  %v15246_v11 = vadd.f32 %v8051_v43, %v7963_v17  ;;  %v15264_v31 = vpop.f32.mrf.mxu2  ;;  %v8288_v17 = vand.u32 2147483647, %v15226_v0 }
 0x5a5   : > { %v11479_v61 = vpop.eup %11478  ;;  %8954 = vst [vmem:[%s15242_s11] sm:$0xff] %v8922_v24  ;;  %v8268_v46 = vadd.f32 %v11477_v5, %v8267_v7  ;;  %v10849_v9 = vmul.f32 -1.442695, %v15246_v11  ;;  %8090 = vmatmul.bf16.gmra.mxu1 %v10376_v56  ;;  %v11601_v56 = vld [vmem:[%s11717_s10 + $0x30] sm:$0xff]  ;;  %vm8289_vm3 = vcmp.eq.f32.partialorder %v8288_v17, 8.507059e+37 }
 0x5a6   : > { %v11481_v59 = vpop.eup %11480  ;;  %v15254_v42 = vadd.f32 1.0, %v11479_v61  ;;  %v8815_v24 = vrot.slane %v11601_v56, 1  ;;  %v8291_v61 = vor.u32 1.1754944e-38, %v8290_v45 }
 0x5a7   : > { %v8272_v30 = vsel %vm8271_vm13, %v11477_v5, %v8268_v46  ;;  %v8280_v26 = vmul.f32 %v11481_v59, %v15226_v0  ;;  %11482 = vpow2.f32 %v10849_v9  ;;  %v7965_v5 = vadd.f32 %v15114_v55, %v15084_v16 }
 0x5a8   : > { %v8277_v25 = vsel %vm8274_vm14, %v8276_v20, %v8272_v30  ;;  %11484 = vrcp.f32 %v15254_v42  ;;  %vm8285_vm7 = vweird.f32 %v11481_v59  ;;  %v11203_v30 = vld [vmem:[#allocation4 + $0x358] sm:$0xf0]  ;;  %v8305_v17 = vand.u32 2147483648, %v15254_v42 }
 0x5a9   : > { %v8730_v48 = vmul.f32 %v8277_v25, %v15198_v54  ;;  %v8281_v60 = vsub.f32 1.0, %v8280_v26  ;;  %v11602_v54 = vld [vmem:[%s11717_s10 + $0x38] sm:$0xff]  ;;  %vm8286_vm1 = vmor %vm8284_vm0, %vm8285_vm7  ;;  %v15278_v26 = vpop.f32.mrf.mxu3  ;;  %vm8299_vm9 = vweird.f32 %v15254_v42 }
 0x5aa   : > { %v8053_v2 = vpop.f32.mrf.mxu1  ;;  %v8816_v7 = vrot.slane %v11602_v54, 1  ;;  %v11603_v54 = vld [vmem:[%s11717_s10 + $0x40] sm:$0x3] }
 0x5ab   : > { %v8923_v15 = vadd.f32 %v8814_v57, %v8730_v48  ;;  %v8282_v14 = vmul.f32 %v11481_v59, %v8281_v60  ;;  %v15268_v43 = vadd.f32 %v8053_v2, %v7965_v5  ;;  %v10411_v60 = vld [vmem:[#allocation4 + $0x338] sm:$0xf]  ;;  %v8303_v5 = vand.u32 2147483647, %v15254_v42 }
 0x5ac   : > { %v8817_v57 = vsel %vm8809_vm10, %v8815_v24, %v8816_v7  ;;  %v10412_v2 = vor.u32 %v11203_v30, %v10411_v60 }
 0x5ad   : > { %v11483_v13 = vpop.eup %11482  ;;  %8955 = vst [vmem:[%s15242_s11 + $0x8] sm:$0xff] %v8923_v15  ;;  %v8283_v29 = vadd.f32 %v11481_v59, %v8282_v14  ;;  %v10850_v16 = vmul.f32 -1.442695, %v15268_v43  ;;  %v15287_v15 = vpop.f32.mrf.mxu0  ;;  %vm8304_vm8 = vcmp.eq.f32.partialorder %v8303_v5, 8.507059e+37 }
 0x5ae   : > { %v11485_v55 = vpop.eup %11484  ;;  %v15275_v46 = vadd.f32 1.0, %v11483_v13  ;;  %v8818_v13 = vrot.slane %v11603_v54, 1  ;;  %v11605_v54 = vld [vmem:[%s11717_s10 + $0x50] sm:$0xff] }
 0x5af   : > { %v8287_v9 = vsel %vm8286_vm1, %v11481_v59, %v8283_v29  ;;  %v8295_v20 = vmul.f32 %v11485_v55, %v15254_v42  ;;  %11486 = vpow2.f32 %v10850_v16  ;;  %v7968_v59 = vadd.f32 %v15149_v32, %v15092_v21 }
 0x5b0   : > { %v8292_v25 = vsel %vm8289_vm3, %v8291_v61, %v8287_v9  ;;  %11488 = vrcp.f32 %v15275_v46  ;;  %vm8300_vm4 = vweird.f32 %v11485_v55  ;;  %v8306_v61 = vor.u32 1.1754944e-38, %v8305_v17 }
 0x5b1   : > { %v8731_v0 = vmul.f32 %v8292_v25, %v15207_v8  ;;  %v8296_v48 = vsub.f32 1.0, %v8295_v20  ;;  %v15291_v8 = vpop.f32.mrf.mxu2  ;;  %vm8301_vm2 = vmor %vm8299_vm9, %vm8300_vm4  ;;  %v15307_v60 = vpop.f32.mrf.mxu3  ;;  %v8318_v5 = vand.u32 2147483647, %v15275_v46  ;;  %v8320_v17 = vand.u32 2147483648, %v15275_v46 }
 0x5b2   : > { %v8056_v45 = vpop.f32.mrf.mxu1  ;;  %vm8314_vm15 = vweird.f32 %v15275_v46 }
 0x5b3   : > { %v8924_v14 = vadd.f32 %v8817_v57, %v8731_v0  ;;  %v8297_v56 = vmul.f32 %v11485_v55, %v8296_v48  ;;  %v15289_v24 = vadd.f32 %v8056_v45, %v7968_v59  ;;  %v8819_v57 = vsel %vm8809_vm10, %v8816_v7, %v8818_v13  ;;  %v15982_v59 = vld [vmem:[#allocation6_spill] sm:$0xff] }
 0x5b4   : > { %v7970_v48 = vadd.f32 %v15157_v51, %v15100_v35  ;;  %v8821_v35 = vrot.slane %v11605_v54, 1  ;;  %vm8319_vm12 = vcmp.eq.f32.partialorder %v8318_v5, 8.507059e+37 }
 0x5b5   : > { %v11487_v29 = vpop.eup %11486  ;;  %8956 = vst [vmem:[%s15242_s11 + $0x10] sm:$0xff] %v8924_v14  ;;  %v8298_v21 = vadd.f32 %v11485_v55, %v8297_v56  ;;  %v10851_v32 = vmul.f32 -1.442695, %v15289_v24  ;;  %8095 = vmatmul.bf16.gmra.mxu1 %v10412_v2  ;;  %v15315_v13 = vpop.f32.mrf.mxu0 }
 0x5b6   : > { %v11489_v16 = vpop.eup %11488  ;;  %v15297_v9 = vadd.f32 1.0, %v11487_v29 }
 0x5b7   : > { %v8302_v20 = vsel %vm8301_vm2, %v11485_v55, %v8298_v21  ;;  %v8310_v30 = vmul.f32 %v11489_v16, %v15275_v46  ;;  %11490 = vpow2.f32 %v10851_v32  ;;  %v7795_v55 = vadd.f32 %v15200_v12, %v15982_v59 }
 0x5b8   : > { %v8307_v25 = vsel %vm8304_vm8, %v8306_v61, %v8302_v20  ;;  %11492 = vrcp.f32 %v15297_v9  ;;  %vm8315_vm6 = vweird.f32 %v11489_v16  ;;  %v8321_v20 = vor.u32 1.1754944e-38, %v8320_v17  ;;  %v10447_v17 = vld [vmem:[#allocation4 + $0x380] sm:$0xf] }
 0x5b9   : > { %v8732_v42 = vmul.f32 %v8307_v25, %v15219_v52  ;;  %v8311_v0 = vsub.f32 1.0, %v8310_v30  ;;  %v11604_v52 = vld [vmem:[%s11717_s10 + $0x48] sm:$0xff]  ;;  %v7884_v32 = vadd.f32 %v15205_v40, %v7795_v55  ;;  %v15321_v61 = vpop.f32.mrf.mxu2  ;;  %vm8316_vm11 = vmor %vm8314_vm15, %vm8315_vm6  ;;  %v15983_v40 = vld [vmem:[#allocation5_spill] sm:$0xff]  ;;  %v15335_v54 = vpop.f32.mrf.mxu3  ;;  %vm8329_vm14 = vweird.f32 %v15297_v9 }
 0x5ba   : > { %v8058_v7 = vpop.f32.mrf.mxu1  ;;  %v8820_v56 = vrot.slane %v11604_v52, 1 }
 0x5bb   : > { %v8925_v45 = vadd.f32 %v8819_v57, %v8732_v42  ;;  %v8312_v2 = vmul.f32 %v11489_v16, %v8311_v0  ;;  %v15311_v14 = vadd.f32 %v8058_v7, %v7970_v48  ;;  %v11212_v42 = vld [vmem:[#allocation4 + $0x3a0] sm:$0xf0]  ;;  %v7797_v48 = vadd.f32 %v15212_v63, %v15983_v40  ;;  %v15984_v40 = vld [vmem:[#allocation7_spill] sm:$0xff] }
 0x5bc   : > { %v8822_v46 = vsel %vm8809_vm10, %v8820_v56, %v8821_v35  ;;  %v7973_v5 = vadd.f32 %v15209_v38, %v7884_v32  ;;  %v8333_v56 = vand.u32 2147483647, %v15297_v9 }
 0x5bd   : > { %v11491_v51 = vpop.eup %11490  ;;  %8957 = vst [vmem:[%s15242_s11 + $0x18] sm:$0xff] %v8925_v45  ;;  %v8313_v12 = vadd.f32 %v11489_v16, %v8312_v2  ;;  %v10852_v29 = vmul.f32 -1.442695, %v15311_v14  ;;  %v10448_v45 = vor.u32 %v11212_v42, %v10447_v17  ;;  %v15346_v42 = vpop.f32.mrf.mxu0 }
 0x5be   : > { %v11493_v21 = vpop.eup %11492  ;;  %v15324_v30 = vadd.f32 1.0, %v11491_v51  ;;  %v11606_v51 = vld [vmem:[%s11717_s10 + $0x58] sm:$0x3]  ;;  %vm8334_vm0 = vcmp.eq.f32.partialorder %v8333_v56, 8.507059e+37  ;;  %v11608_v56 = vld [vmem:[%s11717_s10 + $0x68] sm:$0xff] }
 0x5bf   : > { %v8317_v25 = vsel %vm8316_vm11, %v11489_v16, %v8313_v12  ;;  %v8325_v57 = vmul.f32 %v11493_v21, %v15297_v9  ;;  %11494 = vpow2.f32 %v10852_v29  ;;  %v8335_v16 = vand.u32 2147483648, %v15297_v9 }
 0x5c0   : > { %v8322_v0 = vsel %vm8319_vm12, %v8321_v20, %v8317_v25  ;;  %11496 = vrcp.f32 %v15324_v30  ;;  %vm8330_vm13 = vweird.f32 %v11493_v21  ;;  %v8823_v63 = vrot.slane %v11606_v51, 1 }
 0x5c1   : > { %v8733_v59 = vmul.f32 %v8322_v0, %v15246_v11  ;;  %v8326_v55 = vsub.f32 1.0, %v8325_v57  ;;  %v7886_v29 = vadd.f32 %v15221_v19, %v7797_v48  ;;  %vm8331_vm7 = vmor %vm8329_vm14, %vm8330_vm13  ;;  %v8336_v32 = vor.u32 1.1754944e-38, %v8335_v16  ;;  %v15351_v48 = vpop.f32.mrf.mxu2 }
 0x5c2   : > { %v8061_v7 = vpop.f32.mrf.mxu1  ;;  %v7800_v19 = vadd.f32 %v15232_v10, %v15984_v40  ;;  %v8348_v16 = vand.u32 2147483647, %v15324_v30  ;;  %v8350_v10 = vand.u32 2147483648, %v15324_v30  ;;  %v8826_v51 = vrot.slane %v11608_v56, 1 }
 0x5c3   : > { %v8926_v2 = vadd.f32 %v8822_v46, %v8733_v59  ;;  %v8327_v52 = vmul.f32 %v11493_v21, %v8326_v55  ;;  %v15338_v12 = vadd.f32 %v8061_v7, %v7973_v5  ;;  %v8824_v59 = vsel %vm8809_vm10, %v8821_v35, %v8823_v63  ;;  %v11607_v35 = vld [vmem:[%s11717_s10 + $0x60] sm:$0xff] }
 0x5c4   : > { %vm8344_vm3 = vweird.f32 %v15324_v30  ;;  %vm8349_vm9 = vcmp.eq.f32.partialorder %v8348_v16, 8.507059e+37 }
 0x5c5   : > { %v11495_v11 = vpop.eup %11494  ;;  %8958 = vst [vmem:[%s15242_s11 + $0x20] sm:$0xff] %v8926_v2  ;;  %v8328_v20 = vadd.f32 %v11493_v21, %v8327_v52  ;;  %8100 = vmatmul.bf16.gmra.mxu1 %v10448_v45  ;;  %v10853_v57 = vmul.f32 -1.442695, %v15338_v12  ;;  %v8825_v52 = vrot.slane %v11607_v35, 1 }
 0x5c6   : > { %v11497_v38 = vpop.eup %11496  ;;  %v15343_v25 = vadd.f32 1.0, %v11495_v11 }
 0x5c7   : > { %v8332_v0 = vsel %vm8331_vm7, %v11493_v21, %v8328_v20  ;;  %v8340_v46 = vmul.f32 %v11497_v38, %v15324_v30  ;;  %v7975_v21 = vadd.f32 %v15228_v47, %v7886_v29  ;;  %vm8345_vm1 = vweird.f32 %v11497_v38  ;;  %v15367_v29 = vpop.f32.mrf.mxu3  ;;  %v15985_v30 = vld [vmem:[#allocation8_spill] sm:$0xff] }
 0x5c8   : > { %v8337_v9 = vsel %vm8334_vm0, %v8336_v32, %v8332_v0  ;;  %11498 = vrcp.f32 %v15343_v25  ;;  %vm8346_vm4 = vmor %vm8344_vm3, %vm8345_vm1  ;;  %v8351_v20 = vor.u32 1.1754944e-38, %v8350_v10  ;;  %v8363_v10 = vand.u32 2147483647, %v15343_v25 }
 0x5c9   : > { %v8734_v55 = vmul.f32 %v8337_v9, %v15268_v43  ;;  %v8341_v17 = vsub.f32 1.0, %v8340_v46  ;;  %11500 = vpow2.f32 %v10853_v57  ;;  %v7889_v43 = vadd.f32 %v15252_v3, %v7800_v19  ;;  %v11221_v46 = vld [vmem:[#allocation4 + $0x3e8] sm:$0xf0]  ;;  %v15379_v16 = vpop.f32.mrf.mxu2 }
 0x5ca   : > { %v8063_v5 = vpop.f32.mrf.mxu1  ;;  %v8827_v3 = vsel %vm8809_vm10, %v8825_v52, %v8826_v51  ;;  %v7802_v9 = vadd.f32 %v15264_v31, %v15985_v30  ;;  %vm8359_vm8 = vweird.f32 %v15343_v25  ;;  %vm8364_vm15 = vcmp.eq.f32.partialorder %v8363_v10, 8.507059e+37 }
 0x5cb   : > { %v8927_v7 = vadd.f32 %v8824_v59, %v8734_v55  ;;  %v8342_v45 = vmul.f32 %v11497_v38, %v8341_v17  ;;  %v15359_v2 = vadd.f32 %v8063_v5, %v7975_v21  ;;  %v15375_v59 = vpop.f32.mrf.mxu0  ;;  %v10483_v21 = vld [vmem:[#allocation4 + $0x3c8] sm:$0xf]  ;;  %v8365_v5 = vand.u32 2147483648, %v15343_v25 }
 0x5cc   : > { %v10484_v31 = vor.u32 %v11221_v46, %v10483_v21  ;;  %v15986_v46 = vld [vmem:[#allocation11_spill] sm:$0xff] }
 0x5cd   : > { %8959 = vst [vmem:[%s15242_s11 + $0x28] sm:$0xff] %v8927_v7  ;;  %v8343_v63 = vadd.f32 %v11497_v38, %v8342_v45  ;;  %v10854_v47 = vmul.f32 -1.442695, %v15359_v2 }
 0x5ce   : > { %v11499_v11 = vpop.eup %11498 }
 0x5cf   : > { %v11501_v32 = vpop.eup %11500  ;;  %v8347_v57 = vsel %vm8346_vm4, %v11497_v38, %v8343_v63  ;;  %v8355_v0 = vmul.f32 %v11499_v11, %v15343_v25  ;;  %11502 = vpow2.f32 %v10854_v47  ;;  %v7978_v38 = vadd.f32 %v15259_v27, %v7889_v43 }
 0x5d0   : > { %v8352_v40 = vsel %vm8349_vm9, %v8351_v20, %v8347_v57  ;;  %v15371_v19 = vadd.f32 1.0, %v11501_v32  ;;  %vm8360_vm2 = vweird.f32 %v11499_v11  ;;  %v7891_v43 = vadd.f32 %v15278_v26, %v7802_v9 }
 0x5d1   : > { %v8735_v55 = vmul.f32 %v8352_v40, %v15289_v24  ;;  %v8356_v17 = vsub.f32 1.0, %v8355_v0  ;;  %v11609_v24 = vld [vmem:[%s11717_s10 + $0x70] sm:$0x3]  ;;  %vm8361_vm6 = vmor %vm8359_vm8, %vm8360_vm2  ;;  %v8366_v20 = vor.u32 1.1754944e-38, %v8365_v5  ;;  %v7805_v40 = vadd.f32 %v15291_v8, %v15986_v46 }
 0x5d2   : > { %11504 = vrcp.f32 %v15371_v19  ;;  %v8066_v7 = vpop.f32.mrf.mxu1  ;;  %v8828_v56 = vrot.slane %v11609_v24, 1  ;;  %v8380_v5 = vand.u32 2147483648, %v15371_v19  ;;  %v11610_v24 = vld [vmem:[%s11717_s10 + $0x78] sm:$0xff]  ;;  %vm8374_vm12 = vweird.f32 %v15371_v19 }
 0x5d3   : > { %v8928_v45 = vadd.f32 %v8827_v3, %v8735_v55  ;;  %v8357_v35 = vmul.f32 %v11499_v11, %v8356_v17  ;;  %v15384_v52 = vadd.f32 %v8066_v7, %v7978_v38  ;;  %v15395_v3 = vpop.f32.mrf.mxu3  ;;  %v15402_v17 = vpop.f32.mrf.mxu0  ;;  %v7894_v10 = vadd.f32 %v15307_v60, %v7805_v40 }
 0x5d4   : > { %v8829_v25 = vsel %vm8809_vm10, %v8826_v51, %v8828_v56  ;;  %v15407_v51 = vpop.f32.mrf.mxu2  ;;  %v8830_v56 = vrot.slane %v11610_v24, 1  ;;  %v8381_v40 = vor.u32 1.1754944e-38, %v8380_v5 }
 0x5d5   : > { %v11503_v27 = vpop.eup %11502  ;;  %8960 = vst [vmem:[%s15242_s11 + $0x30] sm:$0xff] %v8928_v45  ;;  %v8358_v63 = vadd.f32 %v11499_v11, %v8357_v35  ;;  %v10855_v47 = vmul.f32 -1.442695, %v15384_v52  ;;  %8105 = vmatmul.bf16.gmra.mxu1 %v10484_v31 }
 0x5d6   : > { %v15391_v32 = vadd.f32 1.0, %v11503_v27  ;;  %v11611_v27 = vld [vmem:[%s11717_s10 + $0x80] sm:$0xff] }
 0x5d7   : > { %v8362_v57 = vsel %vm8361_vm6, %v11499_v11, %v8358_v63  ;;  %11506 = vpow2.f32 %v10855_v47  ;;  %v7980_v11 = vadd.f32 %v15287_v15, %v7891_v43  ;;  %v8378_v15 = vand.u32 2147483647, %v15371_v19 }
 0x5d8   : > { %v11505_v0 = vpop.eup %11504  ;;  %v8367_v26 = vsel %vm8364_vm15, %v8366_v20, %v8362_v57  ;;  %11508 = vrcp.f32 %v15391_v32  ;;  %v8831_v43 = vrot.slane %v11611_v27, 1  ;;  %v10519_v20 = vld [vmem:[#allocation4 + $0x410] sm:$0xf]  ;;  %v15987_v57 = vld [vmem:[#allocation9_spill] sm:$0xff]  ;;  %vm8389_vm0 = vweird.f32 %v15391_v32 }
 0x5d9   : > { %v8736_v30 = vmul.f32 %v8367_v26, %v15311_v14  ;;  %v8370_v9 = vmul.f32 %v11505_v0, %v15371_v19  ;;  %v11230_v14 = vld [vmem:[#allocation4 + $0x430] sm:$0xf0]  ;;  %vm8375_vm11 = vweird.f32 %v11505_v0  ;;  %v7807_v46 = vadd.f32 %v15321_v61, %v15987_v57 }
 0x5da   : > { %v8068_v55 = vpop.f32.mrf.mxu1  ;;  %vm8376_vm13 = vmor %vm8374_vm12, %vm8375_vm11  ;;  %v10520_v26 = vor.u32 %v11230_v14, %v10519_v20  ;;  %vm8379_vm14 = vcmp.eq.f32.partialorder %v8378_v15, 8.507059e+37  ;;  %v8395_v61 = vand.u32 2147483648, %v15391_v32 }
 0x5db   : > { %v8929_v38 = vadd.f32 %v8829_v25, %v8736_v30  ;;  %v8371_v8 = vsub.f32 1.0, %v8370_v9  ;;  %v15404_v21 = vadd.f32 %v8068_v55, %v7980_v11  ;;  %v7983_v9 = vadd.f32 %v15315_v13, %v7894_v10  ;;  %v15424_v19 = vpop.f32.mrf.mxu3  ;;  %v11612_v13 = vld [vmem:[%s11717_s10 + $0x88] sm:$0x3]  ;;  %v15434_v15 = vpop.f32.mrf.mxu0 }
 0x5dc   : > { %v8832_v55 = vsel %vm8809_vm10, %v8830_v56, %v8831_v43  ;;  %v8833_v10 = vrot.slane %v11612_v13, 1  ;;  %v15438_v27 = vpop.f32.mrf.mxu2 }
 0x5dd   : > { %v11507_v7 = vpop.eup %11506  ;;  %8961 = vst [vmem:[%s15242_s11 + $0x38] sm:$0xff] %v8929_v38  ;;  %v8372_v31 = vmul.f32 %v11505_v0, %v8371_v8  ;;  %v10856_v45 = vmul.f32 -1.442695, %v15404_v21  ;;  %v8393_v38 = vand.u32 2147483647, %v15391_v32 }
 0x5de   : > { %v11509_v35 = vpop.eup %11508  ;;  %v15415_v63 = vadd.f32 1.0, %v11507_v7 }
 0x5df   : > { %v8373_v60 = vadd.f32 %v11505_v0, %v8372_v31  ;;  %v8385_v47 = vmul.f32 %v11509_v35, %v15391_v32  ;;  %11510 = vpow2.f32 %v10856_v45  ;;  %vm8390_vm7 = vweird.f32 %v11509_v35 }
 0x5e0   : > { %11512 = vrcp.f32 %v15415_v63  ;;  %vm8391_vm1 = vmor %vm8389_vm0, %vm8390_vm7  ;;  %vm8394_vm3 = vcmp.eq.f32.partialorder %v8393_v38, 8.507059e+37  ;;  %v8834_v32 = vsel %vm8809_vm10, %v8831_v43, %v8833_v10  ;;  %vm8404_vm9 = vweird.f32 %v15415_v63 }
 0x5e1   : > { %v8377_v25 = vsel %vm8376_vm13, %v11505_v0, %v8373_v60  ;;  %v8386_v30 = vsub.f32 1.0, %v8385_v47  ;;  %v7896_v0 = vadd.f32 %v15335_v54, %v7807_v46  ;;  %v8396_v60 = vor.u32 1.1754944e-38, %v8395_v61  ;;  %v11613_v61 = vld [vmem:[%s11717_s10 + $0x90] sm:$0xff] }
 0x5e2   : > { %v8382_v11 = vsel %vm8379_vm14, %v8381_v40, %v8377_v25  ;;  %v8071_v8 = vpop.f32.mrf.mxu1  ;;  %v7810_v46 = vadd.f32 %v15351_v48, %v15081_v49  ;;  %v8408_v25 = vand.u32 2147483647, %v15415_v63  ;;  %v8835_v49 = vrot.slane %v11613_v61, 1  ;;  %v11614_v48 = vld [vmem:[%s11717_s10 + $0x98] sm:$0xff] }
 0x5e3   : > { %v8737_v5 = vmul.f32 %v8382_v11, %v15338_v12  ;;  %v8387_v7 = vmul.f32 %v11509_v35, %v8386_v30  ;;  %v15430_v14 = vadd.f32 %v8071_v8, %v7983_v9  ;;  %v8410_v30 = vand.u32 2147483648, %v15415_v63  ;;  %v15454_v38 = vpop.f32.mrf.mxu3 }
 0x5e4   : > { %vm8409_vm8 = vcmp.eq.f32.partialorder %v8408_v25, 8.507059e+37 }
 0x5e5   : > { %v11511_v31 = vpop.eup %11510  ;;  %v8930_v45 = vadd.f32 %v8832_v55, %v8737_v5  ;;  %v8388_v24 = vadd.f32 %v11509_v35, %v8387_v7  ;;  %v10857_v56 = vmul.f32 -1.442695, %v15430_v14  ;;  %8110 = vmatmul.bf16.gmra.mxu1 %v10520_v26  ;;  %v7899_v5 = vadd.f32 %v15367_v29, %v7810_v46 }
 0x5e6   : > { %v11513_v12 = vpop.eup %11512  ;;  %v15440_v47 = vadd.f32 1.0, %v11511_v31  ;;  %v8411_v13 = vor.u32 1.1754944e-38, %v8410_v30  ;;  %v15464_v31 = vpop.f32.mrf.mxu0  ;;  %v7812_v29 = vadd.f32 %v15379_v16, %v15087_v6 }
 0x5e7   : > { %8962 = vst [vmem:[%s15242_s11 + $0x40] sm:$0xff] %v8930_v45  ;;  %v8392_v54 = vsel %vm8391_vm1, %v11509_v35, %v8388_v24  ;;  %v8400_v20 = vmul.f32 %v11513_v12, %v15415_v63  ;;  %11514 = vpow2.f32 %v10857_v56  ;;  %v7985_v35 = vadd.f32 %v15346_v42, %v7896_v0  ;;  %v15469_v56 = vpop.f32.mrf.mxu2 }
 0x5e8   : > { %v8397_v57 = vsel %vm8394_vm3, %v8396_v60, %v8392_v54  ;;  %11516 = vrcp.f32 %v15440_v47  ;;  %vm8405_vm4 = vweird.f32 %v11513_v12  ;;  %vm8419_vm15 = vweird.f32 %v15440_v47 }
 0x5e9   : > { %v8738_v40 = vmul.f32 %v8397_v57, %v15359_v2  ;;  %v8401_v26 = vsub.f32 1.0, %v8400_v20  ;;  %v8836_v2 = vrot.slane %v11614_v48, 1  ;;  %vm8406_vm2 = vmor %vm8404_vm9, %vm8405_vm4  ;;  %v8423_v57 = vand.u32 2147483647, %v15440_v47 }
 0x5ea   : > { %v8073_v9 = vpop.f32.mrf.mxu1 }
 0x5eb   : > { %v8931_v11 = vadd.f32 %v8834_v32, %v8738_v40  ;;  %v8402_v55 = vmul.f32 %v11513_v12, %v8401_v26  ;;  %v15452_v43 = vadd.f32 %v8073_v9, %v7985_v35  ;;  %v8837_v60 = vsel %vm8809_vm10, %v8835_v49, %v8836_v2  ;;  %v11615_v35 = vld [vmem:[%s11717_s10 + $0xa0] sm:$0x3]  ;;  %v15487_v49 = vpop.f32.mrf.mxu3 }
 0x5ec   : > { %v8425_v32 = vand.u32 2147483648, %v15440_v47  ;;  %v7901_v26 = vadd.f32 %v15395_v3, %v7812_v29  ;;  %v8838_v25 = vrot.slane %v11615_v35, 1  ;;  %v9980_v9 = vrot.slane %v15129_v18, 9 }
 0x5ed   : > { %v11515_v8 = vpop.eup %11514  ;;  %8963 = vst [vmem:[%s15242_s11 + $0x48] sm:$0xff] %v8931_v11  ;;  %v8403_v42 = vadd.f32 %v11513_v12, %v8402_v55  ;;  %v10858_v7 = vmul.f32 -1.442695, %v15452_v43  ;;  %v15988_v55 = vld [vmem:[#allocation12_spill] sm:$0xff]  ;;  %vm8424_vm12 = vcmp.eq.f32.partialorder %v8423_v57, 8.507059e+37 }
 0x5ee   : > { %v11517_v0 = vpop.eup %11516  ;;  %v15462_v10 = vadd.f32 1.0, %v11515_v8  ;;  %v7815_v61 = vadd.f32 %v15407_v51, %v15988_v55  ;;  %v8426_v48 = vor.u32 1.1754944e-38, %v8425_v32  ;;  %v5805_v8 = vrot.slane %v15118_v28, 5  ;;  %v11617_v32 = vld [vmem:[%s11717_s10 + $0xb0] sm:$0xff] }
 0x5ef   : > { %v8407_v45 = vsel %vm8406_vm2, %v11513_v12, %v8403_v42  ;;  %v8415_v24 = vmul.f32 %v11517_v0, %v15440_v47  ;;  %11518 = vpow2.f32 %v10858_v7  ;;  %v7988_v12 = vadd.f32 %v15375_v59, %v7899_v5  ;;  %v15496_v7 = vpop.f32.mrf.mxu0  ;;  %v15502_v29 = vpop.f32.mrf.mxu2 }
 0x5f0   : > { %v8412_v63 = vsel %vm8409_vm8, %v8411_v13, %v8407_v45  ;;  %11520 = vrcp.f32 %v15462_v10  ;;  %vm8420_vm6 = vweird.f32 %v11517_v0  ;;  %v8839_v18 = vsel %vm8809_vm10, %v8836_v2, %v8838_v25 }
 0x5f1   : > { %v8739_v54 = vmul.f32 %v8412_v63, %v15384_v52  ;;  %v8416_v20 = vsub.f32 1.0, %v8415_v24  ;;  %vm8421_vm11 = vmor %vm8419_vm15, %vm8420_vm6  ;;  %v5808_v51 = vrot.slane %v15140_v4, 5  ;;  %v7990_v24 = vadd.f32 %v15402_v17, %v7901_v26 }
 0x5f2   : > { %v8076_v46 = vpop.f32.mrf.mxu1  ;;  %v8438_v2 = vand.u32 2147483647, %v15462_v10  ;;  %v8440_v63 = vand.u32 2147483648, %v15462_v10  ;;  %v5807_v4 = vrot.slane %v5805_v8, 4  ;;  %vm8434_vm14 = vweird.f32 %v15462_v10 }
 0x5f3   : > { %v8932_v6 = vadd.f32 %v8837_v60, %v8739_v54  ;;  %v8417_v16 = vmul.f32 %v11517_v0, %v8416_v20  ;;  %v15477_v40 = vadd.f32 %v8076_v46, %v7988_v12  ;;  %v11616_v12 = vld [vmem:[%s11717_s10 + $0xa8] sm:$0xff]  ;;  %v8841_v46 = vrot.slane %v11617_v32, 1  ;;  %v15519_v55 = vpop.f32.mrf.mxu3 }
 0x5f4   : > { %v8840_v57 = vrot.slane %v11616_v12, 1  ;;  %v5809_v17 = vsel %vm12270_vm5, %v5807_v4, %v5808_v51  ;;  %vm8439_vm0 = vcmp.eq.f32.partialorder %v8438_v2, 8.507059e+37 }
 0x5f5   : > { %v11519_v30 = vpop.eup %11518  ;;  %8964 = vst [vmem:[%s15242_s11 + $0x50] sm:$0xff] %v8932_v6  ;;  %v8418_v52 = vadd.f32 %v11517_v0, %v8417_v16  ;;  %v10859_v59 = vmul.f32 -1.442695, %v15477_v40  ;;  %v7904_v16 = vadd.f32 %v15424_v19, %v7815_v61 }
 0x5f6   : > { %v11521_v11 = vpop.eup %11520  ;;  %v15489_v3 = vadd.f32 1.0, %v11519_v30  ;;  %v8441_v30 = vor.u32 1.1754944e-38, %v8440_v63  ;;  %5843 = vst [vmem:[#allocation4 + $0x47c] sm:$0xf] %v5809_v17  ;;  %v8842_v61 = vsel %vm8809_vm10, %v8840_v57, %v8841_v46 }
 0x5f7   : > { %v8422_v5 = vsel %vm8421_vm11, %v11517_v0, %v8418_v52  ;;  %v8430_v47 = vmul.f32 %v11521_v11, %v15462_v10  ;;  %11522 = vpow2.f32 %v10859_v59  ;;  %v5806_v0 = vsel %vm12270_vm5, %v9980_v9, %v5805_v8  ;;  %v15990_v10 = vld [vmem:[#allocation10_spill] sm:$0xff]  ;;  %v15529_v51 = vpop.f32.mrf.mxu0 }
 0x5f8   : > { %v8427_v42 = vsel %vm8424_vm12, %v8426_v48, %v8422_v5  ;;  %11524 = vrcp.f32 %v15489_v3  ;;  %5842 = vst [vmem:[#allocation4 + $0x458] sm:$0xf] %v5806_v0  ;;  %vm8435_vm13 = vweird.f32 %v11521_v11  ;;  %v7817_v48 = vadd.f32 %v15438_v27, %v15990_v10  ;;  %v15533_v27 = vpop.f32.mrf.mxu2  ;;  %v11619_v10 = vld [vmem:[%s11717_s10 + $0xc0] sm:$0xff] }
 0x5f9   : > { %v8740_v13 = vmul.f32 %v8427_v42, %v15404_v21  ;;  %v8431_v45 = vsub.f32 1.0, %v8430_v47  ;;  %vm8436_vm7 = vmor %vm8434_vm14, %vm8435_vm13  ;;  %v8453_v47 = vand.u32 2147483647, %v15489_v3  ;;  %v8455_v42 = vand.u32 2147483648, %v15489_v3 }
 0x5fa   : > { %v8078_v60 = vpop.f32.mrf.mxu1  ;;  %vm8449_vm1 = vweird.f32 %v15489_v3 }
 0x5fb   : > { %v8933_v54 = vadd.f32 %v8839_v18, %v8740_v13  ;;  %v8432_v20 = vmul.f32 %v11521_v11, %v8431_v45  ;;  %v15506_v21 = vadd.f32 %v8078_v60, %v7990_v24  ;;  %vm8454_vm4 = vcmp.eq.f32.partialorder %v8453_v47, 8.507059e+37 }
 0x5fd   : > { %v11523_v6 = vpop.eup %11522  ;;  %8965 = vst [vmem:[%s15242_s11 + $0x58] sm:$0xff] %v8933_v54  ;;  %v8433_v26 = vadd.f32 %v11521_v11, %v8432_v20  ;;  %v10860_v35 = vmul.f32 -1.442695, %v15506_v21  ;;  %v11239_v4 = vld [vmem:[#allocation4 + $0x478] sm:$0xf0]  ;;  %v8456_v20 = vor.u32 1.1754944e-38, %v8455_v42 }
 0x5fe   : > { %v11525_v25 = vpop.eup %11524  ;;  %v15516_v52 = vadd.f32 1.0, %v11523_v6 }
 0x5ff   : > { %v8437_v59 = vsel %vm8436_vm7, %v11521_v11, %v8433_v26  ;;  %v8445_v9 = vmul.f32 %v11525_v25, %v15489_v3  ;;  %11526 = vpow2.f32 %v10860_v35  ;;  %v7993_v11 = vadd.f32 %v15434_v15, %v7904_v16  ;;  %v10555_v28 = vld [vmem:[#allocation4 + $0x458] sm:$0xf] }
 0x600   : > { %v8442_v19 = vsel %vm8439_vm0, %v8441_v30, %v8437_v59  ;;  %11528 = vrcp.f32 %v15516_v52  ;;  %vm8450_vm5 = vweird.f32 %v11525_v25  ;;  %v7906_v15 = vadd.f32 %v15454_v38, %v7817_v48  ;;  %v15563_v42 = vpop.f32.mrf.mxu2 }
 0x601   : > { %v8741_v8 = vmul.f32 %v8442_v19, %v15430_v14  ;;  %v8446_v5 = vsub.f32 1.0, %v8445_v9  ;;  %v11618_v14 = vld [vmem:[%s11717_s10 + $0xb8] sm:$0x3]  ;;  %vm8451_vm3 = vmor %vm8449_vm1, %vm8450_vm5  ;;  %v10556_v12 = vor.u32 %v11239_v4, %v10555_v28  ;;  %v7820_v3 = vadd.f32 %v15469_v56, %v15110_v36  ;;  %v11620_v56 = vld [vmem:[%s11717_s10 + $0xc8] sm:$0xff] }
 0x602   : > { %v8081_v18 = vpop.f32.mrf.mxu1  ;;  %v8843_v24 = vrot.slane %v11618_v14, 1  ;;  %v7995_v35 = vadd.f32 %v15464_v31, %v7906_v15  ;;  %v8468_v30 = vand.u32 2147483647, %v15516_v52  ;;  %v8470_v59 = vand.u32 2147483648, %v15516_v52 }
 0x603   : > { %v8934_v13 = vadd.f32 %v8842_v61, %v8741_v8  ;;  %v8447_v45 = vmul.f32 %v11525_v25, %v8446_v5  ;;  %v15531_v0 = vadd.f32 %v8081_v18, %v7993_v11  ;;  %8115 = vmatmul.bf16.gmra.mxu1 %v10556_v12  ;;  %v8845_v36 = vrot.slane %v11619_v10, 1  ;;  %v15558_v8 = vpop.f32.mrf.mxu0 }
 0x604   : > { %v8844_v38 = vsel %vm8809_vm10, %v8841_v46, %v8843_v24  ;;  %v7909_v31 = vadd.f32 %v15487_v49, %v7820_v3  ;;  %vm8464_vm2 = vweird.f32 %v15516_v52  ;;  %v8471_v18 = vor.u32 1.1754944e-38, %v8470_v59 }
 0x605   : > { %v11527_v2 = vpop.eup %11526  ;;  %8966 = vst [vmem:[%s15242_s11 + $0x60] sm:$0xff] %v8934_v13  ;;  %v8448_v63 = vadd.f32 %v11525_v25, %v8447_v45  ;;  %v10861_v60 = vmul.f32 -1.442695, %v15531_v0  ;;  %vm8469_vm6 = vcmp.eq.f32.partialorder %v8468_v30, 8.507059e+37 }
 0x606   : > { %v11529_v54 = vpop.eup %11528  ;;  %v15540_v57 = vadd.f32 1.0, %v11527_v2  ;;  %v7998_v15 = vadd.f32 %v15496_v7, %v7909_v31 }
 0x607   : > { %v8452_v32 = vsel %vm8451_vm3, %v11525_v25, %v8448_v63  ;;  %v8460_v17 = vmul.f32 %v11529_v54, %v15516_v52  ;;  %11530 = vpow2.f32 %v10861_v60  ;;  %v15549_v25 = vpop.f32.mrf.mxu3  ;;  %vm8465_vm9 = vweird.f32 %v11529_v54 }
 0x608   : > { %v8457_v6 = vsel %vm8454_vm4, %v8456_v20, %v8452_v32  ;;  %11532 = vrcp.f32 %v15540_v57  ;;  %vm8466_vm8 = vmor %vm8464_vm2, %vm8465_vm9  ;;  %v7822_v52 = vadd.f32 %v15502_v29, %v15116_v50  ;;  %v8483_v63 = vand.u32 2147483647, %v15540_v57 }
 0x609   : > { %v8742_v16 = vmul.f32 %v8457_v6, %v15452_v43  ;;  %v8461_v26 = vsub.f32 1.0, %v8460_v17  ;;  %v8846_v43 = vrot.slane %v11620_v56, 1  ;;  %v8485_v4 = vand.u32 2147483648, %v15540_v57  ;;  %v11621_v17 = vld [vmem:[%s11717_s10 + $0xd0] sm:$0x3] }
 0x60a   : > { %v8083_v46 = vpop.f32.mrf.mxu1  ;;  %v8848_v50 = vrot.slane %v11621_v17, 1  ;;  %vm8479_vm11 = vweird.f32 %v15540_v57  ;;  %vm8484_vm13 = vcmp.eq.f32.partialorder %v8483_v63, 8.507059e+37 }
 0x60b   : > { %v8935_v9 = vadd.f32 %v8844_v38, %v8742_v16  ;;  %v8462_v19 = vmul.f32 %v11529_v54, %v8461_v26  ;;  %v15553_v61 = vadd.f32 %v8083_v46, %v7995_v35  ;;  %v8847_v14 = vsel %vm8809_vm10, %v8845_v36, %v8846_v43  ;;  %v15588_v26 = vpop.f32.mrf.mxu0 }
 0x60c   : > { %v8486_v3 = vor.u32 1.1754944e-38, %v8485_v4  ;;  %v7825_v46 = vadd.f32 %v15533_v27, %v15125_v1 }
 0x60d   : > { %v11531_v48 = vpop.eup %11530  ;;  %8967 = vst [vmem:[%s15242_s11 + $0x68] sm:$0xff] %v8935_v9  ;;  %v8463_v5 = vadd.f32 %v11529_v54, %v8462_v19  ;;  %v10862_v11 = vmul.f32 -1.442695, %v15553_v61 }
 0x60e   : > { %v11533_v47 = vpop.eup %11532  ;;  %v15566_v13 = vadd.f32 1.0, %v11531_v48 }
 0x60f   : > { %v8467_v45 = vsel %vm8466_vm8, %v11529_v54, %v8463_v5  ;;  %v8475_v49 = vmul.f32 %v11533_v47, %v15540_v57  ;;  %11534 = vpow2.f32 %v10862_v11  ;;  %vm8480_vm15 = vweird.f32 %v11533_v47  ;;  %v15579_v32 = vpop.f32.mrf.mxu3  ;;  %v11622_v11 = vld [vmem:[%s11717_s10 + $0xd8] sm:$0xff] }
 0x610   : > { %v8472_v28 = vsel %vm8469_vm6, %v8471_v18, %v8467_v45  ;;  %11536 = vrcp.f32 %v15566_v13  ;;  %vm8481_vm12 = vmor %vm8479_vm11, %vm8480_vm15  ;;  %v8849_v57 = vsel %vm8809_vm10, %v8846_v43, %v8848_v50  ;;  %v8498_v36 = vand.u32 2147483647, %v15566_v13  ;;  %v11623_v18 = vld [vmem:[%s11717_s10 + $0xe0] sm:$0xff] }
 0x611   : > { %v8743_v24 = vmul.f32 %v8472_v28, %v15477_v40  ;;  %v8476_v2 = vsub.f32 1.0, %v8475_v49  ;;  %v7911_v40 = vadd.f32 %v15519_v55, %v7822_v52  ;;  %v15591_v55 = vpop.f32.mrf.mxu2  ;;  %v8500_v56 = vand.u32 2147483648, %v15566_v13 }
 0x612   : > { %v8086_v60 = vpop.f32.mrf.mxu1  ;;  %v8851_v1 = vrot.slane %v11623_v18, 1  ;;  %vm8494_vm7 = vweird.f32 %v15566_v13  ;;  %vm8499_vm5 = vcmp.eq.f32.partialorder %v8498_v36, 8.507059e+37 }
 0x613   : > { %v8936_v54 = vadd.f32 %v8847_v14, %v8743_v24  ;;  %v8477_v20 = vmul.f32 %v11533_v47, %v8476_v2  ;;  %v15577_v12 = vadd.f32 %v8086_v60, %v7998_v15  ;;  %v8000_v10 = vadd.f32 %v15529_v51, %v7911_v40  ;;  %v15616_v63 = vpop.f32.mrf.mxu0 }
 0x614   : > { %v8501_v14 = vor.u32 1.1754944e-38, %v8500_v56 }
 0x615   : > { %v11535_v29 = vpop.eup %11534  ;;  %8968 = vst [vmem:[%s15242_s11 + $0x70] sm:$0xff] %v8936_v54  ;;  %v8478_v6 = vadd.f32 %v11533_v47, %v8477_v20  ;;  %v10863_v7 = vmul.f32 -1.442695, %v15577_v12 }
 0x616   : > { %v11537_v38 = vpop.eup %11536  ;;  %v15586_v16 = vadd.f32 1.0, %v11535_v29 }
 0x617   : > { %v8482_v35 = vsel %vm8481_vm12, %v11533_v47, %v8478_v6  ;;  %v8490_v30 = vmul.f32 %v11537_v38, %v15566_v13  ;;  %11538 = vpow2.f32 %v10863_v7  ;;  %vm8495_vm14 = vweird.f32 %v11537_v38  ;;  %v7918_v28 = vpop.f32.mrf.mxu3 }
 0x618   : > { %v8487_v59 = vsel %vm8484_vm13, %v8486_v3, %v8482_v35  ;;  %11540 = vrcp.f32 %v15586_v16  ;;  %v8850_v47 = vrot.slane %v11622_v11, 1  ;;  %vm8496_vm0 = vmor %vm8494_vm7, %vm8495_vm14  ;;  %v7827_v13 = vadd.f32 %v15563_v42, %v15138_v39  ;;  %v11624_v39 = vld [vmem:[%s11717_s10 + $0xe8] sm:$0x3] }
 0x619   : > { %v8744_v9 = vmul.f32 %v8487_v59, %v15506_v21  ;;  %v8491_v19 = vsub.f32 1.0, %v8490_v30  ;;  %v7914_v21 = vadd.f32 %v15549_v25, %v7825_v46  ;;  %v7831_v20 = vpop.f32.mrf.mxu2  ;;  %v8513_v17 = vand.u32 2147483647, %v15586_v16 }
 0x61a   : > { %v8088_v48 = vpop.f32.mrf.mxu1  ;;  %v8852_v25 = vsel %vm8809_vm10, %v8850_v47, %v8851_v1  ;;  %v8515_v50 = vand.u32 2147483648, %v15586_v16  ;;  %v8853_v42 = vrot.slane %v11624_v39, 1  ;;  %v7916_v3 = vadd.f32 %v15579_v32, %v7827_v13 }
 0x61b   : > { %v8937_v31 = vadd.f32 %v8849_v57, %v8744_v9  ;;  %v8492_v5 = vmul.f32 %v11537_v38, %v8491_v19  ;;  %v15601_v43 = vadd.f32 %v8088_v48, %v8000_v10  ;;  %v8003_v54 = vadd.f32 %v15558_v8, %v7914_v21  ;;  %v15640_v11 = vpop.f32.mrf.mxu0 }
 0x61c   : > { %vm8509_vm3 = vweird.f32 %v15586_v16  ;;  %v8516_v30 = vor.u32 1.1754944e-38, %v8515_v50  ;;  %vm8514_vm9 = vcmp.eq.f32.partialorder %v8513_v17, 8.507059e+37  ;;  %v8854_v32 = vsel %vm8809_vm10, %v8851_v1, %v8853_v42 }
 0x61d   : > { %v11539_v27 = vpop.eup %11538  ;;  %8969 = vst [vmem:[%s15242_s11 + $0x78] sm:$0xff] %v8937_v31  ;;  %v8493_v45 = vadd.f32 %v11537_v38, %v8492_v5  ;;  %v10864_v51 = vmul.f32 -1.442695, %v15601_v43  ;;  %v8005_v56 = vadd.f32 %v15588_v26, %v7916_v3 }
 0x61e   : > { %v11541_v49 = vpop.eup %11540  ;;  %v15609_v52 = vadd.f32 1.0, %v11539_v27 }
 0x61f   : > { %v8497_v24 = vsel %vm8496_vm0, %v11537_v38, %v8493_v45  ;;  %v8505_v2 = vmul.f32 %v11541_v49, %v15586_v16  ;;  %11542 = vpow2.f32 %v10864_v51  ;;  %vm8510_vm1 = vweird.f32 %v11541_v49  ;;  %v7920_v9 = vpop.f32.mrf.mxu3 }
 0x620   : > { %v8502_v15 = vsel %vm8499_vm5, %v8501_v14, %v8497_v24  ;;  %11544 = vrcp.f32 %v15609_v52  ;;  %vm8511_vm4 = vmor %vm8509_vm3, %vm8510_vm1  ;;  %v7830_v16 = vadd.f32 %v15591_v55, %v15151_v23  ;;  %v8528_v48 = vand.u32 2147483647, %v15609_v52  ;;  %v11625_v23 = vld [vmem:[%s11717_s10 + $0xf0] sm:$0xff] }
 0x621   : > { %v8745_v4 = vmul.f32 %v8502_v15, %v15531_v0  ;;  %v8506_v60 = vsub.f32 1.0, %v8505_v2  ;;  %v8530_v31 = vand.u32 2147483648, %v15609_v52  ;;  %v7834_v27 = vpop.f32.mrf.mxu2  ;;  %v8855_v55 = vrot.slane %v11625_v23, 1 }
 0x622   : > { %v8091_v29 = vpop.f32.mrf.mxu1  ;;  %v7919_v26 = vadd.f32 %v7918_v28, %v7830_v16  ;;  %vm8524_vm8 = vweird.f32 %v15609_v52  ;;  %vm8529_vm15 = vcmp.eq.f32.partialorder %v8528_v48, 8.507059e+37 }
 0x623   : > { %v8938_v40 = vadd.f32 %v8852_v25, %v8745_v4  ;;  %v8507_v6 = vmul.f32 %v11541_v49, %v8506_v60  ;;  %v15622_v7 = vadd.f32 %v8091_v29, %v8003_v54  ;;  %v8531_v24 = vor.u32 1.1754944e-38, %v8530_v31 }
 0x624   : > { %v8008_v54 = vadd.f32 %v15616_v63, %v7919_v26 }
 0x625   : > { %v11543_v38 = vpop.eup %11542  ;;  %8970 = vst [vmem:[%s15242_s11 + $0x80] sm:$0xff] %v8938_v40  ;;  %v8508_v0 = vadd.f32 %v11541_v49, %v8507_v6  ;;  %v10865_v8 = vmul.f32 -1.442695, %v15622_v7 }
 0x626   : > { %v11545_v35 = vpop.eup %11544  ;;  %v15629_v59 = vadd.f32 1.0, %v11543_v38  ;;  %v11627_v38 = vld [vmem:[%s11717_s10 + $0x100] sm:$0x3] }
 0x627   : > { %v8512_v57 = vsel %vm8511_vm4, %v11541_v49, %v8508_v0  ;;  %v8520_v46 = vmul.f32 %v11545_v35, %v15609_v52  ;;  %11546 = vpow2.f32 %v10865_v8  ;;  %vm8525_vm2 = vweird.f32 %v11545_v35  ;;  %v7923_v17 = vpop.f32.mrf.mxu3 }
 0x628   : > { %v8517_v19 = vsel %vm8514_vm9, %v8516_v30, %v8512_v57  ;;  %11548 = vrcp.f32 %v15629_v59  ;;  %vm8526_vm6 = vmor %vm8524_vm8, %vm8525_vm2  ;;  %v7832_v52 = vadd.f32 %v7831_v20, %v15155_v34  ;;  %v8543_v50 = vand.u32 2147483647, %v15629_v59 }
 0x629   : > { %v8746_v10 = vmul.f32 %v8517_v19, %v15553_v61  ;;  %v8521_v36 = vsub.f32 1.0, %v8520_v46  ;;  %v11626_v61 = vld [vmem:[%s11717_s10 + $0xf8] sm:$0xff]  ;;  %v8545_v29 = vand.u32 2147483648, %v15629_v59  ;;  %v8858_v3 = vrot.slane %v11627_v38, 1 }
 0x62a   : > { %v8093_v5 = vpop.f32.mrf.mxu1  ;;  %v8856_v21 = vrot.slane %v11626_v61, 1  ;;  %v7921_v20 = vadd.f32 %v7920_v9, %v7832_v52  ;;  %vm8539_vm12 = vweird.f32 %v15629_v59  ;;  %vm8544_vm14 = vcmp.eq.f32.partialorder %v8543_v50, 8.507059e+37 }
 0x62b   : > { %v8939_v47 = vadd.f32 %v8854_v32, %v8746_v10  ;;  %v8522_v18 = vmul.f32 %v11545_v35, %v8521_v36  ;;  %v15642_v1 = vadd.f32 %v8093_v5, %v8005_v56  ;;  %v8546_v30 = vor.u32 1.1754944e-38, %v8545_v29 }
 0x62c   : > { %v8857_v28 = vsel %vm8809_vm10, %v8855_v55, %v8856_v21  ;;  %v8859_v32 = vsel %vm8809_vm10, %v8856_v21, %v8858_v3  ;;  %v8010_v36 = vadd.f32 %v15640_v11, %v7921_v20  ;;  %v11628_v55 = vld [vmem:[%s11717_s10 + $0x108] sm:$0xff] }
 0x62d   : > { %v11547_v45 = vpop.eup %11546  ;;  %8971 = vst [vmem:[%s15242_s11 + $0x88] sm:$0xff] %v8939_v47  ;;  %v8523_v51 = vadd.f32 %v11545_v35, %v8522_v18  ;;  %v10866_v49 = vmul.f32 -1.442695, %v15642_v1  ;;  %v8860_v61 = vrot.slane %v11628_v55, 1  ;;  %v11632_v55 = vld [vmem:[%s11717_s10 + $0x128] sm:$0xff] }
 0x62e   : > { %v11549_v14 = vpop.eup %11548  ;;  %v15649_v2 = vadd.f32 1.0, %v11547_v45 }
 0x62f   : > { %v8527_v15 = vsel %vm8526_vm6, %v11545_v35, %v8523_v51  ;;  %v8535_v25 = vmul.f32 %v11549_v14, %v15629_v59  ;;  %11550 = vpow2.f32 %v10866_v49  ;;  %vm8540_vm11 = vweird.f32 %v11549_v14  ;;  %v7836_v35 = vpop.f32.mrf.mxu2  ;;  %v7925_v23 = vpop.f32.mrf.mxu3 }
 0x630   : > { %v8532_v13 = vsel %vm8529_vm15, %v8531_v24, %v8527_v15  ;;  %11552 = vrcp.f32 %v15649_v2  ;;  %vm8541_vm13 = vmor %vm8539_vm12, %vm8540_vm11  ;;  %v7835_v59 = vadd.f32 %v7834_v27, %v15161_v62  ;;  %v8558_v56 = vand.u32 2147483647, %v15649_v2  ;;  %v11629_v62 = vld [vmem:[%s11717_s10 + $0x110] sm:$0xff] }
 0x631   : > { %v8747_v4 = vmul.f32 %v8532_v13, %v15577_v12  ;;  %v8536_v60 = vsub.f32 1.0, %v8535_v25  ;;  %v8012_v12 = vpop.f32.mrf.mxu0  ;;  %v8560_v48 = vand.u32 2147483648, %v15649_v2  ;;  %v8861_v27 = vrot.slane %v11629_v62, 1 }
 0x632   : > { %v8096_v40 = vpop.f32.mrf.mxu1  ;;  %v7924_v21 = vadd.f32 %v7923_v17, %v7835_v59  ;;  %vm8554_vm0 = vweird.f32 %v15649_v2  ;;  %vm8559_vm1 = vcmp.eq.f32.partialorder %v8558_v56, 8.507059e+37 }
 0x633   : > { %v8940_v6 = vadd.f32 %v8857_v28, %v8747_v4  ;;  %v8537_v39 = vmul.f32 %v11549_v14, %v8536_v60  ;;  %v15659_v42 = vadd.f32 %v8096_v40, %v8008_v54  ;;  %v8561_v51 = vor.u32 1.1754944e-38, %v8560_v48 }
 0x634   : > { %v8862_v28 = vsel %vm8809_vm10, %v8860_v61, %v8861_v27  ;;  %v8013_v60 = vadd.f32 %v8012_v12, %v7924_v21 }
 0x635   : > { %v11551_v34 = vpop.eup %11550  ;;  %8972 = vst [vmem:[%s15242_s11 + $0x90] sm:$0xff] %v8940_v6  ;;  %v8538_v0 = vadd.f32 %v11549_v14, %v8537_v39  ;;  %v10867_v63 = vmul.f32 -1.442695, %v15659_v42  ;;  %v11630_v39 = vld [vmem:[%s11717_s10 + $0x118] sm:$0x3] }
 0x636   : > { %v11553_v8 = vpop.eup %11552  ;;  %v15665_v57 = vadd.f32 1.0, %v11551_v34  ;;  %v8863_v38 = vrot.slane %v11630_v39, 1 }
 0x637   : > { %v8542_v46 = vsel %vm8541_vm13, %v11549_v14, %v8538_v0  ;;  %v8550_v19 = vmul.f32 %v11553_v8, %v15649_v2  ;;  %11554 = vpow2.f32 %v10867_v63  ;;  %vm8555_vm7 = vweird.f32 %v11553_v8  ;;  %v7839_v25 = vpop.f32.mrf.mxu2  ;;  %v7928_v12 = vpop.f32.mrf.mxu3 }
 0x638   : > { %v8547_v9 = vsel %vm8544_vm14, %v8546_v30, %v8542_v46  ;;  %11556 = vrcp.f32 %v15665_v57  ;;  %vm8556_vm5 = vmor %vm8554_vm0, %vm8555_vm7  ;;  %v7837_v2 = vadd.f32 %v7836_v35, %v15165_v22  ;;  %v8573_v54 = vand.u32 2147483647, %v15665_v57 }
 0x639   : > { %v8748_v16 = vmul.f32 %v8547_v9, %v15601_v43  ;;  %v8551_v10 = vsub.f32 1.0, %v8550_v19  ;;  %v8014_v14 = vpop.f32.mrf.mxu0  ;;  %v8575_v17 = vand.u32 2147483648, %v15665_v57  ;;  %vm8569_vm4 = vweird.f32 %v15665_v57 }
 0x63a   : > { %v8098_v31 = vpop.f32.mrf.mxu1  ;;  %v7926_v34 = vadd.f32 %v7925_v23, %v7837_v2  ;;  %vm8574_vm2 = vcmp.eq.f32.partialorder %v8573_v54, 8.507059e+37  ;;  %v8864_v46 = vsel %vm8809_vm10, %v8861_v27, %v8863_v38  ;;  %v7840_v19 = vadd.f32 %v7839_v25, %v15169_v53 }
 0x63b   : > { %v8941_v5 = vadd.f32 %v8859_v32, %v8748_v16  ;;  %v8552_v47 = vmul.f32 %v11553_v8, %v8551_v10  ;;  %v15675_v18 = vadd.f32 %v8098_v31, %v8010_v36  ;;  %v8576_v0 = vor.u32 1.1754944e-38, %v8575_v17 }
 0x63c   : > { %v8015_v59 = vadd.f32 %v8014_v14, %v7926_v34  ;;  %v8866_v53 = vrot.slane %v11632_v55, 1 }
 0x63d   : > { %v11555_v43 = vpop.eup %11554  ;;  %8973 = vst [vmem:[%s15242_s11 + $0x98] sm:$0xff] %v8941_v5  ;;  %v8553_v45 = vadd.f32 %v11553_v8, %v8552_v47  ;;  %v10868_v11 = vmul.f32 -1.442695, %v15675_v18  ;;  %v11631_v47 = vld [vmem:[%s11717_s10 + $0x120] sm:$0xff] }
 0x63e   : > { %v11557_v26 = vpop.eup %11556  ;;  %v15682_v49 = vadd.f32 1.0, %v11555_v43  ;;  %v8865_v23 = vrot.slane %v11631_v47, 1 }
 0x63f   : > { %v8557_v24 = vsel %vm8556_vm5, %v11553_v8, %v8553_v45  ;;  %v8565_v15 = vmul.f32 %v11557_v26, %v15665_v57  ;;  %11558 = vpow2.f32 %v10868_v11  ;;  %vm8570_vm3 = vweird.f32 %v11557_v26  ;;  %v7841_v16 = vpop.f32.mrf.mxu2 }
 0x640   : > { %v8562_v13 = vsel %vm8559_vm1, %v8561_v51, %v8557_v24  ;;  %11560 = vrcp.f32 %v15682_v49  ;;  %vm8571_vm9 = vmor %vm8569_vm4, %vm8570_vm3  ;;  %v8588_v10 = vand.u32 2147483647, %v15682_v49  ;;  %v8590_v36 = vand.u32 2147483648, %v15682_v49  ;;  %v7930_v51 = vpop.f32.mrf.mxu3 }
 0x641   : > { %v8749_v52 = vmul.f32 %v8562_v13, %v15622_v7  ;;  %v8566_v4 = vsub.f32 1.0, %v8565_v15  ;;  %v8017_v57 = vpop.f32.mrf.mxu0  ;;  %vm8584_vm6 = vweird.f32 %v15682_v49  ;;  %v8867_v24 = vsel %vm8809_vm10, %v8865_v23, %v8866_v53 }
 0x642   : > { %v8101_v50 = vpop.f32.mrf.mxu1  ;;  %v8591_v21 = vor.u32 1.1754944e-38, %v8590_v36  ;;  %vm8589_vm11 = vcmp.eq.f32.partialorder %v8588_v10, 8.507059e+37  ;;  %v11634_v10 = vld [vmem:[%s11717_s10 + $0x138] sm:$0xff] }
 0x643   : > { %v8942_v29 = vadd.f32 %v8862_v28, %v8749_v52  ;;  %v8567_v40 = vmul.f32 %v11557_v26, %v8566_v4  ;;  %v15691_v6 = vadd.f32 %v8101_v50, %v8013_v60  ;;  %v8870_v36 = vrot.slane %v11634_v10, 1 }
 0x645   : > { %v11559_v3 = vpop.eup %11558  ;;  %8974 = vst [vmem:[%s15242_s11 + $0xa0] sm:$0xff] %v8942_v29  ;;  %v8568_v22 = vadd.f32 %v11557_v26, %v8567_v40  ;;  %v10869_v7 = vmul.f32 -1.442695, %v15691_v6  ;;  %v11633_v29 = vld [vmem:[%s11717_s10 + $0x130] sm:$0x3] }
 0x646   : > { %v11561_v20 = vpop.eup %11560  ;;  %v15697_v63 = vadd.f32 1.0, %v11559_v3  ;;  %v8868_v40 = vrot.slane %v11633_v29, 1 }
 0x647   : > { %v8572_v8 = vsel %vm8571_vm9, %v11557_v26, %v8568_v22  ;;  %v8580_v35 = vmul.f32 %v11561_v20, %v15682_v49  ;;  %11562 = vpow2.f32 %v10869_v7  ;;  %vm8585_vm8 = vweird.f32 %v11561_v20  ;;  %v7844_v50 = vpop.f32.mrf.mxu2 }
 0x648   : > { %v8577_v30 = vsel %vm8574_vm2, %v8576_v0, %v8572_v8  ;;  %11564 = vrcp.f32 %v15697_v63  ;;  %vm8586_vm15 = vmor %vm8584_vm6, %vm8585_vm8  ;;  %v7842_v49 = vadd.f32 %v7841_v16, %v15173_v41  ;;  %v8603_v28 = vand.u32 2147483647, %v15697_v63 }
 0x649   : > { %v8750_v9 = vmul.f32 %v8577_v30, %v15642_v1  ;;  %v8581_v32 = vsub.f32 1.0, %v8580_v35  ;;  %v7929_v1 = vadd.f32 %v7928_v12, %v7840_v19  ;;  %v8605_v2 = vand.u32 2147483648, %v15697_v63  ;;  %v8019_v17 = vpop.f32.mrf.mxu0 }
 0x64a   : > { %v8103_v56 = vpop.f32.mrf.mxu1  ;;  %v7931_v39 = vadd.f32 %v7930_v51, %v7842_v49  ;;  %vm8599_vm13 = vweird.f32 %v15697_v63  ;;  %vm8604_vm7 = vcmp.eq.f32.partialorder %v8603_v28, 8.507059e+37  ;;  %v8869_v0 = vsel %vm8809_vm10, %v8866_v53, %v8868_v40 }
 0x64b   : > { %v8943_v48 = vadd.f32 %v8864_v46, %v8750_v9  ;;  %v8582_v31 = vmul.f32 %v11561_v20, %v8581_v32  ;;  %v15706_v5 = vadd.f32 %v8103_v56, %v8015_v59  ;;  %v8018_v13 = vadd.f32 %v8017_v57, %v7929_v1  ;;  %v7933_v46 = vpop.f32.mrf.mxu3  ;;  %v11635_v56 = vld [vmem:[%s11717_s10 + $0x140] sm:$0xff] }
 0x64c   : > { %v8606_v34 = vor.u32 1.1754944e-38, %v8605_v2  ;;  %v8020_v30 = vadd.f32 %v8019_v17, %v7931_v39  ;;  %v11636_v2 = vld [vmem:[%s11717_s10 + $0x148] sm:$0x3] }
 0x64d   : > { %v11563_v61 = vpop.eup %11562  ;;  %8975 = vst [vmem:[%s15242_s11 + $0xa8] sm:$0xff] %v8943_v48  ;;  %v8583_v62 = vadd.f32 %v11561_v20, %v8582_v31  ;;  %v10870_v27 = vmul.f32 -1.442695, %v15706_v5 }
 0x64e   : > { %v11565_v43 = vpop.eup %11564  ;;  %v15713_v45 = vadd.f32 1.0, %v11563_v61 }
 0x64f   : > { %v8587_v11 = vsel %vm8586_vm15, %v11561_v20, %v8583_v62  ;;  %v8595_v26 = vmul.f32 %v11565_v43, %v15697_v63  ;;  %11566 = vpow2.f32 %v10870_v27  ;;  %vm8600_vm12 = vweird.f32 %v11565_v43  ;;  %v7846_v53 = vpop.f32.mrf.mxu2 }
 0x650   : > { %v8592_v14 = vsel %vm8589_vm11, %v8591_v21, %v8587_v11  ;;  %11568 = vrcp.f32 %v15713_v45  ;;  %vm8601_vm14 = vmor %vm8599_vm13, %vm8600_vm12  ;;  %v7845_v63 = vadd.f32 %v7844_v50, %v15177_v37  ;;  %v8618_v57 = vand.u32 2147483647, %v15713_v45 }
 0x651   : > { %v8751_v15 = vmul.f32 %v8592_v14, %v15659_v42  ;;  %v8596_v25 = vsub.f32 1.0, %v8595_v26  ;;  %v8620_v19 = vand.u32 2147483648, %v15713_v45  ;;  %v8871_v37 = vrot.slane %v11635_v56, 1  ;;  %v8022_v55 = vpop.f32.mrf.mxu0 }
 0x652   : > { %v8106_v52 = vpop.f32.mrf.mxu1  ;;  %vm8614_vm5 = vweird.f32 %v15713_v45  ;;  %vm8619_vm3 = vcmp.eq.f32.partialorder %v8618_v57, 8.507059e+37 }
 0x653   : > { %v8944_v4 = vadd.f32 %v8867_v24, %v8751_v15  ;;  %v8597_v60 = vmul.f32 %v11565_v43, %v8596_v25  ;;  %v15722_v54 = vadd.f32 %v8106_v52, %v8018_v13  ;;  %v8621_v61 = vor.u32 1.1754944e-38, %v8620_v19  ;;  %v7935_v28 = vpop.f32.mrf.mxu3 }
 0x654   : > { %v8872_v21 = vsel %vm8809_vm10, %v8870_v36, %v8871_v37  ;;  %v8873_v52 = vrot.slane %v11636_v2, 1 }
 0x655   : > { %v11567_v41 = vpop.eup %11566  ;;  %8976 = vst [vmem:[%s15242_s11 + $0xb0] sm:$0xff] %v8944_v4  ;;  %v8598_v42 = vadd.f32 %v11565_v43, %v8597_v60  ;;  %v10871_v38 = vmul.f32 -1.442695, %v15722_v54 }
 0x656   : > { %v11569_v3 = vpop.eup %11568  ;;  %v15728_v22 = vadd.f32 1.0, %v11567_v41 }
 0x657   : > { %v8602_v7 = vsel %vm8601_vm14, %v11565_v43, %v8598_v42  ;;  %v8610_v20 = vmul.f32 %v11569_v3, %v15713_v45  ;;  %11570 = vpow2.f32 %v10871_v38  ;;  %vm8615_vm0 = vweird.f32 %v11569_v3 }
 0x658   : > { %v8607_v12 = vsel %vm8604_vm7, %v8606_v34, %v8602_v7  ;;  %11572 = vrcp.f32 %v15728_v22  ;;  %vm8616_vm1 = vmor %vm8614_vm5, %vm8615_vm0  ;;  %v7847_v45 = vadd.f32 %v7846_v53, %v15181_v44  ;;  %v8633_v14 = vand.u32 2147483647, %v15728_v22 }
 0x659   : > { %v8752_v8 = vmul.f32 %v8607_v12, %v15675_v18  ;;  %v8611_v35 = vsub.f32 1.0, %v8610_v20  ;;  %v7934_v18 = vadd.f32 %v7933_v46, %v7845_v63  ;;  %v8635_v24 = vand.u32 2147483648, %v15728_v22  ;;  %v8024_v39 = vpop.f32.mrf.mxu0  ;;  %v11638_v46 = vld [vmem:[%s11717_s10 + $0x158] sm:$0xff] }
 0x65a   : > { %v8108_v9 = vpop.f32.mrf.mxu1  ;;  %v7936_v44 = vadd.f32 %v7935_v28, %v7847_v45  ;;  %vm8629_vm9 = vweird.f32 %v15728_v22  ;;  %vm8634_vm8 = vcmp.eq.f32.partialorder %v8633_v14, 8.507059e+37  ;;  %v8874_v38 = vsel %vm8809_vm10, %v8871_v37, %v8873_v52 }
 0x65b   : > { %v8945_v32 = vadd.f32 %v8869_v0, %v8752_v8  ;;  %v8612_v59 = vmul.f32 %v11569_v3, %v8611_v35  ;;  %v15737_v16 = vadd.f32 %v8108_v9, %v8020_v30  ;;  %v8023_v51 = vadd.f32 %v8022_v55, %v7934_v18  ;;  %v11637_v35 = vld [vmem:[%s11717_s10 + $0x150] sm:$0xff] }
 0x65c   : > { %v8636_v50 = vor.u32 1.1754944e-38, %v8635_v24  ;;  %v8875_v30 = vrot.slane %v11637_v35, 1  ;;  %v8876_v57 = vrot.slane %v11638_v46, 1 }
 0x65d   : > { %v11571_v48 = vpop.eup %11570  ;;  %8977 = vst [vmem:[%s15242_s11 + $0xb8] sm:$0xff] %v8945_v32  ;;  %v8613_v31 = vadd.f32 %v11569_v3, %v8612_v59  ;;  %v10872_v47 = vmul.f32 -1.442695, %v15737_v16 }
 0x65e   : > { %v11573_v23 = vpop.eup %11572  ;;  %v15745_v1 = vadd.f32 1.0, %v11571_v48  ;;  %v8877_v48 = vsel %vm8809_vm10, %v8875_v30, %v8876_v57  ;;  %v11642_v30 = vld [vmem:[%s11717_s10 + $0x178] sm:$0x3] }
 0x65f   : > { %v8617_v62 = vsel %vm8616_vm1, %v11569_v3, %v8613_v31  ;;  %v8625_v27 = vmul.f32 %v11573_v23, %v15728_v22  ;;  %11574 = vpow2.f32 %v10872_v47  ;;  %vm8630_vm4 = vweird.f32 %v11573_v23 }
 0x660   : > { %v8622_v43 = vsel %vm8619_vm3, %v8621_v61, %v8617_v62  ;;  %11576 = vrcp.f32 %v15745_v1  ;;  %vm8631_vm2 = vmor %vm8629_vm9, %vm8630_vm4  ;;  %v8025_v22 = vadd.f32 %v8024_v39, %v7936_v44  ;;  %v8648_v7 = vand.u32 2147483647, %v15745_v1  ;;  %v11639_v61 = vld [vmem:[%s11717_s10 + $0x160] sm:$0x3]  ;;  %v11640_v44 = vld [vmem:[%s11717_s10 + $0x168] sm:$0xff] }
 0x661   : > { %v8753_v11 = vmul.f32 %v8622_v43, %v15691_v6  ;;  %v8626_v26 = vsub.f32 1.0, %v8625_v27  ;;  %v8650_v20 = vand.u32 2147483648, %v15745_v1  ;;  %vm8644_vm15 = vweird.f32 %v15745_v1 }
 0x662   : > { %v8111_v49 = vpop.f32.mrf.mxu1  ;;  %vm8649_vm12 = vcmp.eq.f32.partialorder %v8648_v7, 8.507059e+37  ;;  %v8883_v46 = vrot.slane %v11642_v30, 1 }
 0x663   : > { %v8946_v15 = vadd.f32 %v8872_v21, %v8753_v11  ;;  %v8627_v25 = vmul.f32 %v11573_v23, %v8626_v26  ;;  %v15754_v13 = vadd.f32 %v8111_v49, %v8023_v51  ;;  %v8651_v59 = vor.u32 1.1754944e-38, %v8650_v20  ;;  %v7849_v11 = vpop.f32.mrf.mxu2 }
 0x665   : > { %v11575_v4 = vpop.eup %11574  ;;  %8978 = vst [vmem:[%s15242_s11 + $0xc0] sm:$0xff] %v8946_v15  ;;  %v8628_v60 = vadd.f32 %v11573_v23, %v8627_v25  ;;  %v10873_v6 = vmul.f32 -1.442695, %v15754_v13  ;;  %v7938_v25 = vpop.f32.mrf.mxu3 }
 0x666   : > { %v11577_v17 = vpop.eup %11576  ;;  %v8244_v29 = vadd.f32 1.0, %v11575_v4  ;;  %v7850_v4 = vadd.f32 %v7849_v11, %v15185_v33  ;;  %v11643_v11 = vld [vmem:[%s11717_s10 + $0x180] sm:$0xff] }
 0x667   : > { %v8632_v40 = vsel %vm8631_vm2, %v11573_v23, %v8628_v60  ;;  %v8640_v41 = vmul.f32 %v11577_v17, %v15745_v1  ;;  %11578 = vpow2.f32 %v10873_v6  ;;  %vm8645_vm6 = vweird.f32 %v11577_v17  ;;  %v11641_v6 = vld [vmem:[%s11717_s10 + $0x170] sm:$0xff] }
 0x668   : > { %v8637_v42 = vsel %vm8634_vm8, %v8636_v50, %v8632_v40  ;;  %11580 = vrcp.f32 %v8244_v29  ;;  %vm8646_vm11 = vmor %vm8644_vm15, %vm8645_vm6  ;;  %v8665_v47 = vand.u32 2147483648, %v8244_v29  ;;  %v8663_v53 = vand.u32 2147483647, %v8244_v29 }
 0x669   : > { %v8754_v3 = vmul.f32 %v8637_v42, %v15706_v5  ;;  %v8641_v34 = vsub.f32 1.0, %v8640_v41  ;;  %v8878_v1 = vrot.slane %v11639_v61, 1  ;;  %vm8659_vm14 = vweird.f32 %v8244_v29 }
 0x66a   : > { %v8113_v12 = vpop.f32.mrf.mxu1  ;;  %v8666_v21 = vor.u32 1.1754944e-38, %v8665_v47  ;;  %vm8664_vm0 = vcmp.eq.f32.partialorder %v8663_v53, 8.507059e+37  ;;  %v8880_v60 = vrot.slane %v11640_v44, 1  ;;  %v7939_v42 = vadd.f32 %v7938_v25, %v7850_v4 }
 0x66b   : > { %v8947_v0 = vadd.f32 %v8874_v38, %v8754_v3  ;;  %v8642_v63 = vmul.f32 %v11577_v17, %v8641_v34  ;;  %v15765_v8 = vadd.f32 %v8113_v12, %v8025_v22  ;;  %v8879_v14 = vsel %vm8809_vm10, %v8876_v57, %v8878_v1  ;;  %v7851_v3 = vpop.f32.mrf.mxu2 }
 0x66c   : > { %v7852_v35 = vadd.f32 %v7851_v3, %v15189_v58 }
 0x66d   : > { %v11579_v19 = vpop.eup %11578  ;;  %8979 = vst [vmem:[%s15242_s11 + $0xc8] sm:$0xff] %v8947_v0  ;;  %v8643_v9 = vadd.f32 %v11577_v17, %v8642_v63  ;;  %v10874_v5 = vmul.f32 -1.442695, %v15765_v8  ;;  %v7940_v57 = vpop.f32.mrf.mxu3 }
 0x66e   : > { %v11581_v32 = vpop.eup %11580  ;;  %v8245_v10 = vadd.f32 1.0, %v11579_v19 }
 0x66f   : > { %v8647_v36 = vsel %vm8646_vm11, %v11577_v17, %v8643_v9  ;;  %v8655_v56 = vmul.f32 %v11581_v32, %v8244_v29  ;;  %11582 = vpow2.f32 %v10874_v5  ;;  %vm8660_vm13 = vweird.f32 %v11581_v32 }
 0x670   : > { %v8652_v37 = vsel %vm8649_vm12, %v8651_v59, %v8647_v36  ;;  %11584 = vrcp.f32 %v8245_v10  ;;  %vm8661_vm7 = vmor %vm8659_vm14, %vm8660_vm13  ;;  %v8680_v15 = vand.u32 2147483648, %v8245_v10  ;;  %v8678_v52 = vand.u32 2147483647, %v8245_v10 }
 0x671   : > { %v8755_v18 = vmul.f32 %v8652_v37, %v15722_v54  ;;  %v8656_v31 = vsub.f32 1.0, %v8655_v56  ;;  %v8881_v17 = vrot.slane %v11641_v6, 1  ;;  %vm8674_vm1 = vweird.f32 %v8245_v10 }
 0x672   : > { %v8681_v40 = vor.u32 1.1754944e-38, %v8680_v15  ;;  %vm8679_vm4 = vcmp.eq.f32.partialorder %v8678_v52, 8.507059e+37  ;;  %v7941_v59 = vadd.f32 %v7940_v57, %v7852_v35 }
 0x673   : > { %v8948_v23 = vadd.f32 %v8877_v48, %v8755_v18  ;;  %v8657_v55 = vmul.f32 %v11581_v32, %v8656_v31  ;;  %v8882_v33 = vsel %vm8809_vm10, %v8880_v60, %v8881_v17  ;;  %v8884_v36 = vsel %vm8809_vm10, %v8881_v17, %v8883_v46 }
 0x675   : > { %v11583_v62 = vpop.eup %11582  ;;  %8980 = vst [vmem:[%s15242_s11 + $0xd0] sm:$0xff] %v8948_v23  ;;  %v8658_v27 = vadd.f32 %v11581_v32, %v8657_v55 }
 0x676   : > { %v11585_v43 = vpop.eup %11584  ;;  %v8246_v45 = vadd.f32 1.0, %v11583_v62 }
 0x677   : > { %v8662_v26 = vsel %vm8661_vm7, %v11581_v32, %v8658_v27  ;;  %v8670_v54 = vmul.f32 %v11585_v43, %v8245_v10  ;;  %vm8675_vm5 = vweird.f32 %v11585_v43 }
 0x678   : > { %v8667_v51 = vsel %vm8664_vm0, %v8666_v21, %v8662_v26  ;;  %11586 = vrcp.f32 %v8246_v45  ;;  %vm8676_vm3 = vmor %vm8674_vm1, %vm8675_vm5  ;;  %v8695_v7 = vand.u32 2147483648, %v8246_v45  ;;  %v8693_v0 = vand.u32 2147483647, %v8246_v45 }
 0x679   : > { %v8756_v24 = vmul.f32 %v8667_v51, %v15737_v16  ;;  %v8671_v49 = vsub.f32 1.0, %v8670_v54  ;;  %v8027_v16 = vpop.f32.mrf.mxu0  ;;  %vm8689_vm2 = vweird.f32 %v8246_v45  ;;  %v8885_v26 = vrot.slane %v11643_v11, 1  ;;  %v11644_v54 = vld [vmem:[%s11717_s10 + $0x188] sm:$0xff] }
 0x67a   : > { %v8028_v63 = vadd.f32 %v8027_v16, %v7939_v42  ;;  %v8696_v5 = vor.u32 1.1754944e-38, %v8695_v7  ;;  %vm8694_vm6 = vcmp.eq.f32.partialorder %v8693_v0, 8.507059e+37  ;;  %v8886_v51 = vrot.slane %v11644_v54, 1 }
 0x67b   : > { %v8949_v28 = vadd.f32 %v8879_v14, %v8756_v24  ;;  %v8672_v2 = vmul.f32 %v11585_v43, %v8671_v49 }
 0x67d   : > { %8981 = vst [vmem:[%s15242_s11 + $0xd8] sm:$0xff] %v8949_v28  ;;  %v8673_v50 = vadd.f32 %v11585_v43, %v8672_v2  ;;  %v8887_v2 = vsel %vm8809_vm10, %v8885_v26, %v8886_v51 }
 0x67e   : > { %v11587_v29 = vpop.eup %11586 }
 0x67f   : > { %v8677_v41 = vsel %vm8676_vm3, %v11585_v43, %v8673_v50  ;;  %v8685_v39 = vmul.f32 %v11587_v29, %v8246_v45  ;;  %vm8690_vm9 = vweird.f32 %v11587_v29  ;;  %v11645_v50 = vld [vmem:[%s11717_s10 + $0x190] sm:$0x3] }
 0x680   : > { %v8682_v38 = vsel %vm8679_vm4, %v8681_v40, %v8677_v41  ;;  %v8116_v9 = vpop.f32.mrf.mxu1  ;;  %vm8691_vm8 = vmor %vm8689_vm2, %vm8690_vm9 }
 0x681   : > { %v8757_v34 = vmul.f32 %v8682_v38, %v15754_v13  ;;  %v8686_v22 = vsub.f32 1.0, %v8685_v39  ;;  %v8117_v13 = vadd.f32 %v8116_v9, %v8028_v63  ;;  %v8029_v37 = vpop.f32.mrf.mxu0 }
 0x682   : > { %v8030_v18 = vadd.f32 %v8029_v37, %v7941_v59 }
 0x683   : > { %v8950_v20 = vadd.f32 %v8882_v33, %v8757_v34  ;;  %v8687_v12 = vmul.f32 %v11587_v29, %v8686_v22  ;;  %v10875_v56 = vmul.f32 -1.442695, %v8117_v13 }
 0x685   : > { %8982 = vst [vmem:[%s15242_s11 + $0xe0] sm:$0xff] %v8950_v20  ;;  %v8688_v19 = vadd.f32 %v11587_v29, %v8687_v12  ;;  %11588 = vpow2.f32 %v10875_v56 }
 0x687   : > { %v8692_v32 = vsel %vm8691_vm8, %v11587_v29, %v8688_v19  ;;  %v8888_v29 = vrot.slane %v11645_v50, 1 }
 0x688   : > { %v8697_v10 = vsel %vm8694_vm6, %v8696_v5, %v8692_v32  ;;  %v8118_v31 = vpop.f32.mrf.mxu1 }
 0x689   : > { %v8758_v58 = vmul.f32 %v8697_v10, %v15765_v8  ;;  %v8119_v47 = vadd.f32 %v8118_v31, %v8030_v18  ;;  %v8889_v42 = vsel %vm8809_vm10, %v8886_v51, %v8888_v29 }
 0x68b   : > { %v8951_v48 = vadd.f32 %v8884_v36, %v8758_v58  ;;  %v11589_v23 = vpop.eup %11588  ;;  %v10876_v55 = vmul.f32 -1.442695, %v8119_v47 }
 0x68c   : > { %v8247_v53 = vadd.f32 1.0, %v11589_v23 }
 0x68d   : > { %8983 = vst [vmem:[%s15242_s11 + $0xe8] sm:$0xff] %v8951_v48  ;;  %11590 = vpow2.f32 %v10876_v55 }
 0x68e   : > { %11592 = vrcp.f32 %v8247_v53  ;;  %v8710_v8 = vand.u32 2147483648, %v8247_v53  ;;  %v8708_v45 = vand.u32 2147483647, %v8247_v53  ;;  %vm8704_vm11 = vweird.f32 %v8247_v53 }
 0x690   : > { %v8711_v49 = vor.u32 1.1754944e-38, %v8710_v8  ;;  %vm8709_vm13 = vcmp.eq.f32.partialorder %v8708_v45, 8.507059e+37 }
 0x693   : > { %v11591_v61 = vpop.eup %11590 }
 0x694   : > { %v11593_v1 = vpop.eup %11592  ;;  %v8248_v62 = vadd.f32 1.0, %v11591_v61 }
 0x695   : > { %v8700_v27 = vmul.f32 %v11593_v1, %v8247_v53  ;;  %vm8705_vm15 = vweird.f32 %v11593_v1 }
 0x696   : > { %11594 = vrcp.f32 %v8248_v62  ;;  %vm8706_vm12 = vmor %vm8704_vm11, %vm8705_vm15  ;;  %v8725_v44 = vand.u32 2147483648, %v8248_v62  ;;  %v8723_v17 = vand.u32 2147483647, %v8248_v62  ;;  %vm8719_vm7 = vweird.f32 %v8248_v62 }
 0x697   : > { %v8701_v43 = vsub.f32 1.0, %v8700_v27 }
 0x698   : > { %v8726_v16 = vor.u32 1.1754944e-38, %v8725_v44  ;;  %vm8724_vm5 = vcmp.eq.f32.partialorder %v8723_v17, 8.507059e+37 }
 0x699   : > { %v8702_v21 = vmul.f32 %v11593_v1, %v8701_v43 }
 0x69b   : > { %v8703_v14 = vadd.f32 %v11593_v1, %v8702_v21 }
 0x69c   : > { %v11595_v24 = vpop.eup %11594 }
 0x69d   : > { %v8707_v15 = vsel %vm8706_vm12, %v11593_v1, %v8703_v14  ;;  %v8715_v25 = vmul.f32 %v11595_v24, %v8248_v62  ;;  %vm8720_vm14 = vweird.f32 %v11595_v24 }
 0x69e   : > { %v8712_v28 = vsel %vm8709_vm13, %v8711_v49, %v8707_v15  ;;  %vm8721_vm0 = vmor %vm8719_vm7, %vm8720_vm14 }
 0x69f   : > { %v8759_v52 = vmul.f32 %v8712_v28, %v8117_v13  ;;  %v8716_v4 = vsub.f32 1.0, %v8715_v25 }
 0x6a1   : > { %v8952_v60 = vadd.f32 %v8887_v2, %v8759_v52  ;;  %v8717_v6 = vmul.f32 %v11595_v24, %v8716_v4 }
 0x6a3   : > { %8984 = vst [vmem:[%s15242_s11 + $0xf0] sm:$0xff] %v8952_v60  ;;  %v8718_v40 = vadd.f32 %v11595_v24, %v8717_v6 }
 0x6a5   : > { %v8722_v41 = vsel %vm8721_vm0, %v11595_v24, %v8718_v40 }
 0x6a6   : > { %v8727_v39 = vsel %vm8724_vm5, %v8726_v16, %v8722_v41 }
 0x6a7   : > { %v8760_v38 = vmul.f32 %v8727_v39, %v8119_v47 }
 0x6a9   : > { %v8953_v33 = vadd.f32 %v8889_v42, %v8760_v38 }
 0x6ab   : > { %8985 = vst [vmem:[%s15242_s11 + $0xf8] sm:$0xff] %v8953_v33 }
 0x6ac PF: > { %s15_s18 = sadd.s32 1, %s11652_s18  }
 0x6ad   : > { %p12_p4 = scmp.ge.s32.totalorder %s15_s18, 4  }
 0x6af   :  { %14 = sbr.rel (!%p12_p4) target bundleno = 1 (0x1), region = 72 }

</bundles_post_ra>
